<compile_context>
chip_gen: v7x
topology: tpu7x:2x2x1
jax: 0.10.0
libtpu: 0.0.40
codegen_flags: <defaults>
</compile_context>

<pallas_src>
import functools

import jax
import jax.numpy as jnp
from jax.experimental import pallas as pl
from jax.experimental.pallas import tpu as pltpu

EMBED = 64
HEADS = 8
HEAD_DIM = EMBED // HEADS
FF_DIM = 4 * EMBED
EPS = 1e-5   # nn.LayerNorm default eps


def _layernorm(y, g, b):
    mu = jnp.mean(y, axis=-1, keepdims=True)
    var = jnp.mean(jnp.square(y - mu), axis=-1, keepdims=True)
    return (y - mu) * jax.lax.rsqrt(var + EPS) * g + b


def attention_block_kernel(x_ref, wqkv_ref, bqkv_ref, wo_ref, w1_ref, b1_ref,
                           w2_ref, vecs_ref, hmask_ref, bbias_ref, out_ref,
                           *, compute_dtype, apply_batch_mask):
    # One grid step == block_b batch elements; everything lives in VMEM.
    Bt, S, E = x_ref.shape
    M = Bt * S
    H = HEADS
    cd = compute_dtype
    is_f32 = cd == jnp.float32

    x = x_ref[...].reshape(M, E)                      # (M, E) f32, M ~ 128

    # packed small vectors: rows = [bo, g1, be1, b2, g2, be2]  (all f32)
    vecs = vecs_ref[...]
    bo, g1, be1 = vecs[0:1, :], vecs[1:2, :], vecs[2:3, :]
    b2, g2, be2 = vecs[3:4, :], vecs[4:5, :], vecs[5:6, :]

    def mm(a, w_ref):
        # Weights are pre-cast to compute_dtype at pack time; only the activation
        # needs a cast, and only on the bf16 path.
        a_c = a if is_f32 else a.astype(cd)
        return jnp.dot(a_c, w_ref[...], preferred_element_type=jnp.float32)

    # ---- fused QKV projection (softmax scale already folded into Q weight/bias) ----
    qkv = mm(x, wqkv_ref) + bqkv_ref[...]             # (M, 3E) f32
    q = qkv[:, :E]
    k = qkv[:, E:2 * E]
    v = qkv[:, 2 * E:]

    # ---- multi-head attention, all heads at once (no per-head loop) ----------------
    # Stack heads along rows: q_stack[h*M + m, e] = q[m, e] iff lane e belongs to head h.
    hmask = hmask_ref[...]                            # (H*M, E) f32, grid-resident
    q_rep = jnp.broadcast_to(q[None, :, :], (H, M, E)).reshape(H * M, E)
    q_stack = q_rep * hmask

    # Scores: contract last dims of both operands (q @ k^T without an explicit .T).
    qs = q_stack if is_f32 else q_stack.astype(cd)
    ks = k if is_f32 else k.astype(cd)
    s = jax.lax.dot_general(qs, ks, (((1,), (1,)), ((), ())),
                            preferred_element_type=jnp.float32)      # (H*M, M)
    if apply_batch_mask:
        # Queries may only attend to keys of their own batch element (precomputed
        # additive 0 / -1e30 bias, kept in the f32 accumulated scores).
        s = s + bbias_ref[...]

    # TODO(synk): fn_mask / attn_mask path not implemented (module default fn_mask=None).
    p = jnp.exp(s - jnp.max(s, axis=-1, keepdims=True))              # un-normalized
    denom = jnp.sum(p, axis=-1, keepdims=True)                       # (H*M, 1)

    ps = p if is_f32 else p.astype(cd)
    vs = v if is_f32 else v.astype(cd)
    ctx_all = jnp.dot(ps, vs, preferred_element_type=jnp.float32)    # (H*M, E)
    # Deferred softmax normalization on the narrow (H*M, E) slab.
    ctx_all = ctx_all * pl.reciprocal(denom, approx=True)
    # Keep each head's own lanes, merge heads back to (M, E) (== concat of heads).
    ctx = jnp.sum((ctx_all * hmask).reshape(H, M, E), axis=0)

    # ---- output projection + residual + LayerNorm 1 ---------------------------------
    attended = mm(ctx, wo_ref) + bo
    x1 = _layernorm(attended + x, g1, be1)

    # ---- feed-forward: Linear -> ReLU -> Linear -> ReLU ------------------------------
    h1 = jnp.maximum(mm(x1, w1_ref) + b1_ref[...], 0.0)
    h2 = jnp.maximum(mm(h1, w2_ref) + b2, 0.0)

    # ---- residual + LayerNorm 2 -------------------------------------------------------
    out = _layernorm(h2 + x1, g2, be2)
    out_ref[...] = out.reshape(Bt, S, E).astype(out_ref.dtype)


def _pack_params(p, compute_dtype):
    """Pack weights; fold the softmax scale into Q; pre-cast matmul weights."""
    scale = 1.0 / (HEAD_DIM ** 0.5)
    wqkv = jnp.concatenate([p["wq"] * scale, p["wk"], p["wv"]], axis=1)     # (E, 3E)
    bqkv = jnp.concatenate([p["bq"] * scale, p["bk"], p["bv"]], axis=1)     # (1, 3E) f32
    vecs = jnp.concatenate([p["bo"], p["g1"], p["be1"],
                            p["b2"], p["g2"], p["be2"]], axis=0)            # (6, E)  f32
    wd = compute_dtype
    return (wqkv.astype(wd), bqkv, p["wo"].astype(wd),
            p["w1"].astype(wd), p["b1"], p["w2"].astype(wd), vecs)


def _pick_block_b(B, S):
    """Pick block_b: ~128 matmul rows per step, even grid >= 2, block_b*S <= 512."""
    divs = [d for d in range(1, B + 1) if B % d == 0]
    best_key, best_d = None, B
    for d in divs:
        M, nb = d * S, B // d
        key = (not (128 <= M <= 512),                 # prefer M in the sweet spot
               not (nb >= 2 and nb % 2 == 0),         # prefer even grid >= 2 (v7x 2 TCs)
               M)                                     # then smallest M (~128)
        if best_key is None or key < best_key:
            best_key, best_d = key, d
    return best_d


def attention_block(x, params, *, block_b=None, compute_dtype=jnp.float32):
    B, S, E = x.shape
    assert E == EMBED
    if block_b is None:
        block_b = _pick_block_b(B, S)
    assert B % block_b == 0
    n_blocks = B // block_b
    M = block_b * S
    H = HEADS

    weights = _pack_params(params, compute_dtype)

    # Static masks, hoisted out of the per-step body (grid-resident via constant index_map).
    row_head = jnp.arange(H * M, dtype=jnp.int32) // M
    col_head = jnp.arange(E, dtype=jnp.int32) // HEAD_DIM
    head_mask = (row_head[:, None] == col_head[None, :]).astype(jnp.float32)   # (H*M, E)

    apply_batch_mask = block_b > 1
    if apply_batch_mask:
        qb = jnp.arange(M, dtype=jnp.int32) // S
        bias2d = jnp.where(qb[:, None] == qb[None, :], 0.0, -1e30).astype(jnp.float32)
        batch_bias = jnp.tile(bias2d, (H, 1))                                  # (H*M, M)
    else:
        batch_bias = jnp.zeros((1, 1), jnp.float32)   # unused placeholder

    inputs = (*weights, head_mask, batch_bias)

    in_specs = [pl.BlockSpec((block_b, S, E), lambda i: (i, 0, 0))]
    # Weights / masks use constant index_maps so they stay resident across the grid.
    in_specs += [pl.BlockSpec(w.shape, lambda i: (0, 0)) for w in inputs]

    kernel = functools.partial(attention_block_kernel,
                               compute_dtype=compute_dtype,
                               apply_batch_mask=apply_batch_mask)

    return pl.pallas_call(
        kernel,
        out_shape=jax.ShapeDtypeStruct((B, S, E), jnp.float32),
        grid_spec=pltpu.PrefetchScalarGridSpec(
            num_scalar_prefetch=0,
            grid=(n_blocks,),
            in_specs=in_specs,
            out_specs=pl.BlockSpec((block_b, S, E), lambda i: (i, 0, 0)),
        ),
        compiler_params=pltpu.CompilerParams(
            dimension_semantics=("parallel",),
            vmem_limit_bytes=32 * 1024 * 1024),
    )(x, *inputs)


def make_params(key):
    ks = jax.random.split(key, 12)
    r = lambda k, shape: jax.random.normal(k, shape, jnp.float32) * 0.02
    return dict(
        wq=r(ks[0], (EMBED, EMBED)), wk=r(ks[1], (EMBED, EMBED)), wv=r(ks[2], (EMBED, EMBED)),
        bq=r(ks[3], (1, EMBED)), bk=r(ks[4], (1, EMBED)), bv=r(ks[5], (1, EMBED)),
        wo=r(ks[6], (EMBED, EMBED)), bo=r(ks[7], (1, EMBED)),
        g1=jnp.ones((1, EMBED), jnp.float32), be1=jnp.zeros((1, EMBED), jnp.float32),
        w1=r(ks[8], (EMBED, FF_DIM)), b1=r(ks[9], (1, FF_DIM)),
        w2=r(ks[10], (FF_DIM, EMBED)), b2=r(ks[11], (1, EMBED)),
        g2=jnp.ones((1, EMBED), jnp.float32), be2=jnp.zeros((1, EMBED), jnp.float32),
    )


def reference(x, p):
    """Plain-JAX reference mirroring the PyTorch forward (for correctness check)."""
    def ln(y, g, b):
        mu = y.mean(-1, keepdims=True)
        var = ((y - mu) ** 2).mean(-1, keepdims=True)
        return (y - mu) / jnp.sqrt(var + EPS) * g + b

    B, S, E = x.shape
    q = x @ p["wq"] + p["bq"]
    k = x @ p["wk"] + p["bk"]
    v = x @ p["wv"] + p["bv"]
    q = q.reshape(B, S, HEADS, HEAD_DIM).transpose(0, 2, 1, 3)
    k = k.reshape(B, S, HEADS, HEAD_DIM).transpose(0, 2, 1, 3)
    v = v.reshape(B, S, HEADS, HEAD_DIM).transpose(0, 2, 1, 3)
    s = jnp.einsum("bhqd,bhkd->bhqk", q, k) / (HEAD_DIM ** 0.5)
    a = jax.nn.softmax(s, axis=-1)
    ctx = jnp.einsum("bhqk,bhkd->bhqd", a, v).transpose(0, 2, 1, 3).reshape(B, S, E)
    attended = ctx @ p["wo"] + p["bo"]
    x1 = ln(attended + x, p["g1"], p["be1"])
    h = jax.nn.relu(jax.nn.relu(x1 @ p["w1"] + p["b1"]) @ p["w2"] + p["b2"])
    return ln(h + x1, p["g2"], p["be2"])


if __name__ == "__main__":
    key = jax.random.PRNGKey(0)
    k_x, k_p = jax.random.split(key)
    B, S = 16, 16                      # block_b=8 -> 128-row matmul slabs, grid=(2,)
    x = jax.random.normal(k_x, (B, S, EMBED), jnp.float32)
    params = make_params(k_p)

    ref = reference(x, params)

    # f32 activations + f32 weights (default; no casts anywhere in the body).
    out = jax.block_until_ready(attention_block(x, params))
    assert out.shape == (B, S, EMBED)
    assert jnp.allclose(out, ref, atol=2e-2, rtol=2e-2), (
        float(jnp.max(jnp.abs(out - ref))))

    # bf16 MXU operands (v6e / v7x option): weights pre-cast at pack time, f32 accumulation.
    out_bf16 = jax.block_until_ready(
        attention_block(x, params, compute_dtype=jnp.bfloat16))
    assert jnp.allclose(out_bf16, ref, atol=1e-1, rtol=1e-1), (
        float(jnp.max(jnp.abs(out_bf16 - ref))))

    print("KERNEL_OK")
</pallas_src>

<mosaic_0001>
module attributes {stable_mosaic.version = 11 : i64} {
  func.func @attention_block_kernel(%arg0: i32, %arg1: memref<8x16x64xf32, #tpu.memory_space<vmem>>, %arg2: memref<64x192xf32, #tpu.memory_space<vmem>>, %arg3: memref<1x192xf32, #tpu.memory_space<vmem>>, %arg4: memref<64x64xf32, #tpu.memory_space<vmem>>, %arg5: memref<64x256xf32, #tpu.memory_space<vmem>>, %arg6: memref<1x256xf32, #tpu.memory_space<vmem>>, %arg7: memref<256x64xf32, #tpu.memory_space<vmem>>, %arg8: memref<6x64xf32, #tpu.memory_space<vmem>>, %arg9: memref<1024x64xf32, #tpu.memory_space<vmem>>, %arg10: memref<1024x128xf32, #tpu.memory_space<vmem>>, %arg11: memref<8x16x64xf32, #tpu.memory_space<vmem>>) attributes {dimension_semantics = [#tpu.dimension_semantics<parallel>], iteration_bounds = array<i64: 2>, scalar_prefetch = 0 : i64, scratch_operands = 0 : i64, tpu.core_type = #tpu.core_type<tc>, window_params = [{transform_indices = @transform_0, window_bounds = array<i64: 8, 16, 64>}, {pipeline_mode = #tpu.pipeline_mode<synchronous>, transform_indices = @transform_1, window_bounds = array<i64: 64, 192>}, {pipeline_mode = #tpu.pipeline_mode<synchronous>, transform_indices = @transform_2, window_bounds = array<i64: 1, 192>}, {pipeline_mode = #tpu.pipeline_mode<synchronous>, transform_indices = @transform_3, window_bounds = array<i64: 64, 64>}, {pipeline_mode = #tpu.pipeline_mode<synchronous>, transform_indices = @transform_4, window_bounds = array<i64: 64, 256>}, {pipeline_mode = #tpu.pipeline_mode<synchronous>, transform_indices = @transform_5, window_bounds = array<i64: 1, 256>}, {pipeline_mode = #tpu.pipeline_mode<synchronous>, transform_indices = @transform_6, window_bounds = array<i64: 256, 64>}, {pipeline_mode = #tpu.pipeline_mode<synchronous>, transform_indices = @transform_7, window_bounds = array<i64: 6, 64>}, {pipeline_mode = #tpu.pipeline_mode<synchronous>, transform_indices = @transform_8, window_bounds = array<i64: 1024, 64>}, {pipeline_mode = #tpu.pipeline_mode<synchronous>, transform_indices = @transform_9, window_bounds = array<i64: 1024, 128>}, {transform_indices = @transform_10, window_bounds = array<i64: 8, 16, 64>}]} {
    %c0 = arith.constant 0 : index
    %c0_0 = arith.constant 0 : index
    %c0_1 = arith.constant 0 : index
    %0 = vector.load %arg1[%c0, %c0_0, %c0_1] : memref<8x16x64xf32, #tpu.memory_space<vmem>>, vector<8x16x64xf32>
    %1 = vector.shape_cast %0 : vector<8x16x64xf32> to vector<128x64xf32>
    %c0_2 = arith.constant 0 : index
    %c0_3 = arith.constant 0 : index
    %2 = vector.load %arg8[%c0_2, %c0_3] : memref<6x64xf32, #tpu.memory_space<vmem>>, vector<6x64xf32>
    %3 = vector.extract_strided_slice %2 {offsets = [0, 0], sizes = [1, 64], strides = [1, 1]} : vector<6x64xf32> to vector<1x64xf32>
    %4 = vector.extract_strided_slice %2 {offsets = [1, 0], sizes = [1, 64], strides = [1, 1]} : vector<6x64xf32> to vector<1x64xf32>
    %5 = vector.extract_strided_slice %2 {offsets = [2, 0], sizes = [1, 64], strides = [1, 1]} : vector<6x64xf32> to vector<1x64xf32>
    %6 = vector.extract_strided_slice %2 {offsets = [3, 0], sizes = [1, 64], strides = [1, 1]} : vector<6x64xf32> to vector<1x64xf32>
    %7 = vector.extract_strided_slice %2 {offsets = [4, 0], sizes = [1, 64], strides = [1, 1]} : vector<6x64xf32> to vector<1x64xf32>
    %8 = vector.extract_strided_slice %2 {offsets = [5, 0], sizes = [1, 64], strides = [1, 1]} : vector<6x64xf32> to vector<1x64xf32>
    %c0_4 = arith.constant 0 : index
    %c0_5 = arith.constant 0 : index
    %9 = vector.load %arg2[%c0_4, %c0_5] : memref<64x192xf32, #tpu.memory_space<vmem>>, vector<64x192xf32>
    %cst = arith.constant dense<0.000000e+00> : vector<128x192xf32>
    %10 = tpu.matmul %1, %9, %cst {dimension_numbers = #tpu.dot_dimension_numbers<[1], [0], [0], [1], [0, 0, 1, 1], [], []>} : vector<128x64xf32>, vector<64x192xf32>, vector<128x192xf32> -> vector<128x192xf32>
    %c0_6 = arith.constant 0 : index
    %c0_7 = arith.constant 0 : index
    %11 = vector.load %arg3[%c0_6, %c0_7] : memref<1x192xf32, #tpu.memory_space<vmem>>, vector<1x192xf32>
    %12 = vector.broadcast %11 : vector<1x192xf32> to vector<128x192xf32>
    %13 = arith.addf %10, %12 : vector<128x192xf32>
    %14 = vector.extract_strided_slice %13 {offsets = [0, 0], sizes = [128, 64], strides = [1, 1]} : vector<128x192xf32> to vector<128x64xf32>
    %15 = vector.extract_strided_slice %13 {offsets = [0, 64], sizes = [128, 64], strides = [1, 1]} : vector<128x192xf32> to vector<128x64xf32>
    %16 = vector.extract_strided_slice %13 {offsets = [0, 128], sizes = [128, 64], strides = [1, 1]} : vector<128x192xf32> to vector<128x64xf32>
    %c0_8 = arith.constant 0 : index
    %c0_9 = arith.constant 0 : index
    %17 = vector.load %arg9[%c0_8, %c0_9] : memref<1024x64xf32, #tpu.memory_space<vmem>>, vector<1024x64xf32>
    %18 = vector.shape_cast %14 : vector<128x64xf32> to vector<1x128x64xf32>
    %19 = vector.shape_cast %18 : vector<1x128x64xf32> to vector<1x128x64xf32>
    %20 = vector.broadcast %19 : vector<1x128x64xf32> to vector<8x128x64xf32>
    %21 = vector.shape_cast %20 : vector<8x128x64xf32> to vector<1024x64xf32>
    %22 = arith.mulf %21, %17 : vector<1024x64xf32>
    %cst_10 = arith.constant dense<0.000000e+00> : vector<1024x128xf32>
    %23 = tpu.matmul %22, %15, %cst_10 {dimension_numbers = #tpu.dot_dimension_numbers<[1], [1], [0], [0], [0, 0, 1, 0], [], []>} : vector<1024x64xf32>, vector<128x64xf32>, vector<1024x128xf32> -> vector<1024x128xf32>
    %c0_11 = arith.constant 0 : index
    %c0_12 = arith.constant 0 : index
    %24 = vector.load %arg10[%c0_11, %c0_12] : memref<1024x128xf32, #tpu.memory_space<vmem>>, vector<1024x128xf32>
    %25 = arith.addf %23, %24 : vector<1024x128xf32>
    %cst_13 = arith.constant dense<0xFF800000> : vector<1024xf32>
    %26 = vector.multi_reduction <maximumf>, %25, %cst_13 [1] : vector<1024x128xf32> to vector<1024xf32>
    %27 = vector.shape_cast %26 : vector<1024xf32> to vector<1024x1xf32>
    %28 = vector.broadcast %27 : vector<1024x1xf32> to vector<1024x128xf32>
    %29 = arith.subf %25, %28 : vector<1024x128xf32>
    %30 = math.exp %29 : vector<1024x128xf32>
    %cst_14 = arith.constant dense<0.000000e+00> : vector<1024xf32>
    %31 = vector.multi_reduction <add>, %30, %cst_14 [1] : vector<1024x128xf32> to vector<1024xf32>
    %32 = vector.shape_cast %31 : vector<1024xf32> to vector<1024x1xf32>
    %cst_15 = arith.constant dense<0.000000e+00> : vector<1024x64xf32>
    %33 = tpu.matmul %30, %16, %cst_15 {dimension_numbers = #tpu.dot_dimension_numbers<[1], [0], [0], [1], [0, 0, 1, 1], [], []>} : vector<1024x128xf32>, vector<128x64xf32>, vector<1024x64xf32> -> vector<1024x64xf32>
    %34 = tpu.reciprocal %32 {approx = true} : vector<1024x1xf32> -> vector<1024x1xf32>
    %35 = vector.broadcast %34 : vector<1024x1xf32> to vector<1024x64xf32>
    %36 = arith.mulf %33, %35 : vector<1024x64xf32>
    %37 = arith.mulf %36, %17 : vector<1024x64xf32>
    %38 = vector.shape_cast %37 : vector<1024x64xf32> to vector<8x128x64xf32>
    %cst_16 = arith.constant dense<0.000000e+00> : vector<128x64xf32>
    %39 = vector.multi_reduction <add>, %38, %cst_16 [0] : vector<8x128x64xf32> to vector<128x64xf32>
    %c0_17 = arith.constant 0 : index
    %c0_18 = arith.constant 0 : index
    %40 = vector.load %arg4[%c0_17, %c0_18] : memref<64x64xf32, #tpu.memory_space<vmem>>, vector<64x64xf32>
    %cst_19 = arith.constant dense<0.000000e+00> : vector<128x64xf32>
    %41 = tpu.matmul %39, %40, %cst_19 {dimension_numbers = #tpu.dot_dimension_numbers<[1], [0], [0], [1], [0, 0, 1, 1], [], []>} : vector<128x64xf32>, vector<64x64xf32>, vector<128x64xf32> -> vector<128x64xf32>
    %42 = vector.broadcast %3 : vector<1x64xf32> to vector<128x64xf32>
    %43 = arith.addf %41, %42 : vector<128x64xf32>
    %44 = arith.addf %43, %1 : vector<128x64xf32>
    %cst_20 = arith.constant dense<0.000000e+00> : vector<128xf32>
    %45 = vector.multi_reduction <add>, %44, %cst_20 [1] : vector<128x64xf32> to vector<128xf32>
    %46 = vector.shape_cast %45 : vector<128xf32> to vector<128x1xf32>
    %cst_21 = arith.constant 6.400000e+01 : f32
    %47 = vector.broadcast %cst_21 : f32 to vector<128x1xf32>
    %48 = arith.divf %46, %47 : vector<128x1xf32>
    %49 = vector.broadcast %48 : vector<128x1xf32> to vector<128x64xf32>
    %50 = arith.subf %44, %49 : vector<128x64xf32>
    %51 = arith.mulf %50, %50 : vector<128x64xf32>
    %cst_22 = arith.constant dense<0.000000e+00> : vector<128xf32>
    %52 = vector.multi_reduction <add>, %51, %cst_22 [1] : vector<128x64xf32> to vector<128xf32>
    %53 = vector.shape_cast %52 : vector<128xf32> to vector<128x1xf32>
    %cst_23 = arith.constant 6.400000e+01 : f32
    %54 = vector.broadcast %cst_23 : f32 to vector<128x1xf32>
    %55 = arith.divf %53, %54 : vector<128x1xf32>
    %56 = vector.broadcast %48 : vector<128x1xf32> to vector<128x64xf32>
    %57 = arith.subf %44, %56 : vector<128x64xf32>
    %cst_24 = arith.constant 9.99999974E-6 : f32
    %58 = vector.broadcast %cst_24 : f32 to vector<128x1xf32>
    %59 = arith.addf %55, %58 : vector<128x1xf32>
    %60 = math.rsqrt %59 : vector<128x1xf32>
    %61 = vector.broadcast %60 : vector<128x1xf32> to vector<128x64xf32>
    %62 = arith.mulf %57, %61 : vector<128x64xf32>
    %63 = vector.broadcast %4 : vector<1x64xf32> to vector<128x64xf32>
    %64 = arith.mulf %62, %63 : vector<128x64xf32>
    %65 = vector.broadcast %5 : vector<1x64xf32> to vector<128x64xf32>
    %66 = arith.addf %64, %65 : vector<128x64xf32>
    %c0_25 = arith.constant 0 : index
    %c0_26 = arith.constant 0 : index
    %67 = vector.load %arg5[%c0_25, %c0_26] : memref<64x256xf32, #tpu.memory_space<vmem>>, vector<64x256xf32>
    %cst_27 = arith.constant dense<0.000000e+00> : vector<128x256xf32>
    %68 = tpu.matmul %66, %67, %cst_27 {dimension_numbers = #tpu.dot_dimension_numbers<[1], [0], [0], [1], [0, 0, 1, 1], [], []>} : vector<128x64xf32>, vector<64x256xf32>, vector<128x256xf32> -> vector<128x256xf32>
    %c0_28 = arith.constant 0 : index
    %c0_29 = arith.constant 0 : index
    %69 = vector.load %arg6[%c0_28, %c0_29] : memref<1x256xf32, #tpu.memory_space<vmem>>, vector<1x256xf32>
    %70 = vector.broadcast %69 : vector<1x256xf32> to vector<128x256xf32>
    %71 = arith.addf %68, %70 : vector<128x256xf32>
    %cst_30 = arith.constant 0.000000e+00 : f32
    %72 = vector.broadcast %cst_30 : f32 to vector<128x256xf32>
    %73 = arith.maximumf %71, %72 : vector<128x256xf32>
    %c0_31 = arith.constant 0 : index
    %c0_32 = arith.constant 0 : index
    %74 = vector.load %arg7[%c0_31, %c0_32] : memref<256x64xf32, #tpu.memory_space<vmem>>, vector<256x64xf32>
    %cst_33 = arith.constant dense<0.000000e+00> : vector<128x64xf32>
    %75 = tpu.matmul %73, %74, %cst_33 {dimension_numbers = #tpu.dot_dimension_numbers<[1], [0], [0], [1], [0, 0, 1, 1], [], []>} : vector<128x256xf32>, vector<256x64xf32>, vector<128x64xf32> -> vector<128x64xf32>
    %76 = vector.broadcast %6 : vector<1x64xf32> to vector<128x64xf32>
    %77 = arith.addf %75, %76 : vector<128x64xf32>
    %cst_34 = arith.constant 0.000000e+00 : f32
    %78 = vector.broadcast %cst_34 : f32 to vector<128x64xf32>
    %79 = arith.maximumf %77, %78 : vector<128x64xf32>
    %80 = arith.addf %79, %66 : vector<128x64xf32>
    %cst_35 = arith.constant dense<0.000000e+00> : vector<128xf32>
    %81 = vector.multi_reduction <add>, %80, %cst_35 [1] : vector<128x64xf32> to vector<128xf32>
    %82 = vector.shape_cast %81 : vector<128xf32> to vector<128x1xf32>
    %cst_36 = arith.constant 6.400000e+01 : f32
    %83 = vector.broadcast %cst_36 : f32 to vector<128x1xf32>
    %84 = arith.divf %82, %83 : vector<128x1xf32>
    %85 = vector.broadcast %84 : vector<128x1xf32> to vector<128x64xf32>
    %86 = arith.subf %80, %85 : vector<128x64xf32>
    %87 = arith.mulf %86, %86 : vector<128x64xf32>
    %cst_37 = arith.constant dense<0.000000e+00> : vector<128xf32>
    %88 = vector.multi_reduction <add>, %87, %cst_37 [1] : vector<128x64xf32> to vector<128xf32>
    %89 = vector.shape_cast %88 : vector<128xf32> to vector<128x1xf32>
    %cst_38 = arith.constant 6.400000e+01 : f32
    %90 = vector.broadcast %cst_38 : f32 to vector<128x1xf32>
    %91 = arith.divf %89, %90 : vector<128x1xf32>
    %92 = vector.broadcast %84 : vector<128x1xf32> to vector<128x64xf32>
    %93 = arith.subf %80, %92 : vector<128x64xf32>
    %cst_39 = arith.constant 9.99999974E-6 : f32
    %94 = vector.broadcast %cst_39 : f32 to vector<128x1xf32>
    %95 = arith.addf %91, %94 : vector<128x1xf32>
    %96 = math.rsqrt %95 : vector<128x1xf32>
    %97 = vector.broadcast %96 : vector<128x1xf32> to vector<128x64xf32>
    %98 = arith.mulf %93, %97 : vector<128x64xf32>
    %99 = vector.broadcast %7 : vector<1x64xf32> to vector<128x64xf32>
    %100 = arith.mulf %98, %99 : vector<128x64xf32>
    %101 = vector.broadcast %8 : vector<1x64xf32> to vector<128x64xf32>
    %102 = arith.addf %100, %101 : vector<128x64xf32>
    %103 = vector.shape_cast %102 : vector<128x64xf32> to vector<8x16x64xf32>
    %c0_40 = arith.constant 0 : index
    %c0_41 = arith.constant 0 : index
    %c0_42 = arith.constant 0 : index
    %104 = vector.load %arg11[%c0_40, %c0_41, %c0_42] : memref<8x16x64xf32, #tpu.memory_space<vmem>>, vector<8x16x64xf32>
    tpu.vector_store %arg11[%c0_40, %c0_41, %c0_42], %103 {strides = array<i32>} : memref<8x16x64xf32, #tpu.memory_space<vmem>>, vector<8x16x64xf32>,
    return
  }
  func.func @transform_0(%arg0: i32) -> (i32, i32, i32) {
    %c0_i32 = arith.constant 0 : i32
    %c0_i32_0 = arith.constant 0 : i32
    %c0_i32_1 = arith.constant 0 : i32
    return %arg0, %c0_i32, %c0_i32_0 : i32, i32, i32
  }
  func.func @transform_1(%arg0: i32) -> (i32, i32) {
    %c0_i32 = arith.constant 0 : i32
    %c0_i32_0 = arith.constant 0 : i32
    %c0_i32_1 = arith.constant 0 : i32
    return %c0_i32, %c0_i32_0 : i32, i32
  }
  func.func @transform_2(%arg0: i32) -> (i32, i32) {
    %c0_i32 = arith.constant 0 : i32
    %c0_i32_0 = arith.constant 0 : i32
    %c0_i32_1 = arith.constant 0 : i32
    return %c0_i32, %c0_i32_0 : i32, i32
  }
  func.func @transform_3(%arg0: i32) -> (i32, i32) {
    %c0_i32 = arith.constant 0 : i32
    %c0_i32_0 = arith.constant 0 : i32
    %c0_i32_1 = arith.constant 0 : i32
    return %c0_i32, %c0_i32_0 : i32, i32
  }
  func.func @transform_4(%arg0: i32) -> (i32, i32) {
    %c0_i32 = arith.constant 0 : i32
    %c0_i32_0 = arith.constant 0 : i32
    %c0_i32_1 = arith.constant 0 : i32
    return %c0_i32, %c0_i32_0 : i32, i32
  }
  func.func @transform_5(%arg0: i32) -> (i32, i32) {
    %c0_i32 = arith.constant 0 : i32
    %c0_i32_0 = arith.constant 0 : i32
    %c0_i32_1 = arith.constant 0 : i32
    return %c0_i32, %c0_i32_0 : i32, i32
  }
  func.func @transform_6(%arg0: i32) -> (i32, i32) {
    %c0_i32 = arith.constant 0 : i32
    %c0_i32_0 = arith.constant 0 : i32
    %c0_i32_1 = arith.constant 0 : i32
    return %c0_i32, %c0_i32_0 : i32, i32
  }
  func.func @transform_7(%arg0: i32) -> (i32, i32) {
    %c0_i32 = arith.constant 0 : i32
    %c0_i32_0 = arith.constant 0 : i32
    %c0_i32_1 = arith.constant 0 : i32
    return %c0_i32, %c0_i32_0 : i32, i32
  }
  func.func @transform_8(%arg0: i32) -> (i32, i32) {
    %c0_i32 = arith.constant 0 : i32
    %c0_i32_0 = arith.constant 0 : i32
    %c0_i32_1 = arith.constant 0 : i32
    return %c0_i32, %c0_i32_0 : i32, i32
  }
  func.func @transform_9(%arg0: i32) -> (i32, i32) {
    %c0_i32 = arith.constant 0 : i32
    %c0_i32_0 = arith.constant 0 : i32
    %c0_i32_1 = arith.constant 0 : i32
    return %c0_i32, %c0_i32_0 : i32, i32
  }
  func.func @transform_10(%arg0: i32) -> (i32, i32, i32) {
    %c0_i32 = arith.constant 0 : i32
    %c0_i32_0 = arith.constant 0 : i32
    %c0_i32_1 = arith.constant 0 : i32
    return %arg0, %c0_i32, %c0_i32_0 : i32, i32, i32
  }
}

</mosaic_0001>

<bundles_post_ra>
// kernel: tpu_custom_call.1
= control target key start
LH: loop header
LB: loop body
LE: loop exit
PB: predicated region body
PF: predicated region fallthrough
CT: control target
= control target key end

     0   :  { %15 = vsyncpa [#allocation3], 0  ;;  %s12294_s0 = inlined_call_operand.vmem [shape: f32[16,16,64], index: 0, kind: input, shape index: {}]   ;;  %s12295_s1 = inlined_call_operand.vmem [shape: f32[64,192], index: 1, kind: input, shape index: {}]   ;;  %s12296_s2 = inlined_call_operand.vmem [shape: f32[1,192], index: 2, kind: input, shape index: {}]   ;;  %s12297_s3 = inlined_call_operand.vmem [shape: f32[64,64], index: 3, kind: input, shape index: {}]   ;;  %s12298_s4 = inlined_call_operand.vmem [shape: f32[64,256], index: 4, kind: input, shape index: {}]   ;;  %s12299_s5 = inlined_call_operand.vmem [shape: f32[1,256], index: 5, kind: input, shape index: {}]   ;;  %s12300_s6 = inlined_call_operand.vmem [shape: f32[256,64], index: 6, kind: input, shape index: {}]   ;;  %s12301_s7 = inlined_call_operand.vmem [shape: f32[6,64], index: 7, kind: input, shape index: {}]   ;;  %s12302_s8 = inlined_call_operand.vmem [shape: f32[1024,64], index: 8, kind: input, shape index: {}]   ;;  %s12303_s9 = inlined_call_operand.vmem [shape: f32[1024,128], index: 9, kind: input, shape index: {}]   ;;  %s12304_s10 = inlined_call_operand.hbm [shape: f32[16,16,64], index: 10, kind: output, shape index: {}]  }
   0x1   :  { %17 = vsyncpa [#allocation3 + $0x1], 0  ;;  %s7883_s13 = smov 0   ;;  %s7885_s14 = smov 0  }
   0x2   :  { %s7887_s15 = smov 0   ;;  %s7889_s16 = smov 0  }
   0x3 LB: > { %s7904_s17 = sadd.s32 4294967295, %s7821_s16   ;;  %s5690_s18 = sadd.s32 4294967294, %s7821_s16   ;;  %s7821_s16 = sphi %s7889_s16, %s12614_s16   ;;  %s7817_s15 = sphi %s7887_s15, %s12613_s15   ;;  %s7813_s14 = sphi %s7885_s14, %s12612_s14   ;;  %s7809_s13 = sphi %s7883_s13, %s12611_s13  }
   0x4   : > { %s7908_s19 = sadd.s32 1, %s7821_s16   ;;  %s245_s20 = sadd.s32 1, %s7817_s15 }
   0x5   : > { %s242_s21 = ssub.s32 %s7821_s16, %s7908_s19  ;;  %p255_p0 = scmp.ne.s32.totalorder %s7817_s15, %s7813_s14 }
   0x6   : > { %p243_p1 = scmp.eq.s32.totalorder %s242_s21, 0  ;;  %p256_p2 = scmp.eq.s32.totalorder %s7904_s17, 1 }
   0x7   : > { %p261_p3 = scmp.ne.s32.totalorder %s7813_s14, %s7809_s13  ;;  %p262_p4 = scmp.eq.s32.totalorder %s5690_s18, 1 }
   0x8   : > { %s7919_s22 = scalar_select %p243_p1, %s7817_s15, %s245_s20  }
   0x9   : > { %p7921_p5 = por %p256_p2, %p255_p0  ;;  %p7925_p6 = por %p262_p4, %p261_p3 }
   0xa   : > { %p5693_p7 = scmp.ge.s32.totalorder %s7821_s16, 1  ;;  %p317_p8 = scmp.lt.s32.totalorder %s7821_s16, 3 }
   0xc   : > { %p318_p9 = pnand %p5693_p7, %p317_p8 }
   0xe   : > { %321 = sbr.rel (%p318_p9) target bundleno = 2635 (0xa4b), region = 60 }
  0x15   : > { %v382_v0 = vld [vmem:[%s12295_s1 + $0x8] sm:$0xff]  ;;  %v384_v1 = vld [vmem:[%s12295_s1 + $0x18] sm:$0xff]  ;;  %v381_v2 = vld [vmem:[%s12295_s1] sm:$0xff]  ;;  %s5695_s11 = sshll.u32 %s7904_s17, 3  ;;  %v12305_v7 = vmov 0.0   ;;  %vm409_vm0 = vcmask 523264   ;;  %v399_v41 = vlaneseq }
  0x16   : > { %v6779_v3 = vpack.c.bf16 %v384_v1, %v382_v0  ;;  %v383_v4 = vld [vmem:[%s12295_s1 + $0x10] sm:$0xff]  ;;  %v386_v5 = vld [vmem:[%s12295_s1 + $0x28] sm:$0xff]  ;;  %v388_v6 = vld [vmem:[%s12295_s1 + $0x38] sm:$0xff]  ;;  %522 = vmatprep.mubr.f32.mxu0 %v12305_v7  ;;  %p357_p10 = scmp.lt.s32.totalorder %s5695_s11, 15  ;;  %s7824_s21 = smov 64  }
  0x17   : > { %v6781_v8 = vpack.c.bf16 %v383_v4, %v381_v2  ;;  %v6783_v9 = vpack.c.bf16 %v388_v6, %v386_v5  ;;  %v385_v10 = vld [vmem:[%s12295_s1 + $0x20] sm:$0xff]  ;;  %v387_v11 = vld [vmem:[%s12295_s1 + $0x30] sm:$0xff]  ;;  %v390_v12 = vld [vmem:[%s12295_s1 + $0x48] sm:$0xff]  ;;  %v8033_v42 = vshrl.u32 %v399_v41, 7 }
  0x18   : > { %6780 = vmatprep.subr.bf16.mxu0 %v6779_v3  ;;  %v392_v13 = vld [vmem:[%s12295_s1 + $0x58] sm:$0xff]  ;;  %v6785_v14 = vpack.c.bf16 %v387_v11, %v385_v10  ;;  %v389_v16 = vld [vmem:[%s12295_s1 + $0x40] sm:$0xff]  ;;  %v391_v17 = vld [vmem:[%s12295_s1 + $0x50] sm:$0xff]  ;;  %s12616_s11 = smov (!%p357_p10, %s5695_s11), 15 }
  0x19   : > { %6782 = vmatpush1.bf16.msra.mxu0 %v6781_v8  ;;  %v6787_v15 = vpack.c.bf16 %v392_v13, %v390_v12  ;;  %v394_v18 = vld [vmem:[%s12295_s1 + $0x68] sm:$0xff]  ;;  %v396_v19 = vld [vmem:[%s12295_s1 + $0x78] sm:$0xff]  ;;  %v6789_v20 = vpack.c.bf16 %v391_v17, %v389_v16  ;;  %v393_v22 = vld [vmem:[%s12295_s1 + $0x60] sm:$0xff]  ;;  %s5896_s27 = sshll.u32 %s12616_s11, 4  ;;  %12403 = vst [vmem:[#allocation5_spill] sm:$0xff] %v8033_v42  ;;  %v8036_v43 = vsub.s32 0, %v8033_v42 }
  0x1a   : > { %6784 = vmatprep.subr.bf16.mxu0 %v6783_v9  ;;  %v6791_v21 = vpack.c.bf16 %v396_v19, %v394_v18  ;;  %v395_v23 = vld [vmem:[%s12295_s1 + $0x70] sm:$0xff]  ;;  %s7984_s30 = scalar_lea.vmem %s12294_s0, %s5896_s27  ;;  %v397_v44 = vld [vmem:[%s12296_s2] sm:$0x3]  ;;  %v8045_v46 = vsub.s32 1, %v8033_v42  ;;  %vm8145_vm1 = vmpackc.low %vm409_vm0, %vm409_vm0  ;;  %s7825_s11 = smov [#allocation2]  }
  0x1b   : > { %v6793_v24 = vpack.c.bf16 %v395_v23, %v393_v22  ;;  %v364_v25 = vld [vmem:[%s7984_s30] sm:$0xff]  ;;  %v365_v26 = vld [vmem:[%s7984_s30 + $0x8] sm:$0xff]  ;;  %v366_v27 = vld [vmem:[%s7984_s30 + $0x10] sm:$0xff]  ;;  %12404 = vst [vmem:[#allocation6_spill] sm:$0xff] %v8036_v43  ;;  %v8042_v45 = vrot.slane %v397_v44, %v8036_v43  ;;  %s7763_s12 = sshll.u32 %s7825_s11, 4  ;;  %s7764_s12 = int_to_ptr.vmem [resolvable:$false] %s7763_s12 }
  0x1c   : > { %v367_v28 = vld [vmem:[%s7984_s30 + $0x18] sm:$0xff]  ;;  %v368_v29 = vld [vmem:[%s7984_s30 + $0x20] sm:$0xff]  ;;  %v369_v30 = vld [vmem:[%s7984_s30 + $0x28] sm:$0xff]  ;;  %12405 = vst [vmem:[#allocation7_spill] sm:$0xff] %v8045_v46  ;;  %v8054_v51 = vrot.slane %v397_v44, %v8045_v46 }
  0x1d   : > { %6786 = vmatpush1.bf16.msra.mxu0 %v6785_v14  ;;  %v370_v31 = vld [vmem:[%s7984_s30 + $0x30] sm:$0xff]  ;;  %v371_v32 = vld [vmem:[%s7984_s30 + $0x38] sm:$0xff]  ;;  %v372_v33 = vld [vmem:[%s7984_s30 + $0x40] sm:$0xff] }
  0x1e   : > { %6788 = vmatprep.subr.bf16.mxu0 %v6787_v15  ;;  %v373_v34 = vld [vmem:[%s7984_s30 + $0x48] sm:$0xff]  ;;  %v374_v35 = vld [vmem:[%s7984_s30 + $0x50] sm:$0xff]  ;;  %v375_v36 = vld [vmem:[%s7984_s30 + $0x58] sm:$0xff] }
  0x1f   : > { %v376_v37 = vld [vmem:[%s7984_s30 + $0x60] sm:$0xff]  ;;  %v377_v38 = vld [vmem:[%s7984_s30 + $0x68] sm:$0xff]  ;;  %v378_v39 = vld [vmem:[%s7984_s30 + $0x70] sm:$0xff] }
  0x20   : > { %v379_v40 = vld [vmem:[%s7984_s30 + $0x78] sm:$0xff]  ;;  %v619_v48 = vld [vmem:[%s12302_s8] sm:$0xff] }
  0x21   : > { %6790 = vmatpush1.bf16.msra.mxu0 %v6789_v20 }
  0x22   : > { %6792 = vmatprep.subr.bf16.mxu0 %v6791_v21 }
  0x25   : > { %6794 = vmatpush1.bf16.msra.mxu0 %v6793_v24 }
  0x28   : > { %5698 = vmatmul.mubr.msk.f32.vlgmr.msra.gmra.mrb[0].mxu0 %vm409_vm0, %v364_v25 }
  0x29   : > { %528 = vmatprep.mubr.f32.mxu0 %v12305_v7 }
  0x2c   : > { %5699 = vmatmul.mubr.msk.f32.gmra.mrb[2].mxu0 %vm409_vm0, %v365_v26 }
  0x2d   : > { %534 = vmatprep.mubr.f32.mxu0 %v12305_v7 }
  0x30   : > { %5700 = vmatmul.mubr.msk.f32.gmra.mrb[4].mxu0 %vm409_vm0, %v366_v27 }
  0x31   : > { %540 = vmatprep.mubr.f32.mxu0 %v12305_v7 }
  0x34   : > { %5701 = vmatmul.mubr.msk.f32.gmra.mrb[6].mxu0 %vm409_vm0, %v367_v28 }
  0x35   : > { %546 = vmatprep.mubr.f32.mxu0 %v12305_v7 }
  0x38   : > { %5702 = vmatmul.mubr.msk.f32.gmra.mrb[8].mxu0 %vm409_vm0, %v368_v29 }
  0x39   : > { %552 = vmatprep.mubr.f32.mxu0 %v12305_v7 }
  0x3c   : > { %5703 = vmatmul.mubr.msk.f32.gmra.mrb[10].mxu0 %vm409_vm0, %v369_v30 }
  0x3d   : > { %558 = vmatprep.mubr.f32.mxu0 %v12305_v7 }
  0x40   : > { %5704 = vmatmul.mubr.msk.f32.gmra.mrb[12].mxu0 %vm409_vm0, %v370_v31 }
  0x41   : > { %564 = vmatprep.mubr.f32.mxu0 %v12305_v7 }
  0x44   : > { %5705 = vmatmul.mubr.msk.f32.gmra.mrb[14].mxu0 %vm409_vm0, %v371_v32 }
  0x45   : > { %570 = vmatprep.mubr.f32.mxu0 %v12305_v7 }
  0x48   : > { %5706 = vmatmul.mubr.msk.f32.gmra.mrb[16].mxu0 %vm409_vm0, %v372_v33 }
  0x49   : > { %576 = vmatprep.mubr.f32.mxu0 %v12305_v7 }
  0x4c   : > { %5707 = vmatmul.mubr.msk.f32.gmra.mrb[18].mxu0 %vm409_vm0, %v373_v34 }
  0x4d   : > { %582 = vmatprep.mubr.f32.mxu0 %v12305_v7 }
  0x50   : > { %5708 = vmatmul.mubr.msk.f32.gmra.mrb[20].mxu0 %vm409_vm0, %v374_v35 }
  0x51   : > { %588 = vmatprep.mubr.f32.mxu0 %v12305_v7 }
  0x54   : > { %5709 = vmatmul.mubr.msk.f32.gmra.mrb[22].mxu0 %vm409_vm0, %v375_v36 }
  0x55   : > { %594 = vmatprep.mubr.f32.mxu0 %v12305_v7 }
  0x58   : > { %5710 = vmatmul.mubr.msk.f32.gmra.mrb[24].mxu0 %vm409_vm0, %v376_v37 }
  0x59   : > { %600 = vmatprep.mubr.f32.mxu0 %v12305_v7 }
  0x5c   : > { %5711 = vmatmul.mubr.msk.f32.gmra.mrb[26].mxu0 %vm409_vm0, %v377_v38 }
  0x5d   : > { %606 = vmatprep.mubr.f32.mxu0 %v12305_v7 }
  0x60   : > { %5712 = vmatmul.mubr.msk.f32.gmra.mrb[28].mxu0 %vm409_vm0, %v378_v39 }
  0x61   : > { %612 = vmatprep.mubr.f32.mxu0 %v12305_v7 }
  0x64   : > { %5713 = vmatmul.mubr.msk.f32.gmra.mrb[30].mxu0 %vm409_vm0, %v379_v40 }
  0xfb   : > { %v524_v47 = vpop.f32.mrb[0].mxu0 }
  0xfc   : > { %v8051_v49 = vadd.f32 %v524_v47, %v8042_v45  ;;  %v526_v50 = vpop.f32.mrb[1].mxu0 }
  0xfd   : > { %v527_v56 = vadd.f32 %v526_v50, %v8054_v51 }
  0xfe   : > { %v747_v52 = vmul.f32 %v619_v48, %v8051_v49 }
  0xff   : > { %v530_v53 = vpop.f32.mrb[2].mxu0 }
 0x100   : > { %v8058_v54 = vadd.f32 %v530_v53, %v8042_v45  ;;  %v532_v55 = vpop.f32.mrb[3].mxu0  ;;  %6323 = vmatprep.mubr.msk.f32.mxu1 %vm409_vm0, %v747_v52 }
 0x101   : > { %v533_v57 = vadd.f32 %v532_v55, %v8054_v51 }
 0x102   : > { %v6998_v58 = vpack.i.bf16 %v8058_v54, %v8051_v49 }
 0x103   : > { %v6843_v59 = vpack.c.bf16 %v533_v57, %v527_v56  ;;  %v536_v60 = vpop.f32.mrb[4].mxu0 }
 0x104   : > { %v538_v61 = vpop.f32.mrb[5].mxu0  ;;  %6999 = vrot.lane.b32.xlu0 %v6998_v58, %s7824_s21  ;;  %v8067_v63 = vadd.f32 %v536_v60, %v8042_v45 }
 0x105   : > { %6844 = vmatprep.subr.bf16.mxu0 %v6843_v59  ;;  %v539_v2 = vadd.f32 %v538_v61, %v8054_v51 }
 0x106   : > { %6846 = vmatpush3.bf16.msra.mxu0 %v6843_v59 }
 0x107   : > { %v542_v62 = vpop.f32.mrb[6].mxu0 }
 0x108   : > { %v8070_v0 = vadd.f32 %v542_v62, %v8042_v45  ;;  %v544_v1 = vpop.f32.mrb[7].mxu0 }
 0x109   : > { %v545_v3 = vadd.f32 %v544_v1, %v8054_v51 }
 0x10a   : > { %v7003_v4 = vpack.i.bf16 %v8070_v0, %v8067_v63 }
 0x10b   : > { %v6847_v5 = vpack.c.bf16 %v545_v3, %v539_v2  ;;  %v548_v6 = vpop.f32.mrb[8].mxu0 }
 0x10c   : > { %v550_v8 = vpop.f32.mrb[9].mxu0  ;;  %7004 = vrot.lane.b32.xlu0 %v7003_v4, %s7824_s21  ;;  %v8078_v10 = vadd.f32 %v548_v6, %v8042_v45 }
 0x10d   : > { %6848 = vmatprep.subr.bf16.mxu0 %v6847_v5  ;;  %v551_v13 = vadd.f32 %v550_v8, %v8054_v51 }
 0x10e   : > { %6850 = vmatpush3.bf16.msra.mxu0 %v6847_v5 }
 0x10f   : > { %v554_v9 = vpop.f32.mrb[10].mxu0 }
 0x110   : > { %v8081_v11 = vadd.f32 %v554_v9, %v8042_v45  ;;  %v556_v12 = vpop.f32.mrb[11].mxu0 }
 0x111   : > { %v557_v14 = vadd.f32 %v556_v12, %v8054_v51 }
 0x112   : > { %v7008_v15 = vpack.i.bf16 %v8081_v11, %v8078_v10 }
 0x113   : > { %v6851_v16 = vpack.c.bf16 %v557_v14, %v551_v13  ;;  %v560_v17 = vpop.f32.mrb[12].mxu0 }
 0x114   : > { %v562_v18 = vpop.f32.mrb[13].mxu0  ;;  %7009 = vrot.lane.b32.xlu1 %v7008_v15, %s7824_s21  ;;  %v8089_v20 = vadd.f32 %v560_v17, %v8042_v45 }
 0x115   : > { %6852 = vmatprep.subr.bf16.mxu0 %v6851_v16  ;;  %v563_v23 = vadd.f32 %v562_v18, %v8054_v51 }
 0x116   : > { %6854 = vmatpush3.bf16.msra.mxu0 %v6851_v16 }
 0x117   : > { %v566_v19 = vpop.f32.mrb[14].mxu0 }
 0x118   : > { %v8092_v21 = vadd.f32 %v566_v19, %v8042_v45  ;;  %v568_v22 = vpop.f32.mrb[15].mxu0 }
 0x119   : > { %v569_v24 = vadd.f32 %v568_v22, %v8054_v51 }
 0x11a   : > { %v7013_v25 = vpack.i.bf16 %v8092_v21, %v8089_v20 }
 0x11b   : > { %v6855_v26 = vpack.c.bf16 %v569_v24, %v563_v23  ;;  %v572_v27 = vpop.f32.mrb[16].mxu0 }
 0x11c   : > { %v574_v28 = vpop.f32.mrb[17].mxu0  ;;  %7014 = vrot.lane.b32.xlu1 %v7013_v25, %s7824_s21  ;;  %v8100_v30 = vadd.f32 %v572_v27, %v8042_v45 }
 0x11d   : > { %6856 = vmatprep.subr.bf16.mxu0 %v6855_v26  ;;  %v575_v33 = vadd.f32 %v574_v28, %v8054_v51 }
 0x11e   : > { %6858 = vmatpush3.bf16.msra.mxu0 %v6855_v26 }
 0x11f   : > { %v578_v29 = vpop.f32.mrb[18].mxu0 }
 0x120   : > { %v8103_v31 = vadd.f32 %v578_v29, %v8042_v45  ;;  %v580_v32 = vpop.f32.mrb[19].mxu0 }
 0x121   : > { %v581_v34 = vadd.f32 %v580_v32, %v8054_v51 }
 0x122   : > { %v7018_v35 = vpack.i.bf16 %v8103_v31, %v8100_v30 }
 0x123   : > { %v6859_v36 = vpack.c.bf16 %v581_v34, %v575_v33  ;;  %v584_v37 = vpop.f32.mrb[20].mxu0 }
 0x124   : > { %v586_v38 = vpop.f32.mrb[21].mxu0  ;;  %7019 = vrot.lane.b32.xlu0 %v7018_v35, %s7824_s21  ;;  %v8111_v40 = vadd.f32 %v584_v37, %v8042_v45 }
 0x125   : > { %6860 = vmatprep.subr.bf16.mxu0 %v6859_v36  ;;  %v587_v47 = vadd.f32 %v586_v38, %v8054_v51 }
 0x126   : > { %6862 = vmatpush3.bf16.msra.mxu0 %v6859_v36 }
 0x127   : > { %v590_v39 = vpop.f32.mrb[22].mxu0 }
 0x128   : > { %v8114_v41 = vadd.f32 %v590_v39, %v8042_v45  ;;  %v592_v44 = vpop.f32.mrb[23].mxu0 }
 0x129   : > { %v593_v48 = vadd.f32 %v592_v44, %v8054_v51 }
 0x12a   : > { %v7023_v50 = vpack.i.bf16 %v8114_v41, %v8111_v40 }
 0x12b   : > { %v6863_v52 = vpack.c.bf16 %v593_v48, %v587_v47  ;;  %v596_v53 = vpop.f32.mrb[24].mxu0 }
 0x12c   : > { %v598_v55 = vpop.f32.mrb[25].mxu0  ;;  %7024 = vrot.lane.b32.xlu1 %v7023_v50, %s7824_s21  ;;  %v8122_v57 = vadd.f32 %v596_v53, %v8042_v45 }
 0x12d   : > { %6864 = vmatprep.subr.bf16.mxu0 %v6863_v52  ;;  %v599_v60 = vadd.f32 %v598_v55, %v8054_v51 }
 0x12e   : > { %6866 = vmatpush3.bf16.msra.mxu0 %v6863_v52 }
 0x12f   : > { %v602_v56 = vpop.f32.mrb[26].mxu0 }
 0x130   : > { %v8125_v58 = vadd.f32 %v602_v56, %v8042_v45  ;;  %v604_v59 = vpop.f32.mrb[27].mxu0 }
 0x131   : > { %v605_v61 = vadd.f32 %v604_v59, %v8054_v51 }
 0x132   : > { %v7028_v62 = vpack.i.bf16 %v8125_v58, %v8122_v57 }
 0x133   : > { %v6867_v1 = vpack.c.bf16 %v605_v61, %v599_v60  ;;  %v608_v2 = vpop.f32.mrb[28].mxu0  ;;  %v620_v61 = vld [vmem:[%s12302_s8 + $0x8] sm:$0xff] }
 0x134   : > { %v610_v3 = vpop.f32.mrb[29].mxu0  ;;  %7029 = vrot.lane.b32.xlu0 %v7028_v62, %s7824_s21  ;;  %v8133_v5 = vadd.f32 %v608_v2, %v8042_v45  ;;  %v621_v62 = vld [vmem:[%s12302_s8 + $0x10] sm:$0xff] }
 0x135   : > { %6868 = vmatprep.subr.bf16.mxu0 %v6867_v1  ;;  %v611_v9 = vadd.f32 %v610_v3, %v8054_v51  ;;  %v749_v2 = vmul.f32 %v621_v62, %v8067_v63  ;;  %v622_v3 = vld [vmem:[%s12302_s8 + $0x18] sm:$0xff]  ;;  %v643_v62 = vld [vmem:[%s12302_s8 + $0xc0] sm:$0xff] }
 0x136   : > { %6870 = vmatpush3.bf16.msra.mxu0 %v6867_v1  ;;  %v748_v1 = vmul.f32 %v620_v61, %v8058_v54  ;;  %v642_v61 = vld [vmem:[%s12302_s8 + $0xb8] sm:$0xff] }
 0x137   : > { %v614_v4 = vpop.f32.mrb[30].mxu0 }
 0x138   : > { %v8136_v6 = vadd.f32 %v614_v4, %v8042_v45  ;;  %v616_v8 = vpop.f32.mrb[31].mxu0  ;;  %v623_v4 = vld [vmem:[%s12302_s8 + $0x20] sm:$0xff] }
 0x139   : > { %v617_v12 = vadd.f32 %v616_v8, %v8054_v51  ;;  %v750_v8 = vmul.f32 %v622_v3, %v8070_v0  ;;  %v644_v3 = vld [vmem:[%s12302_s8 + $0xc8] sm:$0xff] }
 0x13a   : > { %v7033_v13 = vpack.i.bf16 %v8136_v6, %v8133_v5 }
 0x13b   : > { %v6871_v14 = vpack.c.bf16 %v617_v12, %v611_v9  ;;  %v751_v9 = vmul.f32 %v623_v4, %v8078_v10  ;;  %v624_v12 = vld [vmem:[%s12302_s8 + $0x28] sm:$0xff]  ;;  %v645_v4 = vld [vmem:[%s12302_s8 + $0xd0] sm:$0xff] }
 0x13c   : > { %7034 = vrot.lane.b32.xlu1 %v7033_v13, %s7824_s21  ;;  %v625_v13 = vld [vmem:[%s12302_s8 + $0x30] sm:$0xff]  ;;  %s5898_s21 = sshll.u32 %s7904_s17, 11 }
 0x13d   : > { %6872 = vmatprep.subr.bf16.mxu0 %v6871_v14  ;;  %s12244_s28 = scalar_lea.hbm %s12304_s10, %s5898_s21 }
 0x13e   : > { %6874 = vmatpush3.bf16.msra.mxu0 %v6871_v14  ;;  %v752_v14 = vmul.f32 %v624_v12, %v8081_v11  ;;  %v646_v12 = vld [vmem:[%s12302_s8 + $0xd8] sm:$0xff] }
 0x176   : > { %v7000_v15 = vpop.permute.xlu0 %6999 }
 0x177   : > { %v7002_v16 = vunpack.i.h.bf16 %v7000_v15  ;;  %v7001_v17 = vunpack.i.l.bf16 %v7000_v15  ;;  %v753_v15 = vmul.f32 %v625_v13, %v8089_v20  ;;  %v647_v13 = vld [vmem:[%s12302_s8 + $0xe0] sm:$0xff] }
 0x179   : > { %v6795_v18 = vpack.c.bf16 %v7002_v16, %v7001_v17  ;;  %v626_v16 = vld [vmem:[%s12302_s8 + $0x38] sm:$0xff]  ;;  %v627_v17 = vld [vmem:[%s12302_s8 + $0x40] sm:$0xff] }
 0x17a   : > { %v754_v45 = vmul.f32 %v626_v16, %v8092_v21  ;;  %v648_v16 = vld [vmem:[%s12302_s8 + $0xe8] sm:$0xff] }
 0x17b   : > { %6797 = vmatprep.subr.msk.bf16.mxu1 %vm8145_vm1, %v6795_v18 }
 0x17c   : > { %6800 = vmatpush3.bf16.xpose.msk.msra.mxu1 %vm8145_vm1, %v6795_v18  ;;  %v755_v18 = vmul.f32 %v627_v17, %v8100_v30  ;;  %v649_v17 = vld [vmem:[%s12302_s8 + $0xf0] sm:$0xff] }
 0x17e   : > { %v7005_v51 = vpop.permute.xlu0 %7004 }
 0x17f   : > { %v7007_v19 = vunpack.i.h.bf16 %v7005_v51  ;;  %v7006_v22 = vunpack.i.l.bf16 %v7005_v51  ;;  %v628_v51 = vld [vmem:[%s12302_s8 + $0x48] sm:$0xff] }
 0x181   : > { %v6801_v23 = vpack.c.bf16 %v7007_v19, %v7006_v22  ;;  %v629_v19 = vld [vmem:[%s12302_s8 + $0x50] sm:$0xff]  ;;  %v756_v22 = vmul.f32 %v628_v51, %v8103_v31  ;;  %v650_v51 = vld [vmem:[%s12302_s8 + $0xf8] sm:$0xff] }
 0x183   : > { %6803 = vmatprep.subr.msk.bf16.mxu1 %vm8145_vm1, %v6801_v23 }
 0x184   : > { %6806 = vmatpush3.bf16.xpose.msk.msra.mxu1 %vm8145_vm1, %v6801_v23  ;;  %v757_v23 = vmul.f32 %v629_v19, %v8111_v40  ;;  %v651_v19 = vld [vmem:[%s12302_s8 + $0x100] sm:$0xff] }
 0x186   : > { %v7010_v24 = vpop.permute.xlu1 %7009 }
 0x187   : > { %v7012_v25 = vunpack.i.h.bf16 %v7010_v24  ;;  %v7011_v26 = vunpack.i.l.bf16 %v7010_v24  ;;  %v630_v24 = vld [vmem:[%s12302_s8 + $0x58] sm:$0xff] }
 0x189   : > { %v6807_v27 = vpack.c.bf16 %v7012_v25, %v7011_v26  ;;  %v631_v25 = vld [vmem:[%s12302_s8 + $0x60] sm:$0xff]  ;;  %v758_v26 = vmul.f32 %v630_v24, %v8114_v41  ;;  %v652_v24 = vld [vmem:[%s12302_s8 + $0x108] sm:$0xff] }
 0x18b   : > { %6809 = vmatprep.subr.msk.bf16.mxu1 %vm8145_vm1, %v6807_v27 }
 0x18c   : > { %6812 = vmatpush3.bf16.xpose.msk.msra.mxu1 %vm8145_vm1, %v6807_v27  ;;  %v759_v27 = vmul.f32 %v631_v25, %v8122_v57  ;;  %v653_v25 = vld [vmem:[%s12302_s8 + $0x110] sm:$0xff] }
 0x18e   : > { %v7015_v28 = vpop.permute.xlu1 %7014 }
 0x18f   : > { %v7017_v29 = vunpack.i.h.bf16 %v7015_v28  ;;  %v7016_v32 = vunpack.i.l.bf16 %v7015_v28  ;;  %v632_v28 = vld [vmem:[%s12302_s8 + $0x68] sm:$0xff] }
 0x191   : > { %v6813_v33 = vpack.c.bf16 %v7017_v29, %v7016_v32  ;;  %v633_v29 = vld [vmem:[%s12302_s8 + $0x70] sm:$0xff]  ;;  %v760_v32 = vmul.f32 %v632_v28, %v8125_v58  ;;  %v654_v28 = vld [vmem:[%s12302_s8 + $0x118] sm:$0xff] }
 0x193   : > { %6815 = vmatprep.subr.msk.bf16.mxu1 %vm8145_vm1, %v6813_v33 }
 0x194   : > { %6818 = vmatpush3.bf16.xpose.msk.msra.mxu1 %vm8145_vm1, %v6813_v33  ;;  %v761_v33 = vmul.f32 %v633_v29, %v8133_v5  ;;  %v655_v29 = vld [vmem:[%s12302_s8 + $0x120] sm:$0xff] }
 0x196   : > { %v7020_v34 = vpop.permute.xlu0 %7019 }
 0x197   : > { %v7022_v35 = vunpack.i.h.bf16 %v7020_v34  ;;  %v7021_v36 = vunpack.i.l.bf16 %v7020_v34  ;;  %v634_v34 = vld [vmem:[%s12302_s8 + $0x78] sm:$0xff] }
 0x199   : > { %v6819_v37 = vpack.c.bf16 %v7022_v35, %v7021_v36  ;;  %v635_v35 = vld [vmem:[%s12302_s8 + $0x80] sm:$0xff]  ;;  %v762_v36 = vmul.f32 %v634_v34, %v8136_v6  ;;  %v656_v34 = vld [vmem:[%s12302_s8 + $0x128] sm:$0xff] }
 0x19b   : > { %6821 = vmatprep.subr.msk.bf16.mxu1 %vm8145_vm1, %v6819_v37 }
 0x19c   : > { %6824 = vmatpush3.bf16.xpose.msk.msra.mxu1 %vm8145_vm1, %v6819_v37  ;;  %v763_v37 = vmul.f32 %v635_v35, %v8051_v49  ;;  %v657_v35 = vld [vmem:[%s12302_s8 + $0x130] sm:$0xff] }
 0x19e   : > { %v7025_v38 = vpop.permute.xlu1 %7024 }
 0x19f   : > { %v7027_v39 = vunpack.i.h.bf16 %v7025_v38  ;;  %v7026_v44 = vunpack.i.l.bf16 %v7025_v38  ;;  %v636_v38 = vld [vmem:[%s12302_s8 + $0x88] sm:$0xff] }
 0x1a1   : > { %v6825_v47 = vpack.c.bf16 %v7027_v39, %v7026_v44  ;;  %v637_v39 = vld [vmem:[%s12302_s8 + $0x90] sm:$0xff]  ;;  %v764_v44 = vmul.f32 %v636_v38, %v8058_v54  ;;  %v658_v38 = vld [vmem:[%s12302_s8 + $0x138] sm:$0xff] }
 0x1a3   : > { %6827 = vmatprep.subr.msk.bf16.mxu1 %vm8145_vm1, %v6825_v47 }
 0x1a4   : > { %6830 = vmatpush3.bf16.xpose.msk.msra.mxu1 %vm8145_vm1, %v6825_v47  ;;  %v765_v47 = vmul.f32 %v637_v39, %v8067_v63  ;;  %v659_v39 = vld [vmem:[%s12302_s8 + $0x140] sm:$0xff] }
 0x1a6   : > { %v7030_v48 = vpop.permute.xlu0 %7029 }
 0x1a7   : > { %v7032_v50 = vunpack.i.h.bf16 %v7030_v48  ;;  %v7031_v52 = vunpack.i.l.bf16 %v7030_v48  ;;  %v638_v48 = vld [vmem:[%s12302_s8 + $0x98] sm:$0xff] }
 0x1a9   : > { %v6831_v53 = vpack.c.bf16 %v7032_v50, %v7031_v52  ;;  %v639_v50 = vld [vmem:[%s12302_s8 + $0xa0] sm:$0xff]  ;;  %v766_v52 = vmul.f32 %v638_v48, %v8070_v0  ;;  %v660_v48 = vld [vmem:[%s12302_s8 + $0x148] sm:$0xff] }
 0x1ab   : > { %6833 = vmatprep.subr.msk.bf16.mxu1 %vm8145_vm1, %v6831_v53 }
 0x1ac   : > { %6836 = vmatpush3.bf16.xpose.msk.msra.mxu1 %vm8145_vm1, %v6831_v53  ;;  %v767_v53 = vmul.f32 %v639_v50, %v8078_v10  ;;  %v661_v50 = vld [vmem:[%s12302_s8 + $0x150] sm:$0xff] }
 0x1ae   : > { %v7035_v55 = vpop.permute.xlu1 %7034 }
 0x1af   : > { %v7037_v56 = vunpack.i.h.bf16 %v7035_v55  ;;  %v7036_v59 = vunpack.i.l.bf16 %v7035_v55  ;;  %v640_v55 = vld [vmem:[%s12302_s8 + $0xa8] sm:$0xff] }
 0x1b1   : > { %v6837_v60 = vpack.c.bf16 %v7037_v56, %v7036_v59  ;;  %v641_v56 = vld [vmem:[%s12302_s8 + $0xb0] sm:$0xff]  ;;  %v768_v59 = vmul.f32 %v640_v55, %v8081_v11  ;;  %v662_v55 = vld [vmem:[%s12302_s8 + $0x158] sm:$0xff] }
 0x1b3   : > { %6839 = vmatprep.subr.msk.bf16.mxu1 %vm8145_vm1, %v6837_v60 }
 0x1b4   : > { %6842 = vmatpush3.bf16.xpose.msk.msra.mxu1 %vm8145_vm1, %v6837_v60  ;;  %v769_v60 = vmul.f32 %v641_v56, %v8089_v20  ;;  %v663_v56 = vld [vmem:[%s12302_s8 + $0x160] sm:$0xff] }
 0x1bb   : > { %6324 = vmatmul.mubr.msk.f32.vlgmr.msra.gmra.mrb[0].mxu1 %vm409_vm0, %v748_v1  ;;  %v770_v1 = vmul.f32 %v642_v61, %v8092_v21  ;;  %v664_v61 = vld [vmem:[%s12302_s8 + $0x168] sm:$0xff] }
 0x1bc   : > { %6326 = vmatprep.mubr.msk.f32.mxu1 %vm409_vm0, %v749_v2  ;;  %v771_v2 = vmul.f32 %v643_v62, %v8100_v30  ;;  %v665_v62 = vld [vmem:[%s12302_s8 + $0x170] sm:$0xff] }
 0x1bf   : > { %6327 = vmatmul.mubr.msk.f32.gmra.mrb[2].mxu1 %vm409_vm0, %v750_v8  ;;  %v772_v8 = vmul.f32 %v644_v3, %v8103_v31  ;;  %v666_v3 = vld [vmem:[%s12302_s8 + $0x178] sm:$0xff] }
 0x1c0   : > { %6329 = vmatprep.mubr.msk.f32.mxu1 %vm409_vm0, %v751_v9  ;;  %v773_v9 = vmul.f32 %v645_v4, %v8111_v40  ;;  %v667_v4 = vld [vmem:[%s12302_s8 + $0x180] sm:$0xff] }
 0x1c3   : > { %6330 = vmatmul.mubr.msk.f32.gmra.mrb[4].mxu1 %vm409_vm0, %v752_v14  ;;  %v774_v14 = vmul.f32 %v646_v12, %v8114_v41  ;;  %v668_v12 = vld [vmem:[%s12302_s8 + $0x188] sm:$0xff] }
 0x1c4   : > { %6332 = vmatprep.mubr.msk.f32.mxu1 %vm409_vm0, %v753_v15  ;;  %v775_v15 = vmul.f32 %v647_v13, %v8122_v57  ;;  %v669_v13 = vld [vmem:[%s12302_s8 + $0x190] sm:$0xff] }
 0x1c7   : > { %6333 = vmatmul.mubr.msk.f32.gmra.mrb[6].mxu1 %vm409_vm0, %v754_v45  ;;  %v776_v45 = vmul.f32 %v648_v16, %v8125_v58  ;;  %v670_v16 = vld [vmem:[%s12302_s8 + $0x198] sm:$0xff] }
 0x1c8   : > { %6335 = vmatprep.mubr.msk.f32.mxu1 %vm409_vm0, %v755_v18  ;;  %v777_v18 = vmul.f32 %v649_v17, %v8133_v5  ;;  %v671_v17 = vld [vmem:[%s12302_s8 + $0x1a0] sm:$0xff] }
 0x1cb   : > { %6336 = vmatmul.mubr.msk.f32.gmra.mrb[8].mxu1 %vm409_vm0, %v756_v22  ;;  %v778_v22 = vmul.f32 %v650_v51, %v8136_v6  ;;  %v672_v51 = vld [vmem:[%s12302_s8 + $0x1a8] sm:$0xff] }
 0x1cc   : > { %6338 = vmatprep.mubr.msk.f32.mxu1 %vm409_vm0, %v757_v23  ;;  %v779_v23 = vmul.f32 %v651_v19, %v8051_v49  ;;  %v673_v19 = vld [vmem:[%s12302_s8 + $0x1b0] sm:$0xff] }
 0x1cf   : > { %6339 = vmatmul.mubr.msk.f32.gmra.mrb[10].mxu1 %vm409_vm0, %v758_v26  ;;  %v780_v26 = vmul.f32 %v652_v24, %v8058_v54  ;;  %v674_v24 = vld [vmem:[%s12302_s8 + $0x1b8] sm:$0xff] }
 0x1d0   : > { %6341 = vmatprep.mubr.msk.f32.mxu1 %vm409_vm0, %v759_v27  ;;  %v781_v27 = vmul.f32 %v653_v25, %v8067_v63  ;;  %v675_v25 = vld [vmem:[%s12302_s8 + $0x1c0] sm:$0xff] }
 0x1d3   : > { %6342 = vmatmul.mubr.msk.f32.gmra.mrb[12].mxu1 %vm409_vm0, %v760_v32  ;;  %v782_v32 = vmul.f32 %v654_v28, %v8070_v0  ;;  %v676_v28 = vld [vmem:[%s12302_s8 + $0x1c8] sm:$0xff] }
 0x1d4   : > { %6344 = vmatprep.mubr.msk.f32.mxu1 %vm409_vm0, %v761_v33  ;;  %v783_v33 = vmul.f32 %v655_v29, %v8078_v10  ;;  %v677_v29 = vld [vmem:[%s12302_s8 + $0x1d0] sm:$0xff] }
 0x1d7   : > { %6345 = vmatmul.mubr.msk.f32.gmra.mrb[14].mxu1 %vm409_vm0, %v762_v36  ;;  %v784_v36 = vmul.f32 %v656_v34, %v8081_v11  ;;  %v678_v34 = vld [vmem:[%s12302_s8 + $0x1d8] sm:$0xff] }
 0x1d8   : > { %6347 = vmatprep.mubr.msk.f32.mxu1 %vm409_vm0, %v763_v37  ;;  %v785_v37 = vmul.f32 %v657_v35, %v8089_v20  ;;  %v679_v35 = vld [vmem:[%s12302_s8 + $0x1e0] sm:$0xff] }
 0x1db   : > { %6348 = vmatmul.mubr.msk.f32.gmra.mrb[16].mxu1 %vm409_vm0, %v764_v44  ;;  %v786_v44 = vmul.f32 %v658_v38, %v8092_v21  ;;  %v680_v38 = vld [vmem:[%s12302_s8 + $0x1e8] sm:$0xff] }
 0x1dc   : > { %6350 = vmatprep.mubr.msk.f32.mxu1 %vm409_vm0, %v765_v47  ;;  %v787_v47 = vmul.f32 %v659_v39, %v8100_v30  ;;  %v681_v39 = vld [vmem:[%s12302_s8 + $0x1f0] sm:$0xff] }
 0x1df   : > { %6351 = vmatmul.mubr.msk.f32.gmra.mrb[18].mxu1 %vm409_vm0, %v766_v52  ;;  %v788_v52 = vmul.f32 %v660_v48, %v8103_v31  ;;  %v682_v48 = vld [vmem:[%s12302_s8 + $0x1f8] sm:$0xff] }
 0x1e0   : > { %6353 = vmatprep.mubr.msk.f32.mxu1 %vm409_vm0, %v767_v53  ;;  %v789_v53 = vmul.f32 %v661_v50, %v8111_v40  ;;  %v683_v50 = vld [vmem:[%s12302_s8 + $0x200] sm:$0xff] }
 0x1e3   : > { %6354 = vmatmul.mubr.msk.f32.gmra.mrb[20].mxu1 %vm409_vm0, %v768_v59  ;;  %v790_v59 = vmul.f32 %v662_v55, %v8114_v41  ;;  %v684_v55 = vld [vmem:[%s12302_s8 + $0x208] sm:$0xff] }
 0x1e4   : > { %6356 = vmatprep.mubr.msk.f32.mxu1 %vm409_vm0, %v769_v60  ;;  %v791_v60 = vmul.f32 %v663_v56, %v8122_v57  ;;  %v685_v56 = vld [vmem:[%s12302_s8 + $0x210] sm:$0xff] }
 0x1e7   : > { %6357 = vmatmul.mubr.msk.f32.gmra.mrb[22].mxu1 %vm409_vm0, %v770_v1  ;;  %v792_v1 = vmul.f32 %v664_v61, %v8125_v58  ;;  %v686_v61 = vld [vmem:[%s12302_s8 + $0x218] sm:$0xff] }
 0x1e8   : > { %6359 = vmatprep.mubr.msk.f32.mxu1 %vm409_vm0, %v771_v2  ;;  %v793_v2 = vmul.f32 %v665_v62, %v8133_v5  ;;  %v687_v62 = vld [vmem:[%s12302_s8 + $0x220] sm:$0xff] }
 0x1eb   : > { %6360 = vmatmul.mubr.msk.f32.gmra.mrb[24].mxu1 %vm409_vm0, %v772_v8  ;;  %v794_v8 = vmul.f32 %v666_v3, %v8136_v6  ;;  %v688_v3 = vld [vmem:[%s12302_s8 + $0x228] sm:$0xff] }
 0x1ec   : > { %6362 = vmatprep.mubr.msk.f32.mxu1 %vm409_vm0, %v773_v9  ;;  %v795_v9 = vmul.f32 %v667_v4, %v8051_v49  ;;  %v689_v4 = vld [vmem:[%s12302_s8 + $0x230] sm:$0xff] }
 0x1ef   : > { %6363 = vmatmul.mubr.msk.f32.gmra.mrb[26].mxu1 %vm409_vm0, %v774_v14  ;;  %v796_v14 = vmul.f32 %v668_v12, %v8058_v54  ;;  %v690_v12 = vld [vmem:[%s12302_s8 + $0x238] sm:$0xff] }
 0x1f0   : > { %6365 = vmatprep.mubr.msk.f32.mxu1 %vm409_vm0, %v775_v15  ;;  %v797_v15 = vmul.f32 %v669_v13, %v8067_v63  ;;  %v691_v13 = vld [vmem:[%s12302_s8 + $0x240] sm:$0xff] }
 0x1f3   : > { %6366 = vmatmul.mubr.msk.f32.gmra.mrb[28].mxu1 %vm409_vm0, %v776_v45  ;;  %v798_v45 = vmul.f32 %v670_v16, %v8070_v0  ;;  %v692_v16 = vld [vmem:[%s12302_s8 + $0x248] sm:$0xff] }
 0x1f4   : > { %6368 = vmatprep.mubr.msk.f32.mxu1 %vm409_vm0, %v777_v18  ;;  %v799_v18 = vmul.f32 %v671_v17, %v8078_v10  ;;  %v693_v17 = vld [vmem:[%s12302_s8 + $0x250] sm:$0xff] }
 0x1f7   : > { %6369 = vmatmul.mubr.msk.f32.gmra.mrb[30].mxu1 %vm409_vm0, %v778_v22  ;;  %v800_v22 = vmul.f32 %v672_v51, %v8081_v11  ;;  %v694_v51 = vld [vmem:[%s12302_s8 + $0x258] sm:$0xff] }
 0x1f8   : > { %6371 = vmatprep.mubr.msk.f32.mxu1 %vm409_vm0, %v779_v23  ;;  %v801_v23 = vmul.f32 %v673_v19, %v8089_v20  ;;  %v695_v19 = vld [vmem:[%s12302_s8 + $0x260] sm:$0xff] }
 0x1fb   : > { %6372 = vmatmul.mubr.msk.f32.gmra.mrb[32].mxu1 %vm409_vm0, %v780_v26  ;;  %v802_v26 = vmul.f32 %v674_v24, %v8092_v21  ;;  %v696_v24 = vld [vmem:[%s12302_s8 + $0x268] sm:$0xff] }
 0x1fc   : > { %6374 = vmatprep.mubr.msk.f32.mxu1 %vm409_vm0, %v781_v27  ;;  %v803_v27 = vmul.f32 %v675_v25, %v8100_v30  ;;  %v697_v25 = vld [vmem:[%s12302_s8 + $0x270] sm:$0xff] }
 0x1ff   : > { %6375 = vmatmul.mubr.msk.f32.gmra.mrb[34].mxu1 %vm409_vm0, %v782_v32  ;;  %v804_v32 = vmul.f32 %v676_v28, %v8103_v31  ;;  %v698_v28 = vld [vmem:[%s12302_s8 + $0x278] sm:$0xff] }
 0x200   : > { %6377 = vmatprep.mubr.msk.f32.mxu1 %vm409_vm0, %v783_v33  ;;  %v805_v33 = vmul.f32 %v677_v29, %v8111_v40  ;;  %v699_v29 = vld [vmem:[%s12302_s8 + $0x280] sm:$0xff] }
 0x203   : > { %6378 = vmatmul.mubr.msk.f32.gmra.mrb[36].mxu1 %vm409_vm0, %v784_v36  ;;  %v806_v36 = vmul.f32 %v678_v34, %v8114_v41  ;;  %v700_v34 = vld [vmem:[%s12302_s8 + $0x288] sm:$0xff] }
 0x204   : > { %6380 = vmatprep.mubr.msk.f32.mxu1 %vm409_vm0, %v785_v37  ;;  %v807_v37 = vmul.f32 %v679_v35, %v8122_v57  ;;  %v701_v35 = vld [vmem:[%s12302_s8 + $0x290] sm:$0xff] }
 0x207   : > { %6381 = vmatmul.mubr.msk.f32.gmra.mrb[38].mxu1 %vm409_vm0, %v786_v44  ;;  %v808_v44 = vmul.f32 %v680_v38, %v8125_v58  ;;  %v702_v38 = vld [vmem:[%s12302_s8 + $0x298] sm:$0xff] }
 0x208   : > { %6383 = vmatprep.mubr.msk.f32.mxu1 %vm409_vm0, %v787_v47  ;;  %v809_v47 = vmul.f32 %v681_v39, %v8133_v5  ;;  %v703_v39 = vld [vmem:[%s12302_s8 + $0x2a0] sm:$0xff] }
 0x20b   : > { %6384 = vmatmul.mubr.msk.f32.gmra.mrb[40].mxu1 %vm409_vm0, %v788_v52  ;;  %v810_v52 = vmul.f32 %v682_v48, %v8136_v6  ;;  %v704_v48 = vld [vmem:[%s12302_s8 + $0x2a8] sm:$0xff] }
 0x20c   : > { %6386 = vmatprep.mubr.msk.f32.mxu1 %vm409_vm0, %v789_v53  ;;  %v811_v53 = vmul.f32 %v683_v50, %v8051_v49  ;;  %v705_v50 = vld [vmem:[%s12302_s8 + $0x2b0] sm:$0xff] }
 0x20f   : > { %6387 = vmatmul.mubr.msk.f32.gmra.mrb[42].mxu1 %vm409_vm0, %v790_v59  ;;  %v812_v59 = vmul.f32 %v684_v55, %v8058_v54  ;;  %v706_v55 = vld [vmem:[%s12302_s8 + $0x2b8] sm:$0xff] }
 0x210   : > { %6389 = vmatprep.mubr.msk.f32.mxu1 %vm409_vm0, %v791_v60  ;;  %v813_v60 = vmul.f32 %v685_v56, %v8067_v63  ;;  %v707_v56 = vld [vmem:[%s12302_s8 + $0x2c0] sm:$0xff] }
 0x213   : > { %6390 = vmatmul.mubr.msk.f32.gmra.mrb[44].mxu1 %vm409_vm0, %v792_v1  ;;  %v814_v1 = vmul.f32 %v686_v61, %v8070_v0  ;;  %v708_v61 = vld [vmem:[%s12302_s8 + $0x2c8] sm:$0xff] }
 0x214   : > { %6392 = vmatprep.mubr.msk.f32.mxu1 %vm409_vm0, %v793_v2  ;;  %v815_v2 = vmul.f32 %v687_v62, %v8078_v10  ;;  %v709_v62 = vld [vmem:[%s12302_s8 + $0x2d0] sm:$0xff] }
 0x217   : > { %6393 = vmatmul.mubr.msk.f32.gmra.mrb[46].mxu1 %vm409_vm0, %v794_v8  ;;  %v816_v8 = vmul.f32 %v688_v3, %v8081_v11  ;;  %v710_v3 = vld [vmem:[%s12302_s8 + $0x2d8] sm:$0xff] }
 0x218   : > { %6395 = vmatprep.mubr.msk.f32.mxu1 %vm409_vm0, %v795_v9  ;;  %v817_v9 = vmul.f32 %v689_v4, %v8089_v20  ;;  %v711_v4 = vld [vmem:[%s12302_s8 + $0x2e0] sm:$0xff] }
 0x21b   : > { %6396 = vmatmul.mubr.msk.f32.gmra.mrb[48].mxu1 %vm409_vm0, %v796_v14  ;;  %v818_v14 = vmul.f32 %v690_v12, %v8092_v21  ;;  %v712_v12 = vld [vmem:[%s12302_s8 + $0x2e8] sm:$0xff] }
 0x21c   : > { %6398 = vmatprep.mubr.msk.f32.mxu1 %vm409_vm0, %v797_v15  ;;  %v819_v15 = vmul.f32 %v691_v13, %v8100_v30  ;;  %v713_v13 = vld [vmem:[%s12302_s8 + $0x2f0] sm:$0xff] }
 0x21f   : > { %6399 = vmatmul.mubr.msk.f32.gmra.mrb[50].mxu1 %vm409_vm0, %v798_v45  ;;  %v820_v45 = vmul.f32 %v692_v16, %v8103_v31  ;;  %v714_v16 = vld [vmem:[%s12302_s8 + $0x2f8] sm:$0xff] }
 0x220   : > { %6401 = vmatprep.mubr.msk.f32.mxu1 %vm409_vm0, %v799_v18  ;;  %v821_v18 = vmul.f32 %v693_v17, %v8111_v40  ;;  %v715_v17 = vld [vmem:[%s12302_s8 + $0x300] sm:$0xff] }
 0x223   : > { %6402 = vmatmul.mubr.msk.f32.gmra.mrb[52].mxu1 %vm409_vm0, %v800_v22  ;;  %v822_v22 = vmul.f32 %v694_v51, %v8114_v41  ;;  %v716_v51 = vld [vmem:[%s12302_s8 + $0x308] sm:$0xff] }
 0x224   : > { %6404 = vmatprep.mubr.msk.f32.mxu1 %vm409_vm0, %v801_v23  ;;  %v823_v23 = vmul.f32 %v695_v19, %v8122_v57  ;;  %v717_v19 = vld [vmem:[%s12302_s8 + $0x310] sm:$0xff] }
 0x227   : > { %6405 = vmatmul.mubr.msk.f32.gmra.mrb[54].mxu1 %vm409_vm0, %v802_v26  ;;  %v824_v26 = vmul.f32 %v696_v24, %v8125_v58  ;;  %v718_v24 = vld [vmem:[%s12302_s8 + $0x318] sm:$0xff] }
 0x228   : > { %6407 = vmatprep.mubr.msk.f32.mxu1 %vm409_vm0, %v803_v27  ;;  %v825_v27 = vmul.f32 %v697_v25, %v8133_v5  ;;  %v719_v25 = vld [vmem:[%s12302_s8 + $0x320] sm:$0xff] }
 0x22b   : > { %6408 = vmatmul.mubr.msk.f32.gmra.mrb[56].mxu1 %vm409_vm0, %v804_v32  ;;  %v826_v32 = vmul.f32 %v698_v28, %v8136_v6  ;;  %v720_v28 = vld [vmem:[%s12302_s8 + $0x328] sm:$0xff] }
 0x22c   : > { %6410 = vmatprep.mubr.msk.f32.mxu1 %vm409_vm0, %v805_v33  ;;  %v827_v33 = vmul.f32 %v699_v29, %v8051_v49  ;;  %v721_v29 = vld [vmem:[%s12302_s8 + $0x330] sm:$0xff] }
 0x22f   : > { %6411 = vmatmul.mubr.msk.f32.gmra.mrb[58].mxu1 %vm409_vm0, %v806_v36  ;;  %v828_v36 = vmul.f32 %v700_v34, %v8058_v54  ;;  %v722_v34 = vld [vmem:[%s12302_s8 + $0x338] sm:$0xff] }
 0x230   : > { %6413 = vmatprep.mubr.msk.f32.mxu1 %vm409_vm0, %v807_v37  ;;  %v829_v37 = vmul.f32 %v701_v35, %v8067_v63  ;;  %v723_v35 = vld [vmem:[%s12302_s8 + $0x340] sm:$0xff] }
 0x233   : > { %6414 = vmatmul.mubr.msk.f32.gmra.mrb[60].mxu1 %vm409_vm0, %v808_v44  ;;  %v830_v44 = vmul.f32 %v702_v38, %v8070_v0  ;;  %v724_v38 = vld [vmem:[%s12302_s8 + $0x348] sm:$0xff] }
 0x234   : > { %6416 = vmatprep.mubr.msk.f32.mxu1 %vm409_vm0, %v809_v47  ;;  %v831_v47 = vmul.f32 %v703_v39, %v8078_v10  ;;  %v725_v39 = vld [vmem:[%s12302_s8 + $0x350] sm:$0xff] }
 0x237   : > { %6417 = vmatmul.mubr.msk.f32.gmra.mrb[62].mxu1 %vm409_vm0, %v810_v52  ;;  %v832_v52 = vmul.f32 %v704_v48, %v8081_v11  ;;  %v726_v48 = vld [vmem:[%s12302_s8 + $0x358] sm:$0xff] }
 0x238   : > { %6419 = vmatprep.mubr.msk.f32.mxu1 %vm409_vm0, %v811_v53  ;;  %v833_v53 = vmul.f32 %v705_v50, %v8089_v20  ;;  %v727_v50 = vld [vmem:[%s12302_s8 + $0x360] sm:$0xff] }
 0x23b   : > { %6420 = vmatmul.mubr.msk.f32.gmra.mrb[64].mxu1 %vm409_vm0, %v812_v59  ;;  %v834_v59 = vmul.f32 %v706_v55, %v8092_v21  ;;  %v854_v55 = vmul.f32 %v726_v48, %v8114_v41  ;;  %v737_v48 = vld [vmem:[%s12302_s8 + $0x3b0] sm:$0xff] }
 0x23c   : > { %6422 = vmatprep.mubr.msk.f32.mxu1 %vm409_vm0, %v813_v60  ;;  %v835_v60 = vmul.f32 %v707_v56, %v8100_v30 }
 0x23f   : > { %6423 = vmatmul.mubr.msk.f32.gmra.mrb[66].mxu1 %vm409_vm0, %v814_v1  ;;  %v836_v1 = vmul.f32 %v708_v61, %v8103_v31 }
 0x240   : > { %6425 = vmatprep.mubr.msk.f32.mxu1 %vm409_vm0, %v815_v2  ;;  %v837_v2 = vmul.f32 %v709_v62, %v8111_v40 }
 0x243   : > { %6426 = vmatmul.mubr.msk.f32.gmra.mrb[68].mxu1 %vm409_vm0, %v816_v8  ;;  %v838_v8 = vmul.f32 %v710_v3, %v8114_v41  ;;  %v878_v3 = vld [vmem:[%s12303_s9 + $0x18] sm:$0xff] }
 0x244   : > { %6428 = vmatprep.mubr.msk.f32.mxu1 %vm409_vm0, %v817_v9  ;;  %v839_v9 = vmul.f32 %v711_v4, %v8122_v57 }
 0x247   : > { %6429 = vmatmul.mubr.msk.f32.gmra.mrb[70].mxu1 %vm409_vm0, %v818_v14  ;;  %v840_v14 = vmul.f32 %v712_v12, %v8125_v58  ;;  %v730_v12 = vld [vmem:[%s12302_s8 + $0x378] sm:$0xff] }
 0x248   : > { %6431 = vmatprep.mubr.msk.f32.mxu1 %vm409_vm0, %v819_v15  ;;  %v841_v15 = vmul.f32 %v713_v13, %v8133_v5 }
 0x24b   : > { %6432 = vmatmul.mubr.msk.f32.gmra.mrb[72].mxu1 %vm409_vm0, %v820_v45  ;;  %v842_v45 = vmul.f32 %v714_v16, %v8136_v6  ;;  %v877_v16 = vld [vmem:[%s12303_s9 + $0x10] sm:$0xff] }
 0x24c   : > { %6434 = vmatprep.mubr.msk.f32.mxu1 %vm409_vm0, %v821_v18  ;;  %v843_v18 = vmul.f32 %v715_v17, %v8051_v49  ;;  %v879_v17 = vld [vmem:[%s12303_s9 + $0x20] sm:$0xff] }
 0x24f   : > { %6435 = vmatmul.mubr.msk.f32.gmra.mrb[74].mxu1 %vm409_vm0, %v822_v22  ;;  %v844_v22 = vmul.f32 %v716_v51, %v8058_v54 }
 0x250   : > { %6437 = vmatprep.mubr.msk.f32.mxu1 %vm409_vm0, %v823_v23  ;;  %v845_v23 = vmul.f32 %v717_v19, %v8067_v63  ;;  %v732_v19 = vld [vmem:[%s12302_s8 + $0x388] sm:$0xff] }
 0x253   : > { %6438 = vmatmul.mubr.msk.f32.gmra.mrb[76].mxu1 %vm409_vm0, %v824_v26  ;;  %v846_v26 = vmul.f32 %v718_v24, %v8070_v0 }
 0x254   : > { %6440 = vmatprep.mubr.msk.f32.mxu1 %vm409_vm0, %v825_v27  ;;  %v847_v27 = vmul.f32 %v719_v25, %v8078_v10 }
 0x257   : > { %6441 = vmatmul.mubr.msk.f32.gmra.mrb[78].mxu1 %vm409_vm0, %v826_v32  ;;  %v848_v32 = vmul.f32 %v720_v28, %v8081_v11 }
 0x258   : > { %6443 = vmatprep.mubr.msk.f32.mxu1 %vm409_vm0, %v827_v33  ;;  %v849_v33 = vmul.f32 %v721_v29, %v8089_v20 }
 0x25b   : > { %6444 = vmatmul.mubr.msk.f32.gmra.mrb[80].mxu1 %vm409_vm0, %v828_v36  ;;  %v850_v36 = vmul.f32 %v722_v34, %v8092_v21  ;;  %v735_v34 = vld [vmem:[%s12302_s8 + $0x3a0] sm:$0xff] }
 0x25c   : > { %6446 = vmatprep.mubr.msk.f32.mxu1 %vm409_vm0, %v829_v37  ;;  %v851_v37 = vmul.f32 %v723_v35, %v8100_v30 }
 0x25f   : > { %6447 = vmatmul.mubr.msk.f32.gmra.mrb[82].mxu1 %vm409_vm0, %v830_v44  ;;  %v852_v44 = vmul.f32 %v724_v38, %v8103_v31 }
 0x260   : > { %6449 = vmatprep.mubr.msk.f32.mxu1 %vm409_vm0, %v831_v47  ;;  %v853_v47 = vmul.f32 %v725_v39, %v8111_v40  ;;  %v863_v39 = vmul.f32 %v735_v34, %v8078_v10  ;;  %v884_v10 = vld [vmem:[%s12303_s9 + $0x48] sm:$0xff]  ;;  %v745_v34 = vld [vmem:[%s12302_s8 + $0x3f0] sm:$0xff] }
 0x263   : > { %6450 = vmatmul.mubr.msk.f32.gmra.mrb[84].mxu1 %vm409_vm0, %v832_v52  ;;  %v876_v52 = vld [vmem:[%s12303_s9 + $0x8] sm:$0xff] }
 0x264   : > { %6452 = vmatprep.mubr.msk.f32.mxu1 %vm409_vm0, %v833_v53  ;;  %v875_v53 = vld [vmem:[%s12303_s9] sm:$0xff] }
 0x267   : > { %6453 = vmatmul.mubr.msk.f32.gmra.mrb[86].mxu1 %vm409_vm0, %v834_v59  ;;  %v855_v59 = vmul.f32 %v727_v50, %v8122_v57 }
 0x268   : > { %6455 = vmatprep.mubr.msk.f32.mxu1 %vm409_vm0, %v835_v60  ;;  %v728_v60 = vld [vmem:[%s12302_s8 + $0x368] sm:$0xff] }
 0x269   : > { %v856_v4 = vmul.f32 %v728_v60, %v8125_v58 }
 0x26b   : > { %6456 = vmatmul.mubr.msk.f32.gmra.mrb[88].mxu1 %vm409_vm0, %v836_v1  ;;  %v729_v1 = vld [vmem:[%s12302_s8 + $0x370] sm:$0xff] }
 0x26c   : > { %6458 = vmatprep.mubr.msk.f32.mxu1 %vm409_vm0, %v837_v2 }
 0x26f   : > { %6459 = vmatmul.mubr.msk.f32.gmra.mrb[90].mxu1 %vm409_vm0, %v838_v8 }
 0x270   : > { %6461 = vmatprep.mubr.msk.f32.mxu1 %vm409_vm0, %v839_v9  ;;  %v857_v9 = vmul.f32 %v729_v1, %v8133_v5 }
 0x273   : > { %6462 = vmatmul.mubr.msk.f32.gmra.mrb[92].mxu1 %vm409_vm0, %v840_v14 }
 0x274   : > { %6464 = vmatprep.mubr.msk.f32.mxu1 %vm409_vm0, %v841_v15  ;;  %v731_v15 = vld [vmem:[%s12302_s8 + $0x380] sm:$0xff] }
 0x275   : > { %v859_v51 = vmul.f32 %v731_v15, %v8051_v49  ;;  %v880_v49 = vld [vmem:[%s12303_s9 + $0x28] sm:$0xff]  ;;  %v741_v15 = vld [vmem:[%s12302_s8 + $0x3d0] sm:$0xff] }
 0x277   : > { %6465 = vmatmul.mubr.msk.f32.gmra.mrb[94].mxu1 %vm409_vm0, %v842_v45  ;;  %v858_v45 = vmul.f32 %v730_v12, %v8136_v6  ;;  %v740_v12 = vld [vmem:[%s12302_s8 + $0x3c8] sm:$0xff] }
 0x278   : > { %6467 = vmatprep.mubr.msk.f32.mxu1 %vm409_vm0, %v843_v18 }
 0x27b   : > { %6468 = vmatmul.mubr.msk.f32.gmra.mrb[96].mxu1 %vm409_vm0, %v844_v22 }
 0x27c   : > { %6470 = vmatprep.mubr.msk.f32.mxu1 %vm409_vm0, %v845_v23  ;;  %v733_v23 = vld [vmem:[%s12302_s8 + $0x390] sm:$0xff] }
 0x27d   : > { %v861_v29 = vmul.f32 %v733_v23, %v8067_v63  ;;  %v882_v63 = vld [vmem:[%s12303_s9 + $0x38] sm:$0xff]  ;;  %v743_v23 = vld [vmem:[%s12302_s8 + $0x3e0] sm:$0xff] }
 0x27f   : > { %6471 = vmatmul.mubr.msk.f32.gmra.mrb[98].mxu1 %vm409_vm0, %v846_v26  ;;  %v881_v26 = vld [vmem:[%s12303_s9 + $0x30] sm:$0xff] }
 0x280   : > { %6473 = vmatprep.mubr.msk.f32.mxu1 %vm409_vm0, %v847_v27  ;;  %v860_v27 = vmul.f32 %v732_v19, %v8058_v54  ;;  %v742_v19 = vld [vmem:[%s12302_s8 + $0x3d8] sm:$0xff] }
 0x283   : > { %6474 = vmatmul.mubr.msk.f32.gmra.mrb[100].mxu1 %vm409_vm0, %v848_v32  ;;  %v734_v32 = vld [vmem:[%s12302_s8 + $0x398] sm:$0xff] }
 0x284   : > { %6476 = vmatprep.mubr.msk.f32.mxu1 %vm409_vm0, %v849_v33 }
 0x287   : > { %6477 = vmatmul.mubr.msk.f32.gmra.mrb[102].mxu1 %vm409_vm0, %v850_v36  ;;  %v883_v36 = vld [vmem:[%s12303_s9 + $0x40] sm:$0xff] }
 0x288   : > { %6479 = vmatprep.mubr.msk.f32.mxu1 %vm409_vm0, %v851_v37  ;;  %v862_v37 = vmul.f32 %v734_v32, %v8070_v0  ;;  %v744_v32 = vld [vmem:[%s12302_s8 + $0x3e8] sm:$0xff] }
 0x28b   : > { %6480 = vmatmul.mubr.msk.f32.gmra.mrb[104].mxu1 %vm409_vm0, %v852_v44  ;;  %v736_v44 = vld [vmem:[%s12302_s8 + $0x3a8] sm:$0xff] }
 0x28c   : > { %6482 = vmatprep.mubr.msk.f32.mxu1 %vm409_vm0, %v853_v47 }
 0x28e   : > { %v6325_v56 = vpop.f32.mrb[0].mxu1 }
 0x28f   : > { %v8728_v61 = vadd.f32 %v6325_v56, %v876_v52  ;;  %v1533_v62 = vpop.f32.mrb[1].mxu1  ;;  %6483 = vmatmul.mubr.msk.f32.gmra.mrb[106].mxu1 %vm409_vm0, %v854_v55  ;;  %v885_v52 = vld [vmem:[%s12303_s9 + $0x50] sm:$0xff]  ;;  %v865_v56 = vmul.f32 %v737_v48, %v8089_v20  ;;  %v886_v20 = vld [vmem:[%s12303_s9 + $0x58] sm:$0xff] }
 0x290   : > { %v8734_v2 = vadd.f32 %v1533_v62, %v875_v53  ;;  %6485 = vmatprep.mubr.msk.f32.mxu1 %vm409_vm0, %v855_v59  ;;  %v864_v53 = vmul.f32 %v736_v44, %v8081_v11  ;;  %v738_v59 = vld [vmem:[%s12302_s8 + $0x3b8] sm:$0xff]  ;;  %v739_v62 = vld [vmem:[%s12302_s8 + $0x3c0] sm:$0xff] }
 0x291   : > { %2174 = vmax.xlane.f32.xlu1 %v8728_v61  ;;  %v746_v44 = vld [vmem:[%s12302_s8 + $0x3f8] sm:$0xff] }
 0x292   : > { %v6328_v8 = vpop.f32.mrb[2].mxu1  ;;  %2172 = vmax.xlane.f32.xlu0 %v8734_v2 }
 0x293   : > { %v8747_v13 = vadd.f32 %v6328_v8, %v878_v3  ;;  %v1543_v14 = vpop.f32.mrb[3].mxu1  ;;  %6486 = vmatmul.mubr.msk.f32.gmra.mrb[108].mxu1 %vm409_vm0, %v856_v4  ;;  %v887_v3 = vld [vmem:[%s12303_s9 + $0x60] sm:$0xff]  ;;  %v866_v4 = vmul.f32 %v738_v59, %v8092_v21 }
 0x294   : > { %6488 = vmatprep.mubr.msk.f32.mxu1 %vm409_vm0, %v857_v9  ;;  %v8770_v24 = vadd.f32 %v1543_v14, %v877_v16  ;;  %v867_v9 = vmul.f32 %v739_v62, %v8100_v30  ;;  %v888_v30 = vld [vmem:[%s12303_s9 + $0x68] sm:$0xff] }
 0x296   : > { %v6331_v18 = vpop.f32.mrb[4].mxu1  ;;  %2178 = vmax.xlane.f32.xlu0 %v8747_v13 }
 0x297   : > { %v1553_v22 = vpop.f32.mrb[5].mxu1  ;;  %6489 = vmatmul.mubr.msk.f32.gmra.mrb[110].mxu1 %vm409_vm0, %v858_v45  ;;  %v8792_v35 = vadd.f32 %v6331_v18, %v880_v49  ;;  %v868_v45 = vmul.f32 %v740_v12, %v8103_v31 }
 0x298   : > { %v8772_v25 = vadd.f32 %v1553_v22, %v879_v17  ;;  %6491 = vmatprep.mubr.msk.f32.mxu1 %vm409_vm0, %v859_v51  ;;  %v889_v17 = vld [vmem:[%s12303_s9 + $0x70] sm:$0xff]  ;;  %v869_v51 = vmul.f32 %v741_v15, %v8111_v40  ;;  %v890_v40 = vld [vmem:[%s12303_s9 + $0x78] sm:$0xff] }
 0x29a   : > { %v6334_v28 = vpop.f32.mrb[6].mxu1  ;;  %2180 = vmax.xlane.f32.xlu1 %v8772_v25  ;;  %2176 = vmax.xlane.f32.xlu0 %v8770_v24 }
 0x29b   : > { %v1563_v33 = vpop.f32.mrb[7].mxu1  ;;  %6492 = vmatmul.mubr.msk.f32.gmra.mrb[112].mxu1 %vm409_vm0, %v860_v27  ;;  %v8814_v50 = vadd.f32 %v6334_v28, %v882_v63  ;;  %v870_v27 = vmul.f32 %v742_v19, %v8114_v41 }
 0x29c   : > { %v8794_v54 = vadd.f32 %v1563_v33, %v881_v26  ;;  %6494 = vmatprep.mubr.msk.f32.mxu1 %vm409_vm0, %v861_v29  ;;  %v891_v26 = vld [vmem:[%s12303_s9 + $0x80] sm:$0xff]  ;;  %v871_v29 = vmul.f32 %v743_v23, %v8122_v57  ;;  %v892_v57 = vld [vmem:[%s12303_s9 + $0x88] sm:$0xff]  ;;  %v902_v23 = vld [vmem:[%s12303_s9 + $0xd8] sm:$0xff] }
 0x29e   : > { %v6337_v38 = vpop.f32.mrb[8].mxu1  ;;  %2184 = vmax.xlane.f32.xlu1 %v8794_v54  ;;  %2182 = vmax.xlane.f32.xlu0 %v8792_v35 }
 0x29f   : > { %v1573_v47 = vpop.f32.mrb[9].mxu1  ;;  %6495 = vmatmul.mubr.msk.f32.gmra.mrb[114].mxu1 %vm409_vm0, %v862_v37  ;;  %v8836_v1 = vadd.f32 %v6337_v38, %v884_v10  ;;  %v872_v37 = vmul.f32 %v744_v32, %v8125_v58  ;;  %v894_v58 = vld [vmem:[%s12303_s9 + $0x98] sm:$0xff]  ;;  %v904_v32 = vld [vmem:[%s12303_s9 + $0xe8] sm:$0xff] }
 0x2a0   : > { %v8816_v0 = vadd.f32 %v1573_v47, %v883_v36  ;;  %6497 = vmatprep.mubr.msk.f32.mxu1 %vm409_vm0, %v863_v39  ;;  %v893_v36 = vld [vmem:[%s12303_s9 + $0x90] sm:$0xff]  ;;  %v873_v39 = vmul.f32 %v745_v34, %v8133_v5  ;;  %v895_v5 = vld [vmem:[%s12303_s9 + $0xa0] sm:$0xff] }
 0x2a2   : > { %v6340_v55 = vpop.f32.mrb[10].mxu1  ;;  %2188 = vmax.xlane.f32.xlu1 %v8816_v0  ;;  %2186 = vmax.xlane.f32.xlu0 %v8814_v50 }
 0x2a3   : > { %v1583_v60 = vpop.f32.mrb[11].mxu1  ;;  %6498 = vmatmul.mubr.msk.f32.gmra.mrb[116].mxu1 %vm409_vm0, %v864_v53  ;;  %v8858_v16 = vadd.f32 %v6340_v55, %v886_v20 }
 0x2a4   : > { %v8838_v11 = vadd.f32 %v1583_v60, %v885_v52  ;;  %6500 = vmatprep.mubr.msk.f32.mxu1 %vm409_vm0, %v865_v56  ;;  %v874_v52 = vmul.f32 %v746_v44, %v8136_v6  ;;  %v896_v60 = vld [vmem:[%s12303_s9 + $0xa8] sm:$0xff]  ;;  %v897_v6 = vld [vmem:[%s12303_s9 + $0xb0] sm:$0xff] }
 0x2a6   : > { %v6343_v8 = vpop.f32.mrb[12].mxu1  ;;  %2192 = vmax.xlane.f32.xlu1 %v8838_v11  ;;  %2190 = vmax.xlane.f32.xlu0 %v8836_v1 }
 0x2a7   : > { %v1593_v14 = vpop.f32.mrb[13].mxu1  ;;  %6501 = vmatmul.mubr.msk.f32.gmra.mrb[118].mxu1 %vm409_vm0, %v866_v4  ;;  %v8880_v49 = vadd.f32 %v6343_v8, %v888_v30  ;;  %v898_v8 = vld [vmem:[%s12303_s9 + $0xb8] sm:$0xff] }
 0x2a8   : > { %v8860_v21 = vadd.f32 %v1593_v14, %v887_v3  ;;  %6503 = vmatprep.mubr.msk.f32.mxu1 %vm409_vm0, %v867_v9  ;;  %v899_v9 = vld [vmem:[%s12303_s9 + $0xc0] sm:$0xff] }
 0x2aa   : > { %v6346_v18 = vpop.f32.mrb[14].mxu1  ;;  %2196 = vmax.xlane.f32.xlu1 %v8860_v21  ;;  %2194 = vmax.xlane.f32.xlu0 %v8858_v16 }
 0x2ab   : > { %v1603_v22 = vpop.f32.mrb[15].mxu1  ;;  %6504 = vmatmul.mubr.msk.f32.gmra.mrb[120].mxu1 %vm409_vm0, %v868_v45  ;;  %v8902_v63 = vadd.f32 %v6346_v18, %v890_v40  ;;  %v901_v45 = vld [vmem:[%s12303_s9 + $0xd0] sm:$0xff]  ;;  %v903_v40 = vld [vmem:[%s12303_s9 + $0xe0] sm:$0xff] }
 0x2ac   : > { %v8882_v31 = vadd.f32 %v1603_v22, %v889_v17  ;;  %6506 = vmatprep.mubr.msk.f32.mxu1 %vm409_vm0, %v869_v51  ;;  %v900_v17 = vld [vmem:[%s12303_s9 + $0xc8] sm:$0xff] }
 0x2ae   : > { %v6349_v28 = vpop.f32.mrb[16].mxu1  ;;  %2200 = vmax.xlane.f32.xlu1 %v8882_v31  ;;  %2198 = vmax.xlane.f32.xlu0 %v8880_v49 }
 0x2af   : > { %v1613_v33 = vpop.f32.mrb[17].mxu1  ;;  %6507 = vmatmul.mubr.msk.f32.gmra.mrb[122].mxu1 %vm409_vm0, %v870_v27  ;;  %v8921_v48 = vadd.f32 %v6349_v28, %v892_v57 }
 0x2b0   : > { %v8904_v41 = vadd.f32 %v1613_v33, %v891_v26  ;;  %6509 = vmatprep.mubr.msk.f32.mxu1 %vm409_vm0, %v871_v29  ;;  %v905_v33 = vld [vmem:[%s12303_s9 + $0xf0] sm:$0xff] }
 0x2b2   : > { %v6352_v38 = vpop.f32.mrb[18].mxu1  ;;  %2204 = vmax.xlane.f32.xlu1 %v8904_v41  ;;  %2202 = vmax.xlane.f32.xlu0 %v8902_v63 }
 0x2b3   : > { %v1623_v47 = vpop.f32.mrb[19].mxu1  ;;  %6510 = vmatmul.mubr.msk.f32.gmra.mrb[124].mxu1 %vm409_vm0, %v872_v37  ;;  %v8936_v56 = vadd.f32 %v6352_v38, %v894_v58  ;;  %v906_v38 = vld [vmem:[%s12303_s9 + $0xf8] sm:$0xff] }
 0x2b4   : > { %v8923_v10 = vadd.f32 %v1623_v47, %v893_v36  ;;  %6512 = vmatprep.mubr.msk.f32.mxu1 %vm409_vm0, %v873_v39  ;;  %v907_v39 = vld [vmem:[%s12303_s9 + $0x100] sm:$0xff] }
 0x2b6   : > { %v6355_v53 = vpop.f32.mrb[20].mxu1  ;;  %2208 = vmax.xlane.f32.xlu1 %v8923_v10  ;;  %2206 = vmax.xlane.f32.xlu0 %v8921_v48 }
 0x2b7   : > { %v1633_v55 = vpop.f32.mrb[21].mxu1  ;;  %6513 = vmatmul.mubr.msk.f32.gmra.mrb[126].mxu1 %vm409_vm0, %v874_v52  ;;  %v8948_v3 = vadd.f32 %v6355_v53, %v896_v60  ;;  %v908_v52 = vld [vmem:[%s12303_s9 + $0x108] sm:$0xff]  ;;  %v909_v53 = vld [vmem:[%s12303_s9 + $0x110] sm:$0xff] }
 0x2b8   : > { %v8938_v59 = vadd.f32 %v1633_v55, %v895_v5 }
 0x2ba   : > { %v6358_v62 = vpop.f32.mrb[22].mxu1  ;;  %2212 = vmax.xlane.f32.xlu1 %v8938_v59  ;;  %2210 = vmax.xlane.f32.xlu0 %v8936_v56 }
 0x2bb   : > { %v1643_v20 = vpop.f32.mrb[23].mxu1  ;;  %v8960_v15 = vadd.f32 %v6358_v62, %v898_v8  ;;  %v911_v8 = vld [vmem:[%s12303_s9 + $0x120] sm:$0xff] }
 0x2bc   : > { %v8950_v4 = vadd.f32 %v1643_v20, %v897_v6  ;;  %v910_v20 = vld [vmem:[%s12303_s9 + $0x118] sm:$0xff] }
 0x2be   : > { %v6361_v12 = vpop.f32.mrb[24].mxu1  ;;  %2216 = vmax.xlane.f32.xlu1 %v8950_v4  ;;  %2214 = vmax.xlane.f32.xlu0 %v8948_v3 }
 0x2bf   : > { %v1653_v14 = vpop.f32.mrb[25].mxu1  ;;  %v8972_v19 = vadd.f32 %v6361_v12, %v900_v17 }
 0x2c0   : > { %v8962_v30 = vadd.f32 %v1653_v14, %v899_v9 }
 0x2c2   : > { %v6364_v18 = vpop.f32.mrb[26].mxu1  ;;  %2220 = vmax.xlane.f32.xlu1 %v8962_v30  ;;  %2218 = vmax.xlane.f32.xlu0 %v8960_v15 }
 0x2c3   : > { %v1663_v51 = vpop.f32.mrb[27].mxu1  ;;  %v8984_v28 = vadd.f32 %v6364_v18, %v902_v23  ;;  %v913_v18 = vld [vmem:[%s12303_s9 + $0x130] sm:$0xff] }
 0x2c4   : > { %v8974_v22 = vadd.f32 %v1663_v51, %v901_v45  ;;  %v912_v45 = vld [vmem:[%s12303_s9 + $0x128] sm:$0xff] }
 0x2c6   : > { %v6367_v26 = vpop.f32.mrb[28].mxu1  ;;  %2224 = vmax.xlane.f32.xlu1 %v8974_v22  ;;  %2222 = vmax.xlane.f32.xlu0 %v8972_v19 }
 0x2c7   : > { %v1673_v27 = vpop.f32.mrb[29].mxu1  ;;  %v8996_v36 = vadd.f32 %v6367_v26, %v904_v32  ;;  %v915_v32 = vld [vmem:[%s12303_s9 + $0x140] sm:$0xff] }
 0x2c8   : > { %v8986_v29 = vadd.f32 %v1673_v27, %v903_v40  ;;  %v914_v27 = vld [vmem:[%s12303_s9 + $0x138] sm:$0xff] }
 0x2ca   : > { %v6370_v34 = vpop.f32.mrb[30].mxu1  ;;  %2228 = vmax.xlane.f32.xlu1 %v8986_v29  ;;  %2226 = vmax.xlane.f32.xlu0 %v8984_v28 }
 0x2cb   : > { %v1683_v57 = vpop.f32.mrb[31].mxu1  ;;  %v9008_v58 = vadd.f32 %v6370_v34, %v906_v38 }
 0x2cc   : > { %v8998_v37 = vadd.f32 %v1683_v57, %v905_v33 }
 0x2ce   : > { %v6373_v44 = vpop.f32.mrb[32].mxu1  ;;  %2232 = vmax.xlane.f32.xlu1 %v8998_v37  ;;  %2230 = vmax.xlane.f32.xlu0 %v8996_v36 }
 0x2cf   : > { %v1693_v47 = vpop.f32.mrb[33].mxu1  ;;  %v9020_v6 = vadd.f32 %v6373_v44, %v908_v52  ;;  %v917_v44 = vld [vmem:[%s12303_s9 + $0x150] sm:$0xff] }
 0x2d0   : > { %v9010_v5 = vadd.f32 %v1693_v47, %v907_v39  ;;  %v916_v39 = vld [vmem:[%s12303_s9 + $0x148] sm:$0xff] }
 0x2d2   : > { %v6376_v55 = vpop.f32.mrb[34].mxu1  ;;  %2236 = vmax.xlane.f32.xlu1 %v9010_v5  ;;  %2234 = vmax.xlane.f32.xlu0 %v9008_v58 }
 0x2d3   : > { %v1703_v60 = vpop.f32.mrb[35].mxu1  ;;  %v9032_v14 = vadd.f32 %v6376_v55, %v910_v20  ;;  %v919_v20 = vld [vmem:[%s12303_s9 + $0x160] sm:$0xff] }
 0x2d4   : > { %v9022_v62 = vadd.f32 %v1703_v60, %v909_v53  ;;  %v918_v60 = vld [vmem:[%s12303_s9 + $0x158] sm:$0xff] }
 0x2d6   : > { %v6379_v9 = vpop.f32.mrb[36].mxu1  ;;  %2240 = vmax.xlane.f32.xlu1 %v9022_v62  ;;  %2238 = vmax.xlane.f32.xlu0 %v9020_v6 }
 0x2d7   : > { %v1713_v12 = vpop.f32.mrb[37].mxu1  ;;  %v9044_v40 = vadd.f32 %v6379_v9, %v912_v45 }
 0x2d8   : > { %v9034_v17 = vadd.f32 %v1713_v12, %v911_v8 }
 0x2da   : > { %v6382_v51 = vpop.f32.mrb[38].mxu1  ;;  %2244 = vmax.xlane.f32.xlu1 %v9034_v17  ;;  %2242 = vmax.xlane.f32.xlu0 %v9032_v14 }
 0x2db   : > { %v1723_v23 = vpop.f32.mrb[39].mxu1  ;;  %v9056_v57 = vadd.f32 %v6382_v51, %v914_v27  ;;  %v921_v51 = vld [vmem:[%s12303_s9 + $0x170] sm:$0xff] }
 0x2dc   : > { %v9046_v26 = vadd.f32 %v1723_v23, %v913_v18  ;;  %v920_v18 = vld [vmem:[%s12303_s9 + $0x168] sm:$0xff] }
 0x2de   : > { %v6385_v33 = vpop.f32.mrb[40].mxu1  ;;  %2248 = vmax.xlane.f32.xlu1 %v9046_v26  ;;  %2246 = vmax.xlane.f32.xlu0 %v9044_v40 }
 0x2df   : > { %v1733_v34 = vpop.f32.mrb[41].mxu1  ;;  %v9068_v53 = vadd.f32 %v6385_v33, %v916_v39  ;;  %v923_v39 = vld [vmem:[%s12303_s9 + $0x180] sm:$0xff] }
 0x2e0   : > { %v9058_v38 = vadd.f32 %v1733_v34, %v915_v32  ;;  %v922_v34 = vld [vmem:[%s12303_s9 + $0x178] sm:$0xff] }
 0x2e2   : > { %v6388_v47 = vpop.f32.mrb[42].mxu1  ;;  %2252 = vmax.xlane.f32.xlu1 %v9058_v38  ;;  %2250 = vmax.xlane.f32.xlu0 %v9056_v57 }
 0x2e3   : > { %v1743_v52 = vpop.f32.mrb[43].mxu1  ;;  %v9080_v12 = vadd.f32 %v6388_v47, %v918_v60 }
 0x2e4   : > { %v9070_v55 = vadd.f32 %v1743_v52, %v917_v44 }
 0x2e6   : > { %v6391_v8 = vpop.f32.mrb[44].mxu1  ;;  %2256 = vmax.xlane.f32.xlu1 %v9070_v55  ;;  %2254 = vmax.xlane.f32.xlu0 %v9068_v53 }
 0x2e7   : > { %v1753_v9 = vpop.f32.mrb[45].mxu1  ;;  %v9092_v32 = vadd.f32 %v6391_v8, %v920_v18  ;;  %v925_v8 = vld [vmem:[%s12303_s9 + $0x190] sm:$0xff] }
 0x2e8   : > { %v9082_v45 = vadd.f32 %v1753_v9, %v919_v20  ;;  %v924_v20 = vld [vmem:[%s12303_s9 + $0x188] sm:$0xff] }
 0x2ea   : > { %v6394_v23 = vpop.f32.mrb[46].mxu1  ;;  %2260 = vmax.xlane.f32.xlu1 %v9082_v45  ;;  %2258 = vmax.xlane.f32.xlu0 %v9080_v12 }
 0x2eb   : > { %v1763_v27 = vpop.f32.mrb[47].mxu1  ;;  %v9104_v52 = vadd.f32 %v6394_v23, %v922_v34  ;;  %v927_v34 = vld [vmem:[%s12303_s9 + $0x1a0] sm:$0xff] }
 0x2ec   : > { %v9094_v33 = vadd.f32 %v1763_v27, %v921_v51  ;;  %v926_v27 = vld [vmem:[%s12303_s9 + $0x198] sm:$0xff] }
 0x2ed   : > { %12408 = vst [vmem:[#allocation8_spill] sm:$0xff] %v9104_v52 }
 0x2ee   : > { %v6397_v44 = vpop.f32.mrb[48].mxu1  ;;  %2264 = vmax.xlane.f32.xlu1 %v9094_v33  ;;  %2262 = vmax.xlane.f32.xlu0 %v9092_v32 }
 0x2ef   : > { %v1773_v47 = vpop.f32.mrb[49].mxu1  ;;  %v9116_v51 = vadd.f32 %v6397_v44, %v924_v20  ;;  %v928_v20 = vld [vmem:[%s12303_s9 + $0x1a8] sm:$0xff] }
 0x2f0   : > { %v9106_v60 = vadd.f32 %v1773_v47, %v923_v39 }
 0x2f1   : > { %12409 = vst [vmem:[#allocation9_spill] sm:$0xff] %v9116_v51 }
 0x2f2   : > { %v6400_v9 = vpop.f32.mrb[50].mxu1  ;;  %2268 = vmax.xlane.f32.xlu1 %v9106_v60  ;;  %2266 = vmax.xlane.f32.xlu0 %v9104_v52 }
 0x2f3   : > { %v1783_v18 = vpop.f32.mrb[51].mxu1  ;;  %v9128_v7 = vadd.f32 %v6400_v9, %v926_v27  ;;  %v930_v27 = vld [vmem:[%s12303_s9 + $0x1b8] sm:$0xff] }
 0x2f4   : > { %v9118_v23 = vadd.f32 %v1783_v18, %v925_v8  ;;  %v929_v8 = vld [vmem:[%s12303_s9 + $0x1b0] sm:$0xff] }
 0x2f5   : > { %12411 = vst [vmem:[#allocation11_spill] sm:$0xff] %v9128_v7 }
 0x2f6   : > { %12410 = vst [vmem:[#allocation10_spill] sm:$0xff] %v9118_v23  ;;  %v6403_v39 = vpop.f32.mrb[52].mxu1  ;;  %2272 = vmax.xlane.f32.xlu1 %v9118_v23  ;;  %2270 = vmax.xlane.f32.xlu0 %v9116_v51  ;;  %v948_v23 = vld [vmem:[%s12303_s9 + $0x248] sm:$0xff] }
 0x2f7   : > { %v1793_v47 = vpop.f32.mrb[53].mxu1  ;;  %v9140_v42 = vadd.f32 %v6403_v39, %v928_v20  ;;  %v933_v20 = vld [vmem:[%s12303_s9 + $0x1d0] sm:$0xff] }
 0x2f8   : > { %v9130_v44 = vadd.f32 %v1793_v47, %v927_v34  ;;  %v931_v34 = vld [vmem:[%s12303_s9 + $0x1c0] sm:$0xff] }
 0x2f9   : > { %12413 = vst [vmem:[#allocation13_spill] sm:$0xff] %v9140_v42 }
 0x2fa   : > { %12412 = vst [vmem:[#allocation12_spill] sm:$0xff] %v9130_v44  ;;  %v6406_v18 = vpop.f32.mrb[54].mxu1  ;;  %2276 = vmax.xlane.f32.xlu1 %v9130_v44  ;;  %2274 = vmax.xlane.f32.xlu0 %v9128_v7 }
 0x2fb   : > { %v1803_v46 = vpop.f32.mrb[55].mxu1  ;;  %v9152_v7 = vadd.f32 %v6406_v18, %v930_v27  ;;  %v935_v27 = vld [vmem:[%s12303_s9 + $0x1e0] sm:$0xff] }
 0x2fc   : > { %v9142_v9 = vadd.f32 %v1803_v46, %v929_v8  ;;  %v932_v46 = vld [vmem:[%s12303_s9 + $0x1c8] sm:$0xff] }
 0x2fd   : > { %12415 = vst [vmem:[#allocation15_spill] sm:$0xff] %v9152_v7 }
 0x2fe   : > { %12414 = vst [vmem:[#allocation14_spill] sm:$0xff] %v9142_v9  ;;  %v6409_v47 = vpop.f32.mrb[56].mxu1  ;;  %2280 = vmax.xlane.f32.xlu1 %v9142_v9  ;;  %2278 = vmax.xlane.f32.xlu0 %v9140_v42 }
 0x2ff   : > { %v1813_v43 = vpop.f32.mrb[57].mxu1  ;;  %v9164_v42 = vadd.f32 %v6409_v47, %v932_v46  ;;  %v937_v46 = vld [vmem:[%s12303_s9 + $0x1f0] sm:$0xff] }
 0x300   : > { %v9154_v39 = vadd.f32 %v1813_v43, %v931_v34  ;;  %v934_v43 = vld [vmem:[%s12303_s9 + $0x1d8] sm:$0xff] }
 0x301   : > { %12417 = vst [vmem:[#allocation17_spill] sm:$0xff] %v9164_v42 }
 0x302   : > { %12416 = vst [vmem:[#allocation16_spill] sm:$0xff] %v9154_v39  ;;  %v6412_v8 = vpop.f32.mrb[58].mxu1  ;;  %2284 = vmax.xlane.f32.xlu1 %v9154_v39  ;;  %2282 = vmax.xlane.f32.xlu0 %v9152_v7 }
 0x303   : > { %v1823_v9 = vpop.f32.mrb[59].mxu1  ;;  %v9176_v7 = vadd.f32 %v6412_v8, %v934_v43  ;;  %v939_v43 = vld [vmem:[%s12303_s9 + $0x200] sm:$0xff] }
 0x304   : > { %v9166_v18 = vadd.f32 %v1823_v9, %v933_v20  ;;  %v936_v9 = vld [vmem:[%s12303_s9 + $0x1e8] sm:$0xff] }
 0x305   : > { %12419 = vst [vmem:[#allocation19_spill] sm:$0xff] %v9176_v7 }
 0x306   : > { %12418 = vst [vmem:[#allocation18_spill] sm:$0xff] %v9166_v18  ;;  %v6415_v34 = vpop.f32.mrb[60].mxu1  ;;  %2288 = vmax.xlane.f32.xlu1 %v9166_v18  ;;  %2286 = vmax.xlane.f32.xlu0 %v9164_v42 }
 0x307   : > { %v1833_v39 = vpop.f32.mrb[61].mxu1  ;;  %v9188_v42 = vadd.f32 %v6415_v34, %v936_v9  ;;  %v941_v9 = vld [vmem:[%s12303_s9 + $0x210] sm:$0xff] }
 0x308   : > { %v9178_v47 = vadd.f32 %v1833_v39, %v935_v27  ;;  %v938_v39 = vld [vmem:[%s12303_s9 + $0x1f8] sm:$0xff] }
 0x309   : > { %12421 = vst [vmem:[#allocation21_spill] sm:$0xff] %v9188_v42 }
 0x30a   : > { %12420 = vst [vmem:[#allocation20_spill] sm:$0xff] %v9178_v47  ;;  %v6418_v20 = vpop.f32.mrb[62].mxu1  ;;  %2292 = vmax.xlane.f32.xlu1 %v9178_v47  ;;  %2290 = vmax.xlane.f32.xlu0 %v9176_v7 }
 0x30b   : > { %v1843_v18 = vpop.f32.mrb[63].mxu1  ;;  %v9200_v7 = vadd.f32 %v6418_v20, %v938_v39  ;;  %v943_v39 = vld [vmem:[%s12303_s9 + $0x220] sm:$0xff] }
 0x30c   : > { %v9190_v8 = vadd.f32 %v1843_v18, %v937_v46  ;;  %v940_v18 = vld [vmem:[%s12303_s9 + $0x208] sm:$0xff] }
 0x30d   : > { %12423 = vst [vmem:[#allocation23_spill] sm:$0xff] %v9200_v7 }
 0x30e   : > { %12422 = vst [vmem:[#allocation22_spill] sm:$0xff] %v9190_v8  ;;  %v6421_v27 = vpop.f32.mrb[64].mxu1  ;;  %2296 = vmax.xlane.f32.xlu1 %v9190_v8  ;;  %2294 = vmax.xlane.f32.xlu0 %v9188_v42 }
 0x30f   : > { %v1853_v47 = vpop.f32.mrb[65].mxu1  ;;  %v9212_v42 = vadd.f32 %v6421_v27, %v940_v18  ;;  %v945_v18 = vld [vmem:[%s12303_s9 + $0x230] sm:$0xff] }
 0x310   : > { %v9202_v34 = vadd.f32 %v1853_v47, %v939_v43  ;;  %v942_v47 = vld [vmem:[%s12303_s9 + $0x218] sm:$0xff] }
 0x311   : > { %12425 = vst [vmem:[#allocation25_spill] sm:$0xff] %v9212_v42 }
 0x312   : > { %12424 = vst [vmem:[#allocation24_spill] sm:$0xff] %v9202_v34  ;;  %v6424_v46 = vpop.f32.mrb[66].mxu1  ;;  %2300 = vmax.xlane.f32.xlu1 %v9202_v34  ;;  %2298 = vmax.xlane.f32.xlu0 %v9200_v7 }
 0x313   : > { %v1863_v8 = vpop.f32.mrb[67].mxu1  ;;  %v9224_v7 = vadd.f32 %v6424_v46, %v942_v47  ;;  %v947_v47 = vld [vmem:[%s12303_s9 + $0x240] sm:$0xff] }
 0x314   : > { %v9214_v20 = vadd.f32 %v1863_v8, %v941_v9  ;;  %v944_v8 = vld [vmem:[%s12303_s9 + $0x228] sm:$0xff] }
 0x315   : > { %12427 = vst [vmem:[#allocation27_spill] sm:$0xff] %v9224_v7 }
 0x316   : > { %12426 = vst [vmem:[#allocation26_spill] sm:$0xff] %v9214_v20  ;;  %v6427_v43 = vpop.f32.mrb[68].mxu1  ;;  %2304 = vmax.xlane.f32.xlu1 %v9214_v20  ;;  %2302 = vmax.xlane.f32.xlu0 %v9212_v42 }
 0x317   : > { %v1873_v34 = vpop.f32.mrb[69].mxu1  ;;  %v9236_v42 = vadd.f32 %v6427_v43, %v944_v8 }
 0x318   : > { %v9226_v27 = vadd.f32 %v1873_v34, %v943_v39  ;;  %v946_v34 = vld [vmem:[%s12303_s9 + $0x238] sm:$0xff] }
 0x319   : > { %12429 = vst [vmem:[#allocation29_spill] sm:$0xff] %v9236_v42 }
 0x31a   : > { %12428 = vst [vmem:[#allocation28_spill] sm:$0xff] %v9226_v27  ;;  %v6430_v9 = vpop.f32.mrb[70].mxu1  ;;  %2308 = vmax.xlane.f32.xlu1 %v9226_v27  ;;  %2306 = vmax.xlane.f32.xlu0 %v9224_v7 }
 0x31b   : > { %v1883_v20 = vpop.f32.mrb[71].mxu1 }
 0x31c   : > { %v9238_v46 = vadd.f32 %v1883_v20, %v945_v18  ;;  %v9249_v20 = vadd.f32 %v6430_v9, %v946_v34 }
 0x31e   : > { %12430 = vst [vmem:[#allocation30_spill] sm:$0xff] %v9238_v46  ;;  %v2175_v39 = vpop.xlane.xlu1 %2174  ;;  %v6433_v44 = vpop.f32.mrb[72].mxu1  ;;  %2312 = vmax.xlane.f32.xlu1 %v9238_v46  ;;  %2310 = vmax.xlane.f32.xlu0 %v9236_v42  ;;  %v949_v46 = vld [vmem:[%s12303_s9 + $0x250] sm:$0xff] }
 0x31f   : > { %v2429_v7 = vsub.f32 %v8728_v61, %v2175_v39  ;;  %v1893_v43 = vpop.f32.mrb[73].mxu1  ;;  %v2173_v8 = vpop.xlane.xlu0 %2172  ;;  %v9262_v34 = vadd.f32 %v6433_v44, %v948_v23 }
 0x320   : > { %v9251_v18 = vadd.f32 %v1893_v43, %v947_v47  ;;  %v2428_v27 = vsub.f32 %v8734_v2, %v2173_v8  ;;  %v950_v2 = vld [vmem:[%s12303_s9 + $0x258] sm:$0xff]  ;;  %v952_v8 = vld [vmem:[%s12303_s9 + $0x268] sm:$0xff] }
 0x321   : > { %v2558_v51 = vmul.f32 1.442695, %v2429_v7  ;;  %12431 = vst [vmem:[#allocation31_spill] sm:$0xff] %v9262_v34 }
 0x322   : > { %v2556_v42 = vmul.f32 1.442695, %v2428_v27  ;;  %v6436_v52 = vpop.f32.mrb[74].mxu1  ;;  %2316 = vmax.xlane.f32.xlu1 %v9251_v18  ;;  %2314 = vmax.xlane.f32.xlu0 %v9249_v20  ;;  %v951_v27 = vld [vmem:[%s12303_s9 + $0x260] sm:$0xff] }
 0x323   : > { %v1903_v61 = vpop.f32.mrb[75].mxu1  ;;  %v2179_v9 = vpop.xlane.xlu0 %2178  ;;  %v9275_v44 = vadd.f32 %v6436_v52, %v950_v2 }
 0x324   : > { %7038 = vpow2.f32 %v2556_v42  ;;  %v9264_v7 = vadd.f32 %v1903_v61, %v949_v46  ;;  %v2431_v47 = vsub.f32 %v8747_v13, %v2179_v9  ;;  %v953_v61 = vld [vmem:[%s12303_s9 + $0x270] sm:$0xff] }
 0x325   : > { %7040 = vpow2.f32 %v2558_v51 }
 0x326   : > { %12432 = vst [vmem:[#allocation32_spill] sm:$0xff] %v9264_v7  ;;  %v6439_v39 = vpop.f32.mrb[76].mxu1  ;;  %2320 = vmax.xlane.f32.xlu1 %v9264_v7  ;;  %2318 = vmax.xlane.f32.xlu0 %v9262_v34  ;;  %v2562_v9 = vmul.f32 1.442695, %v2431_v47  ;;  %v954_v47 = vld [vmem:[%s12303_s9 + $0x278] sm:$0xff] }
 0x327   : > { %v1913_v23 = vpop.f32.mrb[77].mxu1  ;;  %v2181_v42 = vpop.xlane.xlu1 %2180 }
 0x328   : > { %v9277_v51 = vadd.f32 %v1913_v23, %v951_v27  ;;  %v2432_v46 = vsub.f32 %v8772_v25, %v2181_v42  ;;  %v2177_v43 = vpop.xlane.xlu0 %2176  ;;  %v9289_v23 = vadd.f32 %v6439_v39, %v952_v8 }
 0x329   : > { %v2430_v13 = vsub.f32 %v8770_v24, %v2177_v43 }
 0x32a   : > { %12433 = vst [vmem:[#allocation33_spill] sm:$0xff] %v9277_v51  ;;  %v6442_v34 = vpop.f32.mrb[78].mxu1  ;;  %2324 = vmax.xlane.f32.xlu1 %v9277_v51  ;;  %2322 = vmax.xlane.f32.xlu0 %v9275_v44  ;;  %v2564_v52 = vmul.f32 1.442695, %v2432_v46 }
 0x32b   : > { %v2560_v2 = vmul.f32 1.442695, %v2430_v13  ;;  %v1923_v25 = vpop.f32.mrb[79].mxu1  ;;  %v2185_v27 = vpop.xlane.xlu1 %2184 }
 0x32c   : > { %v9291_v42 = vadd.f32 %v1923_v25, %v953_v61  ;;  %v2434_v24 = vsub.f32 %v8794_v54, %v2185_v27  ;;  %v2183_v43 = vpop.xlane.xlu0 %2182 }
 0x32d   : > { %7042 = vpow2.f32 %v2560_v2  ;;  %v2433_v51 = vsub.f32 %v8792_v35, %v2183_v43  ;;  %v9300_v2 = vadd.f32 %v6442_v34, %v954_v47  ;;  %v956_v35 = vld [vmem:[%s12303_s9 + $0x288] sm:$0xff] }
 0x32e   : > { %v7039_v7 = vpop.eup %7038  ;;  %7044 = vpow2.f32 %v2562_v9  ;;  %v6445_v46 = vpop.f32.mrb[80].mxu1  ;;  %2328 = vmax.xlane.f32.xlu1 %v9291_v42  ;;  %2326 = vmax.xlane.f32.xlu0 %v9289_v23  ;;  %v2568_v8 = vmul.f32 1.442695, %v2434_v24 }
 0x32f   : > { %v7041_v39 = vpop.eup %7040  ;;  %7046 = vpow2.f32 %v2564_v52  ;;  %v2566_v13 = vmul.f32 1.442695, %v2433_v51  ;;  %v1933_v54 = vpop.f32.mrb[81].mxu1  ;;  %6547 = vmatprep.mubr.f32.mxu0 %v7039_v7  ;;  %12434 = vst [vmem:[#allocation34_spill] sm:$0xff] %v9300_v2  ;;  %v9308_v47 = vadd.f32 %v6445_v46, %v956_v35 }
 0x330   : > { %v2189_v61 = vpop.xlane.xlu1 %2188  ;;  %v2187_v27 = vpop.xlane.xlu0 %2186  ;;  %6548 = vmatmul.mubr.f32.vlgmr.msra.gmra.mrb[32].mxu0 %v7041_v39 }
 0x331   : > { %v2436_v25 = vsub.f32 %v8816_v0, %v2189_v61  ;;  %7048 = vpow2.f32 %v2566_v13  ;;  %v2435_v9 = vsub.f32 %v8814_v50, %v2187_v27  ;;  %12435 = vst [vmem:[#allocation35_spill] sm:$0xff] %v9308_v47  ;;  %v958_v61 = vld [vmem:[%s12303_s9 + $0x298] sm:$0xff] }
 0x332   : > { %v6448_v43 = vpop.f32.mrb[82].mxu1  ;;  %2814 = vadd.xlane.f32.xlu1 %v7041_v39  ;;  %2330 = vmax.xlane.f32.xlu0 %v9300_v2  ;;  %7050 = vpow2.f32 %v2568_v8  ;;  %v955_v39 = vld [vmem:[%s12303_s9 + $0x280] sm:$0xff] }
 0x333   : > { %v2572_v51 = vmul.f32 1.442695, %v2436_v25  ;;  %v2570_v52 = vmul.f32 1.442695, %v2435_v9  ;;  %v1943_v34 = vpop.f32.mrb[83].mxu1 }
 0x334   : > { %v2193_v24 = vpop.xlane.xlu1 %2192  ;;  %v2191_v13 = vpop.xlane.xlu0 %2190 }
 0x335   : > { %v2438_v0 = vsub.f32 %v8838_v11, %v2193_v24  ;;  %7052 = vpow2.f32 %v2570_v52  ;;  %v2437_v50 = vsub.f32 %v8836_v1, %v2191_v13  ;;  %v9323_v52 = vadd.f32 %v6448_v43, %v958_v61 }
 0x336   : > { %v6451_v8 = vpop.f32.mrb[84].mxu1  ;;  %2334 = vmax.xlane.f32.xlu0 %v9308_v47  ;;  %2812 = vadd.xlane.f32.xlu1 %v7039_v7  ;;  %7054 = vpow2.f32 %v2572_v51  ;;  %v9329_v47 = vadd.f32 %v1933_v54, %v955_v39  ;;  %v960_v7 = vld [vmem:[%s12303_s9 + $0x2a8] sm:$0xff] }
 0x337   : > { %v9319_v46 = vpop.eup %7042  ;;  %v2576_v11 = vmul.f32 1.442695, %v2438_v0  ;;  %v2574_v25 = vmul.f32 1.442695, %v2437_v50  ;;  %v1953_v27 = vpop.f32.mrb[85].mxu1  ;;  %12436 = vst [vmem:[#allocation36_spill] sm:$0xff] %v9323_v52  ;;  %v9344_v39 = vadd.f32 %v6451_v8, %v960_v7 }
 0x338   : > { %v2197_v35 = vpop.xlane.xlu1 %2196  ;;  %v9321_v9 = vpop.eup %7044  ;;  %6550 = vmatprep.mubr.f32.mxu0 %v9319_v46  ;;  %12437 = vst [vmem:[#allocation37_spill] sm:$0xff] %v9329_v47  ;;  %v959_v8 = vld [vmem:[%s12303_s9 + $0x2a0] sm:$0xff] }
 0x339   : > { %v2440_v1 = vsub.f32 %v8860_v21, %v2197_v35  ;;  %v2195_v24 = vpop.xlane.xlu0 %2194  ;;  %v9327_v13 = vpop.eup %7046  ;;  %7056 = vpow2.f32 %v2574_v25  ;;  %6551 = vmatmul.mubr.f32.gmra.mrb[34].mxu0 %v9321_v9  ;;  %v957_v21 = vld [vmem:[%s12303_s9 + $0x290] sm:$0xff]  ;;  %12438 = vst [vmem:[#allocation38_spill] sm:$0xff] %v9344_v39 }
 0x33a   : > { %v2439_v51 = vsub.f32 %v8858_v16, %v2195_v24  ;;  %6553 = vmatprep.mubr.f32.mxu0 %v9327_v13  ;;  %v6454_v43 = vpop.f32.mrb[86].mxu1  ;;  %2338 = vmax.xlane.f32.xlu0 %v9323_v52  ;;  %7058 = vpow2.f32 %v2576_v11  ;;  %v9349_v2 = vadd.f32 %v1943_v34, %v957_v21  ;;  %v962_v11 = vld [vmem:[%s12303_s9 + $0x2b8] sm:$0xff] }
 0x33b   : > { %v9341_v54 = vpop.eup %7048  ;;  %v2580_v0 = vmul.f32 1.442695, %v2440_v1  ;;  %2332 = vmax.xlane.f32.xlu1 %v9329_v47  ;;  %v1963_v50 = vpop.f32.mrb[87].mxu1  ;;  %v9369_v47 = vadd.f32 %v1953_v27, %v959_v8 }
 0x33c   : > { %v2578_v61 = vmul.f32 1.442695, %v2439_v51  ;;  %v2201_v16 = vpop.xlane.xlu1 %2200  ;;  %v9347_v24 = vpop.eup %7050 }
 0x33d   : > { %v2442_v25 = vsub.f32 %v8882_v31, %v2201_v16  ;;  %v2199_v35 = vpop.xlane.xlu0 %2198  ;;  %6554 = vmatmul.mubr.f32.gmra.mrb[36].mxu0 %v9341_v54 }
 0x33e   : > { %7060 = vpow2.f32 %v2578_v61  ;;  %v2441_v1 = vsub.f32 %v8880_v49, %v2199_v35  ;;  %6556 = vmatprep.mubr.f32.mxu0 %v9347_v24  ;;  %v6457_v31 = vpop.f32.mrb[88].mxu1  ;;  %2342 = vmax.xlane.f32.xlu0 %v9344_v39  ;;  %v9364_v61 = vadd.f32 %v6454_v43, %v962_v11  ;;  %v961_v43 = vld [vmem:[%s12303_s9 + $0x2b0] sm:$0xff] }
 0x33f   : > { %v9361_v34 = vpop.eup %7052  ;;  %7062 = vpow2.f32 %v2580_v0  ;;  %v2584_v7 = vmul.f32 1.442695, %v2442_v25  ;;  %2336 = vmax.xlane.f32.xlu1 %v9349_v2  ;;  %v1973_v21 = vpop.f32.mrb[89].mxu1  ;;  %v964_v0 = vld [vmem:[%s12303_s9 + $0x2c8] sm:$0xff] }
 0x340   : > { %v2582_v51 = vmul.f32 1.442695, %v2441_v1  ;;  %v2205_v49 = vpop.xlane.xlu1 %2204  ;;  %12439 = vst [vmem:[#allocation39_spill] sm:$0xff] %v9364_v61  ;;  %v9367_v52 = vpop.eup %7054 }
 0x341   : > { %v2444_v16 = vsub.f32 %v8904_v41, %v2205_v49  ;;  %v2203_v35 = vpop.xlane.xlu0 %2202  ;;  %12440 = vst [vmem:[#allocation40_spill] sm:$0xff] %v9367_v52  ;;  %6557 = vmatmul.mubr.f32.gmra.mrb[38].mxu0 %v9361_v34 }
 0x342   : > { %7064 = vpow2.f32 %v2582_v51  ;;  %v2443_v25 = vsub.f32 %v8902_v63, %v2203_v35  ;;  %6559 = vmatprep.mubr.f32.mxu0 %v9367_v52  ;;  %v6460_v41 = vpop.f32.mrb[90].mxu1  ;;  %2346 = vmax.xlane.f32.xlu0 %v9364_v61  ;;  %v9384_v51 = vadd.f32 %v6457_v31, %v964_v0  ;;  %v9389_v52 = vadd.f32 %v1963_v50, %v961_v43  ;;  %v963_v31 = vld [vmem:[%s12303_s9 + $0x2c0] sm:$0xff] }
 0x343   : > { %v9381_v27 = vpop.eup %7056  ;;  %7066 = vpow2.f32 %v2584_v7  ;;  %v2588_v11 = vmul.f32 1.442695, %v2444_v16  ;;  %2340 = vmax.xlane.f32.xlu1 %v9369_v47  ;;  %v1983_v8 = vpop.f32.mrb[91].mxu1  ;;  %v966_v7 = vld [vmem:[%s12303_s9 + $0x2d8] sm:$0xff] }
 0x344   : > { %v2586_v1 = vmul.f32 1.442695, %v2443_v25  ;;  %v2209_v63 = vpop.xlane.xlu1 %2208  ;;  %12441 = vst [vmem:[#allocation41_spill] sm:$0xff] %v9384_v51  ;;  %v9387_v39 = vpop.eup %7058 }
 0x345   : > { %v2446_v49 = vsub.f32 %v8923_v10, %v2209_v63  ;;  %v2207_v35 = vpop.xlane.xlu0 %2206  ;;  %12442 = vst [vmem:[#allocation42_spill] sm:$0xff] %v9387_v39  ;;  %6560 = vmatmul.mubr.f32.gmra.mrb[40].mxu0 %v9381_v27 }
 0x346   : > { %7068 = vpow2.f32 %v2586_v1  ;;  %v2445_v16 = vsub.f32 %v8921_v48, %v2207_v35  ;;  %6562 = vmatprep.mubr.f32.mxu0 %v9387_v39  ;;  %v6463_v10 = vpop.f32.mrb[92].mxu1  ;;  %2350 = vmax.xlane.f32.xlu0 %v9384_v51  ;;  %v9404_v1 = vadd.f32 %v6460_v41, %v966_v7  ;;  %v9409_v39 = vadd.f32 %v1973_v21, %v963_v31  ;;  %v965_v41 = vld [vmem:[%s12303_s9 + $0x2d0] sm:$0xff] }
 0x347   : > { %7070 = vpow2.f32 %v2588_v11  ;;  %v2592_v0 = vmul.f32 1.442695, %v2446_v49  ;;  %2344 = vmax.xlane.f32.xlu1 %v9389_v52  ;;  %v1993_v43 = vpop.f32.mrb[93].mxu1  ;;  %v968_v11 = vld [vmem:[%s12303_s9 + $0x2e8] sm:$0xff] }
 0x348   : > { %v9401_v50 = vpop.eup %7060  ;;  %v2590_v25 = vmul.f32 1.442695, %v2445_v16  ;;  %v2213_v48 = vpop.xlane.xlu1 %2212  ;;  %12443 = vst [vmem:[#allocation43_spill] sm:$0xff] %v9404_v1 }
 0x349   : > { %v2448_v63 = vsub.f32 %v8938_v59, %v2213_v48  ;;  %v2211_v35 = vpop.xlane.xlu0 %2210  ;;  %v9407_v61 = vpop.eup %7062  ;;  %6563 = vmatmul.mubr.f32.gmra.mrb[42].mxu0 %v9401_v50 }
 0x34a   : > { %12444 = vst [vmem:[#allocation44_spill] sm:$0xff] %v9407_v61  ;;  %7072 = vpow2.f32 %v2590_v25  ;;  %v2447_v49 = vsub.f32 %v8936_v56, %v2211_v35  ;;  %6565 = vmatprep.mubr.f32.mxu0 %v9407_v61  ;;  %v6466_v59 = vpop.f32.mrb[94].mxu1  ;;  %2354 = vmax.xlane.f32.xlu0 %v9404_v1  ;;  %v9424_v25 = vadd.f32 %v6463_v10, %v968_v11  ;;  %v967_v10 = vld [vmem:[%s12303_s9 + $0x2e0] sm:$0xff] }
 0x34b   : > { %7074 = vpow2.f32 %v2592_v0  ;;  %v2596_v7 = vmul.f32 1.442695, %v2448_v63  ;;  %2348 = vmax.xlane.f32.xlu1 %v9409_v39  ;;  %v2003_v31 = vpop.f32.mrb[95].mxu1  ;;  %v9429_v61 = vadd.f32 %v1983_v8, %v965_v41  ;;  %v970_v0 = vld [vmem:[%s12303_s9 + $0x2f8] sm:$0xff] }
 0x34c   : > { %v9421_v21 = vpop.eup %7064  ;;  %v2594_v16 = vmul.f32 1.442695, %v2447_v49  ;;  %v2217_v56 = vpop.xlane.xlu1 %2216  ;;  %12445 = vst [vmem:[#allocation45_spill] sm:$0xff] %v9424_v25 }
 0x34d   : > { %v2450_v48 = vsub.f32 %v8950_v4, %v2217_v56  ;;  %v2215_v35 = vpop.xlane.xlu0 %2214  ;;  %v9427_v51 = vpop.eup %7066  ;;  %12447 = vst [vmem:[#allocation47_spill] sm:$0xff] %v9429_v61  ;;  %6566 = vmatmul.mubr.f32.gmra.mrb[44].mxu0 %v9421_v21 }
 0x34e   : > { %12446 = vst [vmem:[#allocation46_spill] sm:$0xff] %v9427_v51  ;;  %7076 = vpow2.f32 %v2594_v16  ;;  %v2449_v63 = vsub.f32 %v8948_v3, %v2215_v35  ;;  %6568 = vmatprep.mubr.f32.mxu0 %v9427_v51  ;;  %v9440_v4 = vpop.f32.mrb[96].mxu1  ;;  %2358 = vmax.xlane.f32.xlu0 %v9424_v25  ;;  %v9446_v16 = vadd.f32 %v6466_v59, %v970_v0 }
 0x34f   : > { %7078 = vpow2.f32 %v2596_v7  ;;  %v2600_v11 = vmul.f32 1.442695, %v2450_v48  ;;  %2352 = vmax.xlane.f32.xlu1 %v9429_v61  ;;  %v2013_v3 = vpop.f32.mrb[97].mxu1  ;;  %v9449_v51 = vadd.f32 %v1993_v43, %v967_v10  ;;  %v969_v7 = vld [vmem:[%s12303_s9 + $0x2f0] sm:$0xff] }
 0x350   : > { %v9443_v8 = vpop.eup %7068  ;;  %v2598_v49 = vmul.f32 1.442695, %v2449_v63  ;;  %v2221_v41 = vpop.xlane.xlu1 %2220  ;;  %12448 = vst [vmem:[#allocation48_spill] sm:$0xff] %v9446_v16 }
 0x351   : > { %v2452_v56 = vsub.f32 %v8962_v30, %v2221_v41  ;;  %v2219_v35 = vpop.xlane.xlu0 %2218  ;;  %v7071_v1 = vpop.eup %7070  ;;  %12449 = vst [vmem:[#allocation49_spill] sm:$0xff] %v9449_v51  ;;  %6569 = vmatmul.mubr.f32.gmra.mrb[46].mxu0 %v9443_v8  ;;  %v9463_v41 = vadd.f32 %v2003_v31, %v969_v7 }
 0x352   : > { %7080 = vpow2.f32 %v2598_v49  ;;  %v2451_v25 = vsub.f32 %v8960_v15, %v2219_v35  ;;  %6571 = vmatprep.mubr.f32.mxu0 %v7071_v1  ;;  %v9456_v48 = vpop.f32.mrb[98].mxu1  ;;  %2362 = vmax.xlane.f32.xlu0 %v9446_v16  ;;  %v972_v16 = vld [vmem:[%s12303_s9 + $0x308] sm:$0xff] }
 0x353   : > { %7082 = vpow2.f32 %v2600_v11  ;;  %v2604_v30 = vmul.f32 1.442695, %v2452_v56  ;;  %2356 = vmax.xlane.f32.xlu1 %v9449_v51  ;;  %v2023_v43 = vpop.f32.mrb[99].mxu1  ;;  %12450 = vst [vmem:[#allocation50_spill] sm:$0xff] %v9463_v41  ;;  %v971_v11 = vld [vmem:[%s12303_s9 + $0x300] sm:$0xff] }
 0x354   : > { %v7073_v59 = vpop.eup %7072  ;;  %v2602_v0 = vmul.f32 1.442695, %v2451_v25  ;;  %v2225_v63 = vpop.xlane.xlu1 %2224  ;;  %v9481_v51 = vadd.f32 %v2013_v3, %v971_v11 }
 0x355   : > { %v2454_v15 = vsub.f32 %v8974_v22, %v2225_v63  ;;  %v2223_v10 = vpop.xlane.xlu0 %2222  ;;  %v9461_v49 = vpop.eup %7074  ;;  %6572 = vmatmul.mubr.f32.gmra.mrb[48].mxu0 %v7073_v59 }
 0x356   : > { %7084 = vpow2.f32 %v2602_v0  ;;  %v2453_v35 = vsub.f32 %v8972_v19, %v2223_v10  ;;  %6574 = vmatprep.mubr.f32.mxu0 %v9461_v49  ;;  %v9470_v25 = vpop.f32.mrb[100].mxu1  ;;  %2846 = vadd.xlane.f32.xlu0 %v7073_v59  ;;  %12451 = vst [vmem:[#allocation51_spill] sm:$0xff] %v9481_v51 }
 0x357   : > { %7086 = vpow2.f32 %v2604_v30  ;;  %v2608_v22 = vmul.f32 1.442695, %v2454_v15  ;;  %2360 = vmax.xlane.f32.xlu1 %v9463_v41  ;;  %v2033_v31 = vpop.f32.mrb[101].mxu1  ;;  %v973_v30 = vld [vmem:[%s12303_s9 + $0x310] sm:$0xff] }
 0x358   : > { %v9472_v56 = vpop.eup %7076  ;;  %v2606_v63 = vmul.f32 1.442695, %v2453_v35  ;;  %v2229_v7 = vpop.xlane.xlu1 %2228  ;;  %v9503_v61 = vadd.f32 %v2023_v43, %v973_v30 }
 0x359   : > { %v2456_v19 = vsub.f32 %v8986_v29, %v2229_v7  ;;  %v2227_v0 = vpop.xlane.xlu0 %2226  ;;  %v9476_v10 = vpop.eup %7078  ;;  %6575 = vmatmul.mubr.f32.gmra.mrb[50].mxu0 %v9472_v56 }
 0x35a   : > { %7088 = vpow2.f32 %v2606_v63  ;;  %v2455_v59 = vsub.f32 %v8984_v28, %v2227_v0  ;;  %6577 = vmatprep.mubr.f32.mxu0 %v9476_v10  ;;  %v9489_v29 = vpop.f32.mrb[102].mxu1  ;;  %2844 = vadd.xlane.f32.xlu0 %v7071_v1  ;;  %v9495_v63 = vadd.f32 %v9440_v4, %v972_v16  ;;  %v974_v1 = vld [vmem:[%s12303_s9 + $0x318] sm:$0xff]  ;;  %12453 = vst [vmem:[#allocation53_spill] sm:$0xff] %v9503_v61  ;;  %v975_v4 = vld [vmem:[%s12303_s9 + $0x320] sm:$0xff] }
 0x35b   : > { %7090 = vpow2.f32 %v2608_v22  ;;  %v2612_v35 = vmul.f32 1.442695, %v2456_v19  ;;  %2364 = vmax.xlane.f32.xlu1 %v9481_v51  ;;  %v2043_v11 = vpop.f32.mrb[103].mxu1  ;;  %v9518_v30 = vadd.f32 %v9456_v48, %v974_v1  ;;  %v9526_v51 = vadd.f32 %v2033_v31, %v975_v4  ;;  %v977_v48 = vld [vmem:[%s12303_s9 + $0x330] sm:$0xff] }
 0x35c   : > { %v9491_v15 = vpop.eup %7080  ;;  %v2610_v3 = vmul.f32 1.442695, %v2455_v59  ;;  %v2233_v28 = vpop.xlane.xlu1 %2232  ;;  %12452 = vst [vmem:[#allocation52_spill] sm:$0xff] %v9495_v63 }
 0x35d   : > { %v2458_v7 = vsub.f32 %v8998_v37, %v2233_v28  ;;  %v2231_v0 = vpop.xlane.xlu0 %2230  ;;  %v9498_v41 = vpop.eup %7082  ;;  %6578 = vmatmul.mubr.f32.gmra.mrb[52].mxu0 %v9491_v15  ;;  %12454 = vst [vmem:[#allocation54_spill] sm:$0xff] %v9518_v30  ;;  %12455 = vst [vmem:[#allocation55_spill] sm:$0xff] %v9526_v51 }
 0x35e   : > { %7092 = vpow2.f32 %v2610_v3  ;;  %v2457_v22 = vsub.f32 %v8996_v36, %v2231_v0  ;;  %6580 = vmatprep.mubr.f32.mxu0 %v9498_v41  ;;  %v9511_v37 = vpop.f32.mrb[104].mxu1  ;;  %2366 = vmax.xlane.f32.xlu0 %v9495_v63  ;;  %v976_v63 = vld [vmem:[%s12303_s9 + $0x328] sm:$0xff] }
 0x35f   : > { %7094 = vpow2.f32 %v2612_v35  ;;  %v2616_v43 = vmul.f32 1.442695, %v2458_v7  ;;  %2368 = vmax.xlane.f32.xlu1 %v9503_v61  ;;  %v2053_v36 = vpop.f32.mrb[105].mxu1  ;;  %v9541_v4 = vadd.f32 %v9470_v25, %v976_v63  ;;  %v9549_v61 = vadd.f32 %v2043_v11, %v977_v48  ;;  %v979_v25 = vld [vmem:[%s12303_s9 + $0x340] sm:$0xff] }
 0x360   : > { %v9514_v16 = vpop.eup %7084  ;;  %v2614_v19 = vmul.f32 1.442695, %v2457_v22  ;;  %v2237_v59 = vpop.xlane.xlu1 %2236 }
 0x361   : > { %v2460_v3 = vsub.f32 %v9010_v5, %v2237_v59  ;;  %v2235_v28 = vpop.xlane.xlu0 %2234  ;;  %v9521_v0 = vpop.eup %7086  ;;  %6581 = vmatmul.mubr.f32.gmra.mrb[54].mxu0 %v9514_v16  ;;  %12456 = vst [vmem:[#allocation56_spill] sm:$0xff] %v9541_v4  ;;  %12457 = vst [vmem:[#allocation57_spill] sm:$0xff] %v9549_v61 }
 0x362   : > { %7096 = vpow2.f32 %v2614_v19  ;;  %v2459_v35 = vsub.f32 %v9008_v58, %v2235_v28  ;;  %6583 = vmatprep.mubr.f32.mxu0 %v9521_v0  ;;  %v9534_v5 = vpop.f32.mrb[106].mxu1  ;;  %2370 = vmax.xlane.f32.xlu0 %v9518_v30  ;;  %v978_v30 = vld [vmem:[%s12303_s9 + $0x338] sm:$0xff] }
 0x363   : > { %7098 = vpow2.f32 %v2616_v43  ;;  %v2620_v31 = vmul.f32 1.442695, %v2460_v3  ;;  %2372 = vmax.xlane.f32.xlu1 %v9526_v51  ;;  %v2063_v58 = vpop.f32.mrb[107].mxu1  ;;  %v9564_v48 = vadd.f32 %v9489_v29, %v978_v30  ;;  %v9572_v51 = vadd.f32 %v2053_v36, %v979_v25  ;;  %v981_v29 = vld [vmem:[%s12303_s9 + $0x350] sm:$0xff] }
 0x364   : > { %v9537_v7 = vpop.eup %7088  ;;  %v2618_v1 = vmul.f32 1.442695, %v2459_v35  ;;  %v2241_v22 = vpop.xlane.xlu1 %2240 }
 0x365   : > { %v2462_v19 = vsub.f32 %v9022_v62, %v2241_v22  ;;  %v2239_v59 = vpop.xlane.xlu0 %2238  ;;  %v9544_v28 = vpop.eup %7090  ;;  %6584 = vmatmul.mubr.f32.gmra.mrb[56].mxu0 %v9537_v7  ;;  %12458 = vst [vmem:[#allocation58_spill] sm:$0xff] %v9564_v48  ;;  %12459 = vst [vmem:[#allocation59_spill] sm:$0xff] %v9572_v51 }
 0x366   : > { %7100 = vpow2.f32 %v2618_v1  ;;  %v2461_v43 = vsub.f32 %v9020_v6, %v2239_v59  ;;  %6586 = vmatprep.mubr.f32.mxu0 %v9544_v28  ;;  %v9557_v62 = vpop.f32.mrb[108].mxu1  ;;  %2374 = vmax.xlane.f32.xlu0 %v9541_v4  ;;  %v980_v4 = vld [vmem:[%s12303_s9 + $0x348] sm:$0xff] }
 0x367   : > { %7102 = vpow2.f32 %v2620_v31  ;;  %v2624_v11 = vmul.f32 1.442695, %v2462_v19  ;;  %2376 = vmax.xlane.f32.xlu1 %v9549_v61  ;;  %v2073_v6 = vpop.f32.mrb[109].mxu1  ;;  %v9587_v25 = vadd.f32 %v9511_v37, %v980_v4  ;;  %v9595_v61 = vadd.f32 %v2063_v58, %v981_v29  ;;  %v983_v37 = vld [vmem:[%s12303_s9 + $0x360] sm:$0xff] }
 0x368   : > { %v9560_v63 = vpop.eup %7092  ;;  %v2622_v3 = vmul.f32 1.442695, %v2461_v43  ;;  %v2245_v35 = vpop.xlane.xlu1 %2244 }
 0x369   : > { %v2464_v1 = vsub.f32 %v9034_v17, %v2245_v35  ;;  %v2243_v22 = vpop.xlane.xlu0 %2242  ;;  %v9567_v59 = vpop.eup %7094  ;;  %6587 = vmatmul.mubr.f32.gmra.mrb[58].mxu0 %v9560_v63  ;;  %12461 = vst [vmem:[#allocation61_spill] sm:$0xff] %v9587_v25  ;;  %12462 = vst [vmem:[#allocation62_spill] sm:$0xff] %v9595_v61 }
 0x36a   : > { %7104 = vpow2.f32 %v2622_v3  ;;  %v2463_v31 = vsub.f32 %v9032_v14, %v2243_v22  ;;  %6589 = vmatprep.mubr.f32.mxu0 %v9567_v59  ;;  %v9580_v17 = vpop.f32.mrb[110].mxu1  ;;  %2378 = vmax.xlane.f32.xlu0 %v9564_v48  ;;  %v982_v48 = vld [vmem:[%s12303_s9 + $0x358] sm:$0xff] }
 0x36b   : > { %7106 = vpow2.f32 %v2624_v11  ;;  %v2628_v36 = vmul.f32 1.442695, %v2464_v1  ;;  %2380 = vmax.xlane.f32.xlu1 %v9572_v51  ;;  %v2083_v14 = vpop.f32.mrb[111].mxu1  ;;  %v9610_v29 = vadd.f32 %v9534_v5, %v982_v48  ;;  %v9618_v51 = vadd.f32 %v2073_v6, %v983_v37  ;;  %v985_v5 = vld [vmem:[%s12303_s9 + $0x370] sm:$0xff] }
 0x36c   : > { %v9583_v30 = vpop.eup %7096  ;;  %v2626_v19 = vmul.f32 1.442695, %v2463_v31  ;;  %v2249_v43 = vpop.xlane.xlu1 %2248 }
 0x36d   : > { %12460 = vst [vmem:[#allocation60_spill] sm:$0xff] %v9583_v30  ;;  %v2466_v3 = vsub.f32 %v9046_v26, %v2249_v43  ;;  %v2247_v35 = vpop.xlane.xlu0 %2246  ;;  %v9590_v22 = vpop.eup %7098  ;;  %6590 = vmatmul.mubr.f32.gmra.mrb[60].mxu0 %v9583_v30  ;;  %12464 = vst [vmem:[#allocation64_spill] sm:$0xff] %v9610_v29 }
 0x36e   : > { %7108 = vpow2.f32 %v2626_v19  ;;  %v2465_v11 = vsub.f32 %v9044_v40, %v2247_v35  ;;  %6592 = vmatprep.mubr.f32.mxu0 %v9590_v22  ;;  %v9603_v26 = vpop.f32.mrb[112].mxu1  ;;  %2382 = vmax.xlane.f32.xlu0 %v9587_v25  ;;  %v984_v25 = vld [vmem:[%s12303_s9 + $0x368] sm:$0xff]  ;;  %12465 = vst [vmem:[#allocation65_spill] sm:$0xff] %v9618_v51 }
 0x36f   : > { %7110 = vpow2.f32 %v2628_v36  ;;  %v2632_v58 = vmul.f32 1.442695, %v2466_v3  ;;  %2384 = vmax.xlane.f32.xlu1 %v9595_v61  ;;  %v2093_v40 = vpop.f32.mrb[113].mxu1  ;;  %v9635_v37 = vadd.f32 %v9557_v62, %v984_v25  ;;  %v987_v62 = vld [vmem:[%s12303_s9 + $0x380] sm:$0xff] }
 0x370   : > { %v9606_v4 = vpop.eup %7100  ;;  %v2630_v1 = vmul.f32 1.442695, %v2465_v11  ;;  %v2253_v31 = vpop.xlane.xlu1 %2252 }
 0x371   : > { %12463 = vst [vmem:[#allocation63_spill] sm:$0xff] %v9606_v4  ;;  %v2468_v19 = vsub.f32 %v9058_v38, %v2253_v31  ;;  %v2251_v43 = vpop.xlane.xlu0 %2250  ;;  %v9613_v35 = vpop.eup %7102  ;;  %6593 = vmatmul.mubr.f32.gmra.mrb[62].mxu0 %v9606_v4  ;;  %12466 = vst [vmem:[#allocation66_spill] sm:$0xff] %v9635_v37  ;;  %v986_v4 = vld [vmem:[%s12303_s9 + $0x378] sm:$0xff] }
 0x372   : > { %7112 = vpow2.f32 %v2630_v1  ;;  %v2467_v36 = vsub.f32 %v9056_v57, %v2251_v43  ;;  %6595 = vmatprep.mubr.f32.mxu0 %v9613_v35  ;;  %v9626_v38 = vpop.f32.mrb[114].mxu1  ;;  %2386 = vmax.xlane.f32.xlu0 %v9610_v29 }
 0x373   : > { %7114 = vpow2.f32 %v2632_v58  ;;  %v2636_v6 = vmul.f32 1.442695, %v2468_v19  ;;  %2388 = vmax.xlane.f32.xlu1 %v9618_v51  ;;  %v9632_v57 = vpop.f32.mrb[115].mxu1  ;;  %v9643_v58 = vadd.f32 %v2083_v14, %v985_v5  ;;  %v990_v51 = vld [vmem:[%s12303_s9 + $0x398] sm:$0xff] }
 0x374   : > { %v9629_v48 = vpop.eup %7104  ;;  %v2634_v3 = vmul.f32 1.442695, %v2467_v36  ;;  %v2257_v11 = vpop.xlane.xlu1 %2256 }
 0x375   : > { %v2470_v1 = vsub.f32 %v9070_v55, %v2257_v11  ;;  %v2255_v31 = vpop.xlane.xlu0 %2254  ;;  %v9638_v43 = vpop.eup %7106  ;;  %12467 = vst [vmem:[#allocation67_spill] sm:$0xff] %v9643_v58  ;;  %6596 = vmatmul.mubr.f32.gmra.mrb[64].mxu0 %v9629_v48 }
 0x376   : > { %7116 = vpow2.f32 %v2634_v3  ;;  %v2469_v19 = vsub.f32 %v9068_v53, %v2255_v31  ;;  %6598 = vmatprep.mubr.f32.mxu0 %v9638_v43  ;;  %v9651_v55 = vpop.f32.mrb[116].mxu1  ;;  %2390 = vmax.xlane.f32.xlu0 %v9635_v37  ;;  %v9660_v3 = vadd.f32 %v9580_v17, %v986_v4  ;;  %v988_v37 = vld [vmem:[%s12303_s9 + $0x388] sm:$0xff] }
 0x377   : > { %7118 = vpow2.f32 %v2636_v6  ;;  %v2640_v14 = vmul.f32 1.442695, %v2470_v1  ;;  %2392 = vmax.xlane.f32.xlu1 %v9643_v58  ;;  %v9657_v53 = vpop.f32.mrb[117].mxu1  ;;  %v9668_v6 = vadd.f32 %v2093_v40, %v987_v62 }
 0x378   : > { %v9654_v25 = vpop.eup %7108  ;;  %v2638_v36 = vmul.f32 1.442695, %v2469_v19  ;;  %v2261_v5 = vpop.xlane.xlu1 %2260  ;;  %12468 = vst [vmem:[#allocation68_spill] sm:$0xff] %v9660_v3 }
 0x379   : > { %v2472_v11 = vsub.f32 %v9082_v45, %v2261_v5  ;;  %v2259_v31 = vpop.xlane.xlu0 %2258  ;;  %v9663_v29 = vpop.eup %7110  ;;  %12469 = vst [vmem:[#allocation69_spill] sm:$0xff] %v9668_v6  ;;  %6599 = vmatmul.mubr.f32.gmra.mrb[66].mxu0 %v9654_v25 }
 0x37a   : > { %7120 = vpow2.f32 %v2638_v36  ;;  %v2471_v1 = vsub.f32 %v9080_v12, %v2259_v31  ;;  %6601 = vmatprep.mubr.f32.mxu0 %v9663_v29  ;;  %v9673_v17 = vpop.f32.mrb[118].mxu1  ;;  %2394 = vmax.xlane.f32.xlu0 %v9660_v3  ;;  %v9682_v12 = vadd.f32 %v9603_v26, %v988_v37 }
 0x37b   : > { %7122 = vpow2.f32 %v2640_v14  ;;  %v2644_v4 = vmul.f32 1.442695, %v2472_v11  ;;  %2396 = vmax.xlane.f32.xlu1 %v9668_v6  ;;  %v9679_v40 = vpop.f32.mrb[119].mxu1  ;;  %v989_v14 = vld [vmem:[%s12303_s9 + $0x390] sm:$0xff] }
 0x37c   : > { %v9676_v45 = vpop.eup %7112  ;;  %v2642_v19 = vmul.f32 1.442695, %v2471_v1  ;;  %v2265_v62 = vpop.xlane.xlu1 %2264  ;;  %12470 = vst [vmem:[#allocation70_spill] sm:$0xff] %v9682_v12  ;;  %v9714_v61 = vadd.f32 %v9632_v57, %v989_v14 }
 0x37d   : > { %v2474_v36 = vsub.f32 %v9094_v33, %v2265_v62  ;;  %v2263_v5 = vpop.xlane.xlu0 %2262  ;;  %v9685_v31 = vpop.eup %7114  ;;  %6602 = vmatmul.mubr.f32.gmra.mrb[68].mxu0 %v9676_v45  ;;  %v4397_v33 = vld [vmem:[%s12297_s3] sm:$0xff] }
 0x37e   : > { %7124 = vpow2.f32 %v2642_v19  ;;  %v2473_v3 = vsub.f32 %v9092_v32, %v2263_v5  ;;  %6604 = vmatprep.mubr.f32.mxu0 %v9685_v31  ;;  %v9693_v11 = vpop.f32.mrb[120].mxu1  ;;  %2398 = vmax.xlane.f32.xlu0 %v9682_v12  ;;  %v4398_v32 = vld [vmem:[%s12297_s3 + $0x8] sm:$0xff]  ;;  %12471 = vst [vmem:[#allocation71_spill] sm:$0xff] %v9714_v61 }
 0x37f   : > { %7126 = vpow2.f32 %v2644_v4  ;;  %v2648_v37 = vmul.f32 1.442695, %v2474_v36  ;;  %2876 = vadd.xlane.f32.xlu1 %v9613_v35  ;;  %v9705_v19 = vpop.f32.mrb[121].mxu1  ;;  %v6875_v5 = vpack.c.bf16 %v4398_v32, %v4397_v33  ;;  %v12474_v32 = vld [vmem:[#allocation10_spill] sm:$0xff] }
 0x380   : > { %v9702_v26 = vpop.eup %7116  ;;  %v2646_v1 = vmul.f32 1.442695, %v2473_v3  ;;  %v2269_v62 = vpop.xlane.xlu1 %2268  ;;  %v12472_v3 = vld [vmem:[#allocation8_spill] sm:$0xff] }
 0x381   : > { %v2476_v12 = vsub.f32 %v9106_v60, %v2269_v62  ;;  %v2267_v6 = vpop.xlane.xlu0 %2266  ;;  %v9708_v58 = vpop.eup %7118  ;;  %6605 = vmatmul.mubr.f32.gmra.mrb[70].mxu0 %v9702_v26  ;;  %6876 = vmatprep.subr.bf16.mxu1 %v6875_v5 }
 0x382   : > { %7128 = vpow2.f32 %v2646_v1  ;;  %v2475_v4 = vsub.f32 %v12472_v3, %v2267_v6  ;;  %6607 = vmatprep.mubr.f32.mxu0 %v9708_v58  ;;  %v9719_v35 = vpop.f32.mrb[122].mxu1  ;;  %2878 = vadd.xlane.f32.xlu0 %v9629_v48  ;;  %v9728_v6 = vadd.f32 %v9626_v38, %v990_v51  ;;  %v12476_v48 = vld [vmem:[#allocation9_spill] sm:$0xff] }
 0x383   : > { %7130 = vpow2.f32 %v2648_v37  ;;  %v2652_v36 = vmul.f32 1.442695, %v2476_v12  ;;  %2400 = vmax.xlane.f32.xlu1 %v9714_v61  ;;  %v9725_v57 = vpop.f32.mrb[123].mxu1  ;;  %6878 = vmatpush3.bf16.msra.mxu1 %v6875_v5  ;;  %v991_v12 = vld [vmem:[%s12303_s9 + $0x3a0] sm:$0xff]  ;;  %v992_v61 = vld [vmem:[%s12303_s9 + $0x3a8] sm:$0xff] }
 0x384   : > { %v9722_v60 = vpop.eup %7120  ;;  %v2650_v33 = vmul.f32 1.442695, %v2475_v4  ;;  %v2273_v14 = vpop.xlane.xlu1 %2272  ;;  %12473 = vst [vmem:[#allocation8_spill] sm:$0xff] %v9728_v6 }
 0x385   : > { %v2478_v1 = vsub.f32 %v12474_v32, %v2273_v14  ;;  %v2271_v62 = vpop.xlane.xlu0 %2270  ;;  %v9731_v3 = vpop.eup %7122  ;;  %6608 = vmatmul.mubr.f32.gmra.mrb[72].mxu0 %v9722_v60  ;;  %v12478_v14 = vld [vmem:[#allocation12_spill] sm:$0xff] }
 0x386   : > { %12475 = vst [vmem:[#allocation10_spill] sm:$0xff] %v9731_v3  ;;  %7132 = vpow2.f32 %v2650_v33  ;;  %v2477_v30 = vsub.f32 %v12476_v48, %v2271_v62  ;;  %6610 = vmatprep.mubr.f32.mxu0 %v9731_v3  ;;  %v9739_v37 = vpop.f32.mrb[124].mxu1  ;;  %2402 = vmax.xlane.f32.xlu0 %v9728_v6  ;;  %v9754_v6 = vadd.f32 %v9657_v53, %v991_v12 }
 0x387   : > { %7134 = vpow2.f32 %v2652_v36  ;;  %v2656_v38 = vmul.f32 1.442695, %v2478_v1  ;;  %2816 = vadd.xlane.f32.xlu1 %v9319_v46  ;;  %v9745_v4 = vpop.f32.mrb[125].mxu1  ;;  %v12480_v36 = vld [vmem:[#allocation11_spill] sm:$0xff] }
 0x388   : > { %v9742_v51 = vpop.eup %7124  ;;  %v2654_v5 = vmul.f32 1.442695, %v2477_v30  ;;  %v2277_v33 = vpop.xlane.xlu1 %2276 }
 0x389   : > { %12477 = vst [vmem:[#allocation9_spill] sm:$0xff] %v9742_v51  ;;  %v2480_v32 = vsub.f32 %v12478_v14, %v2277_v33  ;;  %v2275_v62 = vpop.xlane.xlu0 %2274  ;;  %v9748_v48 = vpop.eup %7126  ;;  %6611 = vmatmul.mubr.f32.gmra.mrb[74].mxu0 %v9742_v51 }
 0x38a   : > { %12479 = vst [vmem:[#allocation12_spill] sm:$0xff] %v9748_v48  ;;  %7136 = vpow2.f32 %v2654_v5  ;;  %v2479_v30 = vsub.f32 %v12480_v36, %v2275_v62  ;;  %6613 = vmatprep.mubr.f32.mxu0 %v9748_v48  ;;  %v9759_v46 = vpop.f32.mrb[126].mxu1  ;;  %2848 = vadd.xlane.f32.xlu0 %v9461_v49  ;;  %v9768_v5 = vadd.f32 %v9651_v55, %v992_v61  ;;  %v12482_v62 = vld [vmem:[#allocation14_spill] sm:$0xff]  ;;  %v12484_v49 = vld [vmem:[#allocation13_spill] sm:$0xff] }
 0x38b   : > { %7138 = vpow2.f32 %v2656_v38  ;;  %v2660_v33 = vmul.f32 1.442695, %v2480_v32  ;;  %2404 = vmax.xlane.f32.xlu1 %v9754_v6  ;;  %v9765_v53 = vpop.f32.mrb[127].mxu1  ;;  %v993_v38 = vld [vmem:[%s12303_s9 + $0x3b0] sm:$0xff] }
 0x38c   : > { %v9762_v1 = vpop.eup %7128  ;;  %v2658_v14 = vmul.f32 1.442695, %v2479_v30  ;;  %v2281_v12 = vpop.xlane.xlu1 %2280  ;;  %12481 = vst [vmem:[#allocation11_spill] sm:$0xff] %v9768_v5 }
 0x38d   : > { %v2482_v36 = vsub.f32 %v12482_v62, %v2281_v12  ;;  %v2279_v48 = vpop.xlane.xlu0 %2278  ;;  %v9771_v51 = vpop.eup %7130  ;;  %6614 = vmatmul.mubr.f32.gmra.mrb[76].mxu0 %v9762_v1 }
 0x38e   : > { %12483 = vst [vmem:[#allocation14_spill] sm:$0xff] %v9771_v51  ;;  %7140 = vpow2.f32 %v2658_v14  ;;  %v2481_v3 = vsub.f32 %v12484_v49, %v2279_v48  ;;  %6616 = vmatprep.mubr.f32.mxu0 %v9771_v51  ;;  %2406 = vmax.xlane.f32.xlu0 %v9768_v5  ;;  %v12486_v14 = vld [vmem:[#allocation16_spill] sm:$0xff]  ;;  %v9790_v51 = vadd.f32 %v9679_v40, %v993_v38  ;;  %v12488_v5 = vld [vmem:[#allocation15_spill] sm:$0xff]  ;;  %v12490_v38 = vld [vmem:[#allocation18_spill] sm:$0xff] }
 0x38f   : > { %7142 = vpow2.f32 %v2660_v33  ;;  %v2664_v55 = vmul.f32 1.442695, %v2482_v36  ;;  %2850 = vadd.xlane.f32.xlu1 %v9472_v56  ;;  %v994_v49 = vld [vmem:[%s12303_s9 + $0x3b8] sm:$0xff] }
 0x390   : > { %v9780_v61 = vpop.eup %7132  ;;  %v2662_v32 = vmul.f32 1.442695, %v2481_v3  ;;  %v2285_v30 = vpop.xlane.xlu1 %2284  ;;  %12487 = vst [vmem:[#allocation16_spill] sm:$0xff] %v9790_v51  ;;  %v9800_v40 = vadd.f32 %v9673_v17, %v994_v49 }
 0x391   : > { %12485 = vst [vmem:[#allocation13_spill] sm:$0xff] %v9780_v61  ;;  %v2484_v48 = vsub.f32 %v12486_v14, %v2285_v30  ;;  %v2283_v12 = vpop.xlane.xlu0 %2282  ;;  %v9784_v62 = vpop.eup %7134  ;;  %6617 = vmatmul.mubr.f32.gmra.mrb[78].mxu0 %v9780_v61 }
 0x392   : > { %7144 = vpow2.f32 %v2662_v32  ;;  %v2483_v33 = vsub.f32 %v12488_v5, %v2283_v12  ;;  %6619 = vmatprep.mubr.f32.mxu0 %v9784_v62  ;;  %2818 = vadd.xlane.f32.xlu0 %v9321_v9  ;;  %12489 = vst [vmem:[#allocation15_spill] sm:$0xff] %v9800_v40  ;;  %v996_v9 = vld [vmem:[%s12303_s9 + $0x3c8] sm:$0xff]  ;;  %v12491_v12 = vld [vmem:[#allocation17_spill] sm:$0xff] }
 0x393   : > { %7146 = vpow2.f32 %v2664_v55  ;;  %v2668_v3 = vmul.f32 1.442695, %v2484_v48  ;;  %2408 = vmax.xlane.f32.xlu1 %v9790_v51  ;;  %v995_v48 = vld [vmem:[%s12303_s9 + $0x3c0] sm:$0xff] }
 0x394   : > { %v9796_v56 = vpop.eup %7136  ;;  %v2666_v36 = vmul.f32 1.442695, %v2483_v33  ;;  %v2289_v30 = vpop.xlane.xlu1 %2288  ;;  %v9825_v51 = vadd.f32 %v9705_v19, %v995_v48 }
 0x395   : > { %v2486_v32 = vsub.f32 %v12490_v38, %v2289_v30  ;;  %v2287_v5 = vpop.xlane.xlu0 %2286  ;;  %v9803_v14 = vpop.eup %7138  ;;  %6620 = vmatmul.mubr.f32.gmra.mrb[80].mxu0 %v9796_v56  ;;  %v9819_v30 = vadd.f32 %v9693_v11, %v996_v9  ;;  %v12493_v38 = vld [vmem:[#allocation20_spill] sm:$0xff] }
 0x396   : > { %7148 = vpow2.f32 %v2666_v36  ;;  %v2485_v55 = vsub.f32 %v12491_v12, %v2287_v5  ;;  %6622 = vmatprep.mubr.f32.mxu0 %v9803_v14  ;;  %2410 = vmax.xlane.f32.xlu0 %v9800_v40  ;;  %12494 = vst [vmem:[#allocation17_spill] sm:$0xff] %v9825_v51 }
 0x397   : > { %7150 = vpow2.f32 %v2668_v3  ;;  %v2672_v49 = vmul.f32 1.442695, %v2486_v32  ;;  %2880 = vadd.xlane.f32.xlu1 %v9638_v43  ;;  %12492 = vst [vmem:[#allocation18_spill] sm:$0xff] %v9819_v30  ;;  %v998_v3 = vld [vmem:[%s12303_s9 + $0x3d8] sm:$0xff]  ;;  %v12495_v32 = vld [vmem:[#allocation19_spill] sm:$0xff] }
 0x398   : > { %v9815_v17 = vpop.eup %7140  ;;  %v2670_v33 = vmul.f32 1.442695, %v2485_v55  ;;  %v2293_v36 = vpop.xlane.xlu1 %2292  ;;  %v9838_v48 = vadd.f32 %v9719_v35, %v998_v3 }
 0x399   : > { %v2488_v5 = vsub.f32 %v12493_v38, %v2293_v36  ;;  %v2291_v12 = vpop.xlane.xlu0 %2290  ;;  %v9822_v61 = vpop.eup %7142  ;;  %6623 = vmatmul.mubr.f32.gmra.mrb[82].mxu0 %v9815_v17 }
 0x39a   : > { %7152 = vpow2.f32 %v2670_v33  ;;  %v2487_v55 = vsub.f32 %v12495_v32, %v2291_v12  ;;  %6625 = vmatprep.mubr.f32.mxu0 %v9822_v61  ;;  %2414 = vmax.xlane.f32.xlu0 %v9819_v30  ;;  %12496 = vst [vmem:[#allocation20_spill] sm:$0xff] %v9838_v48  ;;  %v12497_v33 = vld [vmem:[#allocation22_spill] sm:$0xff]  ;;  %v12498_v32 = vld [vmem:[#allocation21_spill] sm:$0xff]  ;;  %v12501_v30 = vld [vmem:[#allocation23_spill] sm:$0xff] }
 0x39b   : > { %7154 = vpow2.f32 %v2672_v49  ;;  %v2676_v11 = vmul.f32 1.442695, %v2488_v5  ;;  %2412 = vmax.xlane.f32.xlu1 %v9825_v51  ;;  %v997_v49 = vld [vmem:[%s12303_s9 + $0x3d0] sm:$0xff] }
 0x39c   : > { %v9834_v43 = vpop.eup %7144  ;;  %v2674_v9 = vmul.f32 1.442695, %v2487_v55  ;;  %v2297_v19 = vpop.xlane.xlu1 %2296 }
 0x39d   : > { %v2490_v36 = vsub.f32 %v12497_v33, %v2297_v19  ;;  %v2295_v38 = vpop.xlane.xlu0 %2294  ;;  %v9841_v12 = vpop.eup %7146  ;;  %6626 = vmatmul.mubr.f32.gmra.mrb[84].mxu0 %v9834_v43 }
 0x39e   : > { %7156 = vpow2.f32 %v2674_v9  ;;  %v2489_v40 = vsub.f32 %v12498_v32, %v2295_v38  ;;  %6628 = vmatprep.mubr.f32.mxu0 %v9841_v12  ;;  %2418 = vmax.xlane.f32.xlu0 %v9838_v48  ;;  %v12499_v9 = vld [vmem:[#allocation24_spill] sm:$0xff]  ;;  %v9857_v32 = vadd.f32 %v9725_v57, %v997_v49 }
 0x39f   : > { %7158 = vpow2.f32 %v2676_v11  ;;  %v2680_v5 = vmul.f32 1.442695, %v2490_v36  ;;  %2882 = vadd.xlane.f32.xlu1 %v9654_v25 }
 0x3a0   : > { %v9850_v35 = vpop.eup %7148  ;;  %v2678_v3 = vmul.f32 1.442695, %v2489_v40  ;;  %v2301_v55 = vpop.xlane.xlu1 %2300  ;;  %12500 = vst [vmem:[#allocation19_spill] sm:$0xff] %v9857_v32 }
 0x3a1   : > { %v2492_v19 = vsub.f32 %v12499_v9, %v2301_v55  ;;  %v2299_v33 = vpop.xlane.xlu0 %2298  ;;  %v9854_v38 = vpop.eup %7150  ;;  %6629 = vmatmul.mubr.f32.gmra.mrb[86].mxu0 %v9850_v35  ;;  %v12502_v55 = vld [vmem:[#allocation26_spill] sm:$0xff]  ;;  %v12503_v9 = vld [vmem:[#allocation25_spill] sm:$0xff] }
 0x3a2   : > { %7160 = vpow2.f32 %v2678_v3  ;;  %v2491_v51 = vsub.f32 %v12501_v30, %v2299_v33  ;;  %6631 = vmatprep.mubr.f32.mxu0 %v9854_v38  ;;  %2852 = vadd.xlane.f32.xlu0 %v9476_v10  ;;  %v1000_v30 = vld [vmem:[%s12303_s9 + $0x3e8] sm:$0xff] }
 0x3a3   : > { %7162 = vpow2.f32 %v2680_v5  ;;  %v2684_v25 = vmul.f32 1.442695, %v2492_v19  ;;  %2416 = vmax.xlane.f32.xlu1 %v9857_v32 }
 0x3a4   : > { %v9863_v40 = vpop.eup %7152  ;;  %v2682_v11 = vmul.f32 1.442695, %v2491_v51  ;;  %v2305_v36 = vpop.xlane.xlu1 %2304  ;;  %v999_v51 = vld [vmem:[%s12303_s9 + $0x3e0] sm:$0xff] }
 0x3a5   : > { %v2494_v57 = vsub.f32 %v12502_v55, %v2305_v36  ;;  %v2303_v49 = vpop.xlane.xlu0 %2302  ;;  %v9867_v3 = vpop.eup %7154  ;;  %6632 = vmatmul.mubr.f32.gmra.mrb[88].mxu0 %v9863_v40  ;;  %v9883_v36 = vadd.f32 %v9739_v37, %v1000_v30  ;;  %v12504_v55 = vld [vmem:[#allocation28_spill] sm:$0xff]  ;;  %v9889_v48 = vadd.f32 %v9745_v4, %v999_v51  ;;  %v12506_v51 = vld [vmem:[#allocation30_spill] sm:$0xff] }
 0x3a6   : > { %7164 = vpow2.f32 %v2682_v11  ;;  %v2493_v10 = vsub.f32 %v12503_v9, %v2303_v49  ;;  %6634 = vmatprep.mubr.f32.mxu0 %v9867_v3  ;;  %2822 = vadd.xlane.f32.xlu0 %v9341_v54  ;;  %v1002_v54 = vld [vmem:[%s12303_s9 + $0x3f8] sm:$0xff] }
 0x3a7   : > { %7166 = vpow2.f32 %v2684_v25  ;;  %v2688_v19 = vmul.f32 1.442695, %v2494_v57  ;;  %2820 = vadd.xlane.f32.xlu1 %v9327_v13  ;;  %v12505_v25 = vld [vmem:[#allocation27_spill] sm:$0xff] }
 0x3a8   : > { %v9879_v5 = vpop.eup %7156  ;;  %v2686_v33 = vmul.f32 1.442695, %v2493_v10  ;;  %v2309_v11 = vpop.xlane.xlu1 %2308  ;;  %v9902_v10 = vadd.f32 %v9759_v46, %v1002_v54 }
 0x3a9   : > { %v2496_v49 = vsub.f32 %v12504_v55, %v2309_v11  ;;  %v2307_v9 = vpop.xlane.xlu0 %2306  ;;  %v9886_v32 = vpop.eup %7158  ;;  %6635 = vmatmul.mubr.f32.gmra.mrb[90].mxu0 %v9879_v5 }
 0x3aa   : > { %7168 = vpow2.f32 %v2686_v33  ;;  %v2495_v57 = vsub.f32 %v12505_v25, %v2307_v9  ;;  %6637 = vmatprep.mubr.f32.mxu0 %v9886_v32  ;;  %2422 = vmax.xlane.f32.xlu0 %v9883_v36  ;;  %v12508_v9 = vld [vmem:[#allocation29_spill] sm:$0xff] }
 0x3ab   : > { %7170 = vpow2.f32 %v2688_v19  ;;  %v2692_v37 = vmul.f32 1.442695, %v2496_v49  ;;  %2420 = vmax.xlane.f32.xlu1 %v9889_v48  ;;  %v1001_v19 = vld [vmem:[%s12303_s9 + $0x3f0] sm:$0xff] }
 0x3ac   : > { %v9898_v13 = vpop.eup %7160  ;;  %v2690_v30 = vmul.f32 1.442695, %v2495_v57  ;;  %v2313_v4 = vpop.xlane.xlu1 %2312 }
 0x3ad   : > { %v2498_v33 = vsub.f32 %v12506_v51, %v2313_v4  ;;  %v2311_v11 = vpop.xlane.xlu0 %2310  ;;  %v9905_v55 = vpop.eup %7162  ;;  %6638 = vmatmul.mubr.f32.gmra.mrb[92].mxu0 %v9898_v13 }
 0x3ae   : > { %12507 = vst [vmem:[#allocation22_spill] sm:$0xff] %v9905_v55  ;;  %7172 = vpow2.f32 %v2690_v30  ;;  %v2497_v25 = vsub.f32 %v12508_v9, %v2311_v11  ;;  %6640 = vmatprep.mubr.f32.mxu0 %v9905_v55  ;;  %2426 = vmax.xlane.f32.xlu0 %v9902_v10  ;;  %v9921_v11 = vadd.f32 %v9765_v53, %v1001_v19  ;;  %v12573_v55 = vld [vmem:[#allocation18_spill] sm:$0xff] }
 0x3af   : > { %7174 = vpow2.f32 %v2692_v37  ;;  %v2696_v49 = vmul.f32 1.442695, %v2498_v33  ;;  %2854 = vadd.xlane.f32.xlu1 %v9491_v15 }
 0x3b0   : > { %v9914_v46 = vpop.eup %7164  ;;  %v2694_v54 = vmul.f32 1.442695, %v2497_v25  ;;  %v2317_v57 = vpop.xlane.xlu1 %2316  ;;  %v12510_v25 = vld [vmem:[#allocation32_spill] sm:$0xff] }
 0x3b1   : > { %12509 = vst [vmem:[#allocation21_spill] sm:$0xff] %v9914_v46  ;;  %v2500_v30 = vsub.f32 %v9251_v18, %v2317_v57  ;;  %v2315_v4 = vpop.xlane.xlu0 %2314  ;;  %v9918_v51 = vpop.eup %7166  ;;  %6641 = vmatmul.mubr.f32.gmra.mrb[94].mxu0 %v9914_v46 }
 0x3b2   : > { %7176 = vpow2.f32 %v2694_v54  ;;  %v2499_v9 = vsub.f32 %v9249_v20, %v2315_v4  ;;  %6643 = vmatprep.mubr.f32.mxu0 %v9918_v51  ;;  %2856 = vadd.xlane.f32.xlu0 %v9498_v41  ;;  %v12511_v20 = vld [vmem:[#allocation31_spill] sm:$0xff] }
 0x3b3   : > { %7178 = vpow2.f32 %v2696_v49  ;;  %v2700_v15 = vmul.f32 1.442695, %v2500_v30  ;;  %2424 = vmax.xlane.f32.xlu1 %v9921_v11 }
 0x3b4   : > { %v9927_v37 = vpop.eup %7168  ;;  %v2698_v18 = vmul.f32 1.442695, %v2499_v9  ;;  %v2321_v33 = vpop.xlane.xlu1 %2320  ;;  %v12512_v9 = vld [vmem:[#allocation33_spill] sm:$0xff] }
 0x3b5   : > { %v2502_v53 = vsub.f32 %v12510_v25, %v2321_v33  ;;  %v2319_v19 = vpop.xlane.xlu0 %2318  ;;  %v9931_v54 = vpop.eup %7170  ;;  %6644 = vmatmul.mubr.f32.gmra.mrb[96].mxu0 %v9927_v37 }
 0x3b6   : > { %7180 = vpow2.f32 %v2698_v18  ;;  %v2501_v57 = vsub.f32 %v12511_v20, %v2319_v19  ;;  %6646 = vmatprep.mubr.f32.mxu0 %v9931_v54  ;;  %2826 = vadd.xlane.f32.xlu0 %v9361_v34 }
 0x3b7   : > { %7182 = vpow2.f32 %v2700_v15  ;;  %v2704_v49 = vmul.f32 1.442695, %v2502_v53  ;;  %2884 = vadd.xlane.f32.xlu1 %v9663_v29 }
 0x3b8   : > { %v9937_v41 = vpop.eup %7172  ;;  %v2702_v30 = vmul.f32 1.442695, %v2501_v57  ;;  %v2325_v4 = vpop.xlane.xlu1 %2324 }
 0x3b9   : > { %v2504_v33 = vsub.f32 %v12512_v9, %v2325_v4  ;;  %v2323_v25 = vpop.xlane.xlu0 %2322  ;;  %v9941_v18 = vpop.eup %7174  ;;  %6647 = vmatmul.mubr.f32.gmra.mrb[98].mxu0 %v9937_v41 }
 0x3ba   : > { %7184 = vpow2.f32 %v2702_v30  ;;  %v2503_v19 = vsub.f32 %v9275_v44, %v2323_v25  ;;  %6649 = vmatprep.mubr.f32.mxu0 %v9941_v18  ;;  %2860 = vadd.xlane.f32.xlu0 %v9521_v0  ;;  %v4400_v25 = vld [vmem:[%s12297_s3 + $0x18] sm:$0xff] }
 0x3bb   : > { %7186 = vpow2.f32 %v2704_v49  ;;  %v2708_v15 = vmul.f32 1.442695, %v2504_v33  ;;  %2886 = vadd.xlane.f32.xlu1 %v9676_v45 }
 0x3bc   : > { %v9947_v34 = vpop.eup %7176  ;;  %v2706_v29 = vmul.f32 1.442695, %v2503_v19  ;;  %v2329_v53 = vpop.xlane.xlu1 %2328 }
 0x3bd   : > { %v2506_v20 = vsub.f32 %v9291_v42, %v2329_v53  ;;  %v2327_v57 = vpop.xlane.xlu0 %2326  ;;  %v9951_v30 = vpop.eup %7178  ;;  %6650 = vmatmul.mubr.f32.gmra.mrb[100].mxu0 %v9947_v34 }
 0x3be   : > { %7188 = vpow2.f32 %v2706_v29  ;;  %v2505_v44 = vsub.f32 %v9289_v23, %v2327_v57  ;;  %6652 = vmatprep.mubr.f32.mxu0 %v9951_v30  ;;  %2830 = vadd.xlane.f32.xlu0 %v9381_v27  ;;  %v12513_v23 = vld [vmem:[#allocation34_spill] sm:$0xff]  ;;  %v4399_v27 = vld [vmem:[%s12297_s3 + $0x10] sm:$0xff] }
 0x3bf   : > { %7190 = vpow2.f32 %v2708_v15  ;;  %v2712_v49 = vmul.f32 1.442695, %v2506_v20  ;;  %2824 = vadd.xlane.f32.xlu1 %v9347_v24  ;;  %v6879_v24 = vpack.c.bf16 %v4400_v25, %v4399_v27  ;;  %v12514_v57 = vld [vmem:[#allocation35_spill] sm:$0xff]  ;;  %v12516_v27 = vld [vmem:[#allocation36_spill] sm:$0xff] }
 0x3c0   : > { %v9957_v0 = vpop.eup %7180  ;;  %v2710_v45 = vmul.f32 1.442695, %v2505_v44  ;;  %v9960_v42 = vpop.xlane.xlu1 %2814 }
 0x3c1   : > { %v2331_v4 = vpop.xlane.xlu0 %2330  ;;  %v9962_v9 = vpop.eup %7182  ;;  %6653 = vmatmul.mubr.f32.gmra.mrb[102].mxu0 %v9957_v0  ;;  %6880 = vmatprep.subr.bf16.mxu1 %v6879_v24 }
 0x3c2   : > { %7192 = vpow2.f32 %v2710_v45  ;;  %v2507_v33 = vsub.f32 %v12513_v23, %v2331_v4  ;;  %6655 = vmatprep.mubr.f32.mxu0 %v9962_v9  ;;  %2864 = vadd.xlane.f32.xlu0 %v9544_v28  ;;  %v12515_v4 = vld [vmem:[#allocation37_spill] sm:$0xff] }
 0x3c3   : > { %7194 = vpow2.f32 %v2712_v49  ;;  %2858 = vadd.xlane.f32.xlu1 %v9514_v16  ;;  %6882 = vmatpush3.bf16.msra.mxu1 %v6879_v24 }
 0x3c4   : > { %v9974_v19 = vpop.eup %7184  ;;  %v2714_v15 = vmul.f32 1.442695, %v2507_v33  ;;  %v9977_v29 = vpop.xlane.xlu1 %2812 }
 0x3c5   : > { %v2335_v53 = vpop.xlane.xlu0 %2334  ;;  %v9979_v20 = vpop.eup %7186  ;;  %6656 = vmatmul.mubr.f32.gmra.mrb[104].mxu0 %v9974_v19 }
 0x3c6   : > { %7196 = vpow2.f32 %v2714_v15  ;;  %v2509_v44 = vsub.f32 %v12514_v57, %v2335_v53  ;;  %6658 = vmatprep.mubr.f32.mxu0 %v9979_v20  ;;  %2834 = vadd.xlane.f32.xlu0 %v9401_v50 }
 0x3c7   : > { %2888 = vadd.xlane.f32.xlu1 %v9685_v31 }
 0x3c8   : > { %v9985_v28 = vpop.eup %7188  ;;  %v2333_v16 = vpop.xlane.xlu1 %2332  ;;  %v2718_v33 = vmul.f32 1.442695, %v2509_v44 }
 0x3c9   : > { %v2339_v49 = vpop.xlane.xlu0 %2338  ;;  %v9988_v45 = vpop.eup %7190  ;;  %v2508_v23 = vsub.f32 %v12515_v4, %v2333_v16  ;;  %6659 = vmatmul.mubr.f32.gmra.mrb[106].mxu0 %v9985_v28  ;;  %v12518_v16 = vld [vmem:[#allocation38_spill] sm:$0xff]  ;;  %v12519_v4 = vld [vmem:[#allocation40_spill] sm:$0xff] }
 0x3ca   : > { %v2511_v25 = vsub.f32 %v12516_v27, %v2339_v49  ;;  %6661 = vmatprep.mubr.f32.mxu0 %v9988_v45  ;;  %2868 = vadd.xlane.f32.xlu0 %v9567_v59 }
 0x3cb   : > { %v2716_v24 = vmul.f32 1.442695, %v2508_v23  ;;  %2890 = vadd.xlane.f32.xlu1 %v9702_v26 }
 0x3cc   : > { %v9995_v50 = vpop.eup %7192  ;;  %v2337_v31 = vpop.xlane.xlu1 %2336  ;;  %v2722_v44 = vmul.f32 1.442695, %v2511_v25  ;;  %v12520_v25 = vld [vmem:[#allocation39_spill] sm:$0xff] }
 0x3cd   : > { %v2343_v15 = vpop.xlane.xlu0 %2342  ;;  %v9998_v53 = vpop.eup %7194  ;;  %7198 = vpow2.f32 %v2716_v24  ;;  %v2510_v57 = vsub.f32 %v9349_v2, %v2337_v31  ;;  %6662 = vmatmul.mubr.f32.gmra.mrb[108].mxu0 %v9995_v50 }
 0x3ce   : > { %12517 = vst [vmem:[#allocation24_spill] sm:$0xff] %v9998_v53  ;;  %7200 = vpow2.f32 %v2718_v33  ;;  %v2513_v49 = vsub.f32 %v12518_v16, %v2343_v15  ;;  %6664 = vmatprep.mubr.f32.mxu0 %v9998_v53  ;;  %2838 = vadd.xlane.f32.xlu0 %v9421_v21 }
 0x3cf   : > { %v2720_v26 = vmul.f32 1.442695, %v2510_v57  ;;  %2828 = vadd.xlane.f32.xlu1 %v12519_v4 }
 0x3d0   : > { %v10005_v59 = vpop.eup %7196  ;;  %v2341_v23 = vpop.xlane.xlu1 %2340  ;;  %v2726_v33 = vmul.f32 1.442695, %v2513_v49 }
 0x3d1   : > { %v2347_v27 = vpop.xlane.xlu0 %2346  ;;  %7202 = vpow2.f32 %v2720_v26  ;;  %v2512_v2 = vsub.f32 %v9369_v47, %v2341_v23  ;;  %6665 = vmatmul.mubr.f32.gmra.mrb[110].mxu0 %v10005_v59  ;;  %v12521_v26 = vld [vmem:[#allocation41_spill] sm:$0xff] }
 0x3d2   : > { %7204 = vpow2.f32 %v2722_v44  ;;  %v2515_v24 = vsub.f32 %v12520_v25, %v2347_v27  ;;  %2872 = vadd.xlane.f32.xlu0 %v9590_v22  ;;  %v12522_v27 = vld [vmem:[#allocation43_spill] sm:$0xff] }
 0x3d3   : > { %v2724_v31 = vmul.f32 1.442695, %v2512_v2  ;;  %2862 = vadd.xlane.f32.xlu1 %v9537_v7 }
 0x3d4   : > { %v2345_v21 = vpop.xlane.xlu1 %2344  ;;  %v2730_v16 = vmul.f32 1.442695, %v2515_v24 }
 0x3d5   : > { %v2351_v15 = vpop.xlane.xlu0 %2350  ;;  %7206 = vpow2.f32 %v2724_v31  ;;  %v2514_v57 = vsub.f32 %v9389_v52, %v2345_v21 }
 0x3d6   : > { %7208 = vpow2.f32 %v2726_v33  ;;  %v2517_v47 = vsub.f32 %v12521_v26, %v2351_v15  ;;  %2842 = vadd.xlane.f32.xlu0 %v9443_v8  ;;  %v12524_v15 = vld [vmem:[#allocation45_spill] sm:$0xff] }
 0x3d7   : > { %v10016_v44 = vpop.eup %7198  ;;  %v2728_v49 = vmul.f32 1.442695, %v2514_v57  ;;  %2892 = vadd.xlane.f32.xlu1 %v9708_v58 }
 0x3d8   : > { %v10019_v22 = vpop.eup %7200  ;;  %v2349_v4 = vpop.xlane.xlu1 %2348  ;;  %6667 = vmatprep.mubr.f32.mxu0 %v10016_v44  ;;  %v2734_v23 = vmul.f32 1.442695, %v2517_v47 }
 0x3d9   : > { %v2355_v7 = vpop.xlane.xlu0 %2354  ;;  %7210 = vpow2.f32 %v2728_v49  ;;  %v2516_v52 = vsub.f32 %v9409_v39, %v2349_v4  ;;  %6668 = vmatmul.mubr.f32.gmra.mrb[112].mxu0 %v10019_v22  ;;  %v12523_v39 = vld [vmem:[#allocation47_spill] sm:$0xff]  ;;  %v12526_v4 = vld [vmem:[#allocation49_spill] sm:$0xff] }
 0x3da   : > { %7212 = vpow2.f32 %v2730_v16  ;;  %v2519_v8 = vsub.f32 %v12522_v27, %v2355_v7  ;;  %2910 = vadd.xlane.f32.xlu0 %v9796_v56  ;;  %v12525_v16 = vld [vmem:[#allocation42_spill] sm:$0xff] }
 0x3db   : > { %v10026_v2 = vpop.eup %7202  ;;  %v2732_v58 = vmul.f32 1.442695, %v2516_v52  ;;  %2894 = vadd.xlane.f32.xlu1 %v9722_v60 }
 0x3dc   : > { %v10029_v33 = vpop.eup %7204  ;;  %v2353_v25 = vpop.xlane.xlu1 %2352  ;;  %6670 = vmatprep.mubr.f32.mxu0 %v10026_v2  ;;  %v2738_v21 = vmul.f32 1.442695, %v2519_v8 }
 0x3dd   : > { %v2359_v24 = vpop.xlane.xlu0 %2358  ;;  %7214 = vpow2.f32 %v2732_v58  ;;  %v2518_v31 = vsub.f32 %v12523_v39, %v2353_v25  ;;  %6671 = vmatmul.mubr.f32.gmra.mrb[114].mxu0 %v10029_v33  ;;  %v12529_v39 = vld [vmem:[#allocation50_spill] sm:$0xff] }
 0x3de   : > { %7216 = vpow2.f32 %v2734_v23  ;;  %v2521_v56 = vsub.f32 %v12524_v15, %v2359_v24  ;;  %2942 = vadd.xlane.f32.xlu0 %v9927_v37  ;;  %v12527_v23 = vld [vmem:[#allocation48_spill] sm:$0xff] }
 0x3df   : > { %v10036_v57 = vpop.eup %7206  ;;  %v2736_v60 = vmul.f32 1.442695, %v2518_v31  ;;  %2832 = vadd.xlane.f32.xlu1 %v12525_v16 }
 0x3e0   : > { %v10039_v26 = vpop.eup %7208  ;;  %v2357_v47 = vpop.xlane.xlu1 %2356  ;;  %6673 = vmatprep.mubr.f32.mxu0 %v10036_v57  ;;  %v2742_v52 = vmul.f32 1.442695, %v2521_v56 }
 0x3e1   : > { %v2363_v49 = vpop.xlane.xlu0 %2362  ;;  %7218 = vpow2.f32 %v2736_v60  ;;  %v2520_v7 = vsub.f32 %v12526_v4, %v2357_v47  ;;  %6674 = vmatmul.mubr.f32.gmra.mrb[116].mxu0 %v10039_v26  ;;  %v12532_v47 = vld [vmem:[#allocation51_spill] sm:$0xff] }
 0x3e2   : > { %7220 = vpow2.f32 %v2738_v21  ;;  %v2523_v37 = vsub.f32 %v12527_v23, %v2363_v49  ;;  %2946 = vadd.xlane.f32.xlu0 %v9937_v41 }
 0x3e3   : > { %v10046_v27 = vpop.eup %7210  ;;  %v2740_v8 = vmul.f32 1.442695, %v2520_v7  ;;  %2866 = vadd.xlane.f32.xlu1 %v9560_v63  ;;  %v12531_v63 = vld [vmem:[#allocation10_spill] sm:$0xff]  ;;  %v12534_v7 = vld [vmem:[#allocation9_spill] sm:$0xff] }
 0x3e4   : > { %12528 = vst [vmem:[#allocation23_spill] sm:$0xff] %v10046_v27  ;;  %v10049_v58 = vpop.eup %7212  ;;  %v2361_v25 = vpop.xlane.xlu1 %2360  ;;  %6676 = vmatprep.mubr.f32.mxu0 %v10046_v27  ;;  %v2746_v21 = vmul.f32 1.442695, %v2523_v37  ;;  %v7616_v27 = vld [vmem:[%s12302_s8 + $0x88] sm:$0xff] }
 0x3e5   : > { %v10052_v24 = vpop.xlane.xlu0 %2846  ;;  %7222 = vpow2.f32 %v2740_v8  ;;  %v2522_v31 = vsub.f32 %v12529_v39, %v2361_v25  ;;  %6677 = vmatmul.mubr.f32.gmra.mrb[118].mxu0 %v10049_v58  ;;  %v12535_v8 = vld [vmem:[#allocation53_spill] sm:$0xff]  ;;  %v12536_v39 = vld [vmem:[#allocation52_spill] sm:$0xff] }
 0x3e6   : > { %7224 = vpow2.f32 %v2742_v52  ;;  %2950 = vadd.xlane.f32.xlu0 %v9947_v34 }
 0x3e7   : > { %v10057_v41 = vpop.eup %7214  ;;  %v2744_v15 = vmul.f32 1.442695, %v2522_v31  ;;  %2896 = vadd.xlane.f32.xlu1 %v12531_v63  ;;  %v12538_v63 = vld [vmem:[#allocation44_spill] sm:$0xff] }
 0x3e8   : > { %12530 = vst [vmem:[#allocation26_spill] sm:$0xff] %v10057_v41  ;;  %v10060_v56 = vpop.eup %7216  ;;  %v2365_v60 = vpop.xlane.xlu1 %2364  ;;  %6679 = vmatprep.mubr.f32.mxu0 %v10057_v41 }
 0x3e9   : > { %v10063_v16 = vpop.xlane.xlu0 %2844  ;;  %7226 = vpow2.f32 %v2744_v15  ;;  %v2524_v49 = vsub.f32 %v12532_v47, %v2365_v60  ;;  %6680 = vmatmul.mubr.f32.gmra.mrb[120].mxu0 %v10060_v56 }
 0x3ea   : > { %7228 = vpow2.f32 %v2746_v21  ;;  %2954 = vadd.xlane.f32.xlu0 %v9957_v0 }
 0x3eb   : > { %v10068_v34 = vpop.eup %7218  ;;  %v2748_v4 = vmul.f32 1.442695, %v2524_v49  ;;  %2898 = vadd.xlane.f32.xlu1 %v12534_v7 }
 0x3ec   : > { %12533 = vst [vmem:[#allocation25_spill] sm:$0xff] %v10068_v34  ;;  %v10071_v52 = vpop.eup %7220  ;;  %v2369_v23 = vpop.xlane.xlu1 %2368  ;;  %6682 = vmatprep.mubr.f32.mxu0 %v10068_v34 }
 0x3ed   : > { %v2367_v37 = vpop.xlane.xlu0 %2366  ;;  %7230 = vpow2.f32 %v2748_v4  ;;  %v2526_v25 = vsub.f32 %v12535_v8, %v2369_v23  ;;  %6683 = vmatmul.mubr.f32.gmra.mrb[122].mxu0 %v10071_v52  ;;  %v12539_v4 = vld [vmem:[#allocation55_spill] sm:$0xff]  ;;  %v12540_v23 = vld [vmem:[#allocation54_spill] sm:$0xff] }
 0x3ee   : > { %v2525_v31 = vsub.f32 %v12536_v39, %v2367_v37  ;;  %2958 = vadd.xlane.f32.xlu0 %v9974_v19  ;;  %v12542_v39 = vld [vmem:[#allocation60_spill] sm:$0xff] }
 0x3ef   : > { %v10078_v0 = vpop.eup %7222  ;;  %v2752_v21 = vmul.f32 1.442695, %v2526_v25  ;;  %2836 = vadd.xlane.f32.xlu1 %v12538_v63 }
 0x3f0   : > { %12537 = vst [vmem:[#allocation28_spill] sm:$0xff] %v10078_v0  ;;  %v2750_v15 = vmul.f32 1.442695, %v2525_v31  ;;  %v10081_v60 = vpop.eup %7224  ;;  %v2373_v47 = vpop.xlane.xlu1 %2372  ;;  %6685 = vmatprep.mubr.f32.mxu0 %v10078_v0 }
 0x3f1   : > { %v2371_v49 = vpop.xlane.xlu0 %2370  ;;  %7232 = vpow2.f32 %v2752_v21  ;;  %v2528_v7 = vsub.f32 %v12539_v4, %v2373_v47  ;;  %6686 = vmatmul.mubr.f32.gmra.mrb[124].mxu0 %v10081_v60  ;;  %v12544_v47 = vld [vmem:[#allocation57_spill] sm:$0xff]  ;;  %v12545_v4 = vld [vmem:[#allocation56_spill] sm:$0xff] }
 0x3f2   : > { %v2527_v37 = vsub.f32 %v12540_v23, %v2371_v49  ;;  %7234 = vpow2.f32 %v2750_v15  ;;  %2962 = vadd.xlane.f32.xlu0 %v9985_v28 }
 0x3f3   : > { %v10088_v19 = vpop.eup %7226  ;;  %v2756_v8 = vmul.f32 1.442695, %v2528_v7  ;;  %2870 = vadd.xlane.f32.xlu1 %v12542_v39 }
 0x3f4   : > { %12541 = vst [vmem:[#allocation27_spill] sm:$0xff] %v10088_v19  ;;  %v2754_v25 = vmul.f32 1.442695, %v2527_v37  ;;  %v10091_v31 = vpop.eup %7228  ;;  %v2377_v63 = vpop.xlane.xlu1 %2376  ;;  %6688 = vmatprep.mubr.f32.mxu0 %v10088_v19  ;;  %v12546_v37 = vld [vmem:[#allocation12_spill] sm:$0xff] }
 0x3f5   : > { %12543 = vst [vmem:[#allocation30_spill] sm:$0xff] %v10091_v31  ;;  %v2375_v21 = vpop.xlane.xlu0 %2374  ;;  %7236 = vpow2.f32 %v2756_v8  ;;  %v2530_v49 = vsub.f32 %v12544_v47, %v2377_v63  ;;  %6689 = vmatmul.mubr.f32.gmra.mrb[126].mxu0 %v10091_v31  ;;  %v12547_v63 = vld [vmem:[#allocation59_spill] sm:$0xff]  ;;  %v12548_v47 = vld [vmem:[#allocation58_spill] sm:$0xff] }
 0x3f6   : > { %v2529_v23 = vsub.f32 %v12545_v4, %v2375_v21  ;;  %7238 = vpow2.f32 %v2754_v25  ;;  %2966 = vadd.xlane.f32.xlu0 %v9995_v50 }
 0x3f7   : > { %v10098_v28 = vpop.eup %7230  ;;  %v2760_v15 = vmul.f32 1.442695, %v2530_v49  ;;  %2900 = vadd.xlane.f32.xlu1 %v12546_v37  ;;  %7240 = vrcp.f32 %v9960_v42 }
 0x3f8   : > { %v2758_v7 = vmul.f32 1.442695, %v2529_v23  ;;  %v2381_v39 = vpop.xlane.xlu1 %2380  ;;  %6691 = vmatprep.mubr.f32.mxu0 %v10098_v28 }
 0x3f9   : > { %v2379_v8 = vpop.xlane.xlu0 %2378  ;;  %7242 = vpow2.f32 %v2760_v15  ;;  %v2532_v21 = vsub.f32 %v12547_v63, %v2381_v39  ;;  %v12549_v15 = vld [vmem:[#allocation62_spill] sm:$0xff] }
 0x3fa   : > { %v2531_v4 = vsub.f32 %v12548_v47, %v2379_v8  ;;  %7244 = vpow2.f32 %v2758_v7  ;;  %2974 = vadd.xlane.f32.xlu0 %v10019_v22  ;;  %v12550_v7 = vld [vmem:[#allocation61_spill] sm:$0xff]  ;;  %v12551_v63 = vld [vmem:[#allocation46_spill] sm:$0xff] }
 0x3fb   : > { %v10106_v50 = vpop.eup %7232  ;;  %7246 = vrcp.f32 %v9977_v29  ;;  %v2764_v25 = vmul.f32 1.442695, %v2532_v21  ;;  %2902 = vadd.xlane.f32.xlu1 %v9762_v1 }
 0x3fc   : > { %v2762_v49 = vmul.f32 1.442695, %v2531_v4  ;;  %v10110_v42 = vpop.eup %7234  ;;  %v2385_v23 = vpop.xlane.xlu1 %2384 }
 0x3fd   : > { %v2383_v37 = vpop.xlane.xlu0 %2382  ;;  %7248 = vpow2.f32 %v2764_v25  ;;  %v2534_v39 = vsub.f32 %v12549_v15, %v2385_v23  ;;  %6692 = vmatmul.mubr.f32.gmra.mrb[128].mxu0 %v10110_v42  ;;  %v12552_v25 = vld [vmem:[#allocation65_spill] sm:$0xff] }
 0x3fe   : > { %v2533_v8 = vsub.f32 %v12550_v7, %v2383_v37  ;;  %7250 = vpow2.f32 %v2762_v49  ;;  %6694 = vmatprep.mubr.f32.mxu0 %v10106_v50  ;;  %2978 = vadd.xlane.f32.xlu0 %v10029_v33  ;;  %v12553_v49 = vld [vmem:[#allocation64_spill] sm:$0xff] }
 0x3ff   : > { %v10117_v29 = vpop.eup %7236  ;;  %v2768_v22 = vmul.f32 1.442695, %v2534_v39  ;;  %2840 = vadd.xlane.f32.xlu1 %v12551_v63 }
 0x400   : > { %v2766_v1 = vmul.f32 1.442695, %v2533_v8  ;;  %v10120_v21 = vpop.eup %7238  ;;  %v2389_v47 = vpop.xlane.xlu1 %2388 }
 0x401   : > { %v2387_v4 = vpop.xlane.xlu0 %2386  ;;  %7252 = vpow2.f32 %v2768_v22  ;;  %v2536_v23 = vsub.f32 %v12552_v25, %v2389_v47  ;;  %6695 = vmatmul.mubr.f32.gmra.mrb[130].mxu0 %v10120_v21  ;;  %v7241_v15 = vpop.eup %7240 }
 0x402   : > { %v2535_v37 = vsub.f32 %v12553_v49, %v2387_v4  ;;  %7254 = vpow2.f32 %v2766_v1  ;;  %6697 = vmatprep.mubr.f32.mxu0 %v10117_v29  ;;  %2982 = vadd.xlane.f32.xlu0 %v10039_v26  ;;  %v4401_v1 = vld [vmem:[%s12297_s3 + $0x20] sm:$0xff]  ;;  %v4402_v26 = vld [vmem:[%s12297_s3 + $0x28] sm:$0xff] }
 0x403   : > { %v10127_v33 = vpop.eup %7242  ;;  %v2772_v39 = vmul.f32 1.442695, %v2536_v23  ;;  %2908 = vadd.xlane.f32.xlu1 %v9784_v62  ;;  %v6549_v8 = vpop.f32.mrb[32].mxu0  ;;  %v12554_v23 = vld [vmem:[#allocation67_spill] sm:$0xff]  ;;  %v12555_v62 = vld [vmem:[#allocation66_spill] sm:$0xff] }
 0x404   : > { %v2770_v7 = vmul.f32 1.442695, %v2535_v37  ;;  %v10130_v22 = vpop.eup %7244  ;;  %v2393_v63 = vpop.xlane.xlu1 %2392  ;;  %v10132_v47 = vmul.f32 %v7241_v15, %v6549_v8  ;;  %v6883_v15 = vpack.c.bf16 %v4402_v26, %v4401_v1  ;;  %v12557_v1 = vld [vmem:[#allocation68_spill] sm:$0xff] }
 0x405   : > { %v2391_v25 = vpop.xlane.xlu0 %2390  ;;  %v7247_v4 = vpop.eup %7246  ;;  %7256 = vpow2.f32 %v2772_v39  ;;  %v2538_v49 = vsub.f32 %v12554_v23, %v2393_v63  ;;  %6698 = vmatmul.mubr.f32.gmra.mrb[132].mxu0 %v10130_v22 }
 0x406   : > { %v2537_v37 = vsub.f32 %v12555_v62, %v2391_v25  ;;  %v3134_v31 = vpop.f32.mrb[33].mxu0  ;;  %7258 = vpow2.f32 %v2770_v7  ;;  %6700 = vmatprep.mubr.f32.mxu0 %v10127_v33  ;;  %2986 = vadd.xlane.f32.xlu0 %v10049_v58  ;;  %v12556_v7 = vld [vmem:[#allocation69_spill] sm:$0xff] }
 0x407   : > { %v10143_v8 = vmul.f32 %v7247_v4, %v3134_v31  ;;  %v10147_v19 = vpop.eup %7248  ;;  %v2776_v0 = vmul.f32 1.442695, %v2538_v49  ;;  %2914 = vadd.xlane.f32.xlu1 %v9815_v17  ;;  %6884 = vmatprep.subr.bf16.mxu1 %v6883_v15 }
 0x408   : > { %v2774_v53 = vmul.f32 1.442695, %v2537_v37  ;;  %v10150_v39 = vpop.eup %7250  ;;  %v2397_v63 = vpop.xlane.xlu1 %2396  ;;  %6886 = vmatpush3.bf16.msra.mxu1 %v6883_v15 }
 0x409   : > { %v2395_v25 = vpop.xlane.xlu0 %2394  ;;  %7260 = vpow2.f32 %v2776_v0  ;;  %v2540_v31 = vsub.f32 %v12556_v7, %v2397_v63  ;;  %6701 = vmatmul.mubr.f32.gmra.mrb[134].mxu0 %v10150_v39 }
 0x40a   : > { %v2539_v26 = vsub.f32 %v12557_v1, %v2395_v25  ;;  %7262 = vpow2.f32 %v2774_v53  ;;  %6703 = vmatprep.mubr.f32.mxu0 %v10147_v19  ;;  %2990 = vadd.xlane.f32.xlu0 %v10060_v56  ;;  %v12558_v56 = vld [vmem:[#allocation70_spill] sm:$0xff] }
 0x40b   : > { %v10157_v58 = vpop.eup %7252  ;;  %v2780_v17 = vmul.f32 1.442695, %v2540_v31  ;;  %2912 = vadd.xlane.f32.xlu1 %v9803_v14  ;;  %v12559_v31 = vld [vmem:[#allocation71_spill] sm:$0xff] }
 0x40c   : > { %v2778_v4 = vmul.f32 1.442695, %v2539_v26  ;;  %v10160_v23 = vpop.eup %7254  ;;  %v10162_v0 = vpop.xlane.xlu1 %2876 }
 0x40d   : > { %v10164_v49 = vpop.f32.mrb[34].mxu0  ;;  %7264 = vpow2.f32 %v2780_v17  ;;  %6704 = vmatmul.mubr.f32.gmra.mrb[136].mxu0 %v10160_v23  ;;  %v2399_v53 = vpop.xlane.xlu0 %2398 }
 0x40e   : > { %v10167_v62 = vpop.f32.mrb[35].mxu0  ;;  %7266 = vpow2.f32 %v2778_v4  ;;  %v2541_v37 = vsub.f32 %v12558_v56, %v2399_v53  ;;  %6706 = vmatprep.mubr.f32.mxu0 %v10157_v58  ;;  %2994 = vadd.xlane.f32.xlu0 %v10071_v52 }
 0x40f   : > { %v10172_v14 = vpop.eup %7256  ;;  %2918 = vadd.xlane.f32.xlu1 %v9834_v43 }
 0x410   : > { %v10175_v15 = vpop.eup %7258  ;;  %v2782_v63 = vmul.f32 1.442695, %v2541_v37  ;;  %v2401_v25 = vpop.xlane.xlu1 %2400 }
 0x411   : > { %v10177_v7 = vpop.f32.mrb[36].mxu0  ;;  %v2542_v1 = vsub.f32 %v12559_v31, %v2401_v25  ;;  %6707 = vmatmul.mubr.f32.gmra.mrb[138].mxu0 %v10175_v15  ;;  %v10181_v26 = vpop.xlane.xlu0 %2878 }
 0x412   : > { %v10183_v17 = vpop.f32.mrb[37].mxu0  ;;  %7268 = vpow2.f32 %v2782_v63  ;;  %6709 = vmatprep.mubr.f32.mxu0 %v10172_v14  ;;  %2970 = vadd.xlane.f32.xlu0 %v10005_v59  ;;  %v12561_v63 = vld [vmem:[#allocation8_spill] sm:$0xff] }
 0x413   : > { %v10187_v43 = vpop.eup %7260  ;;  %v2784_v52 = vmul.f32 1.442695, %v2542_v1  ;;  %2916 = vadd.xlane.f32.xlu1 %v9822_v61 }
 0x414   : > { %12560 = vst [vmem:[#allocation29_spill] sm:$0xff] %v10187_v43  ;;  %v10190_v4 = vpop.eup %7262  ;;  %v2817_v53 = vpop.xlane.xlu1 %2816 }
 0x415   : > { %v10192_v56 = vpop.f32.mrb[38].mxu0  ;;  %7270 = vpow2.f32 %v2784_v52  ;;  %6710 = vmatmul.mubr.f32.gmra.mrb[140].mxu0 %v10190_v4  ;;  %v2403_v37 = vpop.xlane.xlu0 %2402 }
 0x416   : > { %v10195_v25 = vpop.f32.mrb[39].mxu0  ;;  %7272 = vrcp.f32 %v2817_v53  ;;  %v2543_v31 = vsub.f32 %v12561_v63, %v2403_v37  ;;  %6712 = vmatprep.mubr.f32.mxu0 %v10187_v43  ;;  %2998 = vadd.xlane.f32.xlu0 %v10081_v60 }
 0x417   : > { %v10200_v59 = vpop.eup %7264  ;;  %2922 = vadd.xlane.f32.xlu1 %v9850_v35 }
 0x418   : > { %v10203_v61 = vpop.eup %7266  ;;  %v2786_v1 = vmul.f32 1.442695, %v2543_v31  ;;  %v2405_v52 = vpop.xlane.xlu1 %2404 }
 0x419   : > { %12562 = vst [vmem:[#allocation32_spill] sm:$0xff] %v10203_v61  ;;  %v10205_v34 = vpop.f32.mrb[40].mxu0  ;;  %v2544_v46 = vsub.f32 %v9754_v6, %v2405_v52  ;;  %6713 = vmatmul.mubr.f32.gmra.mrb[142].mxu0 %v10203_v61  ;;  %v2849_v53 = vpop.xlane.xlu0 %2848 }
 0x41a   : > { %v10209_v37 = vpop.f32.mrb[41].mxu0  ;;  %7274 = vpow2.f32 %v2786_v1  ;;  %6715 = vmatprep.mubr.f32.mxu0 %v10200_v59  ;;  %3006 = vadd.xlane.f32.xlu0 %v10110_v42  ;;  %v12565_v1 = vld [vmem:[#allocation11_spill] sm:$0xff] }
 0x41b   : > { %12563 = vst [vmem:[#allocation31_spill] sm:$0xff] %v10209_v37  ;;  %v2788_v60 = vmul.f32 1.442695, %v2544_v46  ;;  %2920 = vadd.xlane.f32.xlu1 %v9841_v12 }
 0x41c   : > { %v10214_v35 = vpop.eup %7268  ;;  %v10216_v63 = vpop.f32.mrb[42].mxu0 }
 0x41d   : > { %v2851_v31 = vpop.xlane.xlu1 %2850  ;;  %7276 = vpow2.f32 %v2788_v60  ;;  %6716 = vmatmul.mubr.f32.gmra.mrb[144].mxu0 %v10214_v35  ;;  %v2407_v6 = vpop.xlane.xlu0 %2406 }
 0x41e   : > { %v10219_v52 = vpop.f32.mrb[43].mxu0  ;;  %7278 = vrcp.f32 %v10052_v24  ;;  %v2545_v61 = vsub.f32 %v12565_v1, %v2407_v6  ;;  %3004 = vadd.xlane.f32.xlu0 %v10098_v28 }
 0x41f   : > { %12564 = vst [vmem:[#allocation33_spill] sm:$0xff] %v10219_v52  ;;  %v10224_v46 = vpop.eup %7270  ;;  %7280 = vrcp.f32 %v10063_v16  ;;  %2926 = vadd.xlane.f32.xlu1 %v9863_v40  ;;  %v12567_v52 = vld [vmem:[#allocation16_spill] sm:$0xff] }
 0x420   : > { %v7273_v12 = vpop.eup %7272  ;;  %v2790_v42 = vmul.f32 1.442695, %v2545_v61  ;;  %v10228_v60 = vpop.f32.mrb[44].mxu0  ;;  %6718 = vmatprep.mubr.f32.mxu0 %v10224_v46  ;;  %7282 = vrcp.f32 %v2851_v31 }
 0x421   : > { %12566 = vst [vmem:[#allocation34_spill] sm:$0xff] %v10228_v60  ;;  %v2409_v43 = vpop.xlane.xlu1 %2408  ;;  %v2819_v41 = vpop.xlane.xlu0 %2818  ;;  %v10235_v28 = vmul.f32 %v7273_v12, %v10167_v62 }
 0x422   : > { %v2546_v24 = vsub.f32 %v12567_v52, %v2409_v43  ;;  %v10232_v6 = vpop.f32.mrb[45].mxu0  ;;  %7284 = vpow2.f32 %v2790_v42  ;;  %3010 = vadd.xlane.f32.xlu0 %v10120_v21  ;;  %v12571_v52 = vld [vmem:[#allocation15_spill] sm:$0xff]  ;;  %v7614_v21 = vld [vmem:[%s12302_s8 + $0x8] sm:$0xff] }
 0x423   : > { %12568 = vst [vmem:[#allocation35_spill] sm:$0xff] %v10232_v6  ;;  %7286 = vrcp.f32 %v2819_v41  ;;  %2924 = vadd.xlane.f32.xlu1 %v9854_v38 }
 0x424   : > { %v2792_v40 = vmul.f32 1.442695, %v2546_v24  ;;  %v10239_v16 = vpop.eup %7274  ;;  %7288 = vrcp.f32 %v2849_v53  ;;  %v10241_v61 = vpop.f32.mrb[46].mxu0  ;;  %v4030_v53 = vmul.f32 %v7614_v21, %v10132_v47 }
 0x425   : > { %12569 = vst [vmem:[#allocation37_spill] sm:$0xff] %v10241_v61  ;;  %v10243_v31 = vpop.xlane.xlu1 %2880  ;;  %6719 = vmatmul.mubr.f32.gmra.mrb[146].mxu0 %v10239_v16  ;;  %v2411_v43 = vpop.xlane.xlu0 %2410 }
 0x426   : > { %7290 = vpow2.f32 %v2792_v40  ;;  %v10246_v62 = vpop.f32.mrb[47].mxu0  ;;  %v2547_v1 = vsub.f32 %v12571_v52, %v2411_v43  ;;  %3008 = vadd.xlane.f32.xlu0 %v10106_v50  ;;  %v7615_v50 = vld [vmem:[%s12302_s8] sm:$0xff] }
 0x427   : > { %12570 = vst [vmem:[#allocation36_spill] sm:$0xff] %v10246_v62  ;;  %v10250_v41 = vpop.eup %7276  ;;  %2930 = vadd.xlane.f32.xlu1 %v9879_v5  ;;  %v4029_v43 = vmul.f32 %v7615_v50, %v10143_v8  ;;  %v12572_v52 = vld [vmem:[#allocation17_spill] sm:$0xff] }
 0x428   : > { %v7279_v38 = vpop.eup %7278  ;;  %v2794_v12 = vmul.f32 1.442695, %v2547_v1  ;;  %v6573_v42 = vpop.f32.mrb[48].mxu0  ;;  %6721 = vmatprep.mubr.f32.mxu0 %v10250_v41 }
 0x429   : > { %v2413_v24 = vpop.xlane.xlu1 %2412  ;;  %v7281_v40 = vpop.eup %7280  ;;  %v3918_v5 = vmul.f32 %v7279_v38, %v6573_v42  ;;  %v4172_v38 = vsel %vm409_vm0, %v4030_v53, 0.0 }
 0x42a   : > { %v2548_v61 = vsub.f32 %v12572_v52, %v2413_v24  ;;  %v2415_v62 = vpop.xlane.xlu0 %2414  ;;  %v3214_v6 = vpop.f32.mrb[49].mxu0  ;;  %7292 = vpow2.f32 %v2794_v12  ;;  %3014 = vadd.xlane.f32.xlu0 %v10130_v22  ;;  %v4157_v24 = vsel %vm409_vm0, %v4029_v43, 0.0 }
 0x42b   : > { %v2549_v47 = vsub.f32 %v12573_v55, %v2415_v62  ;;  %v3917_v1 = vmul.f32 %v7281_v40, %v3214_v6  ;;  %v7283_v21 = vpop.eup %7282  ;;  %v4046_v60 = vmul.f32 %v7616_v27, %v3918_v5  ;;  %2928 = vadd.xlane.f32.xlu1 %v9867_v3  ;;  %v7617_v55 = vld [vmem:[%s12302_s8 + $0x80] sm:$0xff] }
 0x42c   : > { %v2796_v37 = vmul.f32 1.442695, %v2548_v61  ;;  %v10269_v8 = vpop.eup %7284  ;;  %v6576_v22 = vpop.f32.mrb[50].mxu0 }
 0x42d   : > { %v2798_v42 = vmul.f32 1.442695, %v2549_v47  ;;  %v4045_v6 = vmul.f32 %v7617_v55, %v3917_v1  ;;  %v10275_v62 = vpop.xlane.xlu1 %2882  ;;  %v7287_v12 = vpop.eup %7286  ;;  %v4173_v27 = vsel %vm409_vm0, %v4046_v60, 0.0  ;;  %v3920_v3 = vmul.f32 %v7283_v21, %v6576_v22  ;;  %6722 = vmatmul.mubr.f32.gmra.mrb[148].mxu0 %v10269_v8  ;;  %v12574_v1 = vld [vmem:[#allocation20_spill] sm:$0xff] }
 0x42e   : > { %7294 = vpow2.f32 %v2796_v37  ;;  %v2419_v61 = vpop.xlane.xlu0 %2418  ;;  %v3224_v53 = vpop.f32.mrb[51].mxu0  ;;  %v10280_v50 = vadd.f32 %v4173_v27, %v4172_v38  ;;  %v3904_v52 = vmul.f32 %v7287_v12, %v10164_v49  ;;  %3012 = vadd.xlane.f32.xlu0 %v10117_v29  ;;  %v7618_v37 = vld [vmem:[%s12302_s8 + $0x98] sm:$0xff]  ;;  %v7620_v29 = vld [vmem:[%s12302_s8 + $0x10] sm:$0xff] }
 0x42f   : > { %v7289_v40 = vpop.eup %7288  ;;  %7296 = vpow2.f32 %v2798_v42  ;;  %v4158_v5 = vsel %vm409_vm0, %v4045_v6, 0.0  ;;  %v4048_v60 = vmul.f32 %v7618_v37, %v3920_v3  ;;  %v2551_v21 = vsub.f32 %v12574_v1, %v2419_v61  ;;  %2934 = vadd.xlane.f32.xlu1 %v9898_v13  ;;  %v7619_v38 = vld [vmem:[%s12302_s8 + $0x18] sm:$0xff] }
 0x430   : > { %v10285_v47 = vpop.eup %7290  ;;  %v10287_v43 = vadd.f32 %v4158_v5, %v4157_v24  ;;  %v4032_v49 = vmul.f32 %v7619_v38, %v3904_v52  ;;  %v3919_v42 = vmul.f32 %v7289_v40, %v3224_v53  ;;  %v4031_v55 = vmul.f32 %v7620_v29, %v10235_v28  ;;  %v10301_v6 = vpop.f32.mrb[52].mxu0  ;;  %v12575_v24 = vld [vmem:[#allocation19_spill] sm:$0xff] }
 0x431   : > { %v2417_v22 = vpop.xlane.xlu1 %2416  ;;  %6724 = vmatprep.mubr.f32.mxu0 %v10285_v47  ;;  %v4203_v12 = vsel %vm409_vm0, %v4048_v60, 0.0  ;;  %v2802_v13 = vmul.f32 1.442695, %v2551_v21  ;;  %v3234_v61 = vpop.f32.mrb[53].mxu0  ;;  %v7621_v40 = vld [vmem:[%s12302_s8 + $0x90] sm:$0xff] }
 0x432   : > { %v2550_v27 = vsub.f32 %v12575_v24, %v2417_v22  ;;  %v2853_v3 = vpop.xlane.xlu0 %2852  ;;  %v4202_v53 = vsel %vm409_vm0, %v4032_v49, 0.0  ;;  %v4047_v5 = vmul.f32 %v7621_v40, %v3919_v42  ;;  %3018 = vadd.xlane.f32.xlu0 %v10150_v39  ;;  %v4187_v60 = vsel %vm409_vm0, %v4031_v55, 0.0 }
 0x433   : > { %7298 = vrcp.f32 %v2853_v3  ;;  %v10311_v28 = vadd.f32 %v4203_v12, %v4202_v53  ;;  %2932 = vadd.xlane.f32.xlu1 %v9886_v32 }
 0x434   : > { %v2800_v52 = vmul.f32 1.442695, %v2550_v27  ;;  %v10314_v37 = vpop.eup %7292  ;;  %7300 = vpow2.f32 %v2802_v13  ;;  %v4188_v1 = vsel %vm409_vm0, %v4047_v5, 0.0  ;;  %v10318_v21 = vpop.f32.mrb[54].mxu0 }
 0x435   : > { %v2821_v38 = vpop.xlane.xlu1 %2820  ;;  %v10320_v49 = vadd.f32 %v4188_v1, %v4187_v60  ;;  %6725 = vmatmul.mubr.f32.gmra.mrb[150].mxu0 %v10314_v37  ;;  %v10323_v42 = vpop.f32.mrb[55].mxu0 }
 0x436   : > { %7302 = vpow2.f32 %v2800_v52  ;;  %v2823_v39 = vpop.xlane.xlu0 %2822  ;;  %3016 = vadd.xlane.f32.xlu0 %v10127_v33 }
 0x437   : > { %7304 = vrcp.f32 %v2821_v38  ;;  %2940 = vadd.xlane.f32.xlu1 %v9918_v51 }
 0x438   : > { %v10326_v32 = vpop.eup %7294  ;;  %7306 = vrcp.f32 %v2823_v39  ;;  %v10331_v55 = vpop.f32.mrb[56].mxu0 }
 0x439   : > { %v10329_v29 = vpop.eup %7296  ;;  %v2421_v22 = vpop.xlane.xlu1 %2420  ;;  %6727 = vmatprep.mubr.f32.mxu0 %v10326_v32  ;;  %7308 = vrcp.f32 %v10162_v0 }
 0x43a   : > { %v2552_v12 = vsub.f32 %v9889_v48, %v2421_v22  ;;  %v2423_v13 = vpop.xlane.xlu0 %2422  ;;  %v10335_v24 = vpop.f32.mrb[57].mxu0  ;;  %6728 = vmatmul.mubr.f32.gmra.mrb[152].mxu0 %v10329_v29  ;;  %3022 = vadd.xlane.f32.xlu0 %v10160_v23  ;;  %7310 = vrcp.f32 %v10181_v26 }
 0x43b   : > { %v2553_v33 = vsub.f32 %v9883_v36, %v2423_v13  ;;  %2944 = vadd.xlane.f32.xlu1 %v9931_v54 }
 0x43c   : > { %v2804_v51 = vmul.f32 1.442695, %v2552_v12  ;;  %v10343_v53 = vpop.f32.mrb[58].mxu0 }
 0x43d   : > { %v7299_v27 = vpop.eup %7298  ;;  %v2806_v3 = vmul.f32 1.442695, %v2553_v33  ;;  %v2855_v48 = vpop.xlane.xlu1 %2854 }
 0x43e   : > { %v3921_v40 = vmul.f32 %v7299_v27, %v3234_v61  ;;  %7312 = vpow2.f32 %v2804_v51  ;;  %v2427_v5 = vpop.xlane.xlu0 %2426  ;;  %v10345_v52 = vpop.f32.mrb[59].mxu0  ;;  %3020 = vadd.xlane.f32.xlu0 %v10147_v19 }
 0x43f   : > { %v10347_v36 = vpop.eup %7300  ;;  %7314 = vpow2.f32 %v2806_v3  ;;  %v2555_v23 = vsub.f32 %v9902_v10, %v2427_v5  ;;  %2948 = vadd.xlane.f32.xlu1 %v9941_v18  ;;  %v7622_v10 = vld [vmem:[%s12302_s8 + $0xa0] sm:$0xff] }
 0x440   : > { %v10351_v54 = vpop.eup %7302  ;;  %7316 = vrcp.f32 %v2855_v48  ;;  %v10354_v26 = vpop.f32.mrb[60].mxu0  ;;  %v4049_v1 = vmul.f32 %v7622_v10, %v3921_v40  ;;  %v4403_v48 = vld [vmem:[%s12297_s3 + $0x30] sm:$0xff]  ;;  %v4404_v40 = vld [vmem:[%s12297_s3 + $0x38] sm:$0xff] }
 0x441   : > { %v7305_v0 = vpop.eup %7304  ;;  %v2425_v61 = vpop.xlane.xlu1 %2424  ;;  %6730 = vmatprep.mubr.f32.mxu0 %v10351_v54  ;;  %7318 = vrcp.f32 %v10243_v31  ;;  %v2810_v22 = vmul.f32 1.442695, %v2555_v23  ;;  %v6887_v23 = vpack.c.bf16 %v4404_v40, %v4403_v48 }
 0x442   : > { %v7307_v60 = vpop.eup %7306  ;;  %v2554_v19 = vsub.f32 %v9921_v11, %v2425_v61  ;;  %v2857_v38 = vpop.xlane.xlu0 %2856  ;;  %6731 = vmatmul.mubr.f32.gmra.mrb[154].mxu0 %v10347_v36  ;;  %v3905_v18 = vmul.f32 %v7305_v0, %v10183_v17  ;;  %7320 = vrcp.f32 %v10275_v62  ;;  %3026 = vadd.xlane.f32.xlu0 %v10175_v15  ;;  %v7623_v11 = vld [vmem:[%s12302_s8 + $0x20] sm:$0xff]  ;;  %v4218_v62 = vsel %vm409_vm0, %v4049_v1, 0.0 }
 0x443   : > { %v10362_v39 = vpop.f32.mrb[61].mxu0  ;;  %v3906_v31 = vmul.f32 %v7307_v60, %v10177_v7  ;;  %7322 = vrcp.f32 %v2857_v38  ;;  %2952 = vadd.xlane.f32.xlu1 %v9951_v30  ;;  %v7309_v17 = vpop.eup %7308  ;;  %v7624_v38 = vld [vmem:[%s12302_s8 + $0x28] sm:$0xff]  ;;  %6888 = vmatprep.subr.bf16.mxu1 %v6887_v23 }
 0x444   : > { %v2808_v12 = vmul.f32 1.442695, %v2554_v19  ;;  %v4033_v13 = vmul.f32 %v7623_v11, %v3905_v18  ;;  %v10373_v33 = vpop.f32.mrb[62].mxu0  ;;  %v7311_v3 = vpop.eup %7310  ;;  %6890 = vmatpush3.bf16.msra.mxu1 %v6887_v23  ;;  %v7625_v11 = vld [vmem:[%s12302_s8 + $0x108] sm:$0xff] }
 0x445   : > { %v2885_v51 = vpop.xlane.xlu1 %2884  ;;  %v10376_v15 = vpop.f32.mrb[63].mxu0 }
 0x446   : > { %7324 = vpow2.f32 %v2808_v12  ;;  %v2827_v27 = vpop.xlane.xlu0 %2826  ;;  %v4217_v7 = vsel %vm409_vm0, %v4033_v13, 0.0  ;;  %3024 = vadd.xlane.f32.xlu0 %v10157_v58 }
 0x447   : > { %7326 = vpow2.f32 %v2810_v22  ;;  %v10380_v30 = vadd.f32 %v4218_v62, %v4217_v7  ;;  %2956 = vadd.xlane.f32.xlu1 %v9962_v9  ;;  %v4034_v9 = vmul.f32 %v7624_v38, %v3906_v31  ;;  %v7626_v31 = vld [vmem:[%s12302_s8 + $0x100] sm:$0xff] }
 0x448   : > { %v10388_v5 = vpop.eup %7312  ;;  %7328 = vrcp.f32 %v2827_v27  ;;  %v6597_v58 = vpop.f32.mrb[64].mxu0 }
 0x449   : > { %v10391_v0 = vpop.eup %7314  ;;  %7330 = vrcp.f32 %v2885_v51  ;;  %v2887_v61 = vpop.xlane.xlu1 %2886  ;;  %6733 = vmatprep.mubr.f32.mxu0 %v10388_v5  ;;  %v3934_v10 = vmul.f32 %v7311_v3, %v6597_v58  ;;  %v4232_v23 = vsel %vm409_vm0, %v4034_v9, 0.0 }
 0x44a   : > { %v7317_v60 = vpop.eup %7316  ;;  %7332 = vrcp.f32 %v2887_v61  ;;  %v2861_v1 = vpop.xlane.xlu0 %2860  ;;  %6734 = vmatmul.mubr.f32.gmra.mrb[156].mxu0 %v10391_v0  ;;  %3030 = vadd.xlane.f32.xlu0 %v10190_v4  ;;  %v7627_v4 = vld [vmem:[%s12302_s8 + $0xa8] sm:$0xff] }
 0x44b   : > { %v3294_v19 = vpop.f32.mrb[65].mxu0  ;;  %7334 = vrcp.f32 %v2861_v1  ;;  %v3922_v22 = vmul.f32 %v7317_v60, %v10301_v6  ;;  %v7319_v12 = vpop.eup %7318  ;;  %v4062_v13 = vmul.f32 %v7625_v11, %v3934_v10  ;;  %2960 = vadd.xlane.f32.xlu1 %v9979_v20 }
 0x44c   : > { %v3933_v18 = vmul.f32 %v7309_v17, %v3294_v19  ;;  %v7321_v51 = vpop.eup %7320  ;;  %v6600_v17 = vpop.f32.mrb[66].mxu0  ;;  %v7628_v19 = vld [vmem:[%s12302_s8 + $0x118] sm:$0xff] }
 0x44d   : > { %v2825_v27 = vpop.xlane.xlu1 %2824  ;;  %v4050_v6 = vmul.f32 %v7627_v4, %v3922_v22  ;;  %v7323_v7 = vpop.eup %7322  ;;  %v4175_v3 = vsel %vm409_vm0, %v4062_v13, 0.0  ;;  %v3936_v48 = vmul.f32 %v7321_v51, %v6600_v17  ;;  %v12576_v4 = vmov 0.0  }
 0x44e   : > { %v4061_v62 = vmul.f32 %v7626_v31, %v3933_v18  ;;  %7336 = vrcp.f32 %v2825_v27  ;;  %v2831_v40 = vpop.xlane.xlu0 %2830  ;;  %v3304_v20 = vpop.f32.mrb[67].mxu0  ;;  %v10413_v58 = vadd.f32 %v4175_v3, %v10280_v50  ;;  %3028 = vadd.xlane.f32.xlu0 %v10172_v14  ;;  %v3923_v9 = vmul.f32 %v7323_v7, %v10323_v42  ;;  %v7629_v14 = vld [vmem:[%s12302_s8 + $0x110] sm:$0xff] }
 0x44f   : > { %7338 = vrcp.f32 %v2831_v40  ;;  %v3935_v60 = vmul.f32 %v7319_v12, %v3304_v20  ;;  %v4064_v38 = vmul.f32 %v7628_v19, %v3936_v48  ;;  %2964 = vadd.xlane.f32.xlu1 %v9988_v45  ;;  %v4233_v50 = vsel %vm409_vm0, %v4050_v6, 0.0 }
 0x450   : > { %v4160_v61 = vsel %vm409_vm0, %v4061_v62, 0.0  ;;  %v10417_v10 = vpop.eup %7324  ;;  %v6603_v12 = vpop.f32.mrb[68].mxu0  ;;  %v4234_v11 = vadd.f32 %v4233_v50, %v4232_v23 }
 0x451   : > { %v10420_v1 = vadd.f32 %v4160_v61, %v10287_v43  ;;  %v10428_v18 = vpop.eup %7326  ;;  %v4063_v22 = vmul.f32 %v7629_v14, %v3935_v60  ;;  %v2859_v43 = vpop.xlane.xlu1 %2858  ;;  %6736 = vmatprep.mubr.f32.mxu0 %v10417_v10  ;;  %v4205_v51 = vsel %vm409_vm0, %v4064_v38, 0.0  ;;  %v12577_v38 = vld [vmem:[#allocation63_spill] sm:$0xff] }
 0x452   : > { %v7329_v13 = vpop.eup %7328  ;;  %7340 = vrcp.f32 %v2859_v43  ;;  %v2865_v45 = vpop.xlane.xlu0 %2864  ;;  %6737 = vmatmul.mubr.f32.gmra.mrb[158].mxu0 %v10428_v18  ;;  %v10438_v17 = vadd.f32 %v4205_v51, %v10311_v28  ;;  %3038 = vadd.xlane.f32.xlu0 %v10214_v35  ;;  %v7630_v35 = vld [vmem:[%s12302_s8 + $0x120] sm:$0xff] }
 0x453   : > { %v3314_v31 = vpop.f32.mrb[69].mxu0  ;;  %v7331_v42 = vpop.eup %7330  ;;  %v3908_v62 = vmul.f32 %v7329_v13, %v10192_v56  ;;  %v4190_v27 = vsel %vm409_vm0, %v4063_v22, 0.0  ;;  %7342 = vrcp.f32 %v2865_v45  ;;  %5007 = vmatprep.mubr.f32.mxu0 %v12576_v4  ;;  %2972 = vadd.xlane.f32.xlu1 %v10016_v44  ;;  %v7631_v44 = vld [vmem:[%s12302_s8 + $0x128] sm:$0xff] }
 0x454   : > { %v7333_v6 = vpop.eup %7332  ;;  %v10444_v7 = vadd.f32 %v4190_v27, %v10320_v49  ;;  %v3937_v3 = vmul.f32 %v7331_v42, %v3314_v31  ;;  %v10447_v20 = vpop.f32.mrb[70].mxu0 }
 0x455   : > { %v7335_v48 = vpop.eup %7334  ;;  %v3938_v40 = vmul.f32 %v7333_v6, %v6603_v12  ;;  %v2889_v56 = vpop.xlane.xlu1 %2888  ;;  %v7632_v12 = vld [vmem:[%s12302_s8 + $0xb0] sm:$0xff] }
 0x456   : > { %v10450_v28 = vmul.f32 %v7335_v48, %v10335_v24  ;;  %v4065_v23 = vmul.f32 %v7630_v35, %v3937_v3  ;;  %7344 = vrcp.f32 %v2889_v56  ;;  %v2835_v61 = vpop.xlane.xlu0 %2834  ;;  %v3324_v49 = vpop.f32.mrb[71].mxu0  ;;  %3036 = vadd.xlane.f32.xlu0 %v10200_v59  ;;  %v4051_v13 = vmul.f32 %v7632_v12, %v3923_v9 }
 0x457   : > { %v4066_v60 = vmul.f32 %v7631_v44, %v3938_v40  ;;  %7346 = vrcp.f32 %v2835_v61  ;;  %2874 = vadd.xlane.f32.xlu1 %v12577_v38 }
 0x458   : > { %v7337_v19 = vpop.eup %7336  ;;  %v4220_v24 = vsel %vm409_vm0, %v4065_v23, 0.0  ;;  %v10469_v59 = vpop.f32.mrb[72].mxu0  ;;  %v4248_v40 = vsel %vm409_vm0, %v4051_v13, 0.0 }
 0x459   : > { %v7339_v50 = vpop.eup %7338  ;;  %v4235_v14 = vsel %vm409_vm0, %v4066_v60, 0.0  ;;  %v10463_v22 = vadd.f32 %v4220_v24, %v10380_v30  ;;  %v3907_v43 = vmul.f32 %v7337_v19, %v10195_v25  ;;  %v2891_v51 = vpop.xlane.xlu1 %2890  ;;  %v7633_v25 = vld [vmem:[%s12302_s8 + $0x30] sm:$0xff]  ;;  %v12578_v60 = vld [vmem:[#allocation14_spill] sm:$0xff] }
 0x45a   : > { %v10472_v45 = vmul.f32 %v7339_v50, %v10205_v34  ;;  %v10474_v31 = vadd.f32 %v4235_v14, %v4234_v11  ;;  %7348 = vrcp.f32 %v2891_v51  ;;  %v2869_v42 = vpop.xlane.xlu0 %2868  ;;  %v10476_v27 = vpop.f32.mrb[73].mxu0  ;;  %3042 = vadd.xlane.f32.xlu0 %v10239_v16  ;;  %v7634_v34 = vld [vmem:[%s12302_s8 + $0x38] sm:$0xff] }
 0x45b   : > { %v4035_v30 = vmul.f32 %v7633_v25, %v3907_v43  ;;  %7350 = vrcp.f32 %v2869_v42  ;;  %2976 = vadd.xlane.f32.xlu1 %v10026_v2  ;;  %v4036_v11 = vmul.f32 %v7634_v34, %v3908_v62  ;;  %v7635_v62 = vld [vmem:[%s12302_s8 + $0xb8] sm:$0xff] }
 0x45c   : > { %v7341_v9 = vpop.eup %7340  ;;  %v10489_v35 = vpop.f32.mrb[74].mxu0 }
 0x45d   : > { %v7343_v6 = vpop.eup %7342  ;;  %v3924_v3 = vmul.f32 %v7341_v9, %v10318_v21  ;;  %v4247_v48 = vsel %vm409_vm0, %v4035_v30, 0.0  ;;  %v2829_v56 = vpop.xlane.xlu1 %2828  ;;  %v4262_v50 = vsel %vm409_vm0, %v4036_v11, 0.0 }
 0x45e   : > { %v10492_v16 = vmul.f32 %v7343_v6, %v10345_v52  ;;  %v4249_v23 = vadd.f32 %v4248_v40, %v4247_v48  ;;  %7352 = vrcp.f32 %v2829_v56  ;;  %v2839_v2 = vpop.xlane.xlu0 %2838  ;;  %v10494_v61 = vpop.f32.mrb[75].mxu0  ;;  %3040 = vadd.xlane.f32.xlu0 %v10224_v46  ;;  %v12580_v40 = vld [vmem:[#allocation13_spill] sm:$0xff] }
 0x45f   : > { %v4052_v21 = vmul.f32 %v7635_v62, %v3924_v3  ;;  %7354 = vrcp.f32 %v2839_v2  ;;  %2904 = vadd.xlane.f32.xlu1 %v12578_v60  ;;  %v12581_v2 = vld [vmem:[#allocation31_spill] sm:$0xff]  ;;  %v12582_v60 = vld [vmem:[#allocation34_spill] sm:$0xff] }
 0x460   : > { %v7345_v44 = vpop.eup %7344  ;;  %v10501_v38 = vpop.f32.mrb[76].mxu0 }
 0x461   : > { %v7347_v19 = vpop.eup %7346  ;;  %v3939_v24 = vmul.f32 %v7345_v44, %v3324_v49  ;;  %v2863_v52 = vpop.xlane.xlu1 %2862  ;;  %v4263_v14 = vsel %vm409_vm0, %v4052_v21, 0.0  ;;  %v7636_v49 = vld [vmem:[%s12302_s8 + $0x130] sm:$0xff] }
 0x462   : > { %v10506_v43 = vmul.f32 %v7347_v19, %v10216_v63  ;;  %7356 = vrcp.f32 %v2863_v52  ;;  %v10508_v12 = vpop.xlane.xlu0 %2872  ;;  %v10510_v13 = vpop.f32.mrb[77].mxu0  ;;  %v4264_v46 = vadd.f32 %v4263_v14, %v4262_v50  ;;  %3046 = vadd.xlane.f32.xlu0 %v10269_v8  ;;  %v7639_v14 = vld [vmem:[%s12302_s8 + $0x40] sm:$0xff] }
 0x463   : > { %v4067_v51 = vmul.f32 %v7636_v49, %v3939_v24  ;;  %2980 = vadd.xlane.f32.xlu1 %v10036_v57  ;;  %v7637_v57 = vld [vmem:[%s12302_s8 + $0x138] sm:$0xff] }
 0x464   : > { %v7349_v42 = vpop.eup %7348  ;;  %v10519_v6 = vpop.f32.mrb[78].mxu0 }
 0x465   : > { %v7351_v25 = vpop.eup %7350  ;;  %v4250_v63 = vsel %vm409_vm0, %v4067_v51, 0.0  ;;  %v3940_v30 = vmul.f32 %v7349_v42, %v10447_v20  ;;  %v2893_v9 = vpop.xlane.xlu1 %2892  ;;  %12579 = vst [vmem:[#allocation38_spill] sm:$0xff] %v10519_v6  ;;  %v12583_v51 = vld [vmem:[#allocation23_spill] sm:$0xff] }
 0x466   : > { %v10521_v34 = vadd.f32 %v4250_v63, %v4249_v23  ;;  %v10524_v11 = vmul.f32 %v7351_v25, %v10362_v39  ;;  %7358 = vrcp.f32 %v2893_v9  ;;  %v10526_v3 = vpop.xlane.xlu0 %2842  ;;  %v10528_v8 = vpop.f32.mrb[79].mxu0  ;;  %3044 = vadd.xlane.f32.xlu0 %v10250_v41  ;;  %v7638_v39 = vld [vmem:[%s12302_s8 + $0xc0] sm:$0xff]  ;;  %v7640_v25 = vld [vmem:[%s12302_s8 + $0x48] sm:$0xff] }
 0x467   : > { %v4068_v20 = vmul.f32 %v7637_v57, %v3940_v30  ;;  %2906 = vadd.xlane.f32.xlu1 %v12580_v40  ;;  %v4053_v23 = vmul.f32 %v7638_v39, %v10450_v28  ;;  %v7641_v40 = vld [vmem:[%s12302_s8 + $0xc8] sm:$0xff] }
 0x468   : > { %v7353_v48 = vpop.eup %7352  ;;  %v6621_v44 = vpop.f32.mrb[80].mxu0  ;;  %v12584_v39 = vld [vmem:[#allocation22_spill] sm:$0xff] }
 0x469   : > { %v7355_v56 = vpop.eup %7354  ;;  %v3909_v62 = vmul.f32 %v7353_v48, %v12581_v2  ;;  %v2895_v21 = vpop.xlane.xlu1 %2894  ;;  %v4265_v41 = vsel %vm409_vm0, %v4068_v20, 0.0  ;;  %v4278_v42 = vsel %vm409_vm0, %v4053_v23, 0.0 }
 0x46a   : > { %v10542_v19 = vmul.f32 %v7355_v56, %v12582_v60  ;;  %7360 = vrcp.f32 %v2895_v21  ;;  %v2911_v24 = vpop.xlane.xlu0 %2910  ;;  %v10544_v52 = vpop.f32.mrb[81].mxu0  ;;  %v10546_v50 = vadd.f32 %v4265_v41, %v4264_v46  ;;  %3050 = vadd.xlane.f32.xlu0 %v10314_v37  ;;  %v4038_v46 = vmul.f32 %v7640_v25, %v10472_v45 }
 0x46b   : > { %v4037_v28 = vmul.f32 %v7639_v14, %v3909_v62  ;;  %7362 = vrcp.f32 %v2911_v24  ;;  %2984 = vadd.xlane.f32.xlu1 %v12583_v51 }
 0x46c   : > { %v7357_v49 = vpop.eup %7356  ;;  %v10560_v57 = vpop.f32.mrb[82].mxu0  ;;  %v4292_v62 = vsel %vm409_vm0, %v4038_v46, 0.0 }
 0x46d   : > { %v4277_v63 = vsel %vm409_vm0, %v4037_v28, 0.0  ;;  %v3926_v30 = vmul.f32 %v7357_v49, %v10331_v55  ;;  %v2833_v9 = vpop.xlane.xlu1 %2832  ;;  %v10564_v20 = vpop.f32.mrb[83].mxu0  ;;  %v12585_v28 = vld [vmem:[#allocation26_spill] sm:$0xff] }
 0x46e   : > { %7364 = vrcp.f32 %v2833_v9  ;;  %v10562_v37 = vpop.xlane.xlu0 %2942  ;;  %v4279_v48 = vadd.f32 %v4278_v42, %v4277_v63  ;;  %3048 = vadd.xlane.f32.xlu0 %v10285_v47  ;;  %v7642_v47 = vld [vmem:[%s12302_s8 + $0x140] sm:$0xff] }
 0x46f   : > { %v4054_v56 = vmul.f32 %v7641_v40, %v3926_v30  ;;  %2936 = vadd.xlane.f32.xlu1 %v12584_v39  ;;  %v7644_v39 = vld [vmem:[%s12302_s8 + $0x188] sm:$0xff] }
 0x470   : > { %v7359_v45 = vpop.eup %7358  ;;  %v10572_v2 = vpop.f32.mrb[84].mxu0 }
 0x471   : > { %v3941_v55 = vmul.f32 %v7359_v45, %v10476_v27  ;;  %v2867_v23 = vpop.xlane.xlu1 %2866  ;;  %v4293_v21 = vsel %vm409_vm0, %v4054_v56, 0.0  ;;  %v10578_v60 = vpop.f32.mrb[85].mxu0  ;;  %v12586_v45 = vld [vmem:[#allocation21_spill] sm:$0xff] }
 0x472   : > { %7366 = vrcp.f32 %v2867_v23  ;;  %v10576_v41 = vpop.xlane.xlu0 %2946  ;;  %v4294_v24 = vadd.f32 %v4293_v21, %v4292_v62  ;;  %3054 = vadd.xlane.f32.xlu0 %v10329_v29  ;;  %v7643_v29 = vld [vmem:[%s12302_s8 + $0x148] sm:$0xff] }
 0x473   : > { %v4069_v14 = vmul.f32 %v7642_v47, %v3941_v55  ;;  %2988 = vadd.xlane.f32.xlu1 %v12585_v28 }
 0x474   : > { %v7361_v27 = vpop.eup %7360  ;;  %v10586_v25 = vpop.f32.mrb[86].mxu0 }
 0x475   : > { %v7363_v49 = vpop.eup %7362  ;;  %v3942_v51 = vmul.f32 %v7361_v27, %v10469_v59  ;;  %v2897_v42 = vpop.xlane.xlu1 %2896  ;;  %v4280_v46 = vsel %vm409_vm0, %v4069_v14, 0.0 }
 0x476   : > { %7368 = vrcp.f32 %v2897_v42  ;;  %v10589_v63 = vpop.xlane.xlu0 %2950  ;;  %v10591_v30 = vpop.f32.mrb[87].mxu0  ;;  %v3950_v9 = vmul.f32 %v7363_v49, %v6621_v44  ;;  %v10593_v40 = vadd.f32 %v4280_v46, %v4279_v48  ;;  %3052 = vadd.xlane.f32.xlu0 %v10326_v32  ;;  %v7645_v44 = vld [vmem:[%s12302_s8 + $0xd0] sm:$0xff]  ;;  %v12587_v32 = vld [vmem:[#allocation33_spill] sm:$0xff] }
 0x477   : > { %v4070_v59 = vmul.f32 %v7643_v29, %v3942_v51  ;;  %2938 = vadd.xlane.f32.xlu1 %v12586_v45  ;;  %v4055_v48 = vmul.f32 %v7645_v44, %v10492_v16  ;;  %v7646_v16 = vld [vmem:[%s12302_s8 + $0x50] sm:$0xff] }
 0x478   : > { %v7365_v56 = vpop.eup %7364  ;;  %v4078_v55 = vmul.f32 %v7644_v39, %v3950_v9  ;;  %v10608_v21 = vpop.f32.mrb[88].mxu0  ;;  %v12588_v9 = vld [vmem:[#allocation25_spill] sm:$0xff] }
 0x479   : > { %v3911_v23 = vmul.f32 %v7365_v56, %v12587_v32  ;;  %v2899_v62 = vpop.xlane.xlu1 %2898  ;;  %v4295_v47 = vsel %vm409_vm0, %v4070_v59, 0.0  ;;  %v10613_v27 = vpop.f32.mrb[89].mxu0  ;;  %v4308_v29 = vsel %vm409_vm0, %v4055_v48, 0.0  ;;  %v7648_v48 = vld [vmem:[%s12302_s8 + $0xd8] sm:$0xff] }
 0x47a   : > { %7370 = vrcp.f32 %v2899_v62  ;;  %v10611_v14 = vpop.xlane.xlu0 %2954  ;;  %v4177_v28 = vsel %vm409_vm0, %v4078_v55, 0.0  ;;  %v10616_v49 = vadd.f32 %v4295_v47, %v4294_v24  ;;  %3058 = vadd.xlane.f32.xlu0 %v10347_v36  ;;  %v7647_v24 = vld [vmem:[%s12302_s8 + $0x58] sm:$0xff] }
 0x47b   : > { %v4039_v51 = vmul.f32 %v7646_v16, %v3911_v23  ;;  %v10623_v42 = vadd.f32 %v4177_v28, %v10413_v58  ;;  %2992 = vadd.xlane.f32.xlu1 %v12588_v9  ;;  %v4040_v59 = vmul.f32 %v7647_v24, %v10506_v43 }
 0x47c   : > { %v7367_v46 = vpop.eup %7366  ;;  %v10633_v36 = vpop.f32.mrb[90].mxu0 }
 0x47d   : > { %v4307_v56 = vsel %vm409_vm0, %v4039_v51, 0.0  ;;  %v3928_v45 = vmul.f32 %v7367_v46, %v10343_v53  ;;  %v2837_v39 = vpop.xlane.xlu1 %2836  ;;  %v10637_v55 = vpop.f32.mrb[91].mxu0  ;;  %v12589_v53 = vld [vmem:[#allocation24_spill] sm:$0xff]  ;;  %v4322_v28 = vsel %vm409_vm0, %v4040_v59, 0.0 }
 0x47e   : > { %7372 = vrcp.f32 %v2837_v39  ;;  %v10635_v58 = vpop.xlane.xlu0 %2958  ;;  %v4309_v44 = vadd.f32 %v4308_v29, %v4307_v56  ;;  %3056 = vadd.xlane.f32.xlu0 %v10351_v54  ;;  %v7649_v54 = vld [vmem:[%s12302_s8 + $0x150] sm:$0xff]  ;;  %v12590_v29 = vld [vmem:[#allocation28_spill] sm:$0xff] }
 0x47f   : > { %7374 = vrcp.f32 %v10562_v37  ;;  %v4056_v43 = vmul.f32 %v7648_v48, %v3928_v45  ;;  %2968 = vadd.xlane.f32.xlu1 %v12589_v53  ;;  %v12593_v53 = vld [vmem:[#allocation27_spill] sm:$0xff] }
 0x480   : > { %v7369_v32 = vpop.eup %7368  ;;  %v10646_v47 = vpop.f32.mrb[92].mxu0 }
 0x481   : > { %v3943_v23 = vmul.f32 %v7369_v32, %v10494_v61  ;;  %v2871_v62 = vpop.xlane.xlu1 %2870  ;;  %v4323_v16 = vsel %vm409_vm0, %v4056_v43, 0.0  ;;  %v10652_v51 = vpop.f32.mrb[93].mxu0 }
 0x482   : > { %7376 = vrcp.f32 %v2871_v62  ;;  %v10650_v37 = vpop.xlane.xlu0 %2962  ;;  %v4324_v46 = vadd.f32 %v4323_v16, %v4322_v28  ;;  %3062 = vadd.xlane.f32.xlu0 %v10391_v0  ;;  %v7650_v0 = vld [vmem:[%s12302_s8 + $0x158] sm:$0xff]  ;;  %v7651_v62 = vld [vmem:[%s12302_s8 + $0xe0] sm:$0xff]  ;;  %v12594_v28 = vld [vmem:[#allocation35_spill] sm:$0xff] }
 0x483   : > { %v4071_v9 = vmul.f32 %v7649_v54, %v3943_v23  ;;  %2996 = vadd.xlane.f32.xlu1 %v12590_v29 }
 0x484   : > { %v7371_v61 = vpop.eup %7370  ;;  %v10660_v56 = vpop.f32.mrb[94].mxu0 }
 0x485   : > { %v3944_v24 = vmul.f32 %v7371_v61, %v10489_v35  ;;  %v2901_v59 = vpop.xlane.xlu1 %2900  ;;  %12591 = vst [vmem:[#allocation40_spill] sm:$0xff] %v10660_v56  ;;  %v4310_v45 = vsel %vm409_vm0, %v4071_v9, 0.0  ;;  %v10665_v48 = vpop.f32.mrb[95].mxu0 }
 0x486   : > { %7378 = vrcp.f32 %v2901_v59  ;;  %v10663_v39 = vpop.xlane.xlu0 %2966  ;;  %12592 = vst [vmem:[#allocation39_spill] sm:$0xff] %v10665_v48  ;;  %v10667_v43 = vadd.f32 %v4310_v45, %v4309_v44  ;;  %3060 = vadd.xlane.f32.xlu0 %v10388_v5  ;;  %v4057_v44 = vmul.f32 %v7651_v62, %v10524_v11  ;;  %v7652_v59 = vld [vmem:[%s12302_s8 + $0x60] sm:$0xff]  ;;  %v12595_v11 = vld [vmem:[#allocation30_spill] sm:$0xff] }
 0x487   : > { %v4072_v32 = vmul.f32 %v7650_v0, %v3944_v24  ;;  %7380 = vrcp.f32 %v10508_v12  ;;  %3000 = vadd.xlane.f32.xlu1 %v12593_v53  ;;  %v12596_v53 = vld [vmem:[#allocation29_spill] sm:$0xff] }
 0x488   : > { %v7373_v35 = vpop.eup %7372  ;;  %v6645_v54 = vpop.f32.mrb[96].mxu0 }
 0x489   : > { %v7375_v23 = vpop.eup %7374  ;;  %v3913_v16 = vmul.f32 %v7373_v35, %v12594_v28  ;;  %v2903_v5 = vpop.xlane.xlu1 %2902  ;;  %v4325_v9 = vsel %vm409_vm0, %v4072_v32, 0.0  ;;  %v7653_v32 = vld [vmem:[%s12302_s8 + $0x208] sm:$0xff] }
 0x48a   : > { %7382 = vrcp.f32 %v2903_v5  ;;  %v3966_v61 = vmul.f32 %v7375_v23, %v6645_v54  ;;  %v10681_v29 = vpop.xlane.xlu0 %2974  ;;  %v10683_v12 = vpop.f32.mrb[97].mxu0  ;;  %v10685_v24 = vadd.f32 %v4325_v9, %v4324_v46  ;;  %3002 = vadd.xlane.f32.xlu0 %v12595_v11  ;;  %v4338_v23 = vsel %vm409_vm0, %v4057_v44, 0.0  ;;  %v7654_v46 = vld [vmem:[%s12302_s8 + $0x68] sm:$0xff] }
 0x48b   : > { %v4041_v45 = vmul.f32 %v7652_v59, %v3913_v16  ;;  %3032 = vadd.xlane.f32.xlu1 %v12596_v53  ;;  %v4042_v62 = vmul.f32 %v7654_v46, %v10542_v19  ;;  %v7655_v11 = vld [vmem:[%s12302_s8 + $0xe8] sm:$0xff] }
 0x48c   : > { %v7377_v0 = vpop.eup %7376  ;;  %v4094_v35 = vmul.f32 %v7653_v32, %v3966_v61  ;;  %v10702_v54 = vpop.f32.mrb[98].mxu0 }
 0x48d   : > { %v4337_v28 = vsel %vm409_vm0, %v4041_v45, 0.0  ;;  %v3930_v16 = vmul.f32 %v7377_v0, %v10354_v26  ;;  %v2841_v5 = vpop.xlane.xlu1 %2840  ;;  %v10707_v59 = vpop.f32.mrb[99].mxu0  ;;  %v12597_v26 = vld [vmem:[#allocation32_spill] sm:$0xff] }
 0x48e   : > { %v4179_v9 = vsel %vm409_vm0, %v4094_v35, 0.0  ;;  %7384 = vrcp.f32 %v2841_v5  ;;  %v10705_v61 = vpop.xlane.xlu0 %2978  ;;  %v4339_v44 = vadd.f32 %v4338_v23, %v4337_v28  ;;  %3034 = vadd.xlane.f32.xlu0 %v12597_v26  ;;  %v4352_v23 = vsel %vm409_vm0, %v4042_v62, 0.0 }
 0x48f   : > { %v4058_v19 = vmul.f32 %v7655_v11, %v3930_v16  ;;  %v10713_v45 = vadd.f32 %v4179_v9, %v10623_v42  ;;  %3064 = vadd.xlane.f32.xlu1 %v10417_v10  ;;  %v7656_v10 = vld [vmem:[%s12302_s8 + $0x160] sm:$0xff] }
 0x490   : > { %v7379_v0 = vpop.eup %7378  ;;  %v10718_v53 = vpop.f32.mrb[100].mxu0 }
 0x491   : > { %v3945_v32 = vmul.f32 %v7379_v0, %v10510_v13  ;;  %v2909_v35 = vpop.xlane.xlu1 %2908  ;;  %v4353_v46 = vsel %vm409_vm0, %v4058_v19, 0.0  ;;  %v7381_v28 = vpop.eup %7380 }
 0x492   : > { %7386 = vrcp.f32 %v2909_v35  ;;  %v10722_v16 = vpop.xlane.xlu0 %2982  ;;  %v10724_v42 = vpop.f32.mrb[101].mxu0  ;;  %v4354_v5 = vadd.f32 %v4353_v46, %v4352_v23  ;;  %3066 = vadd.xlane.f32.xlu0 %v10428_v18  ;;  %v3931_v62 = vmul.f32 %v7381_v28, %v10376_v15  ;;  %v7657_v18 = vld [vmem:[%s12302_s8 + $0x168] sm:$0xff]  ;;  %v12598_v28 = vld [vmem:[#allocation36_spill] sm:$0xff] }
 0x493   : > { %v4073_v9 = vmul.f32 %v7656_v10, %v3945_v32  ;;  %7388 = vrcp.f32 %v10576_v41 }
 0x494   : > { %v7383_v13 = vpop.eup %7382  ;;  %v10733_v26 = vpop.f32.mrb[102].mxu0 }
 0x495   : > { %v3946_v11 = vmul.f32 %v7383_v13, %v10501_v38  ;;  %v2915_v19 = vpop.xlane.xlu1 %2914  ;;  %v4340_v0 = vsel %vm409_vm0, %v4073_v9, 0.0  ;;  %v10738_v23 = vpop.f32.mrb[103].mxu0  ;;  %v7658_v38 = vld [vmem:[%s12302_s8 + $0xf0] sm:$0xff] }
 0x496   : > { %7390 = vrcp.f32 %v2915_v19  ;;  %v10736_v35 = vpop.xlane.xlu0 %2986  ;;  %v10740_v32 = vadd.f32 %v4340_v0, %v4339_v44  ;;  %v4059_v46 = vmul.f32 %v7658_v38, %v3931_v62 }
 0x497   : > { %v4074_v41 = vmul.f32 %v7657_v18, %v3946_v11  ;;  %v7659_v11 = vld [vmem:[%s12302_s8 + $0x70] sm:$0xff] }
 0x498   : > { %v7385_v15 = vpop.eup %7384  ;;  %v10749_v13 = vpop.f32.mrb[104].mxu0 }
 0x499   : > { %v3915_v10 = vmul.f32 %v7385_v15, %v12598_v28  ;;  %v2913_v9 = vpop.xlane.xlu1 %2912  ;;  %v4355_v19 = vsel %vm409_vm0, %v4074_v41, 0.0  ;;  %v10754_v0 = vpop.f32.mrb[105].mxu0  ;;  %v4368_v15 = vsel %vm409_vm0, %v4059_v46, 0.0 }
 0x49a   : > { %7392 = vrcp.f32 %v2913_v9  ;;  %v10752_v44 = vpop.xlane.xlu0 %2990  ;;  %v10756_v4 = vadd.f32 %v4355_v19, %v4354_v5 }
 0x49b   : > { %v4043_v18 = vmul.f32 %v7659_v11, %v3915_v10  ;;  %7394 = vrcp.f32 %v10589_v63  ;;  %v7660_v63 = vld [vmem:[%s12302_s8 + $0x180] sm:$0xff] }
 0x49c   : > { %v7387_v62 = vpop.eup %7386  ;;  %v10765_v9 = vpop.f32.mrb[106].mxu0 }
 0x49d   : > { %v4367_v38 = vsel %vm409_vm0, %v4043_v18, 0.0  ;;  %v3949_v41 = vmul.f32 %v7387_v62, %v10544_v52  ;;  %v2919_v28 = vpop.xlane.xlu1 %2918  ;;  %v7389_v56 = vpop.eup %7388 }
 0x49e   : > { %7396 = vrcp.f32 %v2919_v28  ;;  %v10767_v5 = vpop.xlane.xlu0 %2994  ;;  %v10769_v19 = vpop.f32.mrb[107].mxu0  ;;  %v10771_v48 = vadd.f32 %v4368_v15, %v4367_v38  ;;  %v3968_v10 = vmul.f32 %v7389_v56, %v10702_v54  ;;  %v7662_v54 = vld [vmem:[%s12302_s8 + $0x198] sm:$0xff] }
 0x49f   : > { %v4077_v46 = vmul.f32 %v7660_v63, %v3949_v41  ;;  %7398 = vrcp.f32 %v10611_v14  ;;  %v7661_v14 = vld [vmem:[%s12302_s8 + $0x218] sm:$0xff] }
 0x4a0   : > { %v7391_v11 = vpop.eup %7390  ;;  %v10779_v62 = vpop.f32.mrb[108].mxu0 }
 0x4a1   : > { %v3952_v52 = vmul.f32 %v7391_v11, %v10560_v57  ;;  %v2917_v18 = vpop.xlane.xlu1 %2916  ;;  %v4162_v28 = vsel %vm409_vm0, %v4077_v46, 0.0  ;;  %v10784_v38 = vpop.f32.mrb[109].mxu0  ;;  %v4096_v57 = vmul.f32 %v7661_v14, %v3968_v10 }
 0x4a2   : > { %7400 = vrcp.f32 %v2917_v18  ;;  %v10782_v15 = vpop.xlane.xlu0 %2970  ;;  %v10787_v56 = vadd.f32 %v4162_v28, %v10420_v1 }
 0x4a3   : > { %7402 = vrcp.f32 %v10681_v29  ;;  %v4080_v41 = vmul.f32 %v7662_v54, %v3952_v52  ;;  %v4209_v14 = vsel %vm409_vm0, %v4096_v57, 0.0  ;;  %v7664_v57 = vld [vmem:[%s12302_s8 + $0x228] sm:$0xff] }
 0x4a4   : > { %v7393_v63 = vpop.eup %7392  ;;  %v10797_v18 = vpop.f32.mrb[110].mxu0 }
 0x4a5   : > { %v3951_v46 = vmul.f32 %v7393_v63, %v10564_v20  ;;  %v2923_v11 = vpop.xlane.xlu1 %2922  ;;  %12599 = vst [vmem:[#allocation41_spill] sm:$0xff] %v10797_v18  ;;  %v4207_v1 = vsel %vm409_vm0, %v4080_v41, 0.0  ;;  %v7395_v28 = vpop.eup %7394  ;;  %v7663_v20 = vld [vmem:[%s12302_s8 + $0x190] sm:$0xff] }
 0x4a6   : > { %7404 = vrcp.f32 %v2923_v11  ;;  %v10800_v29 = vpop.xlane.xlu0 %2998  ;;  %v10802_v6 = vpop.f32.mrb[111].mxu0  ;;  %v4208_v10 = vadd.f32 %v4207_v1, %v10438_v17  ;;  %v3970_v52 = vmul.f32 %v7395_v28, %v10718_v53 }
 0x4a7   : > { %12600 = vst [vmem:[#allocation43_spill] sm:$0xff] %v10802_v6  ;;  %7406 = vrcp.f32 %v10705_v61  ;;  %v4079_v54 = vmul.f32 %v7663_v20, %v3951_v46 }
 0x4a8   : > { %v7397_v41 = vpop.eup %7396  ;;  %v10811_v63 = vadd.f32 %v4209_v14, %v4208_v10  ;;  %v4098_v46 = vmul.f32 %v7664_v57, %v3970_v52 }
 0x4a9   : > { %v3954_v11 = vmul.f32 %v7397_v41, %v10572_v2  ;;  %v2921_v18 = vpop.xlane.xlu1 %2920  ;;  %v4192_v6 = vsel %vm409_vm0, %v4079_v54, 0.0  ;;  %v7399_v53 = vpop.eup %7398  ;;  %v7665_v2 = vld [vmem:[%s12302_s8 + $0x1a8] sm:$0xff] }
 0x4aa   : > { %7408 = vrcp.f32 %v2921_v18  ;;  %v10815_v17 = vpop.xlane.xlu0 %3006  ;;  %v10818_v61 = vadd.f32 %v4192_v6, %v10444_v7  ;;  %v3972_v7 = vmul.f32 %v7399_v53, %v10733_v26  ;;  %v7667_v53 = vld [vmem:[%s12302_s8 + $0x288] sm:$0xff] }
 0x4ab   : > { %7410 = vrcp.f32 %v10722_v16  ;;  %v4082_v1 = vmul.f32 %v7665_v2, %v3954_v11  ;;  %v4239_v11 = vsel %vm409_vm0, %v4098_v46, 0.0 }
 0x4ac   : > { %v7401_v28 = vpop.eup %7400  ;;  %7412 = vrcp.f32 %v10635_v58  ;;  %v6669_v14 = vpop.f32.mrb[112].mxu0 }
 0x4ad   : > { %v7403_v18 = vpop.eup %7402  ;;  %v3953_v6 = vmul.f32 %v7401_v28, %v10578_v60  ;;  %v2927_v10 = vpop.xlane.xlu1 %2926  ;;  %v4237_v20 = vsel %vm409_vm0, %v4082_v1, 0.0  ;;  %v7666_v60 = vld [vmem:[%s12302_s8 + $0x1a0] sm:$0xff] }
 0x4ae   : > { %7414 = vrcp.f32 %v2927_v10  ;;  %v3982_v52 = vmul.f32 %v7403_v18, %v6669_v14  ;;  %v10831_v16 = vpop.xlane.xlu0 %3004  ;;  %v10833_v54 = vpop.f32.mrb[113].mxu0  ;;  %v4238_v41 = vadd.f32 %v4237_v20, %v10474_v31  ;;  %v7668_v31 = vld [vmem:[%s12302_s8 + $0x238] sm:$0xff] }
 0x4af   : > { %7416 = vrcp.f32 %v10736_v35  ;;  %v4081_v58 = vmul.f32 %v7666_v60, %v3953_v6  ;;  %v4100_v46 = vmul.f32 %v7668_v31, %v3972_v7 }
 0x4b0   : > { %v7405_v26 = vpop.eup %7404  ;;  %v4110_v57 = vmul.f32 %v7667_v53, %v3982_v52  ;;  %v4240_v2 = vadd.f32 %v4239_v11, %v4238_v41  ;;  %v6672_v18 = vpop.f32.mrb[114].mxu0 }
 0x4b1   : > { %v7407_v1 = vpop.eup %7406  ;;  %v3956_v35 = vmul.f32 %v7405_v26, %v10586_v25  ;;  %v2925_v28 = vpop.xlane.xlu1 %2924  ;;  %v4222_v10 = vsel %vm409_vm0, %v4081_v58, 0.0  ;;  %v7669_v25 = vld [vmem:[%s12302_s8 + $0x1b8] sm:$0xff] }
 0x4b2   : > { %v4181_v6 = vsel %vm409_vm0, %v4110_v57, 0.0  ;;  %7418 = vrcp.f32 %v2925_v28  ;;  %v3984_v14 = vmul.f32 %v7407_v1, %v6672_v18  ;;  %v10850_v20 = vpop.xlane.xlu0 %3010  ;;  %v10852_v52 = vpop.f32.mrb[115].mxu0  ;;  %v10862_v11 = vadd.f32 %v4222_v10, %v10463_v22  ;;  %v7670_v58 = vld [vmem:[%s12302_s8 + $0x298] sm:$0xff] }
 0x4b3   : > { %7420 = vrcp.f32 %v10752_v44  ;;  %v10856_v41 = vadd.f32 %v4181_v6, %v10713_v45  ;;  %v4084_v7 = vmul.f32 %v7669_v25, %v3956_v35  ;;  %v4269_v45 = vsel %vm409_vm0, %v4100_v46, 0.0 }
 0x4b4   : > { %v7409_v60 = vpop.eup %7408  ;;  %7422 = vrcp.f32 %v10650_v37  ;;  %v4112_v26 = vmul.f32 %v7670_v58, %v3984_v14  ;;  %v6675_v1 = vpop.f32.mrb[116].mxu0 }
 0x4b5   : > { %v7411_v44 = vpop.eup %7410  ;;  %v3955_v53 = vmul.f32 %v7409_v60, %v10591_v30  ;;  %v2931_v57 = vpop.xlane.xlu1 %2930  ;;  %v4267_v31 = vsel %vm409_vm0, %v4084_v7, 0.0  ;;  %v7671_v30 = vld [vmem:[%s12302_s8 + $0x1b0] sm:$0xff]  ;;  %v7672_v7 = vld [vmem:[%s12302_s8 + $0x2a8] sm:$0xff] }
 0x4b6   : > { %v7413_v35 = vpop.eup %7412  ;;  %v4211_v22 = vsel %vm409_vm0, %v4112_v26, 0.0  ;;  %7424 = vrcp.f32 %v2931_v57  ;;  %v3986_v28 = vmul.f32 %v7411_v44, %v6675_v1  ;;  %v10872_v37 = vpop.xlane.xlu0 %3008  ;;  %v4268_v10 = vadd.f32 %v4267_v31, %v10546_v50 }
 0x4b7   : > { %v10874_v18 = vpop.f32.mrb[117].mxu0  ;;  %v3974_v6 = vmul.f32 %v7413_v35, %v10749_v13  ;;  %7426 = vrcp.f32 %v10767_v5  ;;  %v4083_v46 = vmul.f32 %v7671_v30, %v3955_v53  ;;  %v10883_v14 = vadd.f32 %v4211_v22, %v10811_v63  ;;  %v7674_v22 = vld [vmem:[%s12302_s8 + $0x1c8] sm:$0xff] }
 0x4b8   : > { %v7415_v25 = vpop.eup %7414  ;;  %v4114_v60 = vmul.f32 %v7672_v7, %v3986_v28  ;;  %v4270_v58 = vadd.f32 %v4269_v45, %v4268_v10  ;;  %v6678_v5 = vpop.f32.mrb[118].mxu0  ;;  %v7673_v45 = vld [vmem:[%s12302_s8 + $0x248] sm:$0xff] }
 0x4b9   : > { %v7417_v50 = vpop.eup %7416  ;;  %v3958_v13 = vmul.f32 %v7415_v25, %v10608_v21  ;;  %v2929_v26 = vpop.xlane.xlu1 %2928  ;;  %v4252_v44 = vsel %vm409_vm0, %v4083_v46, 0.0  ;;  %v4102_v21 = vmul.f32 %v7673_v45, %v3974_v6 }
 0x4ba   : > { %v4241_v57 = vsel %vm409_vm0, %v4114_v60, 0.0  ;;  %7428 = vrcp.f32 %v2929_v26  ;;  %v3988_v53 = vmul.f32 %v7417_v50, %v6678_v5  ;;  %v10891_v63 = vpop.xlane.xlu0 %3014  ;;  %v10893_v1 = vpop.f32.mrb[119].mxu0  ;;  %v10896_v31 = vadd.f32 %v4252_v44, %v10521_v34  ;;  %v7675_v34 = vld [vmem:[%s12302_s8 + $0x2b8] sm:$0xff] }
 0x4bb   : > { %v10901_v35 = vadd.f32 %v4241_v57, %v4240_v2  ;;  %v4086_v28 = vmul.f32 %v7674_v22, %v3958_v13  ;;  %7430 = vrcp.f32 %v10663_v39  ;;  %v4299_v44 = vsel %vm409_vm0, %v4102_v21, 0.0 }
 0x4bc   : > { %v7419_v10 = vpop.eup %7418  ;;  %v4116_v30 = vmul.f32 %v7675_v34, %v3988_v53  ;;  %7432 = vrcp.f32 %v10800_v29  ;;  %v6681_v25 = vpop.f32.mrb[120].mxu0 }
 0x4bd   : > { %v7421_v46 = vpop.eup %7420  ;;  %v3957_v6 = vmul.f32 %v7419_v10, %v10613_v27  ;;  %v2935_v2 = vpop.xlane.xlu1 %2934  ;;  %v4297_v7 = vsel %vm409_vm0, %v4086_v28, 0.0  ;;  %v7676_v27 = vld [vmem:[%s12302_s8 + $0x1c0] sm:$0xff] }
 0x4be   : > { %v7423_v60 = vpop.eup %7422  ;;  %v4271_v50 = vsel %vm409_vm0, %v4116_v30, 0.0  ;;  %7434 = vrcp.f32 %v2935_v2  ;;  %v3990_v13 = vmul.f32 %v7421_v46, %v6681_v25  ;;  %v4298_v39 = vadd.f32 %v4297_v7, %v10616_v49  ;;  %v10915_v26 = vpop.xlane.xlu0 %3012  ;;  %v7677_v49 = vld [vmem:[%s12302_s8 + $0x2c8] sm:$0xff]  ;;  %v7678_v7 = vld [vmem:[%s12302_s8 + $0x258] sm:$0xff] }
 0x4bf   : > { %v10917_v5 = vpop.f32.mrb[121].mxu0  ;;  %v3976_v29 = vmul.f32 %v7423_v60, %v10765_v9  ;;  %v4085_v57 = vmul.f32 %v7676_v27, %v3957_v6  ;;  %v10924_v53 = vadd.f32 %v4271_v50, %v4270_v58  ;;  %v7679_v50 = vld [vmem:[%s12302_s8 + $0x1d8] sm:$0xff] }
 0x4c0   : > { %v7425_v45 = vpop.eup %7424  ;;  %v4118_v22 = vmul.f32 %v7677_v49, %v3990_v13  ;;  %v4300_v28 = vadd.f32 %v4299_v44, %v4298_v39  ;;  %v6684_v30 = vpop.f32.mrb[122].mxu0 }
 0x4c1   : > { %v7427_v10 = vpop.eup %7426  ;;  %v3960_v34 = vmul.f32 %v7425_v45, %v10633_v36  ;;  %v2933_v21 = vpop.xlane.xlu1 %2932  ;;  %v4282_v9 = vsel %vm409_vm0, %v4085_v57, 0.0  ;;  %v4104_v36 = vmul.f32 %v7678_v7, %v3976_v29 }
 0x4c2   : > { %v4301_v46 = vsel %vm409_vm0, %v4118_v22, 0.0  ;;  %7436 = vrcp.f32 %v2933_v21  ;;  %v3992_v6 = vmul.f32 %v7427_v10, %v6684_v30  ;;  %v10932_v58 = vpop.xlane.xlu0 %3018  ;;  %v10934_v2 = vpop.f32.mrb[123].mxu0  ;;  %v10937_v25 = vadd.f32 %v4282_v9, %v10593_v40  ;;  %v7680_v40 = vld [vmem:[%s12302_s8 + $0x2d8] sm:$0xff]  ;;  %v7681_v30 = vld [vmem:[%s12302_s8 + $0x1d0] sm:$0xff] }
 0x4c3   : > { %v10942_v60 = vadd.f32 %v4301_v46, %v4300_v28  ;;  %v4088_v13 = vmul.f32 %v7679_v50, %v3960_v34 }
 0x4c4   : > { %v7429_v39 = vpop.eup %7428  ;;  %v4120_v27 = vmul.f32 %v7680_v40, %v3992_v6  ;;  %v6687_v49 = vpop.f32.mrb[124].mxu0 }
 0x4c5   : > { %v3959_v44 = vmul.f32 %v7429_v39, %v10637_v55  ;;  %v4327_v57 = vsel %vm409_vm0, %v4088_v13, 0.0  ;;  %v2941_v45 = vpop.xlane.xlu1 %2940  ;;  %v7431_v29 = vpop.eup %7430  ;;  %v4329_v55 = vsel %vm409_vm0, %v4104_v36, 0.0 }
 0x4c6   : > { %v4328_v22 = vadd.f32 %v4327_v57, %v10685_v24  ;;  %7438 = vrcp.f32 %v2941_v45  ;;  %v10953_v28 = vpop.xlane.xlu0 %3016  ;;  %v10955_v10 = vpop.f32.mrb[125].mxu0  ;;  %v3978_v21 = vmul.f32 %v7431_v29, %v10779_v62  ;;  %v4331_v7 = vsel %vm409_vm0, %v4120_v27, 0.0  ;;  %v7683_v57 = vld [vmem:[%s12302_s8 + $0x1e8] sm:$0xff] }
 0x4c7   : > { %v7433_v34 = vpop.eup %7432  ;;  %7440 = vrcp.f32 %v10815_v17  ;;  %v4087_v9 = vmul.f32 %v7681_v30, %v3959_v44 }
 0x4c8   : > { %v7435_v46 = vpop.eup %7434  ;;  %v4330_v6 = vadd.f32 %v4329_v55, %v4328_v22  ;;  %v3994_v50 = vmul.f32 %v7433_v34, %v6687_v49  ;;  %v10965_v39 = vpop.f32.mrb[126].mxu0 }
 0x4c9   : > { %v3962_v24 = vmul.f32 %v7435_v46, %v10646_v47  ;;  %v2945_v13 = vpop.xlane.xlu1 %2944  ;;  %v4312_v36 = vsel %vm409_vm0, %v4087_v9, 0.0  ;;  %v10970_v40 = vpop.f32.mrb[127].mxu0  ;;  %v7682_v47 = vld [vmem:[%s12302_s8 + $0x268] sm:$0xff] }
 0x4ca   : > { %v10968_v62 = vadd.f32 %v4331_v7, %v4330_v6  ;;  %7442 = vrcp.f32 %v2945_v13  ;;  %v3023_v17 = vpop.xlane.xlu0 %3022  ;;  %v10973_v44 = vadd.f32 %v4312_v36, %v10667_v43  ;;  %v4106_v27 = vmul.f32 %v7682_v47, %v3978_v21  ;;  %v7684_v43 = vld [vmem:[%s12302_s8 + $0x2e8] sm:$0xff] }
 0x4cb   : > { %7444 = vrcp.f32 %v10850_v20  ;;  %v4090_v45 = vmul.f32 %v7683_v57, %v3962_v24  ;;  %v4122_v22 = vmul.f32 %v7684_v43, %v3994_v50  ;;  %v7687_v43 = vld [vmem:[%s12302_s8 + $0x308] sm:$0xff] }
 0x4cc   : > { %v7437_v49 = vpop.eup %7436  ;;  %v4359_v30 = vsel %vm409_vm0, %v4106_v27, 0.0 }
 0x4cd   : > { %v3961_v29 = vmul.f32 %v7437_v49, %v10652_v51  ;;  %v4357_v34 = vsel %vm409_vm0, %v4090_v45, 0.0  ;;  %v2949_v55 = vpop.xlane.xlu1 %2948  ;;  %v7685_v51 = vld [vmem:[%s12302_s8 + $0x1e0] sm:$0xff]  ;;  %v4361_v50 = vsel %vm409_vm0, %v4122_v22, 0.0 }
 0x4ce   : > { %v4358_v21 = vadd.f32 %v4357_v34, %v10756_v4  ;;  %7446 = vrcp.f32 %v2949_v55  ;;  %v10988_v20 = vpop.xlane.xlu0 %3020 }
 0x4cf   : > { %7448 = vrcp.f32 %v10891_v63  ;;  %v4089_v9 = vmul.f32 %v7685_v51, %v3961_v29 }
 0x4d0   : > { %v7439_v46 = vpop.eup %7438  ;;  %v4360_v6 = vadd.f32 %v4359_v30, %v4358_v21  ;;  %v6693_v4 = vpop.f32.mrb[128].mxu0 }
 0x4d1   : > { %v7441_v24 = vpop.eup %7440  ;;  %v3965_v7 = vmul.f32 %v7439_v46, %v10683_v12  ;;  %v2953_v13 = vpop.xlane.xlu1 %2952  ;;  %v4342_v36 = vsel %vm409_vm0, %v4089_v9, 0.0  ;;  %v7686_v12 = vld [vmem:[%s12302_s8 + $0x200] sm:$0xff] }
 0x4d2   : > { %v10998_v47 = vadd.f32 %v4361_v50, %v4360_v6  ;;  %v3998_v27 = vmul.f32 %v7441_v24, %v6693_v4  ;;  %7450 = vrcp.f32 %v2953_v13  ;;  %v11000_v63 = vpop.f32.mrb[129].mxu0  ;;  %v3027_v57 = vpop.xlane.xlu0 %3026  ;;  %v11003_v45 = vadd.f32 %v4342_v36, %v10740_v32  ;;  %v7689_v4 = vld [vmem:[%s12302_s8 + $0x210] sm:$0xff] }
 0x4d3   : > { %7452 = vrcp.f32 %v10932_v58  ;;  %v4093_v49 = vmul.f32 %v7686_v12, %v3965_v7  ;;  %v7688_v7 = vld [vmem:[%s12302_s8 + $0x318] sm:$0xff] }
 0x4d4   : > { %v7443_v29 = vpop.eup %7442  ;;  %v4126_v22 = vmul.f32 %v7687_v43, %v3998_v27  ;;  %v6696_v21 = vpop.f32.mrb[130].mxu0 }
 0x4d5   : > { %v7445_v34 = vpop.eup %7444  ;;  %v3967_v55 = vmul.f32 %v7443_v29, %v10707_v59  ;;  %v2957_v30 = vpop.xlane.xlu1 %2956  ;;  %v4164_v32 = vsel %vm409_vm0, %v4093_v49, 0.0 }
 0x4d6   : > { %v4183_v58 = vsel %vm409_vm0, %v4126_v22, 0.0  ;;  %v4000_v51 = vmul.f32 %v7445_v34, %v6696_v21  ;;  %7454 = vrcp.f32 %v2957_v30  ;;  %v11015_v9 = vpop.f32.mrb[131].mxu0  ;;  %v11017_v46 = vpop.xlane.xlu0 %3024  ;;  %v11020_v6 = vadd.f32 %v4164_v32, %v10787_v56  ;;  %v7691_v30 = vld [vmem:[%s12302_s8 + $0x220] sm:$0xff] }
 0x4d7   : > { %7456 = vrcp.f32 %v3023_v17  ;;  %v11023_v24 = vadd.f32 %v4183_v58, %v10856_v41  ;;  %v4095_v13 = vmul.f32 %v7689_v4, %v3967_v55 }
 0x4d8   : > { %v7447_v59 = vpop.eup %7446  ;;  %v4128_v50 = vmul.f32 %v7688_v7, %v4000_v51  ;;  %v6699_v56 = vpop.f32.mrb[132].mxu0 }
 0x4d9   : > { %v7449_v36 = vpop.eup %7448  ;;  %v3969_v27 = vmul.f32 %v7447_v59, %v10724_v42  ;;  %v2961_v12 = vpop.xlane.xlu1 %2960  ;;  %v4194_v43 = vsel %vm409_vm0, %v4095_v13, 0.0  ;;  %v7690_v42 = vld [vmem:[%s12302_s8 + $0x328] sm:$0xff] }
 0x4da   : > { %v4213_v17 = vsel %vm409_vm0, %v4128_v50, 0.0  ;;  %v4002_v41 = vmul.f32 %v7449_v36, %v6699_v56  ;;  %7458 = vrcp.f32 %v2961_v12  ;;  %v11033_v49 = vpop.f32.mrb[133].mxu0  ;;  %v3031_v29 = vpop.xlane.xlu0 %3030  ;;  %v11043_v21 = vadd.f32 %v4194_v43, %v10818_v61  ;;  %v7693_v56 = vld [vmem:[%s12302_s8 + $0x230] sm:$0xff] }
 0x4db   : > { %7460 = vrcp.f32 %v3027_v57  ;;  %v11037_v22 = vadd.f32 %v4213_v17, %v10883_v14  ;;  %v4097_v32 = vmul.f32 %v7691_v30, %v3969_v27 }
 0x4dc   : > { %v7451_v34 = vpop.eup %7450  ;;  %v4130_v55 = vmul.f32 %v7690_v42, %v4002_v41  ;;  %7462 = vrcp.f32 %v10526_v3  ;;  %v6702_v57 = vpop.f32.mrb[134].mxu0  ;;  %v7692_v3 = vld [vmem:[%s12302_s8 + $0x338] sm:$0xff] }
 0x4dd   : > { %v7453_v58 = vpop.eup %7452  ;;  %v3971_v14 = vmul.f32 %v7451_v34, %v10738_v23  ;;  %v2965_v51 = vpop.xlane.xlu1 %2964  ;;  %v4224_v4 = vsel %vm409_vm0, %v4097_v32, 0.0 }
 0x4de   : > { %v4243_v59 = vsel %vm409_vm0, %v4130_v55, 0.0  ;;  %v4004_v7 = vmul.f32 %v7453_v58, %v6702_v57  ;;  %7464 = vrcp.f32 %v2965_v51  ;;  %v11051_v50 = vpop.f32.mrb[135].mxu0  ;;  %v11053_v61 = vpop.xlane.xlu0 %3028  ;;  %v11064_v27 = vadd.f32 %v4224_v4, %v10862_v11 }
 0x4df   : > { %v11057_v13 = vadd.f32 %v4243_v59, %v10901_v35  ;;  %7466 = vrcp.f32 %v3031_v29  ;;  %v4099_v12 = vmul.f32 %v7693_v56, %v3971_v14  ;;  %v7695_v14 = vld [vmem:[%s12302_s8 + $0x240] sm:$0xff] }
 0x4e0   : > { %v7455_v36 = vpop.eup %7454  ;;  %7468 = vrcp.f32 %v10831_v16  ;;  %v4132_v23 = vmul.f32 %v7692_v3, %v4004_v7  ;;  %v6705_v41 = vpop.f32.mrb[136].mxu0 }
 0x4e1   : > { %v7457_v17 = vpop.eup %7456  ;;  %v3973_v35 = vmul.f32 %v7455_v36, %v10754_v0  ;;  %v2973_v29 = vpop.xlane.xlu1 %2972  ;;  %v4254_v11 = vsel %vm409_vm0, %v4099_v12, 0.0  ;;  %v7694_v0 = vld [vmem:[%s12302_s8 + $0x348] sm:$0xff] }
 0x4e2   : > { %v4273_v16 = vsel %vm409_vm0, %v4132_v23, 0.0  ;;  %v4006_v43 = vmul.f32 %v7457_v17, %v6705_v41  ;;  %7470 = vrcp.f32 %v2973_v29  ;;  %v11071_v34 = vpop.f32.mrb[137].mxu0  ;;  %v3039_v42 = vpop.xlane.xlu0 %3038  ;;  %v11082_v58 = vadd.f32 %v4254_v11, %v10896_v31  ;;  %v7697_v41 = vld [vmem:[%s12302_s8 + $0x250] sm:$0xff] }
 0x4e3   : > { %v11075_v55 = vadd.f32 %v4273_v16, %v10924_v53  ;;  %7472 = vrcp.f32 %v10872_v37  ;;  %v4101_v57 = vmul.f32 %v7695_v14, %v3973_v35 }
 0x4e4   : > { %v7459_v30 = vpop.eup %7458  ;;  %v4134_v32 = vmul.f32 %v7694_v0, %v4006_v43  ;;  %7474 = vrcp.f32 %v3039_v42  ;;  %v6708_v59 = vpop.f32.mrb[138].mxu0 }
 0x4e5   : > { %v7461_v51 = vpop.eup %7460  ;;  %v3975_v53 = vmul.f32 %v7459_v30, %v10769_v19  ;;  %v2875_v7 = vpop.xlane.xlu1 %2874  ;;  %v4284_v31 = vsel %vm409_vm0, %v4101_v57, 0.0  ;;  %v7696_v19 = vld [vmem:[%s12302_s8 + $0x358] sm:$0xff] }
 0x4e6   : > { %v4303_v37 = vsel %vm409_vm0, %v4134_v32, 0.0  ;;  %v4008_v4 = vmul.f32 %v7461_v51, %v6708_v59  ;;  %7476 = vrcp.f32 %v2875_v7  ;;  %v11089_v36 = vpop.f32.mrb[139].mxu0  ;;  %v3037_v3 = vpop.xlane.xlu0 %3036  ;;  %v11099_v35 = vadd.f32 %v4284_v31, %v10937_v25  ;;  %v7698_v51 = vld [vmem:[%s12302_s8 + $0x260] sm:$0xff] }
 0x4e7   : > { %v7463_v23 = vpop.eup %7462  ;;  %v11093_v56 = vadd.f32 %v4303_v37, %v10942_v60  ;;  %7478 = vrcp.f32 %v3037_v3  ;;  %v4103_v29 = vmul.f32 %v7697_v41, %v3975_v53  ;;  %v12601_v7 = vld [vmem:[#allocation37_spill] sm:$0xff] }
 0x4e8   : > { %v7465_v12 = vpop.eup %7464  ;;  %v4136_v17 = vmul.f32 %v7696_v19, %v4008_v4  ;;  %v6711_v60 = vpop.f32.mrb[140].mxu0  ;;  %v3916_v37 = vmul.f32 %v7463_v23, %v12601_v7  ;;  %v7699_v4 = vld [vmem:[%s12302_s8 + $0x368] sm:$0xff] }
 0x4e9   : > { %v7467_v16 = vpop.eup %7466  ;;  %v3977_v43 = vmul.f32 %v7465_v12, %v10784_v38  ;;  %v2977_v42 = vpop.xlane.xlu1 %2976  ;;  %v4314_v25 = vsel %vm409_vm0, %v4103_v29, 0.0 }
 0x4ea   : > { %v7469_v11 = vpop.eup %7468  ;;  %v4333_v30 = vsel %vm409_vm0, %v4136_v17, 0.0  ;;  %v4010_v0 = vmul.f32 %v7467_v16, %v6711_v60  ;;  %7480 = vrcp.f32 %v2977_v42  ;;  %v11106_v32 = vpop.f32.mrb[141].mxu0  ;;  %v7701_v60 = vld [vmem:[%s12302_s8 + $0x280] sm:$0xff] }
 0x4eb   : > { %v3043_v14 = vpop.xlane.xlu0 %3042  ;;  %v3997_v57 = vmul.f32 %v7469_v11, %v11000_v63  ;;  %v4105_v53 = vmul.f32 %v7698_v51, %v3977_v43  ;;  %v11114_v38 = vadd.f32 %v4333_v30, %v10968_v62  ;;  %7482 = vrcp.f32 %v10915_v26 }
 0x4ec   : > { %v7471_v59 = vpop.eup %7470  ;;  %v4138_v3 = vmul.f32 %v7699_v4, %v4010_v0  ;;  %v11122_v63 = vadd.f32 %v4314_v25, %v10973_v44  ;;  %7484 = vrcp.f32 %v3043_v14  ;;  %v11125_v12 = vpop.f32.mrb[142].mxu0 }
 0x4ed   : > { %v3981_v31 = vmul.f32 %v7471_v59, %v10833_v54  ;;  %v2905_v62 = vpop.xlane.xlu1 %2904  ;;  %v4344_v19 = vsel %vm409_vm0, %v4105_v53, 0.0  ;;  %v7473_v17 = vpop.eup %7472  ;;  %v7700_v54 = vld [vmem:[%s12302_s8 + $0x300] sm:$0xff] }
 0x4ee   : > { %v4363_v23 = vsel %vm409_vm0, %v4138_v3, 0.0  ;;  %7486 = vrcp.f32 %v2905_v62  ;;  %v11129_v26 = vpop.f32.mrb[143].mxu0  ;;  %v11132_v29 = vadd.f32 %v4344_v19, %v11003_v45  ;;  %v7475_v44 = vpop.eup %7474  ;;  %v4125_v16 = vmul.f32 %v7700_v54, %v3997_v57  ;;  %v7702_v45 = vld [vmem:[%s12302_s8 + $0x78] sm:$0xff] }
 0x4ef   : > { %v3041_v41 = vpop.xlane.xlu0 %3040  ;;  %v11138_v43 = vadd.f32 %v4363_v23, %v10998_v47  ;;  %v4109_v42 = vmul.f32 %v7701_v60, %v3981_v31  ;;  %v4044_v30 = vmul.f32 %v7702_v45, %v3916_v37  ;;  %v3999_v51 = vmul.f32 %v7473_v17, %v11015_v9  ;;  %v7703_v37 = vld [vmem:[%s12302_s8 + $0xf8] sm:$0xff]  ;;  %v7704_v9 = vld [vmem:[%s12302_s8 + $0x388] sm:$0xff] }
 0x4f0   : > { %7488 = vrcp.f32 %v3041_v41  ;;  %v7477_v11 = vpop.eup %7476  ;;  %v6717_v25 = vpop.f32.mrb[144].mxu0  ;;  %v4168_v3 = vsel %vm409_vm0, %v4125_v16, 0.0 }
 0x4f1   : > { %v7479_v0 = vpop.eup %7478  ;;  %v3932_v14 = vmul.f32 %v7477_v11, %v10373_v33  ;;  %v2981_v57 = vpop.xlane.xlu1 %2980  ;;  %v4166_v47 = vsel %vm409_vm0, %v4109_v42, 0.0  ;;  %v4014_v53 = vmul.f32 %v7475_v44, %v6717_v25  ;;  %v4382_v19 = vsel %vm409_vm0, %v4044_v30, 0.0  ;;  %v7705_v44 = vld [vmem:[%s12302_s8 + $0x380] sm:$0xff]  ;;  %v7707_v25 = vld [vmem:[%s12302_s8 + $0x290] sm:$0xff] }
 0x4f2   : > { %7490 = vrcp.f32 %v2981_v57  ;;  %v3694_v59 = vpop.f32.mrb[145].mxu0  ;;  %v4167_v7 = vadd.f32 %v4166_v47, %v11020_v6 }
 0x4f3   : > { %v3047_v4 = vpop.xlane.xlu0 %3046  ;;  %v4060_v31 = vmul.f32 %v7703_v37, %v3932_v14  ;;  %v4013_v33 = vmul.f32 %v7479_v0, %v3694_v59  ;;  %7492 = vrcp.f32 %v10953_v28  ;;  %v4142_v17 = vmul.f32 %v7704_v9, %v4014_v53  ;;  %v7706_v28 = vld [vmem:[%s12302_s8 + $0x310] sm:$0xff] }
 0x4f4   : > { %v7481_v62 = vpop.eup %7480  ;;  %v4169_v6 = vadd.f32 %v4168_v3, %v4167_v7  ;;  %7494 = vrcp.f32 %v3047_v4  ;;  %v4127_v42 = vmul.f32 %v7706_v28, %v3999_v51 }
 0x4f5   : > { %v4383_v23 = vsel %vm409_vm0, %v4060_v31, 0.0  ;;  %v3983_v41 = vmul.f32 %v7481_v62, %v10852_v52  ;;  %v4141_v54 = vmul.f32 %v7705_v44, %v4013_v33  ;;  %v2907_v16 = vpop.xlane.xlu1 %2906  ;;  %v7483_v60 = vpop.eup %7482  ;;  %v4185_v45 = vsel %vm409_vm0, %v4142_v17, 0.0  ;;  %v7710_v44 = vld [vmem:[%s12302_s8 + $0x390] sm:$0xff] }
 0x4f6   : > { %v11167_v11 = vadd.f32 %v4383_v23, %v4382_v19  ;;  %7496 = vrcp.f32 %v2907_v16  ;;  %v7485_v52 = vpop.eup %7484  ;;  %v4186_v0 = vadd.f32 %v4185_v45, %v11023_v24  ;;  %v4001_v37 = vmul.f32 %v7483_v60, %v11033_v49 }
 0x4f7   : > { %v3045_v30 = vpop.xlane.xlu0 %3044  ;;  %v4170_v14 = vsel %vm409_vm0, %v4141_v54, 0.0  ;;  %v4111_v57 = vmul.f32 %v7707_v25, %v3983_v41  ;;  %v4198_v19 = vsel %vm409_vm0, %v4127_v42, 0.0 }
 0x4f8   : > { %7498 = vrcp.f32 %v3045_v30  ;;  %v7487_v47 = vpop.eup %7486  ;;  %v4171_v53 = vadd.f32 %v4170_v14, %v4169_v6  ;;  %v6720_v7 = vpop.f32.mrb[146].mxu0  ;;  %v7712_v14 = vld [vmem:[%s12302_s8 + $0x2a0] sm:$0xff] }
 0x4f9   : > { %v3947_v59 = vmul.f32 %v7487_v47, %v10528_v8  ;;  %v2985_v4 = vpop.xlane.xlu1 %2984  ;;  %v4196_v3 = vsel %vm409_vm0, %v4111_v57, 0.0  ;;  %v4016_v24 = vmul.f32 %v7485_v52, %v6720_v7  ;;  %v3704_v31 = vpop.f32.mrb[147].mxu0  ;;  %v7708_v8 = vld [vmem:[%s12302_s8 + $0x170] sm:$0xff] }
 0x4fa   : > { %v7489_v51 = vpop.eup %7488  ;;  %7500 = vrcp.f32 %v2985_v4  ;;  %v4197_v33 = vadd.f32 %v4196_v3, %v11043_v21  ;;  %6755 = vmatprep.mubr.msk.f32.mxu1 %vm409_vm0, %v4171_v53  ;;  %v7709_v21 = vld [vmem:[%s12302_s8 + $0x398] sm:$0xff] }
 0x4fb   : > { %v3051_v62 = vpop.xlane.xlu0 %3050  ;;  %7502 = vrcp.f32 %v10782_v15  ;;  %v4075_v9 = vmul.f32 %v7708_v8, %v3947_v59  ;;  %v4015_v17 = vmul.f32 %v7489_v51, %v3704_v31  ;;  %6756 = vmatmul.mubr.msk.f32.vlgmr.msra.gmra.mrb[128].mxu1 %vm409_vm0, %v4186_v0  ;;  %v4144_v6 = vmul.f32 %v7709_v21, %v4016_v24  ;;  %v12602_v51 = vld [vmem:[#allocation38_spill] sm:$0xff] }
 0x4fc   : > { %v7491_v49 = vpop.eup %7490  ;;  %7504 = vrcp.f32 %v10988_v20  ;;  %v4199_v23 = vadd.f32 %v4198_v19, %v4197_v33  ;;  %v7711_v20 = vld [vmem:[%s12302_s8 + $0x320] sm:$0xff] }
 0x4fd   : > { %v4370_v15 = vsel %vm409_vm0, %v4075_v9, 0.0  ;;  %v3985_v41 = vmul.f32 %v7491_v49, %v10874_v18  ;;  %v4143_v54 = vmul.f32 %v7710_v44, %v4015_v17  ;;  %7506 = vrcp.f32 %v3051_v62  ;;  %v2937_v16 = vpop.xlane.xlu1 %2936  ;;  %v7493_v60 = vpop.eup %7492  ;;  %v7713_v62 = vld [vmem:[%s12302_s8 + $0x178] sm:$0xff]  ;;  %v7714_v9 = vld [vmem:[%s12302_s8 + $0x3a8] sm:$0xff] }
 0x4fe   : > { %v4129_v28 = vmul.f32 %v7711_v20, %v4001_v37  ;;  %v4215_v42 = vsel %vm409_vm0, %v4144_v6, 0.0  ;;  %7508 = vrcp.f32 %v2937_v16  ;;  %v11200_v30 = vadd.f32 %v4370_v15, %v10771_v48  ;;  %v7495_v18 = vpop.eup %7494 }
 0x4ff   : > { %v3049_v45 = vpop.xlane.xlu0 %3048  ;;  %v4216_v52 = vadd.f32 %v4215_v42, %v11037_v22  ;;  %v4200_v0 = vsel %vm409_vm0, %v4143_v54, 0.0  ;;  %v4113_v25 = vmul.f32 %v7712_v14, %v3985_v41  ;;  %v4003_v3 = vmul.f32 %v7493_v60, %v11051_v50  ;;  %v7716_v54 = vld [vmem:[%s12302_s8 + $0x330] sm:$0xff] }
 0x500   : > { %7510 = vrcp.f32 %v3049_v45  ;;  %v7497_v57 = vpop.eup %7496  ;;  %v4201_v47 = vadd.f32 %v4200_v0, %v4199_v23  ;;  %v6723_v7 = vpop.f32.mrb[148].mxu0  ;;  %v4228_v33 = vsel %vm409_vm0, %v4129_v28, 0.0  ;;  %v7715_v23 = vld [vmem:[%s12302_s8 + $0x3a0] sm:$0xff]  ;;  %v7717_v45 = vld [vmem:[%s12302_s8 + $0x2b0] sm:$0xff] }
 0x501   : > { %v3948_v59 = vmul.f32 %v7497_v57, %v12602_v51  ;;  %v2989_v4 = vpop.xlane.xlu1 %2988  ;;  %v4226_v48 = vsel %vm409_vm0, %v4113_v25, 0.0  ;;  %v4018_v22 = vmul.f32 %v7495_v18, %v6723_v7  ;;  %v3714_v37 = vpop.f32.mrb[149].mxu0  ;;  %v4131_v16 = vmul.f32 %v7716_v54, %v4003_v3  ;;  %v12603_v57 = vld [vmem:[#allocation39_spill] sm:$0xff] }
 0x502   : > { %v7499_v53 = vpop.eup %7498  ;;  %7512 = vrcp.f32 %v2989_v4  ;;  %v4227_v24 = vadd.f32 %v4226_v48, %v11064_v27  ;;  %6758 = vmatprep.mubr.msk.f32.mxu1 %vm409_vm0, %v4201_v47 }
 0x503   : > { %v3055_v31 = vpop.xlane.xlu0 %3054  ;;  %v4076_v19 = vmul.f32 %v7713_v62, %v3948_v59  ;;  %v4017_v8 = vmul.f32 %v7499_v53, %v3714_v37  ;;  %6759 = vmatmul.mubr.msk.f32.gmra.mrb[130].mxu1 %vm409_vm0, %v4216_v52  ;;  %v4146_v27 = vmul.f32 %v7714_v9, %v4018_v22  ;;  %v4258_v48 = vsel %vm409_vm0, %v4131_v16, 0.0 }
 0x504   : > { %7514 = vrcp.f32 %v3055_v31  ;;  %v7501_v50 = vpop.eup %7500  ;;  %v4229_v17 = vadd.f32 %v4228_v33, %v4227_v24  ;;  %v12604_v24 = vld [vmem:[#allocation41_spill] sm:$0xff] }
 0x505   : > { %v7503_v49 = vpop.eup %7502  ;;  %7516 = vrcp.f32 %v11017_v46  ;;  %v4385_v21 = vsel %vm409_vm0, %v4076_v19, 0.0  ;;  %v3987_v6 = vmul.f32 %v7501_v50, %v10893_v1  ;;  %v4145_v15 = vmul.f32 %v7715_v23, %v4017_v8  ;;  %v2939_v41 = vpop.xlane.xlu1 %2938  ;;  %v7720_v8 = vld [vmem:[%s12302_s8 + $0x340] sm:$0xff] }
 0x506   : > { %v7505_v44 = vpop.eup %7504  ;;  %v4245_v60 = vsel %vm409_vm0, %v4146_v27, 0.0  ;;  %7518 = vrcp.f32 %v2939_v41  ;;  %v11231_v20 = vadd.f32 %v4385_v21, %v11167_v11  ;;  %v3980_v31 = vmul.f32 %v7503_v49, %v12604_v24  ;;  %v7721_v27 = vld [vmem:[%s12302_s8 + $0x3b0] sm:$0xff] }
 0x507   : > { %v3053_v46 = vpop.xlane.xlu0 %3052  ;;  %v7507_v1 = vpop.eup %7506  ;;  %v4246_v28 = vadd.f32 %v4245_v60, %v11057_v13  ;;  %v4230_v42 = vsel %vm409_vm0, %v4145_v15, 0.0  ;;  %v4115_v18 = vmul.f32 %v7717_v45, %v3987_v6  ;;  %v4005_v25 = vmul.f32 %v7505_v44, %v11071_v34  ;;  %v7718_v34 = vld [vmem:[%s12302_s8 + $0x1f0] sm:$0xff]  ;;  %v7722_v60 = vld [vmem:[%s12302_s8 + $0x2c0] sm:$0xff] }
 0x508   : > { %7520 = vrcp.f32 %v3053_v46  ;;  %v7509_v52 = vpop.eup %7508  ;;  %v4231_v0 = vadd.f32 %v4230_v42, %v4229_v17  ;;  %v6726_v11 = vpop.f32.mrb[150].mxu0  ;;  %v7723_v42 = vld [vmem:[%s12302_s8 + $0x3c8] sm:$0xff] }
 0x509   : > { %v3963_v47 = vmul.f32 %v7509_v52, %v12603_v57  ;;  %v2993_v53 = vpop.xlane.xlu1 %2992  ;;  %v4256_v51 = vsel %vm409_vm0, %v4115_v18, 0.0  ;;  %v4020_v13 = vmul.f32 %v7507_v1, %v6726_v11  ;;  %v3724_v59 = vpop.f32.mrb[151].mxu0  ;;  %v4133_v50 = vmul.f32 %v7720_v8, %v4005_v25 }
 0x50a   : > { %v7511_v14 = vpop.eup %7510  ;;  %7522 = vrcp.f32 %v2993_v53  ;;  %v4257_v7 = vadd.f32 %v4256_v51, %v11082_v58  ;;  %6761 = vmatprep.mubr.msk.f32.mxu1 %vm409_vm0, %v4231_v0  ;;  %v7719_v58 = vld [vmem:[%s12302_s8 + $0x3b8] sm:$0xff] }
 0x50b   : > { %v3059_v4 = vpop.xlane.xlu0 %3058  ;;  %v4091_v3 = vmul.f32 %v7718_v34, %v3963_v47  ;;  %v4019_v22 = vmul.f32 %v7511_v14, %v3724_v59  ;;  %6762 = vmatmul.mubr.msk.f32.gmra.mrb[132].mxu1 %vm409_vm0, %v4246_v28  ;;  %v4148_v33 = vmul.f32 %v7719_v58, %v4020_v13  ;;  %v12605_v0 = vld [vmem:[#allocation40_spill] sm:$0xff]  ;;  %v4288_v13 = vsel %vm409_vm0, %v4133_v50, 0.0 }
 0x50c   : > { %7524 = vrcp.f32 %v3059_v4  ;;  %v7513_v37 = vpop.eup %7512  ;;  %v4259_v62 = vadd.f32 %v4258_v48, %v4257_v7 }
 0x50d   : > { %7526 = vrcp.f32 %v11053_v61  ;;  %v3989_v9 = vmul.f32 %v7513_v37, %v10917_v5  ;;  %v4147_v17 = vmul.f32 %v7721_v27, %v4019_v22  ;;  %v2969_v61 = vpop.xlane.xlu1 %2968  ;;  %v6729_v49 = vpop.f32.mrb[152].mxu0  ;;  %v4372_v21 = vsel %vm409_vm0, %v4091_v3, 0.0  ;;  %v7727_v22 = vld [vmem:[%s12302_s8 + $0x350] sm:$0xff] }
 0x50e   : > { %v7515_v19 = vpop.eup %7514  ;;  %v4275_v6 = vsel %vm409_vm0, %v4148_v33, 0.0  ;;  %7528 = vrcp.f32 %v2969_v61  ;;  %v3734_v41 = vpop.f32.mrb[153].mxu0  ;;  %v11263_v44 = vadd.f32 %v4372_v21, %v11200_v30  ;;  %v7729_v21 = vld [vmem:[%s12302_s8 + $0x3d8] sm:$0xff] }
 0x50f   : > { %v4022_v23 = vmul.f32 %v7515_v19, %v6729_v49  ;;  %v3057_v15 = vpop.xlane.xlu0 %3056  ;;  %v7517_v54 = vpop.eup %7516  ;;  %v4276_v5 = vadd.f32 %v4275_v6, %v11075_v55  ;;  %v4260_v16 = vsel %vm409_vm0, %v4147_v17, 0.0  ;;  %v4117_v46 = vmul.f32 %v7722_v60, %v3989_v9  ;;  %v7724_v55 = vld [vmem:[%s12302_s8 + $0x278] sm:$0xff] }
 0x510   : > { %7530 = vrcp.f32 %v3057_v15  ;;  %v7519_v1 = vpop.eup %7518  ;;  %v4261_v28 = vadd.f32 %v4260_v16, %v4259_v62  ;;  %v4108_v18 = vmul.f32 %v7724_v55, %v3980_v31  ;;  %v4007_v52 = vmul.f32 %v7517_v54, %v11089_v36  ;;  %v7725_v36 = vld [vmem:[%s12302_s8 + $0x1f8] sm:$0xff] }
 0x511   : > { %v4150_v45 = vmul.f32 %v7723_v42, %v4022_v23  ;;  %v3964_v14 = vmul.f32 %v7519_v1, %v12605_v0  ;;  %v4286_v25 = vsel %vm409_vm0, %v4117_v46, 0.0  ;;  %v2997_v57 = vpop.xlane.xlu1 %2996 }
 0x512   : > { %v7521_v30 = vpop.eup %7520  ;;  %v4287_v53 = vadd.f32 %v4286_v25, %v11099_v35  ;;  %7532 = vrcp.f32 %v2997_v57  ;;  %6764 = vmatprep.mubr.msk.f32.mxu1 %vm409_vm0, %v4261_v28  ;;  %v7726_v35 = vld [vmem:[%s12302_s8 + $0x3c0] sm:$0xff]  ;;  %v4135_v37 = vmul.f32 %v7727_v22, %v4007_v52  ;;  %v4389_v27 = vsel %vm409_vm0, %v4108_v18, 0.0  ;;  %v7731_v52 = vld [vmem:[%s12302_s8 + $0x3d0] sm:$0xff] }
 0x513   : > { %v4305_v47 = vsel %vm409_vm0, %v4150_v45, 0.0  ;;  %v4021_v11 = vmul.f32 %v7521_v30, %v3734_v41  ;;  %v3063_v51 = vpop.xlane.xlu0 %3062  ;;  %v4092_v59 = vmul.f32 %v7725_v36, %v3964_v14  ;;  %6765 = vmatmul.mubr.msk.f32.gmra.mrb[134].mxu1 %vm409_vm0, %v4276_v5  ;;  %v12606_v41 = vld [vmem:[#allocation43_spill] sm:$0xff]  ;;  %v7732_v36 = vld [vmem:[%s12302_s8 + $0x360] sm:$0xff] }
 0x514   : > { %v4306_v7 = vadd.f32 %v4305_v47, %v11093_v56  ;;  %7534 = vrcp.f32 %v3063_v51  ;;  %v7523_v4 = vpop.eup %7522  ;;  %v4289_v34 = vadd.f32 %v4288_v13, %v4287_v53  ;;  %v7730_v45 = vld [vmem:[%s12302_s8 + $0x270] sm:$0xff] }
 0x515   : > { %v4149_v48 = vmul.f32 %v7726_v35, %v4021_v11  ;;  %v3991_v24 = vmul.f32 %v7523_v4, %v10934_v2  ;;  %v3001_v31 = vpop.xlane.xlu1 %3000  ;;  %v6732_v56 = vpop.f32.mrb[154].mxu0  ;;  %v4387_v58 = vsel %vm409_vm0, %v4092_v59, 0.0  ;;  %v7728_v2 = vld [vmem:[%s12302_s8 + $0x2d0] sm:$0xff] }
 0x516   : > { %v7525_v3 = vpop.eup %7524  ;;  %7536 = vrcp.f32 %v3001_v31  ;;  %v3744_v50 = vpop.f32.mrb[155].mxu0  ;;  %v4388_v9 = vadd.f32 %v4387_v58, %v11231_v20  ;;  %v4318_v20 = vsel %vm409_vm0, %v4135_v37, 0.0 }
 0x517   : > { %v7527_v33 = vpop.eup %7526  ;;  %v4290_v62 = vsel %vm409_vm0, %v4149_v48, 0.0  ;;  %v4024_v19 = vmul.f32 %v7525_v3, %v6732_v56  ;;  %v3061_v8 = vpop.xlane.xlu0 %3060  ;;  %v4119_v61 = vmul.f32 %v7728_v2, %v3991_v24  ;;  %v7734_v48 = vld [vmem:[%s12302_s8 + $0x3e8] sm:$0xff] }
 0x518   : > { %v4291_v17 = vadd.f32 %v4290_v62, %v4289_v34  ;;  %7538 = vrcp.f32 %v3061_v8  ;;  %v7529_v49 = vpop.eup %7528  ;;  %v11305_v23 = vadd.f32 %v4389_v27, %v4388_v9  ;;  %v4009_v42 = vmul.f32 %v7527_v33, %v11106_v32  ;;  %v7736_v8 = vld [vmem:[%s12302_s8 + $0x3e0] sm:$0xff] }
 0x519   : > { %v4152_v6 = vmul.f32 %v7729_v21, %v4024_v19  ;;  %v3979_v54 = vmul.f32 %v7529_v49, %v12606_v41  ;;  %v4316_v5 = vsel %vm409_vm0, %v4119_v61, 0.0  ;;  %v3033_v16 = vpop.xlane.xlu1 %3032 }
 0x51a   : > { %v7531_v15 = vpop.eup %7530  ;;  %6767 = vmatprep.mubr.msk.f32.mxu1 %vm409_vm0, %v4291_v17  ;;  %v4317_v1 = vadd.f32 %v4316_v5, %v11122_v63  ;;  %7540 = vrcp.f32 %v3033_v16  ;;  %v4137_v59 = vmul.f32 %v7732_v36, %v4009_v42  ;;  %v7739_v42 = vld [vmem:[%s12302_s8 + $0x3f0] sm:$0xff]  ;;  %v4872_v36 = vld [vmem:[%s12298_s4 + $0x28] sm:$0xff] }
 0x51b   : > { %v4335_v60 = vsel %vm409_vm0, %v4152_v6, 0.0  ;;  %v4023_v46 = vmul.f32 %v7531_v15, %v3744_v50  ;;  %6768 = vmatmul.mubr.msk.f32.gmra.mrb[136].mxu1 %vm409_vm0, %v4306_v7  ;;  %v3003_v28 = vpop.xlane.xlu0 %3002  ;;  %v4107_v30 = vmul.f32 %v7730_v45, %v3979_v54  ;;  %v7737_v15 = vld [vmem:[%s12302_s8 + $0x370] sm:$0xff] }
 0x51c   : > { %v4336_v55 = vadd.f32 %v4335_v60, %v11114_v38  ;;  %7542 = vrcp.f32 %v3003_v28  ;;  %v7533_v18 = vpop.eup %7532  ;;  %v4319_v0 = vadd.f32 %v4318_v20, %v4317_v1  ;;  %v4348_v58 = vsel %vm409_vm0, %v4137_v59, 0.0  ;;  %v4874_v59 = vld [vmem:[%s12298_s4 + $0x38] sm:$0xff] }
 0x51d   : > { %v4151_v63 = vmul.f32 %v7731_v52, %v4023_v46  ;;  %v3993_v25 = vmul.f32 %v7533_v18, %v10955_v10  ;;  %v3065_v57 = vpop.xlane.xlu1 %3064  ;;  %v6735_v32 = vpop.f32.mrb[156].mxu0  ;;  %v4374_v47 = vsel %vm409_vm0, %v4107_v30, 0.0  ;;  %v7733_v10 = vld [vmem:[%s12302_s8 + $0x2e0] sm:$0xff]  ;;  %v7740_v30 = vld [vmem:[%s12302_s8 + $0x378] sm:$0xff] }
 0x51e   : > { %v7535_v14 = vpop.eup %7534  ;;  %7544 = vrcp.f32 %v3065_v57  ;;  %v3754_v51 = vpop.f32.mrb[157].mxu0  ;;  %v4375_v13 = vadd.f32 %v4374_v47, %v11263_v44  ;;  %v4868_v47 = vld [vmem:[%s12298_s4 + $0x8] sm:$0xff] }
 0x51f   : > { %v4320_v11 = vsel %vm409_vm0, %v4151_v63, 0.0  ;;  %v4026_v53 = vmul.f32 %v7535_v14, %v6735_v32  ;;  %v3035_v38 = vpop.xlane.xlu0 %3034  ;;  %v4121_v4 = vmul.f32 %v7733_v10, %v3993_v25  ;;  %v6895_v10 = vpack.c.bf16 %v4874_v59, %v4872_v36  ;;  %v7753_v59 = vld [vmem:[%s7984_s30 + $0x50] sm:$0xff] }
 0x520   : > { %v4321_v7 = vadd.f32 %v4320_v11, %v4319_v0  ;;  %7546 = vrcp.f32 %v3035_v38  ;;  %v7537_v35 = vpop.eup %7536  ;;  %v4870_v11 = vld [vmem:[%s12298_s4 + $0x18] sm:$0xff]  ;;  %v4867_v38 = vld [vmem:[%s12298_s4] sm:$0xff] }
 0x521   : > { %v4154_v34 = vmul.f32 %v7734_v48, %v4026_v53  ;;  %v3995_v44 = vmul.f32 %v7537_v35, %v10970_v40  ;;  %v4346_v22 = vsel %vm409_vm0, %v4121_v4, 0.0  ;;  %v7735_v40 = vld [vmem:[%s12302_s8 + $0x2f0] sm:$0xff]  ;;  %v6891_v53 = vpack.c.bf16 %v4870_v11, %v4868_v47  ;;  %v11406_v48 = vld [vmem:[%s12301_s7] sm:$0x3f] }
 0x522   : > { %v7539_v3 = vpop.eup %7538  ;;  %6770 = vmatprep.mubr.msk.f32.mxu1 %vm409_vm0, %v4321_v7  ;;  %v4347_v31 = vadd.f32 %v4346_v22, %v11132_v29  ;;  %v4871_v7 = vld [vmem:[%s12298_s4 + $0x20] sm:$0xff]  ;;  %v4873_v4 = vld [vmem:[%s12298_s4 + $0x30] sm:$0xff] }
 0x523   : > { %v4365_v37 = vsel %vm409_vm0, %v4154_v34, 0.0  ;;  %v4025_v24 = vmul.f32 %v7539_v3, %v3754_v51  ;;  %6771 = vmatmul.mubr.msk.f32.gmra.mrb[138].mxu1 %vm409_vm0, %v4336_v55  ;;  %v3067_v56 = vpop.xlane.xlu0 %3066  ;;  %v4123_v62 = vmul.f32 %v7735_v40, %v3995_v44  ;;  %v4869_v51 = vld [vmem:[%s12298_s4 + $0x10] sm:$0xff]  ;;  %6892 = vmatprep.subr.bf16.mxu0 %v6891_v53  ;;  %v6897_v35 = vpack.c.bf16 %v4873_v4, %v4871_v7  ;;  %v12607_v34 = vld [vmem:[#allocation6_spill] sm:$0xff] }
 0x524   : > { %v4366_v33 = vadd.f32 %v4365_v37, %v11138_v43  ;;  %7548 = vrcp.f32 %v3067_v56  ;;  %v7541_v19 = vpop.eup %7540  ;;  %v4349_v29 = vadd.f32 %v4348_v58, %v4347_v31  ;;  %v11410_v3 = vrot.slane %v11406_v48, %v12607_v34  ;;  %v7742_v31 = vld [vmem:[%s7984_s30 + $0x8] sm:$0xff]  ;;  %v7743_v58 = vld [vmem:[%s7984_s30] sm:$0xff] }
 0x525   : > { %v4153_v50 = vmul.f32 %v7736_v8, %v4025_v24  ;;  %v4011_v27 = vmul.f32 %v7541_v19, %v11129_v26  ;;  %v6738_v17 = vpop.f32.mrb[158].mxu0  ;;  %v4376_v2 = vsel %vm409_vm0, %v4123_v62, 0.0  ;;  %v7738_v26 = vld [vmem:[%s12302_s8 + $0x2f8] sm:$0xff] }
 0x526   : > { %v7543_v9 = vpop.eup %7542  ;;  %v3764_v49 = vpop.f32.mrb[159].mxu0  ;;  %v4377_v21 = vadd.f32 %v4376_v2, %v4375_v13  ;;  %v6893_v13 = vpack.c.bf16 %v4869_v51, %v4867_v38 }
 0x527   : > { %v3996_v43 = vmul.f32 %v7543_v9, %v10965_v39  ;;  %v4350_v61 = vsel %vm409_vm0, %v4153_v50, 0.0  ;;  %v4139_v20 = vmul.f32 %v7737_v15, %v4011_v27  ;;  %v7744_v9 = vld [vmem:[%s7984_s30 + $0x18] sm:$0xff] }
 0x528   : > { %v4351_v6 = vadd.f32 %v4350_v61, %v4349_v29  ;;  %v7545_v41 = vpop.eup %7544  ;;  %6894 = vmatpush1.bf16.msra.mxu0 %v6893_v13  ;;  %v7752_v13 = vld [vmem:[%s7984_s30 + $0x58] sm:$0xff] }
 0x529   : > { %v4124_v54 = vmul.f32 %v7738_v26, %v3996_v43  ;;  %v4027_v16 = vmul.f32 %v7545_v41, %v3764_v49  ;;  %v4378_v39 = vsel %vm409_vm0, %v4139_v20, 0.0  ;;  %6896 = vmatprep.subr.bf16.mxu0 %v6895_v10  ;;  %v7746_v20 = vld [vmem:[%s7984_s30 + $0x28] sm:$0xff]  ;;  %v7747_v26 = vld [vmem:[%s7984_s30 + $0x20] sm:$0xff] }
 0x52a   : > { %v7547_v5 = vpop.eup %7546  ;;  %6773 = vmatprep.mubr.msk.f32.mxu1 %vm409_vm0, %v4351_v6  ;;  %v4379_v1 = vadd.f32 %v4378_v39, %v4377_v21 }
 0x52b   : > { %v4012_v60 = vmul.f32 %v7547_v5, %v11125_v12  ;;  %v4391_v46 = vsel %vm409_vm0, %v4124_v54, 0.0  ;;  %6774 = vmatmul.mubr.msk.f32.gmra.mrb[140].mxu1 %vm409_vm0, %v4366_v33  ;;  %v4155_v45 = vmul.f32 %v7739_v42, %v4027_v16 }
 0x52c   : > { %v4392_v28 = vadd.f32 %v4391_v46, %v11305_v23  ;;  %v7741_v23 = vld [vmem:[%s12302_s8 + $0x3f8] sm:$0xff]  ;;  %6898 = vmatpush1.bf16.msra.mxu0 %v6897_v35 }
 0x52d   : > { %v4140_v55 = vmul.f32 %v7740_v30, %v4012_v60  ;;  %v4380_v12 = vsel %vm409_vm0, %v4155_v45, 0.0  ;;  %v7749_v45 = vld [vmem:[%s7984_s30 + $0x30] sm:$0xff] }
 0x52e   : > { %v7549_v18 = vpop.eup %7548  ;;  %v4381_v0 = vadd.f32 %v4380_v12, %v4379_v1 }
 0x52f   : > { %v4028_v52 = vmul.f32 %v7549_v18, %v6738_v17  ;;  %v4393_v63 = vsel %vm409_vm0, %v4140_v55, 0.0  ;;  %v7745_v17 = vld [vmem:[%s7984_s30 + $0x10] sm:$0xff] }
 0x530   : > { %v4394_v14 = vadd.f32 %v4393_v63, %v4392_v28  ;;  %6776 = vmatprep.mubr.msk.f32.mxu1 %vm409_vm0, %v4381_v0  ;;  %v7748_v28 = vld [vmem:[%s7984_s30 + $0x38] sm:$0xff] }
 0x531   : > { %v4156_v25 = vmul.f32 %v7741_v23, %v4028_v52 }
 0x533   : > { %v4395_v57 = vsel %vm409_vm0, %v4156_v25, 0.0  ;;  %v7751_v25 = vld [vmem:[%s7984_s30 + $0x40] sm:$0xff] }
 0x534   : > { %v4396_v32 = vadd.f32 %v4395_v57, %v4394_v14  ;;  %v7750_v14 = vld [vmem:[%s7984_s30 + $0x48] sm:$0xff] }
 0x536   : > { %6777 = vmatmul.mubr.msk.f32.gmra.mrb[142].mxu1 %vm409_vm0, %v4396_v32 }
 0x5ce   : > { %v6757_v44 = vpop.f32.mrb[128].mxu1 }
 0x5cf   : > { %v4529_v22 = vadd.f32 %v6757_v44, %v11410_v3  ;;  %v4523_v37 = vpop.f32.mrb[129].mxu1 }
 0x5d0   : > { %v4524_v24 = vadd.f32 %v4523_v37, %v11410_v3 }
 0x5d1   : > { %v11415_v56 = vadd.f32 %v7742_v31, %v4529_v22 }
 0x5d2   : > { %v11418_v33 = vadd.f32 %v7743_v58, %v4524_v24  ;;  %v7754_v24 = vld [vmem:[%s7984_s30 + $0x68] sm:$0xff]  ;;  %v7755_v58 = vld [vmem:[%s7984_s30 + $0x60] sm:$0xff] }
 0x5d3   : > { %v4621_v40 = vsel %vm409_vm0, %v11415_v56, 0.0 }
 0x5d4   : > { %4622 = vadd.xlane.f32.xlu0 %v4621_v40  ;;  %v4618_v62 = vsel %vm409_vm0, %v11418_v33, 0.0 }
 0x5d5   : > { %4619 = vadd.xlane.f32.xlu1 %v4618_v62 }
 0x5d6   : > { %v6760_v19 = vpop.f32.mrb[130].mxu1 }
 0x5d7   : > { %v4539_v8 = vadd.f32 %v6760_v19, %v11410_v3  ;;  %v4533_v50 = vpop.f32.mrb[131].mxu1 }
 0x5d8   : > { %v4534_v29 = vadd.f32 %v4533_v50, %v11410_v3 }
 0x5d9   : > { %v11427_v27 = vadd.f32 %v7744_v9, %v4539_v8 }
 0x5da   : > { %v11430_v2 = vadd.f32 %v7745_v17, %v4534_v29  ;;  %v7756_v17 = vld [vmem:[%s7984_s30 + $0x78] sm:$0xff] }
 0x5db   : > { %v4627_v43 = vsel %vm409_vm0, %v11427_v27, 0.0 }
 0x5dc   : > { %4628 = vadd.xlane.f32.xlu0 %v4627_v43  ;;  %v4624_v61 = vsel %vm409_vm0, %v11430_v2, 0.0 }
 0x5dd   : > { %4625 = vadd.xlane.f32.xlu1 %v4624_v61  ;;  %v7757_v61 = vld [vmem:[%s7984_s30 + $0x70] sm:$0xff]  ;;  %s353_s30 = sand.u32 1, %s7813_s14  }
 0x5de   : > { %v6763_v49 = vpop.f32.mrb[132].mxu1  ;;  %s5694_s18 = sshll.u32 %s353_s30, 7  ;;  %s12253_s17 = scalar_lea.sflag [#allocation3], %s353_s30 }
 0x5df   : > { %v4549_v21 = vadd.f32 %v6763_v49, %v11410_v3  ;;  %v4543_v6 = vpop.f32.mrb[133].mxu1  ;;  %s12164_s20 = scalar_lea.vmem [#allocation2], %s5694_s18  ;;  %s7765_s18 = scalar_lea.vmem %s7764_s12, 4096 }
 0x5e0   : > { %v4544_v15 = vadd.f32 %v4543_v6, %v11410_v3  ;;  %v4878_v6 = vld [vmem:[%s12298_s4 + $0x58] sm:$0xff]  ;;  %s5628_s25 = sshll.u32 %s12164_s20, 4  ;;  %s12246_s25 = int_to_ptr.vmem [resolvable:$true] %s5628_s25 }
 0x5e1   : > { %v11439_v41 = vadd.f32 %v7746_v20, %v4549_v21  ;;  %v4876_v21 = vld [vmem:[%s12298_s4 + $0x48] sm:$0xff]  ;;  %s7759_s29 = scalar_lea.vmem %s12246_s25, 2048  ;;  %p7766_p0 = scmp.lt.s32.totalorder %s12246_s25, %s7764_s12 }
 0x5e2   : > { %v11442_v54 = vadd.f32 %v7747_v26, %v4544_v15  ;;  %v4875_v15 = vld [vmem:[%s12298_s4 + $0x40] sm:$0xff]  ;;  %v6899_v20 = vpack.c.bf16 %v4878_v6, %v4876_v21  ;;  %v4877_v26 = vld [vmem:[%s12298_s4 + $0x50] sm:$0xff]  ;;  %p7760_p11 = scmp.ne.s32.totalorder %s12246_s25, %s7759_s29  ;;  %p7767_p1 = scmp.lt.s32.totalorder %s7765_s18, %s7759_s29 }
 0x5e3   : > { %v4633_v5 = vsel %vm409_vm0, %v11439_v41, 0.0 }
 0x5e4   : > { %4634 = vadd.xlane.f32.xlu0 %v4633_v5  ;;  %v4630_v16 = vsel %vm409_vm0, %v11442_v54, 0.0  ;;  %6900 = vmatprep.subr.bf16.mxu0 %v6899_v20  ;;  %p7761_p12 = pnand %p7760_p11, %p7921_p5  ;;  %p7768_p2 = por %p7767_p1, %p7766_p0 }
 0x5e5   : > { %4631 = vadd.xlane.f32.xlu1 %v4630_v16  ;;  %v6901_v16 = vpack.c.bf16 %v4877_v26, %v4875_v15 }
 0x5e6   : > { %v6766_v39 = vpop.f32.mrb[134].mxu1  ;;  %p7762_p13 = pneg %p7761_p12 }
 0x5e7   : > { %v4559_v60 = vadd.f32 %v6766_v39, %v11410_v3  ;;  %v4553_v46 = vpop.f32.mrb[135].mxu1  ;;  %6902 = vmatpush1.bf16.msra.mxu0 %v6901_v16  ;;  %v4880_v39 = vld [vmem:[%s12298_s4 + $0x68] sm:$0xff] }
 0x5e8   : > { %v4554_v1 = vadd.f32 %v4553_v46, %v11410_v3  ;;  %v4879_v46 = vld [vmem:[%s12298_s4 + $0x60] sm:$0xff]  ;;  %p7769_p3 = pnand %p7768_p2, %p7762_p13 }
 0x5e9   : > { %v11451_v42 = vadd.f32 %v7748_v28, %v4559_v60  ;;  %v4882_v60 = vld [vmem:[%s12298_s4 + $0x78] sm:$0xff]  ;;  %v4881_v28 = vld [vmem:[%s12298_s4 + $0x70] sm:$0xff] }
 0x5ea   : > { %v11454_v30 = vadd.f32 %v7749_v45, %v4554_v1  ;;  %v6903_v1 = vpack.c.bf16 %v4882_v60, %v4880_v39  ;;  %v6905_v45 = vpack.c.bf16 %v4881_v28, %v4879_v46 }
 0x5eb   : > { %v4639_v55 = vsel %vm409_vm0, %v11451_v42, 0.0 }
 0x5ec   : > { %4640 = vadd.xlane.f32.xlu0 %v4639_v55  ;;  %v4636_v18 = vsel %vm409_vm0, %v11454_v30, 0.0  ;;  %6904 = vmatprep.subr.bf16.mxu0 %v6903_v1 }
 0x5ed   : > { %4637 = vadd.xlane.f32.xlu1 %v4636_v18  ;;  %6906 = vmatpush1.bf16.msra.mxu0 %v6905_v45 }
 0x5ee   : > { %v6769_v12 = vpop.f32.mrb[136].mxu1 }
 0x5ef   : > { %v4569_v52 = vadd.f32 %v6769_v12, %v11410_v3  ;;  %v4563_v63 = vpop.f32.mrb[137].mxu1 }
 0x5f0   : > { %v4564_v0 = vadd.f32 %v4563_v63, %v11410_v3 }
 0x5f1   : > { %v11463_v23 = vadd.f32 %v7750_v14, %v4569_v52 }
 0x5f2   : > { %v11466_v57 = vadd.f32 %v7751_v25, %v4564_v0 }
 0x5f3   : > { %v4645_v32 = vsel %vm409_vm0, %v11463_v23, 0.0 }
 0x5f4   : > { %4646 = vadd.xlane.f32.xlu0 %v4645_v32  ;;  %v4642_v47 = vsel %vm409_vm0, %v11466_v57, 0.0 }
 0x5f5   : > { %4643 = vadd.xlane.f32.xlu1 %v4642_v47 }
 0x5f6   : > { %v6772_v11 = vpop.f32.mrb[138].mxu1 }
 0x5f7   : > { %v4579_v53 = vadd.f32 %v6772_v11, %v11410_v3  ;;  %v4573_v38 = vpop.f32.mrb[139].mxu1 }
 0x5f8   : > { %v4574_v51 = vadd.f32 %v4573_v38, %v11410_v3 }
 0x5f9   : > { %v11475_v36 = vadd.f32 %v7752_v13, %v4579_v53 }
 0x5fa   : > { %v11478_v7 = vadd.f32 %v7753_v59, %v4574_v51 }
 0x5fb   : > { %v4651_v10 = vsel %vm409_vm0, %v11475_v36, 0.0 }
 0x5fc   : > { %4652 = vadd.xlane.f32.xlu0 %v4651_v10  ;;  %v4648_v4 = vsel %vm409_vm0, %v11478_v7, 0.0 }
 0x5fd   : > { %4649 = vadd.xlane.f32.xlu1 %v4648_v4 }
 0x5fe   : > { %v6775_v35 = vpop.f32.mrb[140].mxu1 }
 0x5ff   : > { %v4589_v44 = vadd.f32 %v6775_v35, %v11410_v3  ;;  %v4583_v22 = vpop.f32.mrb[141].mxu1 }
 0x600   : > { %v4584_v37 = vadd.f32 %v4583_v22, %v11410_v3 }
 0x601   : > { %v11487_v31 = vadd.f32 %v7754_v24, %v4589_v44 }
 0x602   : > { %v11490_v40 = vadd.f32 %v7755_v58, %v4584_v37 }
 0x603   : > { %v4657_v62 = vsel %vm409_vm0, %v11487_v31, 0.0 }
 0x604   : > { %4658 = vadd.xlane.f32.xlu0 %v4657_v62  ;;  %v4654_v19 = vsel %vm409_vm0, %v11490_v40, 0.0 }
 0x605   : > { %4655 = vadd.xlane.f32.xlu1 %v4654_v19 }
 0x609   : > { %v6778_v8 = vpop.f32.mrb[142].mxu1 }
 0x60a   : > { %v4599_v50 = vadd.f32 %v6778_v8, %v11410_v3  ;;  %v4593_v29 = vpop.f32.mrb[143].mxu1 }
 0x60b   : > { %v4594_v9 = vadd.f32 %v4593_v29, %v11410_v3 }
 0x60c   : > { %v11499_v43 = vadd.f32 %v7756_v17, %v4599_v50 }
 0x60d   : > { %v11502_v49 = vadd.f32 %v7757_v61, %v4594_v9 }
 0x60e   : > { %v4663_v3 = vsel %vm409_vm0, %v11499_v43, 0.0 }
 0x60f   : > { %4664 = vadd.xlane.f32.xlu0 %v4663_v3  ;;  %v4660_v5 = vsel %vm409_vm0, %v11502_v49, 0.0 }
 0x610   : > { %4661 = vadd.xlane.f32.xlu1 %v4660_v5 }
 0x661   : > { %v4623_v55 = vpop.xlane.xlu0 %4622 }
 0x662   : > { %v4668_v18 = vmul.f32 0.015625, %v4623_v55  ;;  %v4620_v12 = vpop.xlane.xlu1 %4619 }
 0x663   : > { %v4667_v52 = vmul.f32 0.015625, %v4620_v12 }
 0x664   : > { %v11533_v63 = vsub.f32 %v11415_v56, %v4668_v18 }
 0x665   : > { %v11536_v0 = vsub.f32 %v11418_v33, %v4667_v52 }
 0x666   : > { %v4700_v14 = vmul.f32 %v11533_v63, %v11533_v63 }
 0x667   : > { %v4699_v25 = vmul.f32 %v11536_v0, %v11536_v0 }
 0x668   : > { %v4718_v32 = vsel %vm409_vm0, %v4700_v14, 0.0 }
 0x669   : > { %4719 = vadd.xlane.f32.xlu0 %v4718_v32  ;;  %v4629_v47 = vpop.xlane.xlu0 %4628  ;;  %v4715_v11 = vsel %vm409_vm0, %v4699_v25, 0.0 }
 0x66a   : > { %v4670_v53 = vmul.f32 0.015625, %v4629_v47  ;;  %v4626_v38 = vpop.xlane.xlu1 %4625  ;;  %4716 = vadd.xlane.f32.xlu1 %v4715_v11 }
 0x66b   : > { %v4669_v56 = vmul.f32 0.015625, %v4626_v38 }
 0x66c   : > { %v11545_v51 = vsub.f32 %v11427_v27, %v4670_v53 }
 0x66d   : > { %v11548_v33 = vsub.f32 %v11430_v2, %v4669_v56 }
 0x66e   : > { %v4702_v13 = vmul.f32 %v11545_v51, %v11545_v51 }
 0x66f   : > { %v4701_v59 = vmul.f32 %v11548_v33, %v11548_v33 }
 0x670   : > { %v4724_v10 = vsel %vm409_vm0, %v4702_v13, 0.0 }
 0x671   : > { %4725 = vadd.xlane.f32.xlu0 %v4724_v10  ;;  %v4635_v4 = vpop.xlane.xlu0 %4634  ;;  %v4721_v35 = vsel %vm409_vm0, %v4701_v59, 0.0 }
 0x672   : > { %v4672_v44 = vmul.f32 0.015625, %v4635_v4  ;;  %v4632_v22 = vpop.xlane.xlu1 %4631  ;;  %4722 = vadd.xlane.f32.xlu1 %v4721_v35 }
 0x673   : > { %v4671_v27 = vmul.f32 0.015625, %v4632_v22 }
 0x674   : > { %v11557_v37 = vsub.f32 %v11439_v41, %v4672_v44 }
 0x675   : > { %v11560_v2 = vsub.f32 %v11442_v54, %v4671_v27 }
 0x676   : > { %v4704_v24 = vmul.f32 %v11557_v37, %v11557_v37 }
 0x677   : > { %v4703_v58 = vmul.f32 %v11560_v2, %v11560_v2 }
 0x678   : > { %v4730_v62 = vsel %vm409_vm0, %v4704_v24, 0.0  ;;  %v5136_v24 = vld [vmem:[%s12300_s6] sm:$0xff] }
 0x679   : > { %4731 = vadd.xlane.f32.xlu0 %v4730_v62  ;;  %v4641_v19 = vpop.xlane.xlu0 %4640  ;;  %v4727_v8 = vsel %vm409_vm0, %v4703_v58, 0.0  ;;  %v5137_v62 = vld [vmem:[%s12300_s6 + $0x8] sm:$0xff] }
 0x67a   : > { %v4674_v50 = vmul.f32 0.015625, %v4641_v19  ;;  %v4638_v29 = vpop.xlane.xlu1 %4637  ;;  %4728 = vadd.xlane.f32.xlu1 %v4727_v8  ;;  %v5154_v19 = vld [vmem:[%s12300_s6 + $0x90] sm:$0xff]  ;;  %v5155_v8 = vld [vmem:[%s12300_s6 + $0x98] sm:$0xff] }
 0x67b   : > { %v4673_v41 = vmul.f32 0.015625, %v4638_v29  ;;  %v11648_v29 = vpack.c.bf16 %v5155_v8, %v5154_v19  ;;  %v12608_v19 = vld [vmem:[#allocation5_spill] sm:$0xff] }
 0x67c   : > { %v11569_v9 = vsub.f32 %v11451_v42, %v4674_v50  ;;  %v11646_v50 = vpack.c.bf16 %v5137_v62, %v5136_v24  ;;  %v4849_v8 = vsub.s32 2, %v12608_v19 }
 0x67d   : > { %v11572_v54 = vsub.f32 %v11454_v30, %v4673_v41  ;;  %v5138_v41 = vld [vmem:[%s12300_s6 + $0x10] sm:$0xff] }
 0x67e   : > { %v4706_v17 = vmul.f32 %v11569_v9, %v11569_v9 }
 0x67f   : > { %v4705_v61 = vmul.f32 %v11572_v54, %v11572_v54 }
 0x680   : > { %v4736_v6 = vsel %vm409_vm0, %v4706_v17, 0.0  ;;  %v5139_v17 = vld [vmem:[%s12300_s6 + $0x18] sm:$0xff] }
 0x681   : > { %v4647_v21 = vpop.xlane.xlu0 %4646  ;;  %4737 = vadd.xlane.f32.xlu0 %v4736_v6  ;;  %v4733_v20 = vsel %vm409_vm0, %v4705_v61, 0.0  ;;  %v5156_v61 = vld [vmem:[%s12300_s6 + $0xa0] sm:$0xff]  ;;  %v11664_v6 = vpack.c.bf16 %v5139_v17, %v5138_v41  ;;  %v12609_v17 = vld [vmem:[#allocation7_spill] sm:$0xff] }
 0x682   : > { %v4676_v15 = vmul.f32 0.015625, %v4647_v21  ;;  %v4644_v3 = vpop.xlane.xlu1 %4643  ;;  %4734 = vadd.xlane.f32.xlu1 %v4733_v20  ;;  %v5157_v21 = vld [vmem:[%s12300_s6 + $0xa8] sm:$0xff] }
 0x683   : > { %v4675_v26 = vmul.f32 0.015625, %v4644_v3  ;;  %v5140_v3 = vld [vmem:[%s12300_s6 + $0x20] sm:$0xff]  ;;  %v5141_v20 = vld [vmem:[%s12300_s6 + $0x28] sm:$0xff] }
 0x684   : > { %v11581_v42 = vsub.f32 %v11463_v23, %v4676_v15  ;;  %v11666_v15 = vpack.c.bf16 %v5157_v21, %v5156_v61  ;;  %v11745_v61 = vrot.slane %v11406_v48, %v12609_v17 }
 0x685   : > { %v11584_v30 = vsub.f32 %v11466_v57, %v4675_v26  ;;  %v5158_v26 = vld [vmem:[%s12300_s6 + $0xb0] sm:$0xff] }
 0x686   : > { %v4708_v5 = vmul.f32 %v11581_v42, %v11581_v42 }
 0x687   : > { %v4707_v16 = vmul.f32 %v11584_v30, %v11584_v30 }
 0x688   : > { %v4742_v39 = vsel %vm409_vm0, %v4708_v5, 0.0  ;;  %v5159_v5 = vld [vmem:[%s12300_s6 + $0xb8] sm:$0xff] }
 0x689   : > { %4743 = vadd.xlane.f32.xlu0 %v4742_v39  ;;  %v4653_v60 = vpop.xlane.xlu0 %4652  ;;  %v4739_v46 = vsel %vm409_vm0, %v4707_v16, 0.0  ;;  %v11682_v16 = vpack.c.bf16 %v5141_v20, %v5140_v3  ;;  %v11684_v39 = vpack.c.bf16 %v5159_v5, %v5158_v26  ;;  %v11748_v20 = vrot.slane %v11406_v48, %v4849_v8 }
 0x68a   : > { %v4678_v1 = vmul.f32 0.015625, %v4653_v60  ;;  %v4650_v28 = vpop.xlane.xlu1 %4649  ;;  %4740 = vadd.xlane.f32.xlu1 %v4739_v46  ;;  %v5142_v60 = vld [vmem:[%s12300_s6 + $0x30] sm:$0xff]  ;;  %v5143_v46 = vld [vmem:[%s12300_s6 + $0x38] sm:$0xff] }
 0x68b   : > { %v4677_v23 = vmul.f32 0.015625, %v4650_v28  ;;  %v5161_v28 = vld [vmem:[%s12300_s6 + $0xc8] sm:$0xff] }
 0x68c   : > { %v11593_v45 = vsub.f32 %v11475_v36, %v4678_v1  ;;  %v5160_v1 = vld [vmem:[%s12300_s6 + $0xc0] sm:$0xff] }
 0x68d   : > { %v11596_v57 = vsub.f32 %v11478_v7, %v4677_v23  ;;  %v11700_v23 = vpack.c.bf16 %v5143_v46, %v5142_v60 }
 0x68e   : > { %v4710_v55 = vmul.f32 %v11593_v45, %v11593_v45 }
 0x68f   : > { %v4709_v18 = vmul.f32 %v11596_v57, %v11596_v57 }
 0x690   : > { %v4748_v12 = vsel %vm409_vm0, %v4710_v55, 0.0  ;;  %v11702_v55 = vpack.c.bf16 %v5161_v28, %v5160_v1 }
 0x691   : > { %4749 = vadd.xlane.f32.xlu0 %v4748_v12  ;;  %v4659_v52 = vpop.xlane.xlu0 %4658  ;;  %v4745_v14 = vsel %vm409_vm0, %v4709_v18, 0.0  ;;  %v5144_v18 = vld [vmem:[%s12300_s6 + $0x40] sm:$0xff]  ;;  %v5145_v12 = vld [vmem:[%s12300_s6 + $0x48] sm:$0xff] }
 0x692   : > { %v4680_v25 = vmul.f32 0.015625, %v4659_v52  ;;  %v4656_v32 = vpop.xlane.xlu1 %4655  ;;  %4746 = vadd.xlane.f32.xlu1 %v4745_v14  ;;  %v5162_v52 = vld [vmem:[%s12300_s6 + $0xd0] sm:$0xff]  ;;  %v5163_v14 = vld [vmem:[%s12300_s6 + $0xd8] sm:$0xff] }
 0x693   : > { %v4679_v36 = vmul.f32 0.015625, %v4656_v32  ;;  %v11720_v32 = vpack.c.bf16 %v5163_v14, %v5162_v52 }
 0x694   : > { %v11605_v47 = vsub.f32 %v11487_v31, %v4680_v25  ;;  %v11718_v25 = vpack.c.bf16 %v5145_v12, %v5144_v18 }
 0x695   : > { %v11608_v7 = vsub.f32 %v11490_v40, %v4679_v36  ;;  %v5146_v36 = vld [vmem:[%s12300_s6 + $0x50] sm:$0xff] }
 0x696   : > { %v4712_v11 = vmul.f32 %v11605_v47, %v11605_v47 }
 0x697   : > { %v4711_v53 = vmul.f32 %v11608_v7, %v11608_v7 }
 0x698   : > { %v4754_v38 = vsel %vm409_vm0, %v4712_v11, 0.0  ;;  %v5147_v11 = vld [vmem:[%s12300_s6 + $0x58] sm:$0xff] }
 0x699   : > { %4755 = vadd.xlane.f32.xlu0 %v4754_v38  ;;  %v4751_v56 = vsel %vm409_vm0, %v4711_v53, 0.0  ;;  %v5164_v53 = vld [vmem:[%s12300_s6 + $0xe0] sm:$0xff]  ;;  %v5165_v38 = vld [vmem:[%s12300_s6 + $0xe8] sm:$0xff] }
 0x69a   : > { %4752 = vadd.xlane.f32.xlu1 %v4751_v56  ;;  %v11736_v56 = vpack.c.bf16 %v5147_v11, %v5146_v36  ;;  %v12610_v11 = vmov 0.0  }
 0x69c   : > { %v4665_v13 = vpop.xlane.xlu0 %4664 }
 0x69d   : > { %v4682_v59 = vmul.f32 0.015625, %v4665_v13  ;;  %v4662_v10 = vpop.xlane.xlu1 %4661  ;;  %v11738_v13 = vpack.c.bf16 %v5165_v38, %v5164_v53 }
 0x69e   : > { %v4681_v31 = vmul.f32 0.015625, %v4662_v10 }
 0x69f   : > { %v11617_v4 = vsub.f32 %v11499_v43, %v4682_v59  ;;  %v5152_v43 = vld [vmem:[%s12300_s6 + $0x80] sm:$0xff] }
 0x6a0   : > { %v11620_v40 = vsub.f32 %v11502_v49, %v4681_v31  ;;  %v5153_v49 = vld [vmem:[%s12300_s6 + $0x88] sm:$0xff] }
 0x6a1   : > { %v4714_v35 = vmul.f32 %v11617_v4, %v11617_v4  ;;  %v6907_v58 = vpack.c.bf16 %v5153_v49, %v5152_v43 }
 0x6a2   : > { %v4713_v44 = vmul.f32 %v11620_v40, %v11620_v40 }
 0x6a3   : > { %v4760_v22 = vsel %vm409_vm0, %v4714_v35, 0.0  ;;  %6908 = vmatprep.subr.bf16.mxu0 %v6907_v58  ;;  %6939 = vmatprep.subr.bf16.mxu1 %v6907_v58 }
 0x6a4   : > { %4761 = vadd.xlane.f32.xlu0 %v4760_v22  ;;  %v4757_v27 = vsel %vm409_vm0, %v4713_v44, 0.0  ;;  %6947 = vmatpush3.bf16.msra.mxu1 %v11646_v50 }
 0x6a5   : > { %4758 = vadd.xlane.f32.xlu1 %v4757_v27  ;;  %6940 = vmatprep.subr.bf16.mxu1 %v11648_v29 }
 0x6a8   : > { %6948 = vmatpush3.bf16.msra.mxu1 %v11664_v6 }
 0x6a9   : > { %6941 = vmatprep.subr.bf16.mxu1 %v11666_v15 }
 0x6ac   : > { %6949 = vmatpush3.bf16.msra.mxu1 %v11682_v16 }
 0x6ad   : > { %6942 = vmatprep.subr.bf16.mxu1 %v11684_v39 }
 0x6b0   : > { %6950 = vmatpush3.bf16.msra.mxu1 %v11700_v23 }
 0x6b1   : > { %6943 = vmatprep.subr.bf16.mxu1 %v11702_v55 }
 0x6b4   : > { %6951 = vmatpush3.bf16.msra.mxu1 %v11718_v25 }
 0x6b5   : > { %6944 = vmatprep.subr.bf16.mxu1 %v11720_v32 }
 0x6b8   : > { %6952 = vmatpush3.bf16.msra.mxu1 %v11736_v56 }
 0x6b9   : > { %6945 = vmatprep.subr.bf16.mxu1 %v11738_v13 }
 0x6f6   : > { %v4720_v59 = vpop.xlane.xlu0 %4719 }
 0x6f7   : > { %v4764_v10 = vmul.f32 0.015625, %v4720_v59  ;;  %v4717_v31 = vpop.xlane.xlu1 %4716 }
 0x6f8   : > { %v4763_v35 = vmul.f32 0.015625, %v4717_v31 }
 0x6f9   : > { %v4780_v44 = vadd.f32 1e-05, %v4764_v10 }
 0x6fa   : > { %v4779_v22 = vadd.f32 1e-05, %v4763_v35 }
 0x6fb   : > { %7550 = vrsqrt.f32 %v4780_v44 }
 0x6fc   : > { %7552 = vrsqrt.f32 %v4779_v22 }
 0x6fe   : > { %v4726_v27 = vpop.xlane.xlu0 %4725 }
 0x6ff   : > { %v4766_v43 = vmul.f32 0.015625, %v4726_v27  ;;  %v4723_v49 = vpop.xlane.xlu1 %4722 }
 0x700   : > { %v4765_v24 = vmul.f32 0.015625, %v4723_v49 }
 0x701   : > { %v4782_v58 = vadd.f32 1e-05, %v4766_v43 }
 0x702   : > { %v4781_v62 = vadd.f32 1e-05, %v4765_v24 }
 0x703   : > { %7554 = vrsqrt.f32 %v4782_v58 }
 0x704   : > { %7556 = vrsqrt.f32 %v4781_v62 }
 0x705   : > { %v7551_v41 = vpop.eup %7550 }
 0x706   : > { %v7553_v21 = vpop.eup %7552  ;;  %v4732_v3 = vpop.xlane.xlu0 %4731  ;;  %v4812_v46 = vmul.f32 %v7551_v41, %v11533_v63 }
 0x707   : > { %v4811_v26 = vmul.f32 %v7553_v21, %v11536_v0  ;;  %v4768_v5 = vmul.f32 0.015625, %v4732_v3  ;;  %v4729_v60 = vpop.xlane.xlu1 %4728 }
 0x708   : > { %v4767_v1 = vmul.f32 0.015625, %v4729_v60  ;;  %v4832_v14 = vmul.f32 %v11745_v61, %v4812_v46 }
 0x709   : > { %v4831_v28 = vmul.f32 %v11745_v61, %v4811_v26  ;;  %v4784_v18 = vadd.f32 1e-05, %v4768_v5 }
 0x70a   : > { %v4783_v12 = vadd.f32 1e-05, %v4767_v1  ;;  %v11762_v38 = vadd.f32 %v11748_v20, %v4832_v14 }
 0x70b   : > { %v11754_v52 = vadd.f32 %v11748_v20, %v4831_v28  ;;  %7558 = vrsqrt.f32 %v4784_v18 }
 0x70c   : > { %7560 = vrsqrt.f32 %v4783_v12 }
 0x70d   : > { %v7555_v48 = vpop.eup %7554  ;;  %5874 = vmatmul.mubr.msk.f32.vlgmr.msra.gmra.mrb[160].mxu0 %vm409_vm0, %v11754_v52 }
 0x70e   : > { %v7557_v0 = vpop.eup %7556  ;;  %v4738_v36 = vpop.xlane.xlu0 %4737  ;;  %5013 = vmatprep.mubr.f32.mxu0 %v12610_v11  ;;  %6910 = vmatpush3.bf16.msra.mxu0 %v11646_v50  ;;  %v4814_v10 = vmul.f32 %v7555_v48, %v11545_v51 }
 0x70f   : > { %v4770_v63 = vmul.f32 0.015625, %v4738_v36  ;;  %v4735_v53 = vpop.xlane.xlu1 %4734  ;;  %v4813_v59 = vmul.f32 %v7557_v0, %v11548_v33  ;;  %6912 = vmatprep.subr.bf16.mxu0 %v11648_v29 }
 0x710   : > { %v4769_v31 = vmul.f32 0.015625, %v4735_v53  ;;  %v4834_v51 = vmul.f32 %v11745_v61, %v4814_v10 }
 0x711   : > { %v4786_v35 = vadd.f32 1e-05, %v4770_v63  ;;  %5875 = vmatmul.mubr.msk.f32.gmra.mrb[162].mxu0 %vm409_vm0, %v11762_v38  ;;  %v4833_v44 = vmul.f32 %v11745_v61, %v4813_v59 }
 0x712   : > { %v4785_v22 = vadd.f32 1e-05, %v4769_v31  ;;  %5019 = vmatprep.mubr.f32.mxu0 %v12610_v11  ;;  %6914 = vmatpush3.bf16.msra.mxu0 %v11664_v6  ;;  %v11782_v24 = vadd.f32 %v11748_v20, %v4834_v51 }
 0x713   : > { %7562 = vrsqrt.f32 %v4786_v35  ;;  %v11773_v50 = vadd.f32 %v11748_v20, %v4833_v44  ;;  %6916 = vmatprep.subr.bf16.mxu0 %v11666_v15 }
 0x714   : > { %7564 = vrsqrt.f32 %v4785_v22 }
 0x715   : > { %v7559_v33 = vpop.eup %7558  ;;  %5876 = vmatmul.mubr.msk.f32.gmra.mrb[164].mxu0 %vm409_vm0, %v11773_v50 }
 0x716   : > { %v4744_v29 = vpop.xlane.xlu0 %4743  ;;  %v7561_v27 = vpop.eup %7560  ;;  %5025 = vmatprep.mubr.f32.mxu0 %v12610_v11  ;;  %6918 = vmatpush3.bf16.msra.mxu0 %v11682_v16  ;;  %v4816_v15 = vmul.f32 %v7559_v33, %v11557_v37 }
 0x717   : > { %v4772_v43 = vmul.f32 0.015625, %v4744_v29  ;;  %v4741_v49 = vpop.xlane.xlu1 %4740  ;;  %v4815_v58 = vmul.f32 %v7561_v27, %v11560_v2  ;;  %6920 = vmatprep.subr.bf16.mxu0 %v11684_v39 }
 0x718   : > { %v4771_v6 = vmul.f32 0.015625, %v4741_v49  ;;  %v4836_v37 = vmul.f32 %v11745_v61, %v4816_v15 }
 0x719   : > { %v4788_v62 = vadd.f32 1e-05, %v4772_v43  ;;  %5877 = vmatmul.mubr.msk.f32.gmra.mrb[166].mxu0 %vm409_vm0, %v11782_v24  ;;  %v4835_v41 = vmul.f32 %v11745_v61, %v4815_v58 }
 0x71a   : > { %v4787_v8 = vadd.f32 1e-05, %v4771_v6  ;;  %5031 = vmatprep.mubr.f32.mxu0 %v12610_v11  ;;  %6922 = vmatpush3.bf16.msra.mxu0 %v11700_v23  ;;  %v11802_v5 = vadd.f32 %v11748_v20, %v4836_v37 }
 0x71b   : > { %7566 = vrsqrt.f32 %v4788_v62  ;;  %v11793_v16 = vadd.f32 %v11748_v20, %v4835_v41  ;;  %6924 = vmatprep.subr.bf16.mxu0 %v11702_v55 }
 0x71c   : > { %7568 = vrsqrt.f32 %v4787_v8 }
 0x71d   : > { %v7563_v2 = vpop.eup %7562  ;;  %5878 = vmatmul.mubr.msk.f32.gmra.mrb[168].mxu0 %vm409_vm0, %v11793_v16 }
 0x71e   : > { %v4750_v39 = vpop.xlane.xlu0 %4749  ;;  %v7565_v21 = vpop.eup %7564  ;;  %5037 = vmatprep.mubr.f32.mxu0 %v12610_v11  ;;  %6926 = vmatpush3.bf16.msra.mxu0 %v11718_v25  ;;  %v4818_v55 = vmul.f32 %v7563_v2, %v11569_v9 }
 0x71f   : > { %v4774_v3 = vmul.f32 0.015625, %v4750_v39  ;;  %v4747_v26 = vpop.xlane.xlu1 %4746  ;;  %v4817_v60 = vmul.f32 %v7565_v21, %v11572_v54  ;;  %6928 = vmatprep.subr.bf16.mxu0 %v11720_v32 }
 0x720   : > { %v4773_v23 = vmul.f32 0.015625, %v4747_v26  ;;  %v4838_v9 = vmul.f32 %v11745_v61, %v4818_v55 }
 0x721   : > { %v4790_v46 = vadd.f32 1e-05, %v4774_v3  ;;  %5879 = vmatmul.mubr.msk.f32.gmra.mrb[170].mxu0 %vm409_vm0, %v11802_v5  ;;  %v4837_v28 = vmul.f32 %v11745_v61, %v4817_v60 }
 0x722   : > { %v4789_v1 = vadd.f32 1e-05, %v4773_v23  ;;  %5043 = vmatprep.mubr.f32.mxu0 %v12610_v11  ;;  %6930 = vmatpush3.bf16.msra.mxu0 %v11736_v56  ;;  %v11822_v0 = vadd.f32 %v11748_v20, %v4838_v9 }
 0x723   : > { %7570 = vrsqrt.f32 %v4790_v46  ;;  %v11813_v25 = vadd.f32 %v11748_v20, %v4837_v28  ;;  %6932 = vmatprep.subr.bf16.mxu0 %v11738_v13  ;;  %v5151_v28 = vld [vmem:[%s12300_s6 + $0x78] sm:$0xff] }
 0x724   : > { %7572 = vrsqrt.f32 %v4789_v1  ;;  %v5150_v1 = vld [vmem:[%s12300_s6 + $0x70] sm:$0xff] }
 0x725   : > { %v7567_v54 = vpop.eup %7566  ;;  %5880 = vmatmul.mubr.msk.f32.gmra.mrb[172].mxu0 %vm409_vm0, %v11813_v25  ;;  %v6937_v9 = vpack.c.bf16 %v5151_v28, %v5150_v1 }
 0x726   : > { %v7569_v32 = vpop.eup %7568  ;;  %v4756_v18 = vpop.xlane.xlu0 %4755  ;;  %5049 = vmatprep.mubr.f32.mxu0 %v12610_v11  ;;  %v4820_v36 = vmul.f32 %v7567_v54, %v11581_v42  ;;  %v4883_v54 = vld [vmem:[%s12299_s5] sm:$0x3] }
 0x727   : > { %v4776_v12 = vmul.f32 0.015625, %v4756_v18  ;;  %v4753_v14 = vpop.xlane.xlu1 %4752  ;;  %v4819_v56 = vmul.f32 %v7569_v32, %v11584_v30  ;;  %v11911_v32 = vrot.slane %v4883_v54, %v12607_v34  ;;  %v11914_v18 = vrot.slane %v4883_v54, %v12609_v17 }
 0x728   : > { %v4775_v48 = vmul.f32 0.015625, %v4753_v14  ;;  %v4840_v30 = vmul.f32 %v11745_v61, %v4820_v36 }
 0x729   : > { %v4792_v63 = vadd.f32 1e-05, %v4776_v12  ;;  %v4839_v13 = vmul.f32 %v11745_v61, %v4819_v56  ;;  %5881 = vmatmul.mubr.msk.f32.gmra.mrb[174].mxu0 %vm409_vm0, %v11822_v0 }
 0x72a   : > { %v4791_v53 = vadd.f32 1e-05, %v4775_v48  ;;  %5055 = vmatprep.mubr.f32.mxu0 %v12610_v11  ;;  %v11838_v35 = vadd.f32 %v11748_v20, %v4840_v30 }
 0x72b   : > { %7574 = vrsqrt.f32 %v4792_v63  ;;  %v11830_v59 = vadd.f32 %v11748_v20, %v4839_v13 }
 0x72c   : > { %7576 = vrsqrt.f32 %v4791_v53 }
 0x72d   : > { %v7571_v10 = vpop.eup %7570  ;;  %5882 = vmatmul.mubr.msk.f32.gmra.mrb[176].mxu0 %vm409_vm0, %v11830_v59 }
 0x72e   : > { %v7573_v31 = vpop.eup %7572  ;;  %5061 = vmatprep.mubr.f32.mxu0 %v12610_v11  ;;  %v4822_v44 = vmul.f32 %v7571_v10, %v11593_v45 }
 0x72f   : > { %v4821_v42 = vmul.f32 %v7573_v31, %v11596_v57 }
 0x730   : > { %v4842_v49 = vmul.f32 %v11745_v61, %v4822_v44 }
 0x731   : > { %v4762_v22 = vpop.xlane.xlu0 %4761  ;;  %v4841_v51 = vmul.f32 %v11745_v61, %v4821_v42  ;;  %5883 = vmatmul.mubr.msk.f32.gmra.mrb[178].mxu0 %vm409_vm0, %v11838_v35 }
 0x732   : > { %v4778_v33 = vmul.f32 0.015625, %v4762_v22  ;;  %v4759_v29 = vpop.xlane.xlu1 %4758  ;;  %5067 = vmatprep.mubr.f32.mxu0 %v12610_v11  ;;  %v11854_v62 = vadd.f32 %v11748_v20, %v4842_v49 }
 0x733   : > { %v4777_v27 = vmul.f32 0.015625, %v4759_v29  ;;  %v11846_v43 = vadd.f32 %v11748_v20, %v4841_v51 }
 0x734   : > { %v4794_v57 = vadd.f32 1e-05, %v4778_v33 }
 0x735   : > { %v7575_v6 = vpop.eup %7574  ;;  %v4793_v58 = vadd.f32 1e-05, %v4777_v27  ;;  %5884 = vmatmul.mubr.msk.f32.gmra.mrb[180].mxu0 %vm409_vm0, %v11846_v43 }
 0x736   : > { %v7577_v45 = vpop.eup %7576  ;;  %7578 = vrsqrt.f32 %v4794_v57  ;;  %5073 = vmatprep.mubr.f32.mxu0 %v12610_v11  ;;  %v4824_v8 = vmul.f32 %v7575_v6, %v11605_v47 }
 0x737   : > { %7580 = vrsqrt.f32 %v4793_v58  ;;  %v4823_v15 = vmul.f32 %v7577_v45, %v11608_v7 }
 0x738   : > { %v4844_v2 = vmul.f32 %v11745_v61, %v4824_v8 }
 0x739   : > { %v4843_v41 = vmul.f32 %v11745_v61, %v4823_v15  ;;  %5885 = vmatmul.mubr.msk.f32.gmra.mrb[182].mxu0 %vm409_vm0, %v11854_v62 }
 0x73a   : > { %5079 = vmatprep.mubr.f32.mxu0 %v12610_v11  ;;  %v11869_v47 = vadd.f32 %v11748_v20, %v4844_v2 }
 0x73b   : > { %v11862_v37 = vadd.f32 %v11748_v20, %v4843_v41 }
 0x73d   : > { %5886 = vmatmul.mubr.msk.f32.gmra.mrb[184].mxu0 %vm409_vm0, %v11862_v37 }
 0x73e   : > { %5085 = vmatprep.mubr.f32.mxu0 %v12610_v11 }
 0x740   : > { %v7579_v7 = vpop.eup %7578 }
 0x741   : > { %v7581_v39 = vpop.eup %7580  ;;  %5887 = vmatmul.mubr.msk.f32.gmra.mrb[186].mxu0 %vm409_vm0, %v11869_v47  ;;  %v4826_v3 = vmul.f32 %v7579_v7, %v11617_v4  ;;  %v5148_v4 = vld [vmem:[%s12300_s6 + $0x60] sm:$0xff] }
 0x742   : > { %v4825_v21 = vmul.f32 %v7581_v39, %v11620_v40  ;;  %5091 = vmatprep.mubr.f32.mxu0 %v12610_v11  ;;  %v5149_v40 = vld [vmem:[%s12300_s6 + $0x68] sm:$0xff] }
 0x743   : > { %v4846_v60 = vmul.f32 %v11745_v61, %v4826_v3 }
 0x744   : > { %v4845_v26 = vmul.f32 %v11745_v61, %v4825_v21  ;;  %v6933_v61 = vpack.c.bf16 %v5149_v40, %v5148_v4 }
 0x745   : > { %v11885_v55 = vadd.f32 %v11748_v20, %v4846_v60 }
 0x746   : > { %v11878_v23 = vadd.f32 %v11748_v20, %v4845_v26  ;;  %6934 = vmatpush3.bf16.msra.mxu0 %v6933_v61  ;;  %v5167_v20 = vld [vmem:[%s12300_s6 + $0xf8] sm:$0xff]  ;;  %6953 = vmatpush3.bf16.msra.mxu1 %v6933_v61 }
 0x748   : > { %5888 = vmatmul.mubr.msk.f32.gmra.mrb[188].mxu0 %vm409_vm0, %v11878_v23 }
 0x749   : > { %5097 = vmatprep.mubr.f32.mxu0 %v12610_v11  ;;  %v5166_v11 = vld [vmem:[%s12300_s6 + $0xf0] sm:$0xff] }
 0x74a   : > { %v6935_v46 = vpack.c.bf16 %v5167_v20, %v5166_v11 }
 0x74c   : > { %5889 = vmatmul.mubr.msk.f32.gmra.mrb[190].mxu0 %vm409_vm0, %v11885_v55  ;;  %6936 = vmatprep.subr.bf16.mxu0 %v6935_v46 }
 0x74d   : > { %6946 = vmatprep.subr.bf16.mxu1 %v6935_v46  ;;  %6938 = vmatpush3.bf16.msra.mxu0 %v6937_v9 }
 0x74e   : > { %6954 = vmatpush3.bf16.msra.mxu1 %v6937_v9 }
 0x7e0   : > { %v5009_v12 = vpop.f32.mrb[160].mxu0 }
 0x7e1   : > { %v5010_v14 = vadd.f32 %v5009_v12, %v11911_v32  ;;  %v5011_v56 = vpop.f32.mrb[161].mxu0 }
 0x7e2   : > { %v5012_v48 = vadd.f32 %v5011_v56, %v11914_v18 }
 0x7e3   : > { %v5104_v13 = vmax.f32 %v5010_v14, 0.0 }
 0x7e4   : > { %v5105_v36 = vmax.f32 %v5012_v48, 0.0  ;;  %v5015_v63 = vpop.f32.mrb[162].mxu0 }
 0x7e5   : > { %v5016_v53 = vadd.f32 %v5015_v63, %v11911_v32  ;;  %v5017_v30 = vpop.f32.mrb[163].mxu0 }
 0x7e6   : > { %v5018_v10 = vadd.f32 %v5017_v30, %v11914_v18  ;;  %5236 = vmatprep.mubr.f32.mxu0 %v5105_v36 }
 0x7e7   : > { %5237 = vmatmul.mubr.f32.vlgmr.msra.gmra.mrb[192].mxu0 %v5104_v13  ;;  %v5106_v17 = vmax.f32 %v5016_v53, 0.0 }
 0x7e8   : > { %v5107_v34 = vmax.f32 %v5018_v10, 0.0  ;;  %v5021_v31 = vpop.f32.mrb[164].mxu0 }
 0x7e9   : > { %v5022_v42 = vadd.f32 %v5021_v31, %v11911_v32  ;;  %v5023_v44 = vpop.f32.mrb[165].mxu0 }
 0x7ea   : > { %v5024_v22 = vadd.f32 %v5023_v44, %v11914_v18  ;;  %5241 = vmatprep.mubr.f32.mxu0 %v5107_v34 }
 0x7eb   : > { %5242 = vmatmul.mubr.f32.gmra.mrb[194].mxu0 %v5106_v17  ;;  %v5108_v29 = vmax.f32 %v5022_v42, 0.0 }
 0x7ec   : > { %v5109_v51 = vmax.f32 %v5024_v22, 0.0  ;;  %v5027_v33 = vpop.f32.mrb[166].mxu0 }
 0x7ed   : > { %v5028_v27 = vadd.f32 %v5027_v33, %v11911_v32  ;;  %v5029_v57 = vpop.f32.mrb[167].mxu0 }
 0x7ee   : > { %v5030_v49 = vadd.f32 %v5029_v57, %v11914_v18  ;;  %5246 = vmatprep.mubr.f32.mxu1 %v5109_v51 }
 0x7ef   : > { %5247 = vmatmul.mubr.f32.vlgmr.msra.gmra.mrb[144].mxu1 %v5108_v29  ;;  %v5110_v45 = vmax.f32 %v5028_v27, 0.0 }
 0x7f0   : > { %v5111_v6 = vmax.f32 %v5030_v49, 0.0  ;;  %v5033_v58 = vpop.f32.mrb[168].mxu0 }
 0x7f1   : > { %v5034_v15 = vadd.f32 %v5033_v58, %v11911_v32  ;;  %v5035_v8 = vpop.f32.mrb[169].mxu0 }
 0x7f2   : > { %v5036_v41 = vadd.f32 %v5035_v8, %v11914_v18  ;;  %5251 = vmatprep.mubr.f32.mxu1 %v5111_v6 }
 0x7f3   : > { %5252 = vmatmul.mubr.f32.gmra.mrb[146].mxu1 %v5110_v45  ;;  %v5112_v39 = vmax.f32 %v5034_v15, 0.0 }
 0x7f4   : > { %v5113_v2 = vmax.f32 %v5036_v41, 0.0  ;;  %v5039_v7 = vpop.f32.mrb[170].mxu0 }
 0x7f5   : > { %v5040_v21 = vadd.f32 %v5039_v7, %v11911_v32  ;;  %v5041_v3 = vpop.f32.mrb[171].mxu0 }
 0x7f6   : > { %v5042_v26 = vadd.f32 %v5041_v3, %v11914_v18  ;;  %5256 = vmatprep.mubr.f32.mxu1 %v5113_v2 }
 0x7f7   : > { %5257 = vmatmul.mubr.f32.gmra.mrb[148].mxu1 %v5112_v39  ;;  %v5114_v40 = vmax.f32 %v5040_v21, 0.0 }
 0x7f8   : > { %v5115_v60 = vmax.f32 %v5042_v26, 0.0  ;;  %v5045_v4 = vpop.f32.mrb[172].mxu0 }
 0x7f9   : > { %v5046_v61 = vadd.f32 %v5045_v4, %v11911_v32  ;;  %v5047_v11 = vpop.f32.mrb[173].mxu0 }
 0x7fa   : > { %v5048_v20 = vadd.f32 %v5047_v11, %v11914_v18  ;;  %5261 = vmatprep.mubr.f32.mxu1 %v5115_v60 }
 0x7fb   : > { %5262 = vmatmul.mubr.f32.gmra.mrb[150].mxu1 %v5114_v40  ;;  %v5116_v28 = vmax.f32 %v5046_v61, 0.0 }
 0x7fc   : > { %v5117_v46 = vmax.f32 %v5048_v20, 0.0  ;;  %v5051_v1 = vpop.f32.mrb[174].mxu0 }
 0x7fd   : > { %v5052_v9 = vadd.f32 %v5051_v1, %v11911_v32  ;;  %v5053_v54 = vpop.f32.mrb[175].mxu0 }
 0x7fe   : > { %v5054_v12 = vadd.f32 %v5053_v54, %v11914_v18  ;;  %5266 = vmatprep.mubr.f32.mxu1 %v5117_v46 }
 0x7ff   : > { %5267 = vmatmul.mubr.f32.gmra.mrb[152].mxu1 %v5116_v28  ;;  %v5118_v48 = vmax.f32 %v5052_v9, 0.0 }
 0x800   : > { %v5119_v14 = vmax.f32 %v5054_v12, 0.0  ;;  %v5057_v56 = vpop.f32.mrb[176].mxu0 }
 0x801   : > { %v5058_v36 = vadd.f32 %v5057_v56, %v11911_v32  ;;  %v5059_v63 = vpop.f32.mrb[177].mxu0 }
 0x802   : > { %v5060_v13 = vadd.f32 %v5059_v63, %v11914_v18  ;;  %5271 = vmatprep.mubr.f32.mxu1 %v5119_v14 }
 0x803   : > { %5272 = vmatmul.mubr.f32.gmra.mrb[154].mxu1 %v5118_v48  ;;  %v5120_v10 = vmax.f32 %v5058_v36, 0.0 }
 0x804   : > { %v5121_v53 = vmax.f32 %v5060_v13, 0.0  ;;  %v5063_v30 = vpop.f32.mrb[178].mxu0  ;;  %v5170_v13 = vsub.s32 3, %v12608_v19 }
 0x805   : > { %v5064_v34 = vadd.f32 %v5063_v30, %v11911_v32  ;;  %v5065_v31 = vpop.f32.mrb[179].mxu0  ;;  %v11952_v30 = vld [vmem:[%s12301_s7] sm:$0x3f] }
 0x806   : > { %v5066_v17 = vadd.f32 %v5065_v31, %v11914_v18  ;;  %5276 = vmatprep.mubr.f32.mxu1 %v5121_v53 }
 0x807   : > { %5277 = vmatmul.mubr.f32.gmra.mrb[156].mxu1 %v5120_v10  ;;  %v5122_v22 = vmax.f32 %v5064_v34, 0.0  ;;  %v11955_v10 = vrot.slane %v11952_v30, %v5170_v13 }
 0x808   : > { %v5123_v42 = vmax.f32 %v5066_v17, 0.0  ;;  %v5069_v44 = vpop.f32.mrb[180].mxu0 }
 0x809   : > { %v5070_v51 = vadd.f32 %v5069_v44, %v11911_v32  ;;  %v5071_v33 = vpop.f32.mrb[181].mxu0 }
 0x80a   : > { %v5072_v29 = vadd.f32 %v5071_v33, %v11914_v18  ;;  %5281 = vmatprep.mubr.f32.mxu1 %v5123_v42 }
 0x80b   : > { %5282 = vmatmul.mubr.f32.gmra.mrb[158].mxu1 %v5122_v22  ;;  %v5124_v49 = vmax.f32 %v5070_v51, 0.0 }
 0x80c   : > { %v5125_v27 = vmax.f32 %v5072_v29, 0.0  ;;  %v5075_v57 = vpop.f32.mrb[182].mxu0 }
 0x80d   : > { %v5076_v6 = vadd.f32 %v5075_v57, %v11911_v32  ;;  %v5077_v58 = vpop.f32.mrb[183].mxu0 }
 0x80e   : > { %v5078_v45 = vadd.f32 %v5077_v58, %v11914_v18  ;;  %5286 = vmatprep.mubr.f32.mxu1 %v5125_v27 }
 0x80f   : > { %5287 = vmatmul.mubr.f32.gmra.mrb[160].mxu1 %v5124_v49  ;;  %v5126_v41 = vmax.f32 %v5076_v6, 0.0 }
 0x810   : > { %v5127_v15 = vmax.f32 %v5078_v45, 0.0  ;;  %v5081_v8 = vpop.f32.mrb[184].mxu0 }
 0x811   : > { %v5082_v2 = vadd.f32 %v5081_v8, %v11911_v32  ;;  %v5083_v7 = vpop.f32.mrb[185].mxu0 }
 0x812   : > { %v5084_v39 = vadd.f32 %v5083_v7, %v11914_v18  ;;  %5291 = vmatprep.mubr.f32.mxu1 %v5127_v15 }
 0x813   : > { %5292 = vmatmul.mubr.f32.gmra.mrb[162].mxu1 %v5126_v41  ;;  %v5128_v26 = vmax.f32 %v5082_v2, 0.0 }
 0x814   : > { %v5129_v21 = vmax.f32 %v5084_v39, 0.0  ;;  %v5087_v3 = vpop.f32.mrb[186].mxu0 }
 0x815   : > { %v5088_v60 = vadd.f32 %v5087_v3, %v11911_v32  ;;  %v5089_v4 = vpop.f32.mrb[187].mxu0 }
 0x816   : > { %v5090_v40 = vadd.f32 %v5089_v4, %v11914_v18  ;;  %5296 = vmatprep.mubr.f32.mxu1 %v5129_v21 }
 0x817   : > { %5297 = vmatmul.mubr.f32.gmra.mrb[164].mxu1 %v5128_v26  ;;  %v5130_v11 = vmax.f32 %v5088_v60, 0.0 }
 0x818   : > { %v5131_v61 = vmax.f32 %v5090_v40, 0.0 }
 0x81a   : > { %5301 = vmatprep.mubr.f32.mxu1 %v5131_v61 }
 0x81b   : > { %v5093_v20 = vpop.f32.mrb[188].mxu0  ;;  %5302 = vmatmul.mubr.f32.gmra.mrb[166].mxu1 %v5130_v11 }
 0x81c   : > { %v5094_v46 = vadd.f32 %v5093_v20, %v11911_v32  ;;  %v5095_v1 = vpop.f32.mrb[189].mxu0 }
 0x81d   : > { %v5096_v28 = vadd.f32 %v5095_v1, %v11914_v18 }
 0x81e   : > { %v5132_v12 = vmax.f32 %v5094_v46, 0.0 }
 0x81f   : > { %v5133_v9 = vmax.f32 %v5096_v28, 0.0  ;;  %v5099_v54 = vpop.f32.mrb[190].mxu0 }
 0x820   : > { %v5100_v14 = vadd.f32 %v5099_v54, %v11911_v32  ;;  %v5101_v56 = vpop.f32.mrb[191].mxu0 }
 0x821   : > { %v5102_v48 = vadd.f32 %v5101_v56, %v11914_v18  ;;  %5306 = vmatprep.mubr.f32.mxu1 %v5133_v9 }
 0x822   : > { %5307 = vmatmul.mubr.f32.gmra.mrb[168].mxu1 %v5132_v12  ;;  %v5134_v63 = vmax.f32 %v5100_v14, 0.0 }
 0x823   : > { %v5135_v36 = vmax.f32 %v5102_v48, 0.0 }
 0x825   : > { %5311 = vmatprep.mubr.f32.mxu1 %v5135_v36 }
 0x826   : > { %5312 = vmatmul.mubr.f32.gmra.mrb[170].mxu1 %v5134_v63 }
 0x8ba   : > { %v6243_v53 = vpop.f32.mrb[192].mxu0 }
 0x8bb   : > { %v6244_v32 = vpop.f32.mrb[193].mxu0 }
 0x8bc   : > { %v6245_v34 = vadd.f32 %v6244_v32, %v6243_v53 }
 0x8be   : > { %v5239_v18 = vadd.f32 %v6245_v34, %v11955_v10  ;;  %v6246_v31 = vpop.f32.mrb[194].mxu0 }
 0x8bf   : > { %v6247_v17 = vpop.f32.mrb[195].mxu0 }
 0x8c0   : > { %v5317_v42 = vmax.f32 %v5239_v18, 0.0  ;;  %v6248_v44 = vadd.f32 %v6247_v17, %v6246_v31 }
 0x8c2   : > { %v5244_v22 = vadd.f32 %v6248_v44, %v11955_v10  ;;  %v6249_v51 = vpop.f32.mrb[144].mxu1  ;;  %v11960_v33 = vadd.f32 %v5317_v42, %v11754_v52 }
 0x8c3   : > { %v6250_v29 = vpop.f32.mrb[145].mxu1 }
 0x8c4   : > { %v5318_v27 = vmax.f32 %v5244_v22, 0.0  ;;  %v6251_v57 = vadd.f32 %v6250_v29, %v6249_v51  ;;  %v5349_v49 = vsel %vm409_vm0, %v11960_v33, 0.0 }
 0x8c5   : > { %5350 = vadd.xlane.f32.xlu1 %v5349_v49 }
 0x8c6   : > { %v5249_v6 = vadd.f32 %v6251_v57, %v11955_v10  ;;  %v6252_v58 = vpop.f32.mrb[146].mxu1  ;;  %v11966_v45 = vadd.f32 %v5318_v27, %v11762_v38 }
 0x8c7   : > { %v6253_v15 = vpop.f32.mrb[147].mxu1 }
 0x8c8   : > { %v5319_v8 = vmax.f32 %v5249_v6, 0.0  ;;  %v6254_v41 = vadd.f32 %v6253_v15, %v6252_v58  ;;  %v5352_v52 = vsel %vm409_vm0, %v11966_v45, 0.0 }
 0x8c9   : > { %5353 = vadd.xlane.f32.xlu0 %v5352_v52 }
 0x8ca   : > { %v5254_v2 = vadd.f32 %v6254_v41, %v11955_v10  ;;  %v6255_v7 = vpop.f32.mrb[148].mxu1  ;;  %v11972_v39 = vadd.f32 %v5319_v8, %v11773_v50 }
 0x8cb   : > { %v6256_v21 = vpop.f32.mrb[149].mxu1 }
 0x8cc   : > { %v5320_v3 = vmax.f32 %v5254_v2, 0.0  ;;  %v6257_v26 = vadd.f32 %v6256_v21, %v6255_v7  ;;  %v5355_v38 = vsel %vm409_vm0, %v11972_v39, 0.0 }
 0x8cd   : > { %5356 = vadd.xlane.f32.xlu1 %v5355_v38 }
 0x8ce   : > { %v5259_v60 = vadd.f32 %v6257_v26, %v11955_v10  ;;  %v6258_v4 = vpop.f32.mrb[150].mxu1  ;;  %v11978_v40 = vadd.f32 %v5320_v3, %v11782_v24 }
 0x8cf   : > { %v6259_v61 = vpop.f32.mrb[151].mxu1 }
 0x8d0   : > { %v5321_v11 = vmax.f32 %v5259_v60, 0.0  ;;  %v6260_v20 = vadd.f32 %v6259_v61, %v6258_v4  ;;  %v5358_v50 = vsel %vm409_vm0, %v11978_v40, 0.0 }
 0x8d1   : > { %5359 = vadd.xlane.f32.xlu0 %v5358_v50 }
 0x8d2   : > { %v5264_v46 = vadd.f32 %v6260_v20, %v11955_v10  ;;  %v6261_v1 = vpop.f32.mrb[152].mxu1  ;;  %v11984_v28 = vadd.f32 %v5321_v11, %v11793_v16 }
 0x8d3   : > { %v6262_v9 = vpop.f32.mrb[153].mxu1 }
 0x8d4   : > { %v5322_v54 = vmax.f32 %v5264_v46, 0.0  ;;  %v6263_v12 = vadd.f32 %v6262_v9, %v6261_v1  ;;  %v5361_v24 = vsel %vm409_vm0, %v11984_v28, 0.0 }
 0x8d5   : > { %5362 = vadd.xlane.f32.xlu1 %v5361_v24 }
 0x8d6   : > { %v5269_v14 = vadd.f32 %v6263_v12, %v11955_v10  ;;  %v6264_v56 = vpop.f32.mrb[154].mxu1  ;;  %v11990_v48 = vadd.f32 %v5322_v54, %v11802_v5 }
 0x8d7   : > { %v6265_v36 = vpop.f32.mrb[155].mxu1 }
 0x8d8   : > { %v5323_v63 = vmax.f32 %v5269_v14, 0.0  ;;  %v6266_v13 = vadd.f32 %v6265_v36, %v6264_v56  ;;  %v5364_v16 = vsel %vm409_vm0, %v11990_v48, 0.0 }
 0x8d9   : > { %5365 = vadd.xlane.f32.xlu0 %v5364_v16 }
 0x8da   : > { %v5274_v53 = vadd.f32 %v6266_v13, %v11955_v10  ;;  %v6267_v32 = vpop.f32.mrb[156].mxu1  ;;  %v11996_v34 = vadd.f32 %v5323_v63, %v11813_v25 }
 0x8db   : > { %v6268_v18 = vpop.f32.mrb[157].mxu1 }
 0x8dc   : > { %v5324_v31 = vmax.f32 %v5274_v53, 0.0  ;;  %v6269_v17 = vadd.f32 %v6268_v18, %v6267_v32  ;;  %v5367_v5 = vsel %vm409_vm0, %v11996_v34, 0.0 }
 0x8dd   : > { %5368 = vadd.xlane.f32.xlu1 %v5367_v5 }
 0x8de   : > { %v5279_v42 = vadd.f32 %v6269_v17, %v11955_v10  ;;  %v6270_v44 = vpop.f32.mrb[158].mxu1  ;;  %v12002_v22 = vadd.f32 %v5324_v31, %v11822_v0 }
 0x8df   : > { %v6271_v51 = vpop.f32.mrb[159].mxu1 }
 0x8e0   : > { %v5325_v29 = vmax.f32 %v5279_v42, 0.0  ;;  %v6272_v27 = vadd.f32 %v6271_v51, %v6270_v44  ;;  %v5370_v25 = vsel %vm409_vm0, %v12002_v22, 0.0 }
 0x8e1   : > { %5371 = vadd.xlane.f32.xlu0 %v5370_v25 }
 0x8e2   : > { %v5284_v57 = vadd.f32 %v6272_v27, %v11955_v10  ;;  %v6273_v49 = vpop.f32.mrb[160].mxu1  ;;  %v12008_v6 = vadd.f32 %v5325_v29, %v11830_v59 }
 0x8e3   : > { %v6274_v58 = vpop.f32.mrb[161].mxu1 }
 0x8e4   : > { %v5326_v15 = vmax.f32 %v5284_v57, 0.0  ;;  %v6275_v8 = vadd.f32 %v6274_v58, %v6273_v49  ;;  %v5373_v0 = vsel %vm409_vm0, %v12008_v6, 0.0 }
 0x8e5   : > { %5374 = vadd.xlane.f32.xlu1 %v5373_v0 }
 0x8e6   : > { %v5289_v41 = vadd.f32 %v6275_v8, %v11955_v10  ;;  %v6276_v52 = vpop.f32.mrb[162].mxu1  ;;  %v12014_v2 = vadd.f32 %v5326_v15, %v11838_v35 }
 0x8e7   : > { %v6277_v7 = vpop.f32.mrb[163].mxu1 }
 0x8e8   : > { %v5327_v21 = vmax.f32 %v5289_v41, 0.0  ;;  %v6278_v3 = vadd.f32 %v6277_v7, %v6276_v52  ;;  %v5376_v59 = vsel %vm409_vm0, %v12014_v2, 0.0 }
 0x8e9   : > { %5377 = vadd.xlane.f32.xlu0 %v5376_v59 }
 0x8ea   : > { %v5294_v26 = vadd.f32 %v6278_v3, %v11955_v10  ;;  %v6279_v38 = vpop.f32.mrb[164].mxu1  ;;  %v12020_v60 = vadd.f32 %v5327_v21, %v11846_v43 }
 0x8eb   : > { %v6280_v4 = vpop.f32.mrb[165].mxu1 }
 0x8ec   : > { %v5328_v61 = vmax.f32 %v5294_v26, 0.0  ;;  %v6281_v11 = vadd.f32 %v6280_v4, %v6279_v38  ;;  %v5379_v35 = vsel %vm409_vm0, %v12020_v60, 0.0 }
 0x8ed   : > { %5380 = vadd.xlane.f32.xlu1 %v5379_v35 }
 0x8ee   : > { %v5299_v20 = vadd.f32 %v6281_v11, %v11955_v10  ;;  %v6282_v50 = vpop.f32.mrb[166].mxu1  ;;  %v12026_v46 = vadd.f32 %v5328_v61, %v11854_v62 }
 0x8ef   : > { %v6283_v1 = vpop.f32.mrb[167].mxu1 }
 0x8f0   : > { %v5329_v9 = vmax.f32 %v5299_v20, 0.0  ;;  %v6284_v54 = vadd.f32 %v6283_v1, %v6282_v50  ;;  %v5382_v43 = vsel %vm409_vm0, %v12026_v46, 0.0 }
 0x8f1   : > { %5383 = vadd.xlane.f32.xlu0 %v5382_v43 }
 0x8f2   : > { %v5304_v12 = vadd.f32 %v6284_v54, %v11955_v10  ;;  %v12032_v24 = vadd.f32 %v5329_v9, %v11862_v37 }
 0x8f4   : > { %v5330_v14 = vmax.f32 %v5304_v12, 0.0  ;;  %v5385_v36 = vsel %vm409_vm0, %v12032_v24, 0.0 }
 0x8f5   : > { %v6285_v56 = vpop.f32.mrb[168].mxu1  ;;  %5386 = vadd.xlane.f32.xlu1 %v5385_v36 }
 0x8f6   : > { %v6286_v63 = vpop.f32.mrb[169].mxu1  ;;  %v12037_v13 = vadd.f32 %v5330_v14, %v11869_v47 }
 0x8f7   : > { %v6287_v62 = vadd.f32 %v6286_v63, %v6285_v56 }
 0x8f8   : > { %v5388_v32 = vsel %vm409_vm0, %v12037_v13, 0.0 }
 0x8f9   : > { %v5309_v16 = vadd.f32 %v6287_v62, %v11955_v10  ;;  %v6288_v53 = vpop.f32.mrb[170].mxu1  ;;  %5389 = vadd.xlane.f32.xlu0 %v5388_v32 }
 0x8fa   : > { %v6289_v37 = vpop.f32.mrb[171].mxu1 }
 0x8fb   : > { %v5331_v18 = vmax.f32 %v5309_v16, 0.0  ;;  %v6290_v31 = vadd.f32 %v6289_v37, %v6288_v53 }
 0x8fd   : > { %v5314_v17 = vadd.f32 %v6290_v31, %v11955_v10  ;;  %v12044_v5 = vadd.f32 %v5331_v18, %v11878_v23 }
 0x8ff   : > { %v5332_v42 = vmax.f32 %v5314_v17, 0.0  ;;  %v5391_v47 = vsel %vm409_vm0, %v12044_v5, 0.0 }
 0x900   : > { %5392 = vadd.xlane.f32.xlu1 %v5391_v47 }
 0x901   : > { %v12049_v44 = vadd.f32 %v5332_v42, %v11885_v55 }
 0x903   : > { %v5394_v51 = vsel %vm409_vm0, %v12049_v44, 0.0 }
 0x904   : > { %5395 = vadd.xlane.f32.xlu0 %v5394_v51 }
 0x952   : > { %v5351_v29 = vpop.xlane.xlu1 %5350 }
 0x953   : > { %v5397_v27 = vmul.f32 0.015625, %v5351_v29 }
 0x955   : > { %v12054_v25 = vsub.f32 %v11960_v33, %v5397_v27 }
 0x956   : > { %v5354_v10 = vpop.xlane.xlu0 %5353 }
 0x957   : > { %v5398_v23 = vmul.f32 0.015625, %v5354_v10  ;;  %v5429_v57 = vmul.f32 %v12054_v25, %v12054_v25 }
 0x959   : > { %v12059_v49 = vsub.f32 %v11966_v45, %v5398_v23  ;;  %v5445_v55 = vsel %vm409_vm0, %v5429_v57, 0.0 }
 0x95a   : > { %5446 = vadd.xlane.f32.xlu1 %v5445_v55  ;;  %v5357_v58 = vpop.xlane.xlu1 %5356 }
 0x95b   : > { %v5399_v15 = vmul.f32 0.015625, %v5357_v58  ;;  %v5430_v8 = vmul.f32 %v12059_v49, %v12059_v49 }
 0x95d   : > { %v12065_v0 = vsub.f32 %v11972_v39, %v5399_v15  ;;  %v5448_v33 = vsel %vm409_vm0, %v5430_v8, 0.0 }
 0x95e   : > { %v5360_v41 = vpop.xlane.xlu0 %5359  ;;  %5449 = vadd.xlane.f32.xlu0 %v5448_v33 }
 0x95f   : > { %v5400_v52 = vmul.f32 0.015625, %v5360_v41  ;;  %v5431_v45 = vmul.f32 %v12065_v0, %v12065_v0 }
 0x961   : > { %v12071_v7 = vsub.f32 %v11978_v40, %v5400_v52  ;;  %v5451_v21 = vsel %vm409_vm0, %v5431_v45, 0.0 }
 0x962   : > { %5452 = vadd.xlane.f32.xlu1 %v5451_v21  ;;  %v5363_v3 = vpop.xlane.xlu1 %5362 }
 0x963   : > { %v5401_v59 = vmul.f32 0.015625, %v5363_v3  ;;  %v5432_v39 = vmul.f32 %v12071_v7, %v12071_v7 }
 0x965   : > { %v12077_v26 = vsub.f32 %v11984_v28, %v5401_v59  ;;  %v5454_v38 = vsel %vm409_vm0, %v5432_v39, 0.0 }
 0x966   : > { %v5366_v4 = vpop.xlane.xlu0 %5365  ;;  %5455 = vadd.xlane.f32.xlu0 %v5454_v38 }
 0x967   : > { %v5402_v61 = vmul.f32 0.015625, %v5366_v4  ;;  %v5433_v40 = vmul.f32 %v12077_v26, %v12077_v26 }
 0x969   : > { %v12083_v11 = vsub.f32 %v11990_v48, %v5402_v61  ;;  %v5457_v35 = vsel %vm409_vm0, %v5433_v40, 0.0 }
 0x96a   : > { %5458 = vadd.xlane.f32.xlu1 %v5457_v35  ;;  %v5369_v20 = vpop.xlane.xlu1 %5368 }
 0x96b   : > { %v5403_v50 = vmul.f32 0.015625, %v5369_v20  ;;  %v5434_v28 = vmul.f32 %v12083_v11, %v12083_v11 }
 0x96d   : > { %v12089_v1 = vsub.f32 %v11996_v34, %v5403_v50  ;;  %v5460_v9 = vsel %vm409_vm0, %v5434_v28, 0.0 }
 0x96e   : > { %v5372_v54 = vpop.xlane.xlu0 %5371  ;;  %5461 = vadd.xlane.f32.xlu0 %v5460_v9 }
 0x96f   : > { %v5404_v43 = vmul.f32 0.015625, %v5372_v54  ;;  %v5435_v48 = vmul.f32 %v12089_v1, %v12089_v1  ;;  %v5559_v54 = vsub.s32 4, %v12608_v19 }
 0x971   : > { %v12095_v12 = vsub.f32 %v12002_v22, %v5404_v43  ;;  %v5463_v14 = vsel %vm409_vm0, %v5435_v48, 0.0  ;;  %v5579_v48 = vsub.s32 5, %v12608_v19 }
 0x972   : > { %5464 = vadd.xlane.f32.xlu1 %v5463_v14  ;;  %v5375_v56 = vpop.xlane.xlu1 %5374 }
 0x973   : > { %v5405_v36 = vmul.f32 0.015625, %v5375_v56  ;;  %v5436_v34 = vmul.f32 %v12095_v12, %v12095_v12 }
 0x975   : > { %v12101_v63 = vsub.f32 %v12008_v6, %v5405_v36  ;;  %v5466_v62 = vsel %vm409_vm0, %v5436_v34, 0.0  ;;  %v12153_v36 = vrot.slane %v11952_v30, %v5559_v54 }
 0x976   : > { %v5378_v16 = vpop.xlane.xlu0 %5377  ;;  %5467 = vadd.xlane.f32.xlu0 %v5466_v62 }
 0x977   : > { %v5406_v53 = vmul.f32 0.015625, %v5378_v16  ;;  %v5437_v22 = vmul.f32 %v12101_v63, %v12101_v63  ;;  %v12156_v16 = vrot.slane %v11952_v30, %v5579_v48 }
 0x979   : > { %v12107_v32 = vsub.f32 %v12014_v2, %v5406_v53  ;;  %v5469_v37 = vsel %vm409_vm0, %v5437_v22, 0.0 }
 0x97a   : > { %5470 = vadd.xlane.f32.xlu1 %v5469_v37  ;;  %v5381_v18 = vpop.xlane.xlu1 %5380 }
 0x97b   : > { %v5407_v31 = vmul.f32 0.015625, %v5381_v18  ;;  %v5438_v6 = vmul.f32 %v12107_v32, %v12107_v32 }
 0x97d   : > { %v12113_v17 = vsub.f32 %v12020_v60, %v5407_v31  ;;  %v5472_v42 = vsel %vm409_vm0, %v5438_v6, 0.0 }
 0x97e   : > { %v5384_v47 = vpop.xlane.xlu0 %5383  ;;  %5473 = vadd.xlane.f32.xlu0 %v5472_v42 }
 0x97f   : > { %v5408_v51 = vmul.f32 0.015625, %v5384_v47  ;;  %v5439_v2 = vmul.f32 %v12113_v17, %v12113_v17 }
 0x981   : > { %v12119_v29 = vsub.f32 %v12026_v46, %v5408_v51  ;;  %v5475_v27 = vsel %vm409_vm0, %v5439_v2, 0.0 }
 0x982   : > { %5476 = vadd.xlane.f32.xlu1 %v5475_v27  ;;  %v5387_v10 = vpop.xlane.xlu1 %5386 }
 0x983   : > { %v5409_v23 = vmul.f32 0.015625, %v5387_v10  ;;  %v5440_v60 = vmul.f32 %v12119_v29, %v12119_v29 }
 0x985   : > { %v12125_v57 = vsub.f32 %v12032_v24, %v5409_v23  ;;  %v5478_v55 = vsel %vm409_vm0, %v5440_v60, 0.0 }
 0x986   : > { %v5390_v58 = vpop.xlane.xlu0 %5389  ;;  %5479 = vadd.xlane.f32.xlu0 %v5478_v55 }
 0x987   : > { %v5410_v15 = vmul.f32 0.015625, %v5390_v58  ;;  %v5441_v46 = vmul.f32 %v12125_v57, %v12125_v57 }
 0x989   : > { %v12131_v8 = vsub.f32 %v12037_v13, %v5410_v15  ;;  %v5481_v33 = vsel %vm409_vm0, %v5441_v46, 0.0 }
 0x98a   : > { %5482 = vadd.xlane.f32.xlu1 %v5481_v33 }
 0x98b   : > { %v5442_v41 = vmul.f32 %v12131_v8, %v12131_v8 }
 0x98d   : > { %v5393_v52 = vpop.xlane.xlu1 %5392  ;;  %v5484_v45 = vsel %vm409_vm0, %v5442_v41, 0.0 }
 0x98e   : > { %v5411_v24 = vmul.f32 0.015625, %v5393_v52  ;;  %5485 = vadd.xlane.f32.xlu0 %v5484_v45 }
 0x990   : > { %v12138_v21 = vsub.f32 %v12044_v5, %v5411_v24 }
 0x991   : > { %v5396_v3 = vpop.xlane.xlu0 %5395 }
 0x992   : > { %v5412_v59 = vmul.f32 0.015625, %v5396_v3  ;;  %v5443_v13 = vmul.f32 %v12138_v21, %v12138_v21 }
 0x994   : > { %v12143_v39 = vsub.f32 %v12049_v44, %v5412_v59  ;;  %v5487_v38 = vsel %vm409_vm0, %v5443_v13, 0.0 }
 0x995   : > { %5488 = vadd.xlane.f32.xlu1 %v5487_v38 }
 0x996   : > { %v5444_v4 = vmul.f32 %v12143_v39, %v12143_v39 }
 0x998   : > { %v5490_v61 = vsel %vm409_vm0, %v5444_v4, 0.0 }
 0x999   : > { %5491 = vadd.xlane.f32.xlu0 %v5490_v61 }
 0x9e7   : > { %v5447_v5 = vpop.xlane.xlu1 %5446 }
 0x9e8   : > { %v5493_v40 = vmul.f32 0.015625, %v5447_v5 }
 0x9ea   : > { %v5509_v35 = vadd.f32 1e-05, %v5493_v40 }
 0x9eb   : > { %v5450_v20 = vpop.xlane.xlu0 %5449 }
 0x9ec   : > { %7582 = vrsqrt.f32 %v5509_v35  ;;  %v5494_v50 = vmul.f32 0.015625, %v5450_v20 }
 0x9ee   : > { %v5510_v28 = vadd.f32 1e-05, %v5494_v50 }
 0x9ef   : > { %v5453_v44 = vpop.xlane.xlu1 %5452 }
 0x9f0   : > { %7584 = vrsqrt.f32 %v5510_v28  ;;  %v5495_v9 = vmul.f32 0.015625, %v5453_v44 }
 0x9f2   : > { %v5511_v43 = vadd.f32 1e-05, %v5495_v9 }
 0x9f3   : > { %v5456_v14 = vpop.xlane.xlu0 %5455 }
 0x9f4   : > { %7586 = vrsqrt.f32 %v5511_v43  ;;  %v5496_v56 = vmul.f32 0.015625, %v5456_v14 }
 0x9f6   : > { %v7583_v34 = vpop.eup %7582  ;;  %v5512_v62 = vadd.f32 1e-05, %v5496_v56 }
 0x9f7   : > { %v5541_v53 = vmul.f32 %v7583_v34, %v12054_v25  ;;  %v5459_v22 = vpop.xlane.xlu1 %5458 }
 0x9f8   : > { %7588 = vrsqrt.f32 %v5512_v62  ;;  %v5497_v37 = vmul.f32 0.015625, %v5459_v22 }
 0x9f9   : > { %v5561_v19 = vmul.f32 %v12153_v36, %v5541_v53 }
 0x9fa   : > { %v7585_v18 = vpop.eup %7584  ;;  %v5513_v31 = vadd.f32 1e-05, %v5497_v37 }
 0x9fb   : > { %v5581_v6 = vadd.f32 %v12156_v16, %v5561_v19  ;;  %v5542_v42 = vmul.f32 %v7585_v18, %v12059_v49  ;;  %v5462_v47 = vpop.xlane.xlu0 %5461 }
 0x9fc   : > { %7590 = vrsqrt.f32 %v5513_v31  ;;  %v5498_v51 = vmul.f32 0.015625, %v5462_v47 }
 0x9fd   : > { %5597 = vst.msk [vmem:[%s12164_s20] sm:$0xff] %vm409_vm0, %v5581_v6  ;;  %v5562_v30 = vmul.f32 %v12153_v36, %v5542_v42 }
 0x9fe   : > { %v7587_v25 = vpop.eup %7586  ;;  %v5514_v2 = vadd.f32 1e-05, %v5498_v51 }
 0x9ff   : > { %v5582_v27 = vadd.f32 %v12156_v16, %v5562_v30  ;;  %v5543_v10 = vmul.f32 %v7587_v25, %v12065_v0  ;;  %v5465_v23 = vpop.xlane.xlu1 %5464 }
 0xa00   : > { %7592 = vrsqrt.f32 %v5514_v2  ;;  %v5499_v49 = vmul.f32 0.015625, %v5465_v23 }
 0xa01   : > { %5598 = vst.msk [vmem:[%s12164_s20 + $0x8] sm:$0xff] %vm409_vm0, %v5582_v27  ;;  %v5563_v60 = vmul.f32 %v12153_v36, %v5543_v10 }
 0xa02   : > { %v7589_v55 = vpop.eup %7588  ;;  %v5515_v58 = vadd.f32 1e-05, %v5499_v49 }
 0xa03   : > { %v5583_v15 = vadd.f32 %v12156_v16, %v5563_v60  ;;  %v5544_v46 = vmul.f32 %v7589_v55, %v12071_v7  ;;  %v5468_v33 = vpop.xlane.xlu0 %5467 }
 0xa04   : > { %7594 = vrsqrt.f32 %v5515_v58  ;;  %v5500_v41 = vmul.f32 0.015625, %v5468_v33 }
 0xa05   : > { %5599 = vst.msk [vmem:[%s12164_s20 + $0x10] sm:$0xff] %vm409_vm0, %v5583_v15  ;;  %v5564_v0 = vmul.f32 %v12153_v36, %v5544_v46 }
 0xa06   : > { %v7591_v52 = vpop.eup %7590  ;;  %v5516_v24 = vadd.f32 1e-05, %v5500_v41 }
 0xa07   : > { %v5584_v45 = vadd.f32 %v12156_v16, %v5564_v0  ;;  %v5545_v3 = vmul.f32 %v7591_v52, %v12077_v26  ;;  %v5471_v59 = vpop.xlane.xlu1 %5470 }
 0xa08   : > { %7596 = vrsqrt.f32 %v5516_v24  ;;  %v5501_v13 = vmul.f32 0.015625, %v5471_v59 }
 0xa09   : > { %5600 = vst.msk [vmem:[%s12164_s20 + $0x18] sm:$0xff] %vm409_vm0, %v5584_v45  ;;  %v5565_v7 = vmul.f32 %v12153_v36, %v5545_v3 }
 0xa0a   : > { %v7593_v38 = vpop.eup %7592  ;;  %v5517_v4 = vadd.f32 1e-05, %v5501_v13 }
 0xa0b   : > { %v5585_v61 = vadd.f32 %v12156_v16, %v5565_v7  ;;  %v5546_v5 = vmul.f32 %v7593_v38, %v12083_v11  ;;  %v5474_v40 = vpop.xlane.xlu0 %5473 }
 0xa0c   : > { %7598 = vrsqrt.f32 %v5517_v4  ;;  %v5502_v35 = vmul.f32 0.015625, %v5474_v40 }
 0xa0d   : > { %5601 = vst.msk [vmem:[%s12164_s20 + $0x20] sm:$0xff] %vm409_vm0, %v5585_v61  ;;  %v5566_v26 = vmul.f32 %v12153_v36, %v5546_v5 }
 0xa0e   : > { %v7595_v20 = vpop.eup %7594  ;;  %v5518_v50 = vadd.f32 1e-05, %v5502_v35 }
 0xa0f   : > { %v5586_v28 = vadd.f32 %v12156_v16, %v5566_v26  ;;  %v5547_v44 = vmul.f32 %v7595_v20, %v12089_v1  ;;  %v5477_v9 = vpop.xlane.xlu1 %5476 }
 0xa10   : > { %7600 = vrsqrt.f32 %v5518_v50  ;;  %v5503_v54 = vmul.f32 0.015625, %v5477_v9 }
 0xa11   : > { %5602 = vst.msk [vmem:[%s12164_s20 + $0x28] sm:$0xff] %vm409_vm0, %v5586_v28  ;;  %v5567_v11 = vmul.f32 %v12153_v36, %v5547_v44 }
 0xa12   : > { %v7597_v43 = vpop.eup %7596  ;;  %v5519_v48 = vadd.f32 1e-05, %v5503_v54 }
 0xa13   : > { %v5587_v14 = vadd.f32 %v12156_v16, %v5567_v11  ;;  %v5548_v56 = vmul.f32 %v7597_v43, %v12095_v12  ;;  %v5480_v34 = vpop.xlane.xlu0 %5479 }
 0xa14   : > { %7602 = vrsqrt.f32 %v5519_v48  ;;  %v5504_v62 = vmul.f32 0.015625, %v5480_v34 }
 0xa15   : > { %5603 = vst.msk [vmem:[%s12164_s20 + $0x30] sm:$0xff] %vm409_vm0, %v5587_v14  ;;  %v5568_v1 = vmul.f32 %v12153_v36, %v5548_v56 }
 0xa16   : > { %v7599_v53 = vpop.eup %7598  ;;  %v5520_v22 = vadd.f32 1e-05, %v5504_v62 }
 0xa17   : > { %v5588_v37 = vadd.f32 %v12156_v16, %v5568_v1  ;;  %v5549_v19 = vmul.f32 %v7599_v53, %v12101_v63  ;;  %v5483_v18 = vpop.xlane.xlu1 %5482 }
 0xa18   : > { %7604 = vrsqrt.f32 %v5520_v22  ;;  %v5505_v31 = vmul.f32 0.015625, %v5483_v18 }
 0xa19   : > { %5604 = vst.msk [vmem:[%s12164_s20 + $0x38] sm:$0xff] %vm409_vm0, %v5588_v37  ;;  %v5569_v12 = vmul.f32 %v12153_v36, %v5549_v19 }
 0xa1a   : > { %v7601_v6 = vpop.eup %7600  ;;  %v5521_v42 = vadd.f32 1e-05, %v5505_v31 }
 0xa1b   : > { %v5589_v47 = vadd.f32 %v12156_v16, %v5569_v12  ;;  %v5550_v51 = vmul.f32 %v7601_v6, %v12107_v32  ;;  %v5486_v30 = vpop.xlane.xlu0 %5485 }
 0xa1c   : > { %7606 = vrsqrt.f32 %v5521_v42  ;;  %v5506_v25 = vmul.f32 0.015625, %v5486_v30 }
 0xa1d   : > { %5605 = vst.msk [vmem:[%s12164_s20 + $0x40] sm:$0xff] %vm409_vm0, %v5589_v47  ;;  %v5570_v63 = vmul.f32 %v12153_v36, %v5550_v51 }
 0xa1e   : > { %v7603_v2 = vpop.eup %7602  ;;  %v5522_v27 = vadd.f32 1e-05, %v5506_v25 }
 0xa1f   : > { %v5590_v10 = vadd.f32 %v12156_v16, %v5570_v63  ;;  %v5551_v23 = vmul.f32 %v7603_v2, %v12113_v17 }
 0xa20   : > { %7608 = vrsqrt.f32 %v5522_v27 }
 0xa21   : > { %5606 = vst.msk [vmem:[%s12164_s20 + $0x48] sm:$0xff] %vm409_vm0, %v5590_v10  ;;  %v5571_v49 = vmul.f32 %v12153_v36, %v5551_v23 }
 0xa22   : > { %v5489_v32 = vpop.xlane.xlu1 %5488  ;;  %v7605_v60 = vpop.eup %7604 }
 0xa23   : > { %v5507_v55 = vmul.f32 0.015625, %v5489_v32  ;;  %v5591_v58 = vadd.f32 %v12156_v16, %v5571_v49  ;;  %v5552_v15 = vmul.f32 %v7605_v60, %v12119_v29 }
 0xa25   : > { %v5523_v46 = vadd.f32 1e-05, %v5507_v55  ;;  %5607 = vst.msk [vmem:[%s12164_s20 + $0x50] sm:$0xff] %vm409_vm0, %v5591_v58  ;;  %v5572_v33 = vmul.f32 %v12153_v36, %v5552_v15 }
 0xa26   : > { %v5492_v17 = vpop.xlane.xlu0 %5491  ;;  %v7607_v41 = vpop.eup %7606 }
 0xa27   : > { %7610 = vrsqrt.f32 %v5523_v46  ;;  %v5508_v0 = vmul.f32 0.015625, %v5492_v17  ;;  %v5592_v52 = vadd.f32 %v12156_v16, %v5572_v33  ;;  %v5553_v24 = vmul.f32 %v7607_v41, %v12125_v57 }
 0xa29   : > { %v5524_v45 = vadd.f32 1e-05, %v5508_v0  ;;  %5608 = vst.msk [vmem:[%s12164_s20 + $0x58] sm:$0xff] %vm409_vm0, %v5592_v52  ;;  %v5573_v29 = vmul.f32 %v12153_v36, %v5553_v24 }
 0xa2a   : > { %v7609_v3 = vpop.eup %7608 }
 0xa2b   : > { %7612 = vrsqrt.f32 %v5524_v45  ;;  %v5593_v59 = vadd.f32 %v12156_v16, %v5573_v29  ;;  %v5554_v13 = vmul.f32 %v7609_v3, %v12131_v8 }
 0xa2d   : > { %5609 = vst.msk [vmem:[%s12164_s20 + $0x60] sm:$0xff] %vm409_vm0, %v5593_v59  ;;  %v5574_v7 = vmul.f32 %v12153_v36, %v5554_v13 }
 0xa2f   : > { %v5594_v57 = vadd.f32 %v12156_v16, %v5574_v7 }
 0xa31   : > { %v7611_v38 = vpop.eup %7610  ;;  %5610 = vst.msk [vmem:[%s12164_s20 + $0x68] sm:$0xff] %vm409_vm0, %v5594_v57 }
 0xa32   : > { %v5555_v4 = vmul.f32 %v7611_v38, %v12138_v21 }
 0xa34   : > { %v5575_v61 = vmul.f32 %v12153_v36, %v5555_v4 }
 0xa35   : > { %v7613_v5 = vpop.eup %7612 }
 0xa36   : > { %v5595_v40 = vadd.f32 %v12156_v16, %v5575_v61  ;;  %v5556_v8 = vmul.f32 %v7613_v5, %v12143_v39 }
 0xa38   : > { %5611 = vst.msk [vmem:[%s12164_s20 + $0x70] sm:$0xff] %vm409_vm0, %v5595_v40  ;;  %v5576_v35 = vmul.f32 %v12153_v36, %v5556_v8 }
 0xa3a   : > { %v5596_v21 = vadd.f32 %v12156_v16, %v5576_v35 }
 0xa3c   : > { %5612 = vst.msk [vmem:[%s12164_s20 + $0x78] sm:$0xff] %vm409_vm0, %v5596_v21 }
 0xa3d   : > { %7772 = shalt.err (!%p7769_p3)
}
 0xa3e   : > { %s7773_s30 = scalar_lea.hbm %s12244_s28, 2048  ;;  %s7777_s26 = scalar_lea.hbm %s12304_s10, 4096 }
 0xa3f   : > { %p7774_p4 = scmp.ne.s32.totalorder %s12244_s28, %s7773_s30  ;;  %p7778_p9 = scmp.lt.u32.totalorder %s12244_s28, %s12304_s10 }
 0xa40   : > { %p7779_p10 = scmp.lt.u32.totalorder %s7777_s26, %s7773_s30  ;;  %p7781_p12 = scmp.lt.u32.totalorder %s7773_s30, %s12244_s28 }
 0xa41   : > { %p7775_p7 = pnand %p7774_p4, %p7921_p5 }
 0xa42   : > { %p7780_p11 = por %p7779_p10, %p7778_p9 }
 0xa43   : > { %p7776_p8 = pneg %p7775_p7 }
 0xa44   : > { %p7782_p13 = por %p7781_p12, %p7780_p11 }
 0xa46   : > { %p7783_p0 = pnand %p7782_p13, %p7776_p8 }
 0xa48   : > { %7786 = shalt.err (!%p7783_p0)
}
 0xa49   : > { %s7826_s29 = smov 128   ;;  %s7827_s12 = smov 8  }
 0xa4a   : > { %6955 = dma.vmem_to_hbm [thread:$0]  (%p7921_p5), %s12246_s25, 2048, %s12244_s28, %s12253_s17, %s7826_s29, %s7826_s29, %s7827_s12  }
 0xa4b PF: > { %p6961_p1 = scmp.ge.s32.totalorder %s7821_s16, 2  ;;  %s5643_s18 = sand.u32 1, %s7809_s13  }
 0xa4c   : > { %s5644_s30 = scalar_lea.sflag [#allocation3], %s5643_s18 }
 0xa4d   : > { %p6958_p2 = pnand %p6961_p1, %p7925_p6 }
 0xa4f   : > { %7804 = dma.done.wait (!%p6958_p2), %s5644_s30, 2048  }
 0xa50   : > { %7806 = vsyncadd (!%p6958_p2), %s5644_s30, 4294965248  ;;  %p20_p3 = scmp.ge.s32.totalorder %s7908_s19, 4   ;;  %s12611_s13 = smov %s7813_s14 }
 0xa51   : > { %s12612_s14 = smov %s7817_s15  ;;  %s12613_s15 = smov %s7919_s22 }
 0xa52   : > { %s12614_s16 = smov %s7908_s19  ;;  %22 = sbr.rel (!%p20_p3) target bundleno = 3 (0x3), region = 95 }
 0xa59   :  { %5649 = vsyncpa [#allocation3], 1 }
 0xa5a   :  { %5651 = vsyncpa [#allocation3 + $0x1], 1 }

</bundles_post_ra>
